<compile_context>
chip_gen: v5e
topology: v5e:2x2
jax: 0.10.0
libtpu: 0.0.40
codegen_flags: <defaults>
</compile_context>

<pallas_src>
import functools
import math

import jax
import jax.numpy as jnp
from jax.experimental import pallas as pl
from jax.experimental.pallas import tpu as pltpu

VMEM_LIMIT = 48 * 1024 * 1024


def _round_up(x, m):
    return ((x + m - 1) // m) * m


# -----------------------------------------------------------------------------
# Kernel 1: tiled matmul, bf16 operands, f32 accumulate.
#   optional pre-activation per-K scale/bias + ReLU on the LHS tile (pre-conv BN+ReLU)
#   optional epilogue per-N bias + ReLU (post-conv BN with its scale folded into W)
# -----------------------------------------------------------------------------
def _mm_kernel(*refs, has_pre, has_bias, act):
    i = 0
    a_ref = refs[i]; i += 1
    b_ref = refs[i]; i += 1
    if has_pre:
        ps_ref = refs[i]; i += 1
        pb_ref = refs[i]; i += 1
    if has_bias:
        c_ref = refs[i]; i += 1
    o_ref = refs[i]; i += 1
    acc_ref = refs[i]

    @pl.when(pl.program_id(2) == 0)
    def _():
        acc_ref[...] = jnp.zeros_like(acc_ref)

    a = a_ref[...]
    if has_pre:
        a = jnp.maximum(a.astype(jnp.float32) * ps_ref[...] + pb_ref[...], 0.0)
        a = a.astype(jnp.bfloat16)
    acc_ref[...] += jnp.dot(a, b_ref[...], preferred_element_type=jnp.float32)

    @pl.when(pl.program_id(2) == pl.num_programs(2) - 1)
    def _():
        y = acc_ref[...]
        if has_bias:
            y = y + c_ref[...]
        if act == "relu":
            y = jnp.maximum(y, 0.0)
        o_ref[...] = y.astype(o_ref.dtype)


def matmul_fused(a, b, prescale=None, prebias=None, bias=None, act="none",
                 out_dtype=jnp.float32):
    M, K = a.shape
    Kb, N = b.shape
    assert K == Kb
    has_pre = prescale is not None
    has_bias = bias is not None

    Mp = _round_up(M, 128)
    if Mp % 512 == 0 and Mp >= 1024:
        tm = 512
    elif Mp % 256 == 0:
        tm = 256
    else:
        tm = 128
    Np = _round_up(N, 128)
    tn = 256 if Np % 256 == 0 else 128
    Kp = _round_up(K, 128)
    if Kp <= 2048:
        tk = Kp                      # single K step (e.g. stem K=147 -> 256, 1 step)
    elif Kp % 512 == 0:
        tk = 512
    elif Kp % 256 == 0:
        tk = 256
    else:
        tk = 128

    a_p = jnp.pad(a.astype(jnp.bfloat16), ((0, Mp - M), (0, Kp - K)))
    b_p = jnp.pad(b.astype(jnp.bfloat16), ((0, Kp - K), (0, Np - N)))

    inputs = [a_p, b_p]
    in_specs = [
        pl.BlockSpec((tm, tk), lambda i, j, k: (i, k)),
        pl.BlockSpec((tk, tn), lambda i, j, k: (k, j)),
    ]
    if has_pre:
        ps = jnp.pad(prescale.reshape(1, K).astype(jnp.float32),
                     ((0, 0), (0, Kp - K)))
        pb = jnp.pad(prebias.reshape(1, K).astype(jnp.float32),
                     ((0, 0), (0, Kp - K)))
        inputs += [ps, pb]
        in_specs += [pl.BlockSpec((1, tk), lambda i, j, k: (0, k)),
                     pl.BlockSpec((1, tk), lambda i, j, k: (0, k))]
    if has_bias:
        c = jnp.pad(bias.reshape(1, N).astype(jnp.float32), ((0, 0), (0, Np - N)))
        inputs += [c]
        in_specs += [pl.BlockSpec((1, tn), lambda i, j, k: (0, j))]

    out = pl.pallas_call(
        functools.partial(_mm_kernel, has_pre=has_pre, has_bias=has_bias, act=act),
        out_shape=jax.ShapeDtypeStruct((Mp, Np), out_dtype),
        grid=(Mp // tm, Np // tn, Kp // tk),
        in_specs=in_specs,
        out_specs=pl.BlockSpec((tm, tn), lambda i, j, k: (i, j)),
        scratch_shapes=[pltpu.VMEM((tm, tn), jnp.float32)],
        compiler_params=pltpu.CompilerParams(
            dimension_semantics=("parallel", "parallel", "arbitrary"),
            vmem_limit_bytes=VMEM_LIMIT),
    )(*inputs)
    return out[:M, :N]


def conv2d(x, w_mat, kh, kw, stride, padding, prescale=None, prebias=None,
           bias=None, act="none", out_dtype=jnp.float32):
    """x: (B,H,W,Cin) NHWC; w_mat: (kh*kw*Cin, Cout) bf16, any BN scale pre-folded.
    prescale/prebias: per-input-channel BN+ReLU applied before the conv (1x1 only).
    bias/act: epilogue (post-conv folded BN bias + optional ReLU)."""
    B, H, W, Cin = x.shape
    Cout = w_mat.shape[1]
    assert w_mat.shape[0] == kh * kw * Cin
    Ho = (H + 2 * padding - kh) // stride + 1
    Wo = (W + 2 * padding - kw) // stride + 1
    xb = x.astype(jnp.bfloat16)
    if padding > 0:
        xb = jnp.pad(xb, ((0, 0), (padding, padding), (padding, padding), (0, 0)))
    if kh == 1 and kw == 1:
        a = xb[:, ::stride, ::stride, :][:, :Ho, :Wo, :].reshape(B * Ho * Wo, Cin)
    else:
        taps = []
        for ki in range(kh):
            for kj in range(kw):
                taps.append(xb[:, ki:ki + stride * (Ho - 1) + 1:stride,
                                kj:kj + stride * (Wo - 1) + 1:stride, :])
        a = jnp.stack(taps, axis=3).reshape(B * Ho * Wo, kh * kw * Cin)
    out = matmul_fused(a, w_mat, prescale=prescale, prebias=prebias,
                       bias=bias, act=act, out_dtype=out_dtype)
    return out.reshape(B, Ho, Wo, Cout)


# -----------------------------------------------------------------------------
# Kernel 2: max pool (3x3/s2/p1 for the stem).  Taps stacked and reduced; spatial
# rows are packed to 128 lanes when C < 128 (lane-dense stores).
# -----------------------------------------------------------------------------
def _maxpool_kernel(x_ref, o_ref):
    o_ref[...] = jnp.max(x_ref[...], axis=0)


def maxpool2d(x, ksize, stride, padding):
    B, H, W, C = x.shape
    Ho = (H + 2 * padding - ksize) // stride + 1
    Wo = (W + 2 * padding - ksize) // stride + 1
    need_h = stride * (Ho - 1) + ksize
    need_w = stride * (Wo - 1) + ksize
    x_p = jnp.pad(x, ((0, 0),
                      (padding, max(0, need_h - H - padding)),
                      (padding, max(0, need_w - W - padding)),
                      (0, 0)), constant_values=-jnp.inf)
    taps = []
    for ki in range(ksize):
        for kj in range(ksize):
            taps.append(x_p[:, ki:ki + stride * (Ho - 1) + 1:stride,
                            kj:kj + stride * (Wo - 1) + 1:stride, :])
    T = ksize * ksize
    M = B * Ho * Wo
    a = jnp.stack(taps, axis=0).reshape(T, M, C)

    # lane packing: pack spatial positions so the last dim is 128 (lane-dense stores)
    if C < 128 and 128 % C == 0 and M % (128 // C) == 0:
        pack = 128 // C
    else:
        pack = 1
    Mr = M // pack
    L = pack * C
    a = a.reshape(T, Mr, L)
    if Mr <= 1024:
        Mrp = _round_up(Mr, 8)
        tmr = Mrp
    else:
        tmr = 512
        Mrp = _round_up(Mr, tmr)
    a = jnp.pad(a, ((0, 0), (0, Mrp - Mr), (0, 0)), constant_values=-jnp.inf)

    out = pl.pallas_call(
        _maxpool_kernel,
        out_shape=jax.ShapeDtypeStruct((Mrp, L), x.dtype),
        grid=(Mrp // tmr,),
        in_specs=[pl.BlockSpec((T, tmr, L), lambda i: (0, i, 0))],
        out_specs=pl.BlockSpec((tmr, L), lambda i: (i, 0)),
        compiler_params=pltpu.CompilerParams(
            dimension_semantics=("parallel",), vmem_limit_bytes=VMEM_LIMIT),
    )(a)
    return out[:Mr].reshape(M, C).reshape(B, Ho, Wo, C)


# -----------------------------------------------------------------------------
# Kernel 3: transition prologue — BN + ReLU + avgpool 2x2/s2 fused in one kernel.
# The 2x2 average pool commutes with the (linear) 1x1 conv that follows, so pooling
# first shrinks the transition matmul by 4x (exact up to float rounding).
# -----------------------------------------------------------------------------
def _bn_relu_avgpool_kernel(x_ref, s_ref, b_ref, o_ref, *, ntaps):
    s = s_ref[...]
    b = b_ref[...]
    acc = None
    for t in range(ntaps):
        y = jnp.maximum(x_ref[t].astype(jnp.float32) * s + b, 0.0)
        acc = y if acc is None else acc + y
    o_ref[...] = (acc * (1.0 / ntaps)).astype(o_ref.dtype)


def bn_relu_avgpool2x2(x, scale, bias):
    B, H, W, C = x.shape
    Ho, Wo = H // 2, W // 2
    taps = []
    for ki in range(2):
        for kj in range(2):
            taps.append(x[:, ki:ki + 2 * (Ho - 1) + 1:2,
                          kj:kj + 2 * (Wo - 1) + 1:2, :])
    M = B * Ho * Wo
    a = jnp.stack(taps, axis=0).reshape(4, M, C)
    if M <= 1024:
        Mp = _round_up(M, 8)
        tmr = Mp
    else:
        tmr = 512
        Mp = _round_up(M, tmr)
    a = jnp.pad(a, ((0, 0), (0, Mp - M), (0, 0)))
    out = pl.pallas_call(
        functools.partial(_bn_relu_avgpool_kernel, ntaps=4),
        out_shape=jax.ShapeDtypeStruct((Mp, C), jnp.bfloat16),
        grid=(Mp // tmr,),
        in_specs=[pl.BlockSpec((4, tmr, C), lambda i: (0, i, 0)),
                  pl.BlockSpec((1, C), lambda i: (0, 0)),
                  pl.BlockSpec((1, C), lambda i: (0, 0))],
        out_specs=pl.BlockSpec((tmr, C), lambda i: (i, 0)),
        compiler_params=pltpu.CompilerParams(
            dimension_semantics=("parallel",), vmem_limit_bytes=VMEM_LIMIT),
    )(a, scale.reshape(1, C).astype(jnp.float32),
      bias.reshape(1, C).astype(jnp.float32))
    return out[:M].reshape(B, Ho, Wo, C)


# -----------------------------------------------------------------------------
# Kernel 4: head — norm5 (BN) + ReLU + global avg pool + classifier, one kernel.
# Produces both the feature map (post-ReLU, returned by the module) and the logits.
# -----------------------------------------------------------------------------
def _head_kernel(x_ref, s_ref, b_ref, w_ref, cb_ref, out2_ref, logit_ref):
    x = x_ref[0].astype(jnp.float32)                      # (HW, C)
    y = jnp.maximum(x * s_ref[...] + b_ref[...], 0.0)     # BN + ReLU
    out2_ref[0] = y
    m = jnp.mean(y, axis=0, keepdims=True)                # global avg pool (1, C)
    logit_ref[0] = (jnp.dot(m.astype(jnp.bfloat16), w_ref[...],
                            preferred_element_type=jnp.float32) + cb_ref[...])


def densenet_head(x, scale, bias, w_bf16, cbias, num_classes):
    B, H, W, C = x.shape
    HW = H * W
    NCp = w_bf16.shape[1]
    out2, logits = pl.pallas_call(
        _head_kernel,
        out_shape=(jax.ShapeDtypeStruct((B, HW, C), jnp.float32),
                   jax.ShapeDtypeStruct((B, 1, NCp), jnp.float32)),
        grid=(B,),
        in_specs=[
            pl.BlockSpec((1, HW, C), lambda i: (i, 0, 0)),
            pl.BlockSpec((1, C), lambda i: (0, 0)),
            pl.BlockSpec((1, C), lambda i: (0, 0)),
            pl.BlockSpec((C, NCp), lambda i: (0, 0)),
            pl.BlockSpec((1, NCp), lambda i: (0, 0)),
        ],
        out_specs=(pl.BlockSpec((1, HW, C), lambda i: (i, 0, 0)),
                   pl.BlockSpec((1, 1, NCp), lambda i: (i, 0, 0))),
        compiler_params=pltpu.CompilerParams(
            dimension_semantics=("parallel",), vmem_limit_bytes=VMEM_LIMIT),
    )(x.reshape(B, HW, C), scale.reshape(1, C), bias.reshape(1, C), w_bf16, cbias)
    return logits.reshape(B, NCp)[:, :num_classes], out2.reshape(B, H, W, C)


# -----------------------------------------------------------------------------
# Deterministic parameter construction (synthetic; eval-mode BN folded, weights bf16)
# -----------------------------------------------------------------------------
class _KeyGen:
    def __init__(self, key):
        self._key = key

    def __call__(self):
        self._key, sub = jax.random.split(self._key)
        return sub


def _bn_params(kg, c):
    gamma = 1.0 + 0.1 * jax.random.normal(kg(), (c,), dtype=jnp.float32)
    beta = 0.1 * jax.random.normal(kg(), (c,), dtype=jnp.float32)
    mean = 0.1 * jax.random.normal(kg(), (c,), dtype=jnp.float32)
    var = jax.random.uniform(kg(), (c,), minval=0.5, maxval=1.5, dtype=jnp.float32)
    scale = gamma / jnp.sqrt(var + 1e-5)                  # eval-mode BN folded
    bias = beta - mean * scale
    return scale, bias


def _conv_w(kg, kh, kw, cin, cout):
    std = math.sqrt(2.0 / (kh * kw * cin))                # kaiming_normal
    return std * jax.random.normal(kg(), (kh, kw, cin, cout), dtype=jnp.float32)


def _make_stem(kg, cout):
    w = _conv_w(kg, 7, 7, 3, cout)
    s, b = _bn_params(kg, cout)
    w = w * s.reshape(1, 1, 1, cout)                      # fold norm0 scale into conv0
    return {"w": w.reshape(7 * 7 * 3, cout).astype(jnp.bfloat16), "bn_bias": b}


def _make_dense_layer(kg, cin, growth, bn_size):
    mid = bn_size * growth
    s1, b1 = _bn_params(kg, cin)                          # norm1 (pre conv1)
    w1 = _conv_w(kg, 1, 1, cin, mid)
    s2, b2 = _bn_params(kg, mid)                          # norm2 (pre conv2)
    w2 = _conv_w(kg, 3, 3, mid, growth)
    w1 = w1 * s2.reshape(1, 1, 1, mid)                    # fold norm2 scale into conv1
    return {
        "bn1_scale": s1, "bn1_bias": b1,
        "w1": w1.reshape(cin, mid).astype(jnp.bfloat16),
        "bn2_bias": b2,
        "w2": w2.reshape(9 * mid, growth).astype(jnp.bfloat16),
    }


def _make_transition(kg, cin, cout):
    s, b = _bn_params(kg, cin)
    w = _conv_w(kg, 1, 1, cin, cout)
    return {"bn_scale": s, "bn_bias": b,
            "w": w.reshape(cin, cout).astype(jnp.bfloat16)}


def init_densenet_params(key, growth_rate=32, block_config=(6, 12, 24, 16),
                         num_init_features=64, bn_size=4, drop_rate=0,
                         num_classes=1000):
    # TODO(synk): dropout (drop_rate > 0, training mode) not implemented; drop_rate=0
    # is the module default and is an identity at inference.
    assert drop_rate == 0
    kg = _KeyGen(key)
    params = {"stem": _make_stem(kg, num_init_features), "blocks": []}
    nf = num_init_features
    for i, nlayers in enumerate(block_config):
        layers = []
        for li in range(nlayers):
            layers.append(_make_dense_layer(kg, nf + li * growth_rate,
                                            growth_rate, bn_size))
        nf = nf + nlayers * growth_rate
        trans = None
        if i != len(block_config) - 1:
            trans = _make_transition(kg, nf, nf // 2)
            nf = nf // 2
        params["blocks"].append({"layers": layers, "transition": trans})
    s5, b5 = _bn_params(kg, nf)
    params["norm5_scale"], params["norm5_bias"] = s5, b5
    ncp = _round_up(num_classes, 128)                     # lane-dense classifier output
    cls_w = (1.0 / math.sqrt(nf)) * jax.random.normal(
        kg(), (nf, num_classes), dtype=jnp.float32)
    params["cls_w"] = jnp.pad(cls_w, ((0, 0), (0, ncp - num_classes))
                              ).astype(jnp.bfloat16)
    params["cls_b"] = jnp.zeros((1, ncp), jnp.float32)    # Linear bias init to 0
    return params


# -----------------------------------------------------------------------------
# Forward pass (mirrors DenseNet.forward: features -> relu -> pool -> classifier)
# -----------------------------------------------------------------------------
def dense_layer_forward(x, p):
    # BN1+ReLU fused as prescale into the 1x1 conv; BN2(+ReLU) fused into its epilogue
    # (scale folded into w1); output directly in bf16 for the 3x3 im2col.
    mid = conv2d(x, p["w1"], 1, 1, stride=1, padding=0,
                 prescale=p["bn1_scale"], prebias=p["bn1_bias"],
                 bias=p["bn2_bias"], act="relu", out_dtype=jnp.bfloat16)
    new = conv2d(mid, p["w2"], 3, 3, stride=1, padding=1, out_dtype=jnp.bfloat16)
    return jnp.concatenate([x, new], axis=-1)             # torch.cat([x, new], dim=1)


def transition_forward(x, p):
    # BN+ReLU+avgpool first (fused kernel), then the 1x1 conv on 4x fewer rows
    # (avg pool commutes with the linear 1x1 conv).
    pooled = bn_relu_avgpool2x2(x, p["bn_scale"], p["bn_bias"])
    return conv2d(pooled, p["w"], 1, 1, stride=1, padding=0,
                  out_dtype=jnp.bfloat16)


@functools.partial(jax.jit, static_argnames=("num_classes",))
def densenet_forward(x_nchw, params, *, num_classes):
    x = jnp.transpose(x_nchw, (0, 2, 3, 1)).astype(jnp.float32)     # NCHW -> NHWC
    # stem: conv0 (norm0 scale folded, bias+relu epilogue) + maxpool 3x3/s2/p1
    st = params["stem"]
    x = conv2d(x, st["w"], 7, 7, stride=2, padding=3,
               bias=st["bn_bias"], act="relu", out_dtype=jnp.bfloat16)
    x = maxpool2d(x, ksize=3, stride=2, padding=1)
    for block in params["blocks"]:
        for layer in block["layers"]:
            x = dense_layer_forward(x, layer)
        if block["transition"] is not None:
            x = transition_forward(x, block["transition"])
    logits, feat = densenet_head(x, params["norm5_scale"], params["norm5_bias"],
                                 params["cls_w"], params["cls_b"], num_classes)
    feat_nchw = jnp.transpose(feat, (0, 3, 1, 2))                   # NHWC -> NCHW
    return logits, feat_nchw, feat_nchw


if __name__ == "__main__":
    key = jax.random.PRNGKey(0)
    pkey, xkey = jax.random.split(key)
    # Small synthetic config (block_config shortened from (6,12,24,16) for a fast run).
    params = init_densenet_params(pkey, growth_rate=32, block_config=(2, 2, 2, 2),
                                  num_init_features=64, bn_size=4, drop_rate=0,
                                  num_classes=1000)
    x = jax.random.normal(xkey, (2, 3, 64, 64), dtype=jnp.float32)
    logits, feat, feat2 = densenet_forward(x, params, num_classes=1000)
    jax.block_until_ready((logits, feat, feat2))
    assert logits.shape == (2, 1000), logits.shape
    assert feat.shape == (2, 128, 2, 2), feat.shape
    assert bool(jnp.all(jnp.isfinite(logits)))
    assert bool(jnp.all(jnp.isfinite(feat)))
    print("KERNEL_OK")
</pallas_src>

<mosaic_0001>
module attributes {stable_mosaic.version = 11 : i64} {
  func.func @_mm_kernel(%arg0: i32, %arg1: i32, %arg2: i32, %arg3: memref<512x256xbf16, #tpu.memory_space<vmem>>, %arg4: memref<256x128xbf16, #tpu.memory_space<vmem>>, %arg5: memref<1x128xf32, #tpu.memory_space<vmem>>, %arg6: memref<512x128xbf16, #tpu.memory_space<vmem>>, %arg7: memref<512x128xf32, #tpu.memory_space<vmem>>) attributes {dimension_semantics = [#tpu.dimension_semantics<parallel>, #tpu.dimension_semantics<parallel>, #tpu.dimension_semantics<arbitrary>], iteration_bounds = array<i64: 4, 1, 1>, scalar_prefetch = 0 : i64, scratch_operands = 1 : i64, tpu.core_type = #tpu.core_type<tc>, window_params = [{transform_indices = @transform_0, window_bounds = array<i64: 512, 256>}, {transform_indices = @transform_1, window_bounds = array<i64: 256, 128>}, {transform_indices = @transform_2, window_bounds = array<i64: 1, 128>}, {transform_indices = @transform_3, window_bounds = array<i64: 512, 128>}]} {
    %c0_i32 = arith.constant 0 : i32
    %0 = arith.cmpi eq, %arg2, %c0_i32 : i32
    %1 = arith.extui %0 : i1 to i32
    %c0_i32_0 = arith.constant 0 : i32
    %2 = arith.cmpi ne, %1, %c0_i32_0 : i32
    scf.if %2 {
      %cst_10 = arith.constant 0.000000e+00 : f32
      %12 = vector.broadcast %cst_10 : f32 to vector<512x128xf32>
      %c0_11 = arith.constant 0 : index
      %c0_12 = arith.constant 0 : index
      %13 = vector.load %arg7[%c0_11, %c0_12] : memref<512x128xf32, #tpu.memory_space<vmem>>, vector<512x128xf32>
      tpu.vector_store %arg7[%c0_11, %c0_12], %12 {strides = array<i32>} : memref<512x128xf32, #tpu.memory_space<vmem>>, vector<512x128xf32>,
    } else {
    }
    %c0 = arith.constant 0 : index
    %c0_1 = arith.constant 0 : index
    %3 = vector.load %arg3[%c0, %c0_1] : memref<512x256xbf16, #tpu.memory_space<vmem>>, vector<512x256xbf16>
    %c0_2 = arith.constant 0 : index
    %c0_3 = arith.constant 0 : index
    %4 = vector.load %arg7[%c0_2, %c0_3] : memref<512x128xf32, #tpu.memory_space<vmem>>, vector<512x128xf32>
    %c0_4 = arith.constant 0 : index
    %c0_5 = arith.constant 0 : index
    %5 = vector.load %arg4[%c0_4, %c0_5] : memref<256x128xbf16, #tpu.memory_space<vmem>>, vector<256x128xbf16>
    %cst = arith.constant dense<0.000000e+00> : vector<512x128xf32>
    %6 = tpu.matmul %3, %5, %cst {dimension_numbers = #tpu.dot_dimension_numbers<[1], [0], [0], [1], [0, 0, 1, 1], [], []>} : vector<512x256xbf16>, vector<256x128xbf16>, vector<512x128xf32> -> vector<512x128xf32>
    %7 = arith.addf %4, %6 : vector<512x128xf32>
    %c0_6 = arith.constant 0 : index
    %c0_7 = arith.constant 0 : index
    %8 = vector.load %arg7[%c0_6, %c0_7] : memref<512x128xf32, #tpu.memory_space<vmem>>, vector<512x128xf32>
    tpu.vector_store %arg7[%c0_6, %c0_7], %7 {strides = array<i32>} : memref<512x128xf32, #tpu.memory_space<vmem>>, vector<512x128xf32>,
    %c0_i32_8 = arith.constant 0 : i32
    %9 = arith.cmpi eq, %arg2, %c0_i32_8 : i32
    %10 = arith.extui %9 : i1 to i32
    %c0_i32_9 = arith.constant 0 : i32
    %11 = arith.cmpi ne, %10, %c0_i32_9 : i32
    scf.if %11 {
      %c0_10 = arith.constant 0 : index
      %c0_11 = arith.constant 0 : index
      %12 = vector.load %arg7[%c0_10, %c0_11] : memref<512x128xf32, #tpu.memory_space<vmem>>, vector<512x128xf32>
      %c0_12 = arith.constant 0 : index
      %c0_13 = arith.constant 0 : index
      %13 = vector.load %arg5[%c0_12, %c0_13] : memref<1x128xf32, #tpu.memory_space<vmem>>, vector<1x128xf32>
      %14 = vector.broadcast %13 : vector<1x128xf32> to vector<512x128xf32>
      %15 = arith.addf %12, %14 : vector<512x128xf32>
      %cst_14 = arith.constant 0.000000e+00 : f32
      %16 = vector.broadcast %cst_14 : f32 to vector<512x128xf32>
      %17 = arith.maximumf %15, %16 : vector<512x128xf32>
      %18 = arith.truncf %17 : vector<512x128xf32> to vector<512x128xbf16>
      %c0_15 = arith.constant 0 : index
      %c0_16 = arith.constant 0 : index
      %19 = vector.load %arg6[%c0_15, %c0_16] : memref<512x128xbf16, #tpu.memory_space<vmem>>, vector<512x128xbf16>
      tpu.vector_store %arg6[%c0_15, %c0_16], %18 {strides = array<i32>} : memref<512x128xbf16, #tpu.memory_space<vmem>>, vector<512x128xbf16>,
    } else {
    }
    return
  }
  func.func @transform_0(%arg0: i32, %arg1: i32, %arg2: i32) -> (i32, i32) {
    %c0_i32 = arith.constant 0 : i32
    return %arg0, %arg2 : i32, i32
  }
  func.func @transform_1(%arg0: i32, %arg1: i32, %arg2: i32) -> (i32, i32) {
    %c0_i32 = arith.constant 0 : i32
    return %arg2, %arg1 : i32, i32
  }
  func.func @transform_2(%arg0: i32, %arg1: i32, %arg2: i32) -> (i32, i32) {
    %c0_i32 = arith.constant 0 : i32
    %c0_i32_0 = arith.constant 0 : i32
    return %c0_i32, %arg1 : i32, i32
  }
  func.func @transform_3(%arg0: i32, %arg1: i32, %arg2: i32) -> (i32, i32) {
    %c0_i32 = arith.constant 0 : i32
    return %arg0, %arg1 : i32, i32
  }
}

module attributes {stable_mosaic.version = 11 : i64} {
  func.func @_maxpool_kernel(%arg0: i32, %arg1: memref<9x256x128xbf16, #tpu.memory_space<vmem>>, %arg2: memref<256x128xbf16, #tpu.memory_space<vmem>>) attributes {dimension_semantics = [#tpu.dimension_semantics<parallel>], iteration_bounds = array<i64: 1>, scalar_prefetch = 0 : i64, scratch_operands = 0 : i64, tpu.core_type = #tpu.core_type<tc>, window_params = [{transform_indices = @transform_0, window_bounds = array<i64: 9, 256, 128>}, {transform_indices = @transform_1, window_bounds = array<i64: 256, 128>}]} {
    %c0 = arith.constant 0 : index
    %c0_0 = arith.constant 0 : index
    %c0_1 = arith.constant 0 : index
    %0 = vector.load %arg1[%c0, %c0_0, %c0_1] : memref<9x256x128xbf16, #tpu.memory_space<vmem>>, vector<9x256x128xbf16>
    %cst = arith.constant dense<0xFF80> : vector<256x128xbf16>
    %1 = vector.multi_reduction <maximumf>, %0, %cst [0] : vector<9x256x128xbf16> to vector<256x128xbf16>
    %c0_2 = arith.constant 0 : index
    %c0_3 = arith.constant 0 : index
    %2 = vector.load %arg2[%c0_2, %c0_3] : memref<256x128xbf16, #tpu.memory_space<vmem>>, vector<256x128xbf16>
    tpu.vector_store %arg2[%c0_2, %c0_3], %1 {strides = array<i32>} : memref<256x128xbf16, #tpu.memory_space<vmem>>, vector<256x128xbf16>,
    return
  }
  func.func @transform_0(%arg0: i32) -> (i32, i32, i32) {
    %c0_i32 = arith.constant 0 : i32
    %c0_i32_0 = arith.constant 0 : i32
    %c0_i32_1 = arith.constant 0 : i32
    return %c0_i32, %arg0, %c0_i32_0 : i32, i32, i32
  }
  func.func @transform_1(%arg0: i32) -> (i32, i32) {
    %c0_i32 = arith.constant 0 : i32
    %c0_i32_0 = arith.constant 0 : i32
    return %arg0, %c0_i32 : i32, i32
  }
}

module attributes {stable_mosaic.version = 11 : i64} {
  func.func @_mm_kernel(%arg0: i32, %arg1: i32, %arg2: i32, %arg3: memref<256x128xbf16, #tpu.memory_space<vmem>>, %arg4: memref<128x128xbf16, #tpu.memory_space<vmem>>, %arg5: memref<1x128xf32, #tpu.memory_space<vmem>>, %arg6: memref<1x128xf32, #tpu.memory_space<vmem>>, %arg7: memref<1x128xf32, #tpu.memory_space<vmem>>, %arg8: memref<256x128xbf16, #tpu.memory_space<vmem>>, %arg9: memref<256x128xf32, #tpu.memory_space<vmem>>) attributes {dimension_semantics = [#tpu.dimension_semantics<parallel>, #tpu.dimension_semantics<parallel>, #tpu.dimension_semantics<arbitrary>], iteration_bounds = array<i64: 2, 1, 1>, scalar_prefetch = 0 : i64, scratch_operands = 1 : i64, tpu.core_type = #tpu.core_type<tc>, window_params = [{transform_indices = @transform_0, window_bounds = array<i64: 256, 128>}, {transform_indices = @transform_1, window_bounds = array<i64: 128, 128>}, {transform_indices = @transform_2, window_bounds = array<i64: 1, 128>}, {transform_indices = @transform_3, window_bounds = array<i64: 1, 128>}, {transform_indices = @transform_4, window_bounds = array<i64: 1, 128>}, {transform_indices = @transform_5, window_bounds = array<i64: 256, 128>}]} {
    %c0_i32 = arith.constant 0 : i32
    %0 = arith.cmpi eq, %arg2, %c0_i32 : i32
    %1 = arith.extui %0 : i1 to i32
    %c0_i32_0 = arith.constant 0 : i32
    %2 = arith.cmpi ne, %1, %c0_i32_0 : i32
    scf.if %2 {
      %cst_15 = arith.constant 0.000000e+00 : f32
      %22 = vector.broadcast %cst_15 : f32 to vector<256x128xf32>
      %c0_16 = arith.constant 0 : index
      %c0_17 = arith.constant 0 : index
      %23 = vector.load %arg9[%c0_16, %c0_17] : memref<256x128xf32, #tpu.memory_space<vmem>>, vector<256x128xf32>
      tpu.vector_store %arg9[%c0_16, %c0_17], %22 {strides = array<i32>} : memref<256x128xf32, #tpu.memory_space<vmem>>, vector<256x128xf32>,
    } else {
    }
    %c0 = arith.constant 0 : index
    %c0_1 = arith.constant 0 : index
    %3 = vector.load %arg3[%c0, %c0_1] : memref<256x128xbf16, #tpu.memory_space<vmem>>, vector<256x128xbf16>
    %4 = arith.extf %3 : vector<256x128xbf16> to vector<256x128xf32>
    %c0_2 = arith.constant 0 : index
    %c0_3 = arith.constant 0 : index
    %5 = vector.load %arg5[%c0_2, %c0_3] : memref<1x128xf32, #tpu.memory_space<vmem>>, vector<1x128xf32>
    %6 = vector.broadcast %5 : vector<1x128xf32> to vector<256x128xf32>
    %7 = arith.mulf %4, %6 : vector<256x128xf32>
    %c0_4 = arith.constant 0 : index
    %c0_5 = arith.constant 0 : index
    %8 = vector.load %arg6[%c0_4, %c0_5] : memref<1x128xf32, #tpu.memory_space<vmem>>, vector<1x128xf32>
    %9 = vector.broadcast %8 : vector<1x128xf32> to vector<256x128xf32>
    %10 = arith.addf %7, %9 : vector<256x128xf32>
    %cst = arith.constant 0.000000e+00 : f32
    %11 = vector.broadcast %cst : f32 to vector<256x128xf32>
    %12 = arith.maximumf %10, %11 : vector<256x128xf32>
    %13 = arith.truncf %12 : vector<256x128xf32> to vector<256x128xbf16>
    %c0_6 = arith.constant 0 : index
    %c0_7 = arith.constant 0 : index
    %14 = vector.load %arg9[%c0_6, %c0_7] : memref<256x128xf32, #tpu.memory_space<vmem>>, vector<256x128xf32>
    %c0_8 = arith.constant 0 : index
    %c0_9 = arith.constant 0 : index
    %15 = vector.load %arg4[%c0_8, %c0_9] : memref<128x128xbf16, #tpu.memory_space<vmem>>, vector<128x128xbf16>
    %cst_10 = arith.constant dense<0.000000e+00> : vector<256x128xf32>
    %16 = tpu.matmul %13, %15, %cst_10 {dimension_numbers = #tpu.dot_dimension_numbers<[1], [0], [0], [1], [0, 0, 1, 1], [], []>} : vector<256x128xbf16>, vector<128x128xbf16>, vector<256x128xf32> -> vector<256x128xf32>
    %17 = arith.addf %14, %16 : vector<256x128xf32>
    %c0_11 = arith.constant 0 : index
    %c0_12 = arith.constant 0 : index
    %18 = vector.load %arg9[%c0_11, %c0_12] : memref<256x128xf32, #tpu.memory_space<vmem>>, vector<256x128xf32>
    tpu.vector_store %arg9[%c0_11, %c0_12], %17 {strides = array<i32>} : memref<256x128xf32, #tpu.memory_space<vmem>>, vector<256x128xf32>,
    %c0_i32_13 = arith.constant 0 : i32
    %19 = arith.cmpi eq, %arg2, %c0_i32_13 : i32
    %20 = arith.extui %19 : i1 to i32
    %c0_i32_14 = arith.constant 0 : i32
    %21 = arith.cmpi ne, %20, %c0_i32_14 : i32
    scf.if %21 {
      %c0_15 = arith.constant 0 : index
      %c0_16 = arith.constant 0 : index
      %22 = vector.load %arg9[%c0_15, %c0_16] : memref<256x128xf32, #tpu.memory_space<vmem>>, vector<256x128xf32>
      %c0_17 = arith.constant 0 : index
      %c0_18 = arith.constant 0 : index
      %23 = vector.load %arg7[%c0_17, %c0_18] : memref<1x128xf32, #tpu.memory_space<vmem>>, vector<1x128xf32>
      %24 = vector.broadcast %23 : vector<1x128xf32> to vector<256x128xf32>
      %25 = arith.addf %22, %24 : vector<256x128xf32>
      %cst_19 = arith.constant 0.000000e+00 : f32
      %26 = vector.broadcast %cst_19 : f32 to vector<256x128xf32>
      %27 = arith.maximumf %25, %26 : vector<256x128xf32>
      %28 = arith.truncf %27 : vector<256x128xf32> to vector<256x128xbf16>
      %c0_20 = arith.constant 0 : index
      %c0_21 = arith.constant 0 : index
      %29 = vector.load %arg8[%c0_20, %c0_21] : memref<256x128xbf16, #tpu.memory_space<vmem>>, vector<256x128xbf16>
      tpu.vector_store %arg8[%c0_20, %c0_21], %28 {strides = array<i32>} : memref<256x128xbf16, #tpu.memory_space<vmem>>, vector<256x128xbf16>,
    } else {
    }
    return
  }
  func.func @transform_0(%arg0: i32, %arg1: i32, %arg2: i32) -> (i32, i32) {
    %c0_i32 = arith.constant 0 : i32
    return %arg0, %arg2 : i32, i32
  }
  func.func @transform_1(%arg0: i32, %arg1: i32, %arg2: i32) -> (i32, i32) {
    %c0_i32 = arith.constant 0 : i32
    return %arg2, %arg1 : i32, i32
  }
  func.func @transform_2(%arg0: i32, %arg1: i32, %arg2: i32) -> (i32, i32) {
    %c0_i32 = arith.constant 0 : i32
    %c0_i32_0 = arith.constant 0 : i32
    return %c0_i32, %arg2 : i32, i32
  }
  func.func @transform_3(%arg0: i32, %arg1: i32, %arg2: i32) -> (i32, i32) {
    %c0_i32 = arith.constant 0 : i32
    %c0_i32_0 = arith.constant 0 : i32
    return %c0_i32, %arg2 : i32, i32
  }
  func.func @transform_4(%arg0: i32, %arg1: i32, %arg2: i32) -> (i32, i32) {
    %c0_i32 = arith.constant 0 : i32
    %c0_i32_0 = arith.constant 0 : i32
    return %c0_i32, %arg1 : i32, i32
  }
  func.func @transform_5(%arg0: i32, %arg1: i32, %arg2: i32) -> (i32, i32) {
    %c0_i32 = arith.constant 0 : i32
    return %arg0, %arg1 : i32, i32
  }
}

module attributes {stable_mosaic.version = 11 : i64} {
  func.func @_mm_kernel(%arg0: i32, %arg1: i32, %arg2: i32, %arg3: memref<256x1152xbf16, #tpu.memory_space<vmem>>, %arg4: memref<1152x128xbf16, #tpu.memory_space<vmem>>, %arg5: memref<256x128xbf16, #tpu.memory_space<vmem>>, %arg6: memref<256x128xf32, #tpu.memory_space<vmem>>) attributes {dimension_semantics = [#tpu.dimension_semantics<parallel>, #tpu.dimension_semantics<parallel>, #tpu.dimension_semantics<arbitrary>], iteration_bounds = array<i64: 2, 1, 1>, scalar_prefetch = 0 : i64, scratch_operands = 1 : i64, tpu.core_type = #tpu.core_type<tc>, window_params = [{transform_indices = @transform_0, window_bounds = array<i64: 256, 1152>}, {transform_indices = @transform_1, window_bounds = array<i64: 1152, 128>}, {transform_indices = @transform_2, window_bounds = array<i64: 256, 128>}]} {
    %c0_i32 = arith.constant 0 : i32
    %0 = arith.cmpi eq, %arg2, %c0_i32 : i32
    %1 = arith.extui %0 : i1 to i32
    %c0_i32_0 = arith.constant 0 : i32
    %2 = arith.cmpi ne, %1, %c0_i32_0 : i32
    scf.if %2 {
      %cst_10 = arith.constant 0.000000e+00 : f32
      %12 = vector.broadcast %cst_10 : f32 to vector<256x128xf32>
      %c0_11 = arith.constant 0 : index
      %c0_12 = arith.constant 0 : index
      %13 = vector.load %arg6[%c0_11, %c0_12] : memref<256x128xf32, #tpu.memory_space<vmem>>, vector<256x128xf32>
      tpu.vector_store %arg6[%c0_11, %c0_12], %12 {strides = array<i32>} : memref<256x128xf32, #tpu.memory_space<vmem>>, vector<256x128xf32>,
    } else {
    }
    %c0 = arith.constant 0 : index
    %c0_1 = arith.constant 0 : index
    %3 = vector.load %arg3[%c0, %c0_1] : memref<256x1152xbf16, #tpu.memory_space<vmem>>, vector<256x1152xbf16>
    %c0_2 = arith.constant 0 : index
    %c0_3 = arith.constant 0 : index
    %4 = vector.load %arg6[%c0_2, %c0_3] : memref<256x128xf32, #tpu.memory_space<vmem>>, vector<256x128xf32>
    %c0_4 = arith.constant 0 : index
    %c0_5 = arith.constant 0 : index
    %5 = vector.load %arg4[%c0_4, %c0_5] : memref<1152x128xbf16, #tpu.memory_space<vmem>>, vector<1152x128xbf16>
    %cst = arith.constant dense<0.000000e+00> : vector<256x128xf32>
    %6 = tpu.matmul %3, %5, %cst {dimension_numbers = #tpu.dot_dimension_numbers<[1], [0], [0], [1], [0, 0, 1, 1], [], []>} : vector<256x1152xbf16>, vector<1152x128xbf16>, vector<256x128xf32> -> vector<256x128xf32>
    %7 = arith.addf %4, %6 : vector<256x128xf32>
    %c0_6 = arith.constant 0 : index
    %c0_7 = arith.constant 0 : index
    %8 = vector.load %arg6[%c0_6, %c0_7] : memref<256x128xf32, #tpu.memory_space<vmem>>, vector<256x128xf32>
    tpu.vector_store %arg6[%c0_6, %c0_7], %7 {strides = array<i32>} : memref<256x128xf32, #tpu.memory_space<vmem>>, vector<256x128xf32>,
    %c0_i32_8 = arith.constant 0 : i32
    %9 = arith.cmpi eq, %arg2, %c0_i32_8 : i32
    %10 = arith.extui %9 : i1 to i32
    %c0_i32_9 = arith.constant 0 : i32
    %11 = arith.cmpi ne, %10, %c0_i32_9 : i32
    scf.if %11 {
      %c0_10 = arith.constant 0 : index
      %c0_11 = arith.constant 0 : index
      %12 = vector.load %arg6[%c0_10, %c0_11] : memref<256x128xf32, #tpu.memory_space<vmem>>, vector<256x128xf32>
      %13 = arith.truncf %12 : vector<256x128xf32> to vector<256x128xbf16>
      %c0_12 = arith.constant 0 : index
      %c0_13 = arith.constant 0 : index
      %14 = vector.load %arg5[%c0_12, %c0_13] : memref<256x128xbf16, #tpu.memory_space<vmem>>, vector<256x128xbf16>
      tpu.vector_store %arg5[%c0_12, %c0_13], %13 {strides = array<i32>} : memref<256x128xbf16, #tpu.memory_space<vmem>>, vector<256x128xbf16>,
    } else {
    }
    return
  }
  func.func @transform_0(%arg0: i32, %arg1: i32, %arg2: i32) -> (i32, i32) {
    %c0_i32 = arith.constant 0 : i32
    return %arg0, %arg2 : i32, i32
  }
  func.func @transform_1(%arg0: i32, %arg1: i32, %arg2: i32) -> (i32, i32) {
    %c0_i32 = arith.constant 0 : i32
    return %arg2, %arg1 : i32, i32
  }
  func.func @transform_2(%arg0: i32, %arg1: i32, %arg2: i32) -> (i32, i32) {
    %c0_i32 = arith.constant 0 : i32
    return %arg0, %arg1 : i32, i32
  }
}

module attributes {stable_mosaic.version = 11 : i64} {
  func.func @_bn_relu_avgpool_kernel(%arg0: i32, %arg1: memref<4x128x128xbf16, #tpu.memory_space<vmem>>, %arg2: memref<1x128xf32, #tpu.memory_space<vmem>>, %arg3: memref<1x128xf32, #tpu.memory_space<vmem>>, %arg4: memref<128x128xbf16, #tpu.memory_space<vmem>>) attributes {dimension_semantics = [#tpu.dimension_semantics<parallel>], iteration_bounds = array<i64: 1>, scalar_prefetch = 0 : i64, scratch_operands = 0 : i64, tpu.core_type = #tpu.core_type<tc>, window_params = [{transform_indices = @transform_0, window_bounds = array<i64: 4, 128, 128>}, {pipeline_mode = #tpu.pipeline_mode<synchronous>, transform_indices = @transform_1, window_bounds = array<i64: 1, 128>}, {pipeline_mode = #tpu.pipeline_mode<synchronous>, transform_indices = @transform_2, window_bounds = array<i64: 1, 128>}, {transform_indices = @transform_3, window_bounds = array<i64: 128, 128>}]} {
    %c0 = arith.constant 0 : index
    %c0_0 = arith.constant 0 : index
    %0 = vector.load %arg2[%c0, %c0_0] : memref<1x128xf32, #tpu.memory_space<vmem>>, vector<1x128xf32>
    %c0_1 = arith.constant 0 : index
    %c0_2 = arith.constant 0 : index
    %1 = vector.load %arg3[%c0_1, %c0_2] : memref<1x128xf32, #tpu.memory_space<vmem>>, vector<1x128xf32>
    %c0_3 = arith.constant 0 : index
    %c0_4 = arith.constant 0 : index
    %c0_5 = arith.constant 0 : index
    %2 = vector.load %arg1[%c0_3, %c0_4, %c0_5] : memref<4x128x128xbf16, #tpu.memory_space<vmem>>, vector<1x128x128xbf16>
    %3 = vector.shape_cast %2 : vector<1x128x128xbf16> to vector<128x128xbf16>
    %4 = arith.extf %3 : vector<128x128xbf16> to vector<128x128xf32>
    %5 = vector.broadcast %0 : vector<1x128xf32> to vector<128x128xf32>
    %6 = arith.mulf %4, %5 : vector<128x128xf32>
    %7 = vector.broadcast %1 : vector<1x128xf32> to vector<128x128xf32>
    %8 = arith.addf %6, %7 : vector<128x128xf32>
    %cst = arith.constant 0.000000e+00 : f32
    %9 = vector.broadcast %cst : f32 to vector<128x128xf32>
    %10 = arith.maximumf %8, %9 : vector<128x128xf32>
    %c1 = arith.constant 1 : index
    %c0_6 = arith.constant 0 : index
    %c0_7 = arith.constant 0 : index
    %11 = vector.load %arg1[%c1, %c0_6, %c0_7] : memref<4x128x128xbf16, #tpu.memory_space<vmem>>, vector<1x128x128xbf16>
    %12 = vector.shape_cast %11 : vector<1x128x128xbf16> to vector<128x128xbf16>
    %13 = arith.extf %12 : vector<128x128xbf16> to vector<128x128xf32>
    %14 = vector.broadcast %0 : vector<1x128xf32> to vector<128x128xf32>
    %15 = arith.mulf %13, %14 : vector<128x128xf32>
    %16 = vector.broadcast %1 : vector<1x128xf32> to vector<128x128xf32>
    %17 = arith.addf %15, %16 : vector<128x128xf32>
    %cst_8 = arith.constant 0.000000e+00 : f32
    %18 = vector.broadcast %cst_8 : f32 to vector<128x128xf32>
    %19 = arith.maximumf %17, %18 : vector<128x128xf32>
    %20 = arith.addf %10, %19 : vector<128x128xf32>
    %c2 = arith.constant 2 : index
    %c0_9 = arith.constant 0 : index
    %c0_10 = arith.constant 0 : index
    %21 = vector.load %arg1[%c2, %c0_9, %c0_10] : memref<4x128x128xbf16, #tpu.memory_space<vmem>>, vector<1x128x128xbf16>
    %22 = vector.shape_cast %21 : vector<1x128x128xbf16> to vector<128x128xbf16>
    %23 = arith.extf %22 : vector<128x128xbf16> to vector<128x128xf32>
    %24 = vector.broadcast %0 : vector<1x128xf32> to vector<128x128xf32>
    %25 = arith.mulf %23, %24 : vector<128x128xf32>
    %26 = vector.broadcast %1 : vector<1x128xf32> to vector<128x128xf32>
    %27 = arith.addf %25, %26 : vector<128x128xf32>
    %cst_11 = arith.constant 0.000000e+00 : f32
    %28 = vector.broadcast %cst_11 : f32 to vector<128x128xf32>
    %29 = arith.maximumf %27, %28 : vector<128x128xf32>
    %30 = arith.addf %20, %29 : vector<128x128xf32>
    %c3 = arith.constant 3 : index
    %c0_12 = arith.constant 0 : index
    %c0_13 = arith.constant 0 : index
    %31 = vector.load %arg1[%c3, %c0_12, %c0_13] : memref<4x128x128xbf16, #tpu.memory_space<vmem>>, vector<1x128x128xbf16>
    %32 = vector.shape_cast %31 : vector<1x128x128xbf16> to vector<128x128xbf16>
    %33 = arith.extf %32 : vector<128x128xbf16> to vector<128x128xf32>
    %34 = vector.broadcast %0 : vector<1x128xf32> to vector<128x128xf32>
    %35 = arith.mulf %33, %34 : vector<128x128xf32>
    %36 = vector.broadcast %1 : vector<1x128xf32> to vector<128x128xf32>
    %37 = arith.addf %35, %36 : vector<128x128xf32>
    %cst_14 = arith.constant 0.000000e+00 : f32
    %38 = vector.broadcast %cst_14 : f32 to vector<128x128xf32>
    %39 = arith.maximumf %37, %38 : vector<128x128xf32>
    %40 = arith.addf %30, %39 : vector<128x128xf32>
    %cst_15 = arith.constant 2.500000e-01 : f32
    %41 = vector.broadcast %cst_15 : f32 to vector<128x128xf32>
    %42 = arith.mulf %40, %41 : vector<128x128xf32>
    %43 = arith.truncf %42 : vector<128x128xf32> to vector<128x128xbf16>
    %c0_16 = arith.constant 0 : index
    %c0_17 = arith.constant 0 : index
    %44 = vector.load %arg4[%c0_16, %c0_17] : memref<128x128xbf16, #tpu.memory_space<vmem>>, vector<128x128xbf16>
    tpu.vector_store %arg4[%c0_16, %c0_17], %43 {strides = array<i32>} : memref<128x128xbf16, #tpu.memory_space<vmem>>, vector<128x128xbf16>,
    return
  }
  func.func @transform_0(%arg0: i32) -> (i32, i32, i32) {
    %c0_i32 = arith.constant 0 : i32
    %c0_i32_0 = arith.constant 0 : i32
    %c0_i32_1 = arith.constant 0 : i32
    return %c0_i32, %arg0, %c0_i32_0 : i32, i32, i32
  }
  func.func @transform_1(%arg0: i32) -> (i32, i32) {
    %c0_i32 = arith.constant 0 : i32
    %c0_i32_0 = arith.constant 0 : i32
    %c0_i32_1 = arith.constant 0 : i32
    return %c0_i32, %c0_i32_0 : i32, i32
  }
  func.func @transform_2(%arg0: i32) -> (i32, i32) {
    %c0_i32 = arith.constant 0 : i32
    %c0_i32_0 = arith.constant 0 : i32
    %c0_i32_1 = arith.constant 0 : i32
    return %c0_i32, %c0_i32_0 : i32, i32
  }
  func.func @transform_3(%arg0: i32) -> (i32, i32) {
    %c0_i32 = arith.constant 0 : i32
    %c0_i32_0 = arith.constant 0 : i32
    return %arg0, %c0_i32 : i32, i32
  }
}

module attributes {stable_mosaic.version = 11 : i64} {
  func.func @_mm_kernel(%arg0: i32, %arg1: i32, %arg2: i32, %arg3: memref<128x128xbf16, #tpu.memory_space<vmem>>, %arg4: memref<128x128xbf16, #tpu.memory_space<vmem>>, %arg5: memref<128x128xbf16, #tpu.memory_space<vmem>>, %arg6: memref<128x128xf32, #tpu.memory_space<vmem>>) attributes {dimension_semantics = [#tpu.dimension_semantics<parallel>, #tpu.dimension_semantics<parallel>, #tpu.dimension_semantics<arbitrary>], iteration_bounds = array<i64: 1, 1, 1>, scalar_prefetch = 0 : i64, scratch_operands = 1 : i64, tpu.core_type = #tpu.core_type<tc>, window_params = [{transform_indices = @transform_0, window_bounds = array<i64: 128, 128>}, {transform_indices = @transform_1, window_bounds = array<i64: 128, 128>}, {transform_indices = @transform_2, window_bounds = array<i64: 128, 128>}]} {
    %c0_i32 = arith.constant 0 : i32
    %0 = arith.cmpi eq, %arg2, %c0_i32 : i32
    %1 = arith.extui %0 : i1 to i32
    %c0_i32_0 = arith.constant 0 : i32
    %2 = arith.cmpi ne, %1, %c0_i32_0 : i32
    scf.if %2 {
      %cst_10 = arith.constant 0.000000e+00 : f32
      %12 = vector.broadcast %cst_10 : f32 to vector<128x128xf32>
      %c0_11 = arith.constant 0 : index
      %c0_12 = arith.constant 0 : index
      %13 = vector.load %arg6[%c0_11, %c0_12] : memref<128x128xf32, #tpu.memory_space<vmem>>, vector<128x128xf32>
      tpu.vector_store %arg6[%c0_11, %c0_12], %12 {strides = array<i32>} : memref<128x128xf32, #tpu.memory_space<vmem>>, vector<128x128xf32>,
    } else {
    }
    %c0 = arith.constant 0 : index
    %c0_1 = arith.constant 0 : index
    %3 = vector.load %arg3[%c0, %c0_1] : memref<128x128xbf16, #tpu.memory_space<vmem>>, vector<128x128xbf16>
    %c0_2 = arith.constant 0 : index
    %c0_3 = arith.constant 0 : index
    %4 = vector.load %arg6[%c0_2, %c0_3] : memref<128x128xf32, #tpu.memory_space<vmem>>, vector<128x128xf32>
    %c0_4 = arith.constant 0 : index
    %c0_5 = arith.constant 0 : index
    %5 = vector.load %arg4[%c0_4, %c0_5] : memref<128x128xbf16, #tpu.memory_space<vmem>>, vector<128x128xbf16>
    %cst = arith.constant dense<0.000000e+00> : vector<128x128xf32>
    %6 = tpu.matmul %3, %5, %cst {dimension_numbers = #tpu.dot_dimension_numbers<[1], [0], [0], [1], [0, 0, 1, 1], [], []>} : vector<128x128xbf16>, vector<128x128xbf16>, vector<128x128xf32> -> vector<128x128xf32>
    %7 = arith.addf %4, %6 : vector<128x128xf32>
    %c0_6 = arith.constant 0 : index
    %c0_7 = arith.constant 0 : index
    %8 = vector.load %arg6[%c0_6, %c0_7] : memref<128x128xf32, #tpu.memory_space<vmem>>, vector<128x128xf32>
    tpu.vector_store %arg6[%c0_6, %c0_7], %7 {strides = array<i32>} : memref<128x128xf32, #tpu.memory_space<vmem>>, vector<128x128xf32>,
    %c0_i32_8 = arith.constant 0 : i32
    %9 = arith.cmpi eq, %arg2, %c0_i32_8 : i32
    %10 = arith.extui %9 : i1 to i32
    %c0_i32_9 = arith.constant 0 : i32
    %11 = arith.cmpi ne, %10, %c0_i32_9 : i32
    scf.if %11 {
      %c0_10 = arith.constant 0 : index
      %c0_11 = arith.constant 0 : index
      %12 = vector.load %arg6[%c0_10, %c0_11] : memref<128x128xf32, #tpu.memory_space<vmem>>, vector<128x128xf32>
      %13 = arith.truncf %12 : vector<128x128xf32> to vector<128x128xbf16>
      %c0_12 = arith.constant 0 : index
      %c0_13 = arith.constant 0 : index
      %14 = vector.load %arg5[%c0_12, %c0_13] : memref<128x128xbf16, #tpu.memory_space<vmem>>, vector<128x128xbf16>
      tpu.vector_store %arg5[%c0_12, %c0_13], %13 {strides = array<i32>} : memref<128x128xbf16, #tpu.memory_space<vmem>>, vector<128x128xbf16>,
    } else {
    }
    return
  }
  func.func @transform_0(%arg0: i32, %arg1: i32, %arg2: i32) -> (i32, i32) {
    %c0_i32 = arith.constant 0 : i32
    return %arg0, %arg2 : i32, i32
  }
  func.func @transform_1(%arg0: i32, %arg1: i32, %arg2: i32) -> (i32, i32) {
    %c0_i32 = arith.constant 0 : i32
    return %arg2, %arg1 : i32, i32
  }
  func.func @transform_2(%arg0: i32, %arg1: i32, %arg2: i32) -> (i32, i32) {
    %c0_i32 = arith.constant 0 : i32
    return %arg0, %arg1 : i32, i32
  }
}

module attributes {stable_mosaic.version = 11 : i64} {
  func.func @_mm_kernel(%arg0: i32, %arg1: i32, %arg2: i32, %arg3: memref<128x128xbf16, #tpu.memory_space<vmem>>, %arg4: memref<128x128xbf16, #tpu.memory_space<vmem>>, %arg5: memref<1x128xf32, #tpu.memory_space<vmem>>, %arg6: memref<1x128xf32, #tpu.memory_space<vmem>>, %arg7: memref<1x128xf32, #tpu.memory_space<vmem>>, %arg8: memref<128x128xbf16, #tpu.memory_space<vmem>>, %arg9: memref<128x128xf32, #tpu.memory_space<vmem>>) attributes {dimension_semantics = [#tpu.dimension_semantics<parallel>, #tpu.dimension_semantics<parallel>, #tpu.dimension_semantics<arbitrary>], iteration_bounds = array<i64: 1, 1, 1>, scalar_prefetch = 0 : i64, scratch_operands = 1 : i64, tpu.core_type = #tpu.core_type<tc>, window_params = [{transform_indices = @transform_0, window_bounds = array<i64: 128, 128>}, {transform_indices = @transform_1, window_bounds = array<i64: 128, 128>}, {transform_indices = @transform_2, window_bounds = array<i64: 1, 128>}, {transform_indices = @transform_3, window_bounds = array<i64: 1, 128>}, {transform_indices = @transform_4, window_bounds = array<i64: 1, 128>}, {transform_indices = @transform_5, window_bounds = array<i64: 128, 128>}]} {
    %c0_i32 = arith.constant 0 : i32
    %0 = arith.cmpi eq, %arg2, %c0_i32 : i32
    %1 = arith.extui %0 : i1 to i32
    %c0_i32_0 = arith.constant 0 : i32
    %2 = arith.cmpi ne, %1, %c0_i32_0 : i32
    scf.if %2 {
      %cst_15 = arith.constant 0.000000e+00 : f32
      %22 = vector.broadcast %cst_15 : f32 to vector<128x128xf32>
      %c0_16 = arith.constant 0 : index
      %c0_17 = arith.constant 0 : index
      %23 = vector.load %arg9[%c0_16, %c0_17] : memref<128x128xf32, #tpu.memory_space<vmem>>, vector<128x128xf32>
      tpu.vector_store %arg9[%c0_16, %c0_17], %22 {strides = array<i32>} : memref<128x128xf32, #tpu.memory_space<vmem>>, vector<128x128xf32>,
    } else {
    }
    %c0 = arith.constant 0 : index
    %c0_1 = arith.constant 0 : index
    %3 = vector.load %arg3[%c0, %c0_1] : memref<128x128xbf16, #tpu.memory_space<vmem>>, vector<128x128xbf16>
    %4 = arith.extf %3 : vector<128x128xbf16> to vector<128x128xf32>
    %c0_2 = arith.constant 0 : index
    %c0_3 = arith.constant 0 : index
    %5 = vector.load %arg5[%c0_2, %c0_3] : memref<1x128xf32, #tpu.memory_space<vmem>>, vector<1x128xf32>
    %6 = vector.broadcast %5 : vector<1x128xf32> to vector<128x128xf32>
    %7 = arith.mulf %4, %6 : vector<128x128xf32>
    %c0_4 = arith.constant 0 : index
    %c0_5 = arith.constant 0 : index
    %8 = vector.load %arg6[%c0_4, %c0_5] : memref<1x128xf32, #tpu.memory_space<vmem>>, vector<1x128xf32>
    %9 = vector.broadcast %8 : vector<1x128xf32> to vector<128x128xf32>
    %10 = arith.addf %7, %9 : vector<128x128xf32>
    %cst = arith.constant 0.000000e+00 : f32
    %11 = vector.broadcast %cst : f32 to vector<128x128xf32>
    %12 = arith.maximumf %10, %11 : vector<128x128xf32>
    %13 = arith.truncf %12 : vector<128x128xf32> to vector<128x128xbf16>
    %c0_6 = arith.constant 0 : index
    %c0_7 = arith.constant 0 : index
    %14 = vector.load %arg9[%c0_6, %c0_7] : memref<128x128xf32, #tpu.memory_space<vmem>>, vector<128x128xf32>
    %c0_8 = arith.constant 0 : index
    %c0_9 = arith.constant 0 : index
    %15 = vector.load %arg4[%c0_8, %c0_9] : memref<128x128xbf16, #tpu.memory_space<vmem>>, vector<128x128xbf16>
    %cst_10 = arith.constant dense<0.000000e+00> : vector<128x128xf32>
    %16 = tpu.matmul %13, %15, %cst_10 {dimension_numbers = #tpu.dot_dimension_numbers<[1], [0], [0], [1], [0, 0, 1, 1], [], []>} : vector<128x128xbf16>, vector<128x128xbf16>, vector<128x128xf32> -> vector<128x128xf32>
    %17 = arith.addf %14, %16 : vector<128x128xf32>
    %c0_11 = arith.constant 0 : index
    %c0_12 = arith.constant 0 : index
    %18 = vector.load %arg9[%c0_11, %c0_12] : memref<128x128xf32, #tpu.memory_space<vmem>>, vector<128x128xf32>
    tpu.vector_store %arg9[%c0_11, %c0_12], %17 {strides = array<i32>} : memref<128x128xf32, #tpu.memory_space<vmem>>, vector<128x128xf32>,
    %c0_i32_13 = arith.constant 0 : i32
    %19 = arith.cmpi eq, %arg2, %c0_i32_13 : i32
    %20 = arith.extui %19 : i1 to i32
    %c0_i32_14 = arith.constant 0 : i32
    %21 = arith.cmpi ne, %20, %c0_i32_14 : i32
    scf.if %21 {
      %c0_15 = arith.constant 0 : index
      %c0_16 = arith.constant 0 : index
      %22 = vector.load %arg9[%c0_15, %c0_16] : memref<128x128xf32, #tpu.memory_space<vmem>>, vector<128x128xf32>
      %c0_17 = arith.constant 0 : index
      %c0_18 = arith.constant 0 : index
      %23 = vector.load %arg7[%c0_17, %c0_18] : memref<1x128xf32, #tpu.memory_space<vmem>>, vector<1x128xf32>
      %24 = vector.broadcast %23 : vector<1x128xf32> to vector<128x128xf32>
      %25 = arith.addf %22, %24 : vector<128x128xf32>
      %cst_19 = arith.constant 0.000000e+00 : f32
      %26 = vector.broadcast %cst_19 : f32 to vector<128x128xf32>
      %27 = arith.maximumf %25, %26 : vector<128x128xf32>
      %28 = arith.truncf %27 : vector<128x128xf32> to vector<128x128xbf16>
      %c0_20 = arith.constant 0 : index
      %c0_21 = arith.constant 0 : index
      %29 = vector.load %arg8[%c0_20, %c0_21] : memref<128x128xbf16, #tpu.memory_space<vmem>>, vector<128x128xbf16>
      tpu.vector_store %arg8[%c0_20, %c0_21], %28 {strides = array<i32>} : memref<128x128xbf16, #tpu.memory_space<vmem>>, vector<128x128xbf16>,
    } else {
    }
    return
  }
  func.func @transform_0(%arg0: i32, %arg1: i32, %arg2: i32) -> (i32, i32) {
    %c0_i32 = arith.constant 0 : i32
    return %arg0, %arg2 : i32, i32
  }
  func.func @transform_1(%arg0: i32, %arg1: i32, %arg2: i32) -> (i32, i32) {
    %c0_i32 = arith.constant 0 : i32
    return %arg2, %arg1 : i32, i32
  }
  func.func @transform_2(%arg0: i32, %arg1: i32, %arg2: i32) -> (i32, i32) {
    %c0_i32 = arith.constant 0 : i32
    %c0_i32_0 = arith.constant 0 : i32
    return %c0_i32, %arg2 : i32, i32
  }
  func.func @transform_3(%arg0: i32, %arg1: i32, %arg2: i32) -> (i32, i32) {
    %c0_i32 = arith.constant 0 : i32
    %c0_i32_0 = arith.constant 0 : i32
    return %c0_i32, %arg2 : i32, i32
  }
  func.func @transform_4(%arg0: i32, %arg1: i32, %arg2: i32) -> (i32, i32) {
    %c0_i32 = arith.constant 0 : i32
    %c0_i32_0 = arith.constant 0 : i32
    return %c0_i32, %arg1 : i32, i32
  }
  func.func @transform_5(%arg0: i32, %arg1: i32, %arg2: i32) -> (i32, i32) {
    %c0_i32 = arith.constant 0 : i32
    return %arg0, %arg1 : i32, i32
  }
}

module attributes {stable_mosaic.version = 11 : i64} {
  func.func @_mm_kernel(%arg0: i32, %arg1: i32, %arg2: i32, %arg3: memref<128x1152xbf16, #tpu.memory_space<vmem>>, %arg4: memref<1152x128xbf16, #tpu.memory_space<vmem>>, %arg5: memref<128x128xbf16, #tpu.memory_space<vmem>>, %arg6: memref<128x128xf32, #tpu.memory_space<vmem>>) attributes {dimension_semantics = [#tpu.dimension_semantics<parallel>, #tpu.dimension_semantics<parallel>, #tpu.dimension_semantics<arbitrary>], iteration_bounds = array<i64: 1, 1, 1>, scalar_prefetch = 0 : i64, scratch_operands = 1 : i64, tpu.core_type = #tpu.core_type<tc>, window_params = [{transform_indices = @transform_0, window_bounds = array<i64: 128, 1152>}, {transform_indices = @transform_1, window_bounds = array<i64: 1152, 128>}, {transform_indices = @transform_2, window_bounds = array<i64: 128, 128>}]} {
    %c0_i32 = arith.constant 0 : i32
    %0 = arith.cmpi eq, %arg2, %c0_i32 : i32
    %1 = arith.extui %0 : i1 to i32
    %c0_i32_0 = arith.constant 0 : i32
    %2 = arith.cmpi ne, %1, %c0_i32_0 : i32
    scf.if %2 {
      %cst_10 = arith.constant 0.000000e+00 : f32
      %12 = vector.broadcast %cst_10 : f32 to vector<128x128xf32>
      %c0_11 = arith.constant 0 : index
      %c0_12 = arith.constant 0 : index
      %13 = vector.load %arg6[%c0_11, %c0_12] : memref<128x128xf32, #tpu.memory_space<vmem>>, vector<128x128xf32>
      tpu.vector_store %arg6[%c0_11, %c0_12], %12 {strides = array<i32>} : memref<128x128xf32, #tpu.memory_space<vmem>>, vector<128x128xf32>,
    } else {
    }
    %c0 = arith.constant 0 : index
    %c0_1 = arith.constant 0 : index
    %3 = vector.load %arg3[%c0, %c0_1] : memref<128x1152xbf16, #tpu.memory_space<vmem>>, vector<128x1152xbf16>
    %c0_2 = arith.constant 0 : index
    %c0_3 = arith.constant 0 : index
    %4 = vector.load %arg6[%c0_2, %c0_3] : memref<128x128xf32, #tpu.memory_space<vmem>>, vector<128x128xf32>
    %c0_4 = arith.constant 0 : index
    %c0_5 = arith.constant 0 : index
    %5 = vector.load %arg4[%c0_4, %c0_5] : memref<1152x128xbf16, #tpu.memory_space<vmem>>, vector<1152x128xbf16>
    %cst = arith.constant dense<0.000000e+00> : vector<128x128xf32>
    %6 = tpu.matmul %3, %5, %cst {dimension_numbers = #tpu.dot_dimension_numbers<[1], [0], [0], [1], [0, 0, 1, 1], [], []>} : vector<128x1152xbf16>, vector<1152x128xbf16>, vector<128x128xf32> -> vector<128x128xf32>
    %7 = arith.addf %4, %6 : vector<128x128xf32>
    %c0_6 = arith.constant 0 : index
    %c0_7 = arith.constant 0 : index
    %8 = vector.load %arg6[%c0_6, %c0_7] : memref<128x128xf32, #tpu.memory_space<vmem>>, vector<128x128xf32>
    tpu.vector_store %arg6[%c0_6, %c0_7], %7 {strides = array<i32>} : memref<128x128xf32, #tpu.memory_space<vmem>>, vector<128x128xf32>,
    %c0_i32_8 = arith.constant 0 : i32
    %9 = arith.cmpi eq, %arg2, %c0_i32_8 : i32
    %10 = arith.extui %9 : i1 to i32
    %c0_i32_9 = arith.constant 0 : i32
    %11 = arith.cmpi ne, %10, %c0_i32_9 : i32
    scf.if %11 {
      %c0_10 = arith.constant 0 : index
      %c0_11 = arith.constant 0 : index
      %12 = vector.load %arg6[%c0_10, %c0_11] : memref<128x128xf32, #tpu.memory_space<vmem>>, vector<128x128xf32>
      %13 = arith.truncf %12 : vector<128x128xf32> to vector<128x128xbf16>
      %c0_12 = arith.constant 0 : index
      %c0_13 = arith.constant 0 : index
      %14 = vector.load %arg5[%c0_12, %c0_13] : memref<128x128xbf16, #tpu.memory_space<vmem>>, vector<128x128xbf16>
      tpu.vector_store %arg5[%c0_12, %c0_13], %13 {strides = array<i32>} : memref<128x128xbf16, #tpu.memory_space<vmem>>, vector<128x128xbf16>,
    } else {
    }
    return
  }
  func.func @transform_0(%arg0: i32, %arg1: i32, %arg2: i32) -> (i32, i32) {
    %c0_i32 = arith.constant 0 : i32
    return %arg0, %arg2 : i32, i32
  }
  func.func @transform_1(%arg0: i32, %arg1: i32, %arg2: i32) -> (i32, i32) {
    %c0_i32 = arith.constant 0 : i32
    return %arg2, %arg1 : i32, i32
  }
  func.func @transform_2(%arg0: i32, %arg1: i32, %arg2: i32) -> (i32, i32) {
    %c0_i32 = arith.constant 0 : i32
    return %arg0, %arg1 : i32, i32
  }
}

module attributes {stable_mosaic.version = 11 : i64} {
  func.func @_bn_relu_avgpool_kernel(%arg0: i32, %arg1: memref<4x32x128xbf16, #tpu.memory_space<vmem>>, %arg2: memref<1x128xf32, #tpu.memory_space<vmem>>, %arg3: memref<1x128xf32, #tpu.memory_space<vmem>>, %arg4: memref<32x128xbf16, #tpu.memory_space<vmem>>) attributes {dimension_semantics = [#tpu.dimension_semantics<parallel>], iteration_bounds = array<i64: 1>, scalar_prefetch = 0 : i64, scratch_operands = 0 : i64, tpu.core_type = #tpu.core_type<tc>, window_params = [{transform_indices = @transform_0, window_bounds = array<i64: 4, 32, 128>}, {pipeline_mode = #tpu.pipeline_mode<synchronous>, transform_indices = @transform_1, window_bounds = array<i64: 1, 128>}, {pipeline_mode = #tpu.pipeline_mode<synchronous>, transform_indices = @transform_2, window_bounds = array<i64: 1, 128>}, {transform_indices = @transform_3, window_bounds = array<i64: 32, 128>}]} {
    %c0 = arith.constant 0 : index
    %c0_0 = arith.constant 0 : index
    %0 = vector.load %arg2[%c0, %c0_0] : memref<1x128xf32, #tpu.memory_space<vmem>>, vector<1x128xf32>
    %c0_1 = arith.constant 0 : index
    %c0_2 = arith.constant 0 : index
    %1 = vector.load %arg3[%c0_1, %c0_2] : memref<1x128xf32, #tpu.memory_space<vmem>>, vector<1x128xf32>
    %c0_3 = arith.constant 0 : index
    %c0_4 = arith.constant 0 : index
    %c0_5 = arith.constant 0 : index
    %2 = vector.load %arg1[%c0_3, %c0_4, %c0_5] : memref<4x32x128xbf16, #tpu.memory_space<vmem>>, vector<1x32x128xbf16>
    %3 = vector.shape_cast %2 : vector<1x32x128xbf16> to vector<32x128xbf16>
    %4 = arith.extf %3 : vector<32x128xbf16> to vector<32x128xf32>
    %5 = vector.broadcast %0 : vector<1x128xf32> to vector<32x128xf32>
    %6 = arith.mulf %4, %5 : vector<32x128xf32>
    %7 = vector.broadcast %1 : vector<1x128xf32> to vector<32x128xf32>
    %8 = arith.addf %6, %7 : vector<32x128xf32>
    %cst = arith.constant 0.000000e+00 : f32
    %9 = vector.broadcast %cst : f32 to vector<32x128xf32>
    %10 = arith.maximumf %8, %9 : vector<32x128xf32>
    %c1 = arith.constant 1 : index
    %c0_6 = arith.constant 0 : index
    %c0_7 = arith.constant 0 : index
    %11 = vector.load %arg1[%c1, %c0_6, %c0_7] : memref<4x32x128xbf16, #tpu.memory_space<vmem>>, vector<1x32x128xbf16>
    %12 = vector.shape_cast %11 : vector<1x32x128xbf16> to vector<32x128xbf16>
    %13 = arith.extf %12 : vector<32x128xbf16> to vector<32x128xf32>
    %14 = vector.broadcast %0 : vector<1x128xf32> to vector<32x128xf32>
    %15 = arith.mulf %13, %14 : vector<32x128xf32>
    %16 = vector.broadcast %1 : vector<1x128xf32> to vector<32x128xf32>
    %17 = arith.addf %15, %16 : vector<32x128xf32>
    %cst_8 = arith.constant 0.000000e+00 : f32
    %18 = vector.broadcast %cst_8 : f32 to vector<32x128xf32>
    %19 = arith.maximumf %17, %18 : vector<32x128xf32>
    %20 = arith.addf %10, %19 : vector<32x128xf32>
    %c2 = arith.constant 2 : index
    %c0_9 = arith.constant 0 : index
    %c0_10 = arith.constant 0 : index
    %21 = vector.load %arg1[%c2, %c0_9, %c0_10] : memref<4x32x128xbf16, #tpu.memory_space<vmem>>, vector<1x32x128xbf16>
    %22 = vector.shape_cast %21 : vector<1x32x128xbf16> to vector<32x128xbf16>
    %23 = arith.extf %22 : vector<32x128xbf16> to vector<32x128xf32>
    %24 = vector.broadcast %0 : vector<1x128xf32> to vector<32x128xf32>
    %25 = arith.mulf %23, %24 : vector<32x128xf32>
    %26 = vector.broadcast %1 : vector<1x128xf32> to vector<32x128xf32>
    %27 = arith.addf %25, %26 : vector<32x128xf32>
    %cst_11 = arith.constant 0.000000e+00 : f32
    %28 = vector.broadcast %cst_11 : f32 to vector<32x128xf32>
    %29 = arith.maximumf %27, %28 : vector<32x128xf32>
    %30 = arith.addf %20, %29 : vector<32x128xf32>
    %c3 = arith.constant 3 : index
    %c0_12 = arith.constant 0 : index
    %c0_13 = arith.constant 0 : index
    %31 = vector.load %arg1[%c3, %c0_12, %c0_13] : memref<4x32x128xbf16, #tpu.memory_space<vmem>>, vector<1x32x128xbf16>
    %32 = vector.shape_cast %31 : vector<1x32x128xbf16> to vector<32x128xbf16>
    %33 = arith.extf %32 : vector<32x128xbf16> to vector<32x128xf32>
    %34 = vector.broadcast %0 : vector<1x128xf32> to vector<32x128xf32>
    %35 = arith.mulf %33, %34 : vector<32x128xf32>
    %36 = vector.broadcast %1 : vector<1x128xf32> to vector<32x128xf32>
    %37 = arith.addf %35, %36 : vector<32x128xf32>
    %cst_14 = arith.constant 0.000000e+00 : f32
    %38 = vector.broadcast %cst_14 : f32 to vector<32x128xf32>
    %39 = arith.maximumf %37, %38 : vector<32x128xf32>
    %40 = arith.addf %30, %39 : vector<32x128xf32>
    %cst_15 = arith.constant 2.500000e-01 : f32
    %41 = vector.broadcast %cst_15 : f32 to vector<32x128xf32>
    %42 = arith.mulf %40, %41 : vector<32x128xf32>
    %43 = arith.truncf %42 : vector<32x128xf32> to vector<32x128xbf16>
    %c0_16 = arith.constant 0 : index
    %c0_17 = arith.constant 0 : index
    %44 = vector.load %arg4[%c0_16, %c0_17] : memref<32x128xbf16, #tpu.memory_space<vmem>>, vector<32x128xbf16>
    tpu.vector_store %arg4[%c0_16, %c0_17], %43 {strides = array<i32>} : memref<32x128xbf16, #tpu.memory_space<vmem>>, vector<32x128xbf16>,
    return
  }
  func.func @transform_0(%arg0: i32) -> (i32, i32, i32) {
    %c0_i32 = arith.constant 0 : i32
    %c0_i32_0 = arith.constant 0 : i32
    %c0_i32_1 = arith.constant 0 : i32
    return %c0_i32, %arg0, %c0_i32_0 : i32, i32, i32
  }
  func.func @transform_1(%arg0: i32) -> (i32, i32) {
    %c0_i32 = arith.constant 0 : i32
    %c0_i32_0 = arith.constant 0 : i32
    %c0_i32_1 = arith.constant 0 : i32
    return %c0_i32, %c0_i32_0 : i32, i32
  }
  func.func @transform_2(%arg0: i32) -> (i32, i32) {
    %c0_i32 = arith.constant 0 : i32
    %c0_i32_0 = arith.constant 0 : i32
    %c0_i32_1 = arith.constant 0 : i32
    return %c0_i32, %c0_i32_0 : i32, i32
  }
  func.func @transform_3(%arg0: i32) -> (i32, i32) {
    %c0_i32 = arith.constant 0 : i32
    %c0_i32_0 = arith.constant 0 : i32
    return %arg0, %c0_i32 : i32, i32
  }
}

module attributes {stable_mosaic.version = 11 : i64} {
  func.func @_bn_relu_avgpool_kernel(%arg0: i32, %arg1: memref<4x8x128xbf16, #tpu.memory_space<vmem>>, %arg2: memref<1x128xf32, #tpu.memory_space<vmem>>, %arg3: memref<1x128xf32, #tpu.memory_space<vmem>>, %arg4: memref<8x128xbf16, #tpu.memory_space<vmem>>) attributes {dimension_semantics = [#tpu.dimension_semantics<parallel>], iteration_bounds = array<i64: 1>, scalar_prefetch = 0 : i64, scratch_operands = 0 : i64, tpu.core_type = #tpu.core_type<tc>, window_params = [{transform_indices = @transform_0, window_bounds = array<i64: 4, 8, 128>}, {pipeline_mode = #tpu.pipeline_mode<synchronous>, transform_indices = @transform_1, window_bounds = array<i64: 1, 128>}, {pipeline_mode = #tpu.pipeline_mode<synchronous>, transform_indices = @transform_2, window_bounds = array<i64: 1, 128>}, {transform_indices = @transform_3, window_bounds = array<i64: 8, 128>}]} {
    %c0 = arith.constant 0 : index
    %c0_0 = arith.constant 0 : index
    %0 = vector.load %arg2[%c0, %c0_0] : memref<1x128xf32, #tpu.memory_space<vmem>>, vector<1x128xf32>
    %c0_1 = arith.constant 0 : index
    %c0_2 = arith.constant 0 : index
    %1 = vector.load %arg3[%c0_1, %c0_2] : memref<1x128xf32, #tpu.memory_space<vmem>>, vector<1x128xf32>
    %c0_3 = arith.constant 0 : index
    %c0_4 = arith.constant 0 : index
    %c0_5 = arith.constant 0 : index
    %2 = vector.load %arg1[%c0_3, %c0_4, %c0_5] : memref<4x8x128xbf16, #tpu.memory_space<vmem>>, vector<1x8x128xbf16>
    %3 = vector.shape_cast %2 : vector<1x8x128xbf16> to vector<8x128xbf16>
    %4 = arith.extf %3 : vector<8x128xbf16> to vector<8x128xf32>
    %5 = vector.broadcast %0 : vector<1x128xf32> to vector<8x128xf32>
    %6 = arith.mulf %4, %5 : vector<8x128xf32>
    %7 = vector.broadcast %1 : vector<1x128xf32> to vector<8x128xf32>
    %8 = arith.addf %6, %7 : vector<8x128xf32>
    %cst = arith.constant 0.000000e+00 : f32
    %9 = vector.broadcast %cst : f32 to vector<8x128xf32>
    %10 = arith.maximumf %8, %9 : vector<8x128xf32>
    %c1 = arith.constant 1 : index
    %c0_6 = arith.constant 0 : index
    %c0_7 = arith.constant 0 : index
    %11 = vector.load %arg1[%c1, %c0_6, %c0_7] : memref<4x8x128xbf16, #tpu.memory_space<vmem>>, vector<1x8x128xbf16>
    %12 = vector.shape_cast %11 : vector<1x8x128xbf16> to vector<8x128xbf16>
    %13 = arith.extf %12 : vector<8x128xbf16> to vector<8x128xf32>
    %14 = vector.broadcast %0 : vector<1x128xf32> to vector<8x128xf32>
    %15 = arith.mulf %13, %14 : vector<8x128xf32>
    %16 = vector.broadcast %1 : vector<1x128xf32> to vector<8x128xf32>
    %17 = arith.addf %15, %16 : vector<8x128xf32>
    %cst_8 = arith.constant 0.000000e+00 : f32
    %18 = vector.broadcast %cst_8 : f32 to vector<8x128xf32>
    %19 = arith.maximumf %17, %18 : vector<8x128xf32>
    %20 = arith.addf %10, %19 : vector<8x128xf32>
    %c2 = arith.constant 2 : index
    %c0_9 = arith.constant 0 : index
    %c0_10 = arith.constant 0 : index
    %21 = vector.load %arg1[%c2, %c0_9, %c0_10] : memref<4x8x128xbf16, #tpu.memory_space<vmem>>, vector<1x8x128xbf16>
    %22 = vector.shape_cast %21 : vector<1x8x128xbf16> to vector<8x128xbf16>
    %23 = arith.extf %22 : vector<8x128xbf16> to vector<8x128xf32>
    %24 = vector.broadcast %0 : vector<1x128xf32> to vector<8x128xf32>
    %25 = arith.mulf %23, %24 : vector<8x128xf32>
    %26 = vector.broadcast %1 : vector<1x128xf32> to vector<8x128xf32>
    %27 = arith.addf %25, %26 : vector<8x128xf32>
    %cst_11 = arith.constant 0.000000e+00 : f32
    %28 = vector.broadcast %cst_11 : f32 to vector<8x128xf32>
    %29 = arith.maximumf %27, %28 : vector<8x128xf32>
    %30 = arith.addf %20, %29 : vector<8x128xf32>
    %c3 = arith.constant 3 : index
    %c0_12 = arith.constant 0 : index
    %c0_13 = arith.constant 0 : index
    %31 = vector.load %arg1[%c3, %c0_12, %c0_13] : memref<4x8x128xbf16, #tpu.memory_space<vmem>>, vector<1x8x128xbf16>
    %32 = vector.shape_cast %31 : vector<1x8x128xbf16> to vector<8x128xbf16>
    %33 = arith.extf %32 : vector<8x128xbf16> to vector<8x128xf32>
    %34 = vector.broadcast %0 : vector<1x128xf32> to vector<8x128xf32>
    %35 = arith.mulf %33, %34 : vector<8x128xf32>
    %36 = vector.broadcast %1 : vector<1x128xf32> to vector<8x128xf32>
    %37 = arith.addf %35, %36 : vector<8x128xf32>
    %cst_14 = arith.constant 0.000000e+00 : f32
    %38 = vector.broadcast %cst_14 : f32 to vector<8x128xf32>
    %39 = arith.maximumf %37, %38 : vector<8x128xf32>
    %40 = arith.addf %30, %39 : vector<8x128xf32>
    %cst_15 = arith.constant 2.500000e-01 : f32
    %41 = vector.broadcast %cst_15 : f32 to vector<8x128xf32>
    %42 = arith.mulf %40, %41 : vector<8x128xf32>
    %43 = arith.truncf %42 : vector<8x128xf32> to vector<8x128xbf16>
    %c0_16 = arith.constant 0 : index
    %c0_17 = arith.constant 0 : index
    %44 = vector.load %arg4[%c0_16, %c0_17] : memref<8x128xbf16, #tpu.memory_space<vmem>>, vector<8x128xbf16>
    tpu.vector_store %arg4[%c0_16, %c0_17], %43 {strides = array<i32>} : memref<8x128xbf16, #tpu.memory_space<vmem>>, vector<8x128xbf16>,
    return
  }
  func.func @transform_0(%arg0: i32) -> (i32, i32, i32) {
    %c0_i32 = arith.constant 0 : i32
    %c0_i32_0 = arith.constant 0 : i32
    %c0_i32_1 = arith.constant 0 : i32
    return %c0_i32, %arg0, %c0_i32_0 : i32, i32, i32
  }
  func.func @transform_1(%arg0: i32) -> (i32, i32) {
    %c0_i32 = arith.constant 0 : i32
    %c0_i32_0 = arith.constant 0 : i32
    %c0_i32_1 = arith.constant 0 : i32
    return %c0_i32, %c0_i32_0 : i32, i32
  }
  func.func @transform_2(%arg0: i32) -> (i32, i32) {
    %c0_i32 = arith.constant 0 : i32
    %c0_i32_0 = arith.constant 0 : i32
    %c0_i32_1 = arith.constant 0 : i32
    return %c0_i32, %c0_i32_0 : i32, i32
  }
  func.func @transform_3(%arg0: i32) -> (i32, i32) {
    %c0_i32 = arith.constant 0 : i32
    %c0_i32_0 = arith.constant 0 : i32
    return %arg0, %c0_i32 : i32, i32
  }
}

module attributes {stable_mosaic.version = 11 : i64} {
  func.func @_head_kernel(%arg0: i32, %arg1: memref<1x4x128xbf16, #tpu.memory_space<vmem>>, %arg2: memref<1x128xf32, #tpu.memory_space<vmem>>, %arg3: memref<1x128xf32, #tpu.memory_space<vmem>>, %arg4: memref<128x1024xbf16, #tpu.memory_space<vmem>>, %arg5: memref<1x1024xf32, #tpu.memory_space<vmem>>, %arg6: memref<1x4x128xf32, #tpu.memory_space<vmem>>, %arg7: memref<1x1x1024xf32, #tpu.memory_space<vmem>>) attributes {dimension_semantics = [#tpu.dimension_semantics<parallel>], iteration_bounds = array<i64: 2>, scalar_prefetch = 0 : i64, scratch_operands = 0 : i64, tpu.core_type = #tpu.core_type<tc>, window_params = [{transform_indices = @transform_0, window_bounds = array<i64: 1, 4, 128>}, {pipeline_mode = #tpu.pipeline_mode<synchronous>, transform_indices = @transform_1, window_bounds = array<i64: 1, 128>}, {pipeline_mode = #tpu.pipeline_mode<synchronous>, transform_indices = @transform_2, window_bounds = array<i64: 1, 128>}, {pipeline_mode = #tpu.pipeline_mode<synchronous>, transform_indices = @transform_3, window_bounds = array<i64: 128, 1024>}, {pipeline_mode = #tpu.pipeline_mode<synchronous>, transform_indices = @transform_4, window_bounds = array<i64: 1, 1024>}, {transform_indices = @transform_5, window_bounds = array<i64: 1, 4, 128>}, {transform_indices = @transform_6, window_bounds = array<i64: 1, 1, 1024>}]} {
    %c0 = arith.constant 0 : index
    %c0_0 = arith.constant 0 : index
    %c0_1 = arith.constant 0 : index
    %0 = vector.load %arg1[%c0, %c0_0, %c0_1] : memref<1x4x128xbf16, #tpu.memory_space<vmem>>, vector<1x4x128xbf16>
    %1 = vector.shape_cast %0 : vector<1x4x128xbf16> to vector<4x128xbf16>
    %2 = arith.extf %1 : vector<4x128xbf16> to vector<4x128xf32>
    %c0_2 = arith.constant 0 : index
    %c0_3 = arith.constant 0 : index
    %3 = vector.load %arg2[%c0_2, %c0_3] : memref<1x128xf32, #tpu.memory_space<vmem>>, vector<1x128xf32>
    %4 = vector.broadcast %3 : vector<1x128xf32> to vector<4x128xf32>
    %5 = arith.mulf %2, %4 : vector<4x128xf32>
    %c0_4 = arith.constant 0 : index
    %c0_5 = arith.constant 0 : index
    %6 = vector.load %arg3[%c0_4, %c0_5] : memref<1x128xf32, #tpu.memory_space<vmem>>, vector<1x128xf32>
    %7 = vector.broadcast %6 : vector<1x128xf32> to vector<4x128xf32>
    %8 = arith.addf %5, %7 : vector<4x128xf32>
    %cst = arith.constant 0.000000e+00 : f32
    %9 = vector.broadcast %cst : f32 to vector<4x128xf32>
    %10 = arith.maximumf %8, %9 : vector<4x128xf32>
    %c0_6 = arith.constant 0 : index
    %c0_7 = arith.constant 0 : index
    %c0_8 = arith.constant 0 : index
    %11 = vector.load %arg6[%c0_6, %c0_7, %c0_8] : memref<1x4x128xf32, #tpu.memory_space<vmem>>, vector<1x4x128xf32>
    %12 = vector.shape_cast %11 : vector<1x4x128xf32> to vector<4x128xf32>
    %13 = vector.shape_cast %10 : vector<4x128xf32> to vector<1x4x128xf32>
    tpu.vector_store %arg6[%c0_6, %c0_7, %c0_8], %13 {strides = array<i32>} : memref<1x4x128xf32, #tpu.memory_space<vmem>>, vector<1x4x128xf32>,
    %cst_9 = arith.constant dense<0.000000e+00> : vector<128xf32>
    %14 = vector.multi_reduction <add>, %10, %cst_9 [0] : vector<4x128xf32> to vector<128xf32>
    %15 = vector.shape_cast %14 : vector<128xf32> to vector<1x128xf32>
    %cst_10 = arith.constant 4.000000e+00 : f32
    %16 = vector.broadcast %cst_10 : f32 to vector<1x128xf32>
    %17 = arith.divf %15, %16 : vector<1x128xf32>
    %18 = arith.truncf %17 : vector<1x128xf32> to vector<1x128xbf16>
    %c0_11 = arith.constant 0 : index
    %c0_12 = arith.constant 0 : index
    %19 = vector.load %arg4[%c0_11, %c0_12] : memref<128x1024xbf16, #tpu.memory_space<vmem>>, vector<128x1024xbf16>
    %cst_13 = arith.constant dense<0.000000e+00> : vector<1x1024xf32>
    %20 = tpu.matmul %18, %19, %cst_13 {dimension_numbers = #tpu.dot_dimension_numbers<[1], [0], [0], [1], [0, 0, 1, 1], [], []>} : vector<1x128xbf16>, vector<128x1024xbf16>, vector<1x1024xf32> -> vector<1x1024xf32>
    %c0_14 = arith.constant 0 : index
    %c0_15 = arith.constant 0 : index
    %21 = vector.load %arg5[%c0_14, %c0_15] : memref<1x1024xf32, #tpu.memory_space<vmem>>, vector<1x1024xf32>
    %22 = arith.addf %20, %21 : vector<1x1024xf32>
    %c0_16 = arith.constant 0 : index
    %c0_17 = arith.constant 0 : index
    %c0_18 = arith.constant 0 : index
    %23 = vector.load %arg7[%c0_16, %c0_17, %c0_18] : memref<1x1x1024xf32, #tpu.memory_space<vmem>>, vector<1x1x1024xf32>
    %24 = vector.shape_cast %23 : vector<1x1x1024xf32> to vector<1x1024xf32>
    %25 = vector.shape_cast %22 : vector<1x1024xf32> to vector<1x1x1024xf32>
    tpu.vector_store %arg7[%c0_16, %c0_17, %c0_18], %25 {strides = array<i32>} : memref<1x1x1024xf32, #tpu.memory_space<vmem>>, vector<1x1x1024xf32>,
    return
  }
  func.func @transform_0(%arg0: i32) -> (i32, i32, i32) {
    %c0_i32 = arith.constant 0 : i32
    %c0_i32_0 = arith.constant 0 : i32
    %c0_i32_1 = arith.constant 0 : i32
    return %arg0, %c0_i32, %c0_i32_0 : i32, i32, i32
  }
  func.func @transform_1(%arg0: i32) -> (i32, i32) {
    %c0_i32 = arith.constant 0 : i32
    %c0_i32_0 = arith.constant 0 : i32
    %c0_i32_1 = arith.constant 0 : i32
    return %c0_i32, %c0_i32_0 : i32, i32
  }
  func.func @transform_2(%arg0: i32) -> (i32, i32) {
    %c0_i32 = arith.constant 0 : i32
    %c0_i32_0 = arith.constant 0 : i32
    %c0_i32_1 = arith.constant 0 : i32
    return %c0_i32, %c0_i32_0 : i32, i32
  }
  func.func @transform_3(%arg0: i32) -> (i32, i32) {
    %c0_i32 = arith.constant 0 : i32
    %c0_i32_0 = arith.constant 0 : i32
    %c0_i32_1 = arith.constant 0 : i32
    return %c0_i32, %c0_i32_0 : i32, i32
  }
  func.func @transform_4(%arg0: i32) -> (i32, i32) {
    %c0_i32 = arith.constant 0 : i32
    %c0_i32_0 = arith.constant 0 : i32
    %c0_i32_1 = arith.constant 0 : i32
    return %c0_i32, %c0_i32_0 : i32, i32
  }
  func.func @transform_5(%arg0: i32) -> (i32, i32, i32) {
    %c0_i32 = arith.constant 0 : i32
    %c0_i32_0 = arith.constant 0 : i32
    %c0_i32_1 = arith.constant 0 : i32
    return %arg0, %c0_i32, %c0_i32_0 : i32, i32, i32
  }
  func.func @transform_6(%arg0: i32) -> (i32, i32, i32) {
    %c0_i32 = arith.constant 0 : i32
    %c0_i32_0 = arith.constant 0 : i32
    %c0_i32_1 = arith.constant 0 : i32
    return %arg0, %c0_i32, %c0_i32_0 : i32, i32, i32
  }
}

</mosaic_0001>

<bundles_post_ra>
// kernel: densenet_forward.25
= control target key start
LH: loop header
LB: loop body
LE: loop exit
PB: predicated region body
PF: predicated region fallthrough
CT: control target
= control target key end

     0   :  { %s2509_s12 = smov 0   ;;  %s2511_s13 = smov 0   ;;  %s2830_s0 = inlined_call_operand.vmem [shape: bf16[2048,256], index: 0, kind: input, shape index: {}]   ;;  %s2831_s1 = inlined_call_operand.vmem [shape: bf16[256,128], index: 1, kind: input, shape index: {}]   ;;  %s2832_s2 = inlined_call_operand.vmem [shape: f32[1,128], index: 2, kind: input, shape index: {}]   ;;  %s2833_s3 = inlined_call_operand.vmem [shape: bf16[2048,128], index: 3, kind: output, shape index: {}]  }
   0x1   :  { %s2513_s14 = smov 0  }
   0x2 LB: > { %s32_s15 = sadd.s32 1, %s2483_s13  ;;  %p1824_p0 = scmp.ge.s32.totalorder %s2487_s14, 1  ;;  %s2487_s14 = sphi %s2513_s14, %s13_s14   ;;  %s2483_s13 = sphi %s2511_s13, %s2835_s13   ;;  %s2479_s12 = sphi %s2509_s12, %s2834_s12  }
   0x3   : > { %p34_p1 = scmp.ge.s32.totalorder %s32_s15, 4  ;;  %p191_p2 = scmp.lt.s32.totalorder %s2487_s14, 5 }
   0x5   : > { %s2837_s15 = smov (%p34_p1, %s32_s15), 0  ;;  %p192_p3 = pnand %p1824_p0, %p191_p2 }
   0x6   : > { %s1825_s28 = sshll.u32 (!%p192_p3), %s2479_s12, 6 }
   0x7   : > { %195 = sbr.rel (%p192_p3) target bundleno = 434 (0x1b2), region = 32  ;;  %p236_p4 = scmp.lt.s32.totalorder (!%p192_p3), %s1825_s28, 255 }
   0xc   : > { %v2224_v0 = vld [vmem:[%s2831_s1 + $0x38] sm:$0xff]  ;;  %v2223_v2 = vld [vmem:[%s2831_s1 + $0x30] sm:$0xff]  ;;  %v2222_v4 = vld [vmem:[%s2831_s1 + $0x28] sm:$0xff]  ;;  %s2839_s28 = smov (!%p236_p4, %s1825_s28), 255 }
   0xd   : > { %v2232_v1 = vld [vmem:[%s2831_s1 + $0x78] sm:$0xff]  ;;  %911 = vmatpush.bf16.msra.mxu0 %v2224_v0  ;;  %2424 = vmatpush.bf16.msra.mxu2 %v2224_v0  ;;  %v2231_v3 = vld [vmem:[%s2831_s1 + $0x70] sm:$0xff]  ;;  %v2230_v5 = vld [vmem:[%s2831_s1 + $0x68] sm:$0xff]  ;;  %s2152_s17 = sshll.u32 %s2839_s28, 3  ;;  %s1829_s5 = sshll.u32 %s2839_s28, 2 }
   0xe   : > { %1080 = vmatpush.bf16.msra.mxu1 %v2232_v1  ;;  %2432 = vmatpush.bf16.msra.mxu3 %v2232_v1  ;;  %v2221_v6 = vld [vmem:[%s2831_s1 + $0x20] sm:$0xff]  ;;  %v2220_v8 = vld [vmem:[%s2831_s1 + $0x18] sm:$0xff]  ;;  %v2219_v10 = vld [vmem:[%s2831_s1 + $0x10] sm:$0xff]  ;;  %s2575_s22 = scalar_lea.vmem %s2830_s0, %s2152_s17  ;;  %s2677_s8 = scalar_lea.vmem %s2833_s3, %s1829_s5 }
   0xf   : > { %v2229_v7 = vld [vmem:[%s2831_s1 + $0x60] sm:$0xff]  ;;  %v2228_v9 = vld [vmem:[%s2831_s1 + $0x58] sm:$0xff]  ;;  %v2227_v11 = vld [vmem:[%s2831_s1 + $0x50] sm:$0xff] }
  0x10   : > { %v2218_v12 = vld [vmem:[%s2831_s1 + $0x8] sm:$0xff]  ;;  %v2217_v14 = vld [vmem:[%s2831_s1] sm:$0xff]  ;;  %v1840_v28 = vld [vmem:[%s2575_s22 + $0x10] sm:$0xf] }
  0x11   : > { %912 = vmatpush.bf16.msra.mxu0 %v2223_v2  ;;  %2425 = vmatpush.bf16.msra.mxu2 %v2223_v2  ;;  %v2226_v13 = vld [vmem:[%s2831_s1 + $0x48] sm:$0xff]  ;;  %v2225_v15 = vld [vmem:[%s2831_s1 + $0x40] sm:$0xff]  ;;  %v2156_v29 = vld [vmem:[%s2575_s22 + $0x14] sm:$0xf0] }
  0x12   : > { %1081 = vmatpush.bf16.msra.mxu1 %v2231_v3  ;;  %2433 = vmatpush.bf16.msra.mxu3 %v2231_v3  ;;  %v1832_v16 = vld [vmem:[%s2575_s22] sm:$0xf]  ;;  %v2154_v17 = vld [vmem:[%s2575_s22 + $0x4] sm:$0xf0]  ;;  %v2153_v20 = vld [vmem:[%s2575_s22 + $0x4] sm:$0xf]  ;;  %v1841_v36 = vor.u32 %v2156_v29, %v1840_v28 }
  0x13   : > { %v1960_v18 = vld [vmem:[%s2575_s22 + $0x100] sm:$0xf]  ;;  %v2186_v19 = vld [vmem:[%s2575_s22 + $0x104] sm:$0xf0]  ;;  %v1834_v21 = vld [vmem:[%s2575_s22 + $0x8] sm:$0xf0]  ;;  %v1833_v24 = vor.u32 %v2154_v17, %v1832_v16 }
  0x14   : > { %v2185_v22 = vld [vmem:[%s2575_s22 + $0x104] sm:$0xf]  ;;  %v1962_v23 = vld [vmem:[%s2575_s22 + $0x108] sm:$0xf0]  ;;  %v1961_v25 = vor.u32 %v2186_v19, %v1960_v18  ;;  %v1837_v26 = vor.u32 %v2153_v20, %v1834_v21  ;;  %v1968_v30 = vld [vmem:[%s2575_s22 + $0x110] sm:$0xf] }
  0x15   : > { %913 = vmatpush.bf16.msra.mxu0 %v2222_v4  ;;  %2426 = vmatpush.bf16.msra.mxu2 %v2222_v4  ;;  %v1965_v27 = vor.u32 %v2185_v22, %v1962_v23  ;;  %v2188_v31 = vld [vmem:[%s2575_s22 + $0x114] sm:$0xf0]  ;;  %v2155_v32 = vld [vmem:[%s2575_s22 + $0x14] sm:$0xf]  ;;  %v1842_v33 = vld [vmem:[%s2575_s22 + $0x18] sm:$0xf0] }
  0x16   : > { %1082 = vmatpush.bf16.msra.mxu1 %v2230_v5  ;;  %2434 = vmatpush.bf16.msra.mxu3 %v2230_v5  ;;  %v2187_v34 = vld [vmem:[%s2575_s22 + $0x114] sm:$0xf]  ;;  %v1970_v35 = vld [vmem:[%s2575_s22 + $0x118] sm:$0xf0]  ;;  %v1969_v37 = vor.u32 %v2188_v31, %v1968_v30  ;;  %v1845_v38 = vor.u32 %v2155_v32, %v1842_v33  ;;  %v1848_v40 = vld [vmem:[%s2575_s22 + $0x20] sm:$0xf] }
  0x17   : > { %v1973_v39 = vor.u32 %v2187_v34, %v1970_v35  ;;  %v2158_v41 = vld [vmem:[%s2575_s22 + $0x24] sm:$0xf0]  ;;  %v1976_v42 = vld [vmem:[%s2575_s22 + $0x120] sm:$0xf]  ;;  %v2157_v44 = vld [vmem:[%s2575_s22 + $0x24] sm:$0xf] }
  0x18   : > { %v2190_v43 = vld [vmem:[%s2575_s22 + $0x124] sm:$0xf0]  ;;  %v1850_v45 = vld [vmem:[%s2575_s22 + $0x28] sm:$0xf0]  ;;  %v2189_v46 = vld [vmem:[%s2575_s22 + $0x124] sm:$0xf]  ;;  %v1849_v48 = vor.u32 %v2158_v41, %v1848_v40 }
  0x19   : > { %914 = vmatpush.bf16.msra.mxu0 %v2221_v6  ;;  %2427 = vmatpush.bf16.msra.mxu2 %v2221_v6  ;;  %v1978_v47 = vld [vmem:[%s2575_s22 + $0x128] sm:$0xf0]  ;;  %v1977_v49 = vor.u32 %v2190_v43, %v1976_v42  ;;  %v1853_v50 = vor.u32 %v2157_v44, %v1850_v45  ;;  %v1856_v52 = vld [vmem:[%s2575_s22 + $0x30] sm:$0xf]  ;;  %v2160_v53 = vld [vmem:[%s2575_s22 + $0x34] sm:$0xf0] }
  0x1a   : > { %1083 = vmatpush.bf16.msra.mxu1 %v2229_v7  ;;  %2435 = vmatpush.bf16.msra.mxu3 %v2229_v7  ;;  %v1981_v51 = vor.u32 %v2189_v46, %v1978_v47  ;;  %v1984_v54 = vld [vmem:[%s2575_s22 + $0x130] sm:$0xf]  ;;  %v2192_v55 = vld [vmem:[%s2575_s22 + $0x134] sm:$0xf0]  ;;  %v2159_v56 = vld [vmem:[%s2575_s22 + $0x34] sm:$0xf]  ;;  %v1857_v60 = vor.u32 %v2160_v53, %v1856_v52 }
  0x1b   : > { %v1858_v57 = vld [vmem:[%s2575_s22 + $0x38] sm:$0xf0]  ;;  %v2191_v58 = vld [vmem:[%s2575_s22 + $0x134] sm:$0xf]  ;;  %v1985_v61 = vor.u32 %v2192_v55, %v1984_v54  ;;  %v1864_v0 = vld [vmem:[%s2575_s22 + $0x40] sm:$0xf] }
  0x1c   : > { %v1986_v59 = vld [vmem:[%s2575_s22 + $0x138] sm:$0xf0]  ;;  %v1861_v62 = vor.u32 %v2159_v56, %v1858_v57  ;;  %v2162_v1 = vld [vmem:[%s2575_s22 + $0x44] sm:$0xf0]  ;;  %v1992_v2 = vld [vmem:[%s2575_s22 + $0x140] sm:$0xf] }
  0x1d   : > { %915 = vmatpush.bf16.msra.mxu0 %v2220_v8  ;;  %2428 = vmatpush.bf16.msra.mxu2 %v2220_v8  ;;  %v1989_v63 = vor.u32 %v2191_v58, %v1986_v59  ;;  %v2194_v3 = vld [vmem:[%s2575_s22 + $0x144] sm:$0xf0]  ;;  %v2161_v4 = vld [vmem:[%s2575_s22 + $0x44] sm:$0xf]  ;;  %v1866_v5 = vld [vmem:[%s2575_s22 + $0x48] sm:$0xf0]  ;;  %v1865_v8 = vor.u32 %v2162_v1, %v1864_v0 }
  0x1e   : > { %1084 = vmatpush.bf16.msra.mxu1 %v2228_v9  ;;  %2436 = vmatpush.bf16.msra.mxu3 %v2228_v9  ;;  %v2193_v6 = vld [vmem:[%s2575_s22 + $0x144] sm:$0xf]  ;;  %v1994_v7 = vld [vmem:[%s2575_s22 + $0x148] sm:$0xf0]  ;;  %v1993_v9 = vor.u32 %v2194_v3, %v1992_v2  ;;  %v2163_v16 = vld [vmem:[%s2575_s22 + $0x54] sm:$0xf] }
  0x1f   : > { %v1874_v17 = vld [vmem:[%s2575_s22 + $0x58] sm:$0xf0]  ;;  %v2195_v18 = vld [vmem:[%s2575_s22 + $0x154] sm:$0xf]  ;;  %v2165_v28 = vld [vmem:[%s2575_s22 + $0x64] sm:$0xf] }
  0x20   : > { %v2002_v19 = vld [vmem:[%s2575_s22 + $0x158] sm:$0xf0]  ;;  %v1877_v22 = vor.u32 %v2163_v16, %v1874_v17  ;;  %v1882_v29 = vld [vmem:[%s2575_s22 + $0x68] sm:$0xf0]  ;;  %v2197_v30 = vld [vmem:[%s2575_s22 + $0x164] sm:$0xf] }
  0x21   : > { %916 = vmatpush.bf16.msra.mxu0 %v2219_v10  ;;  %2429 = vmatpush.bf16.msra.mxu2 %v2219_v10  ;;  %v1869_v10 = vor.u32 %v2161_v4, %v1866_v5  ;;  %v2005_v23 = vor.u32 %v2195_v18, %v2002_v19  ;;  %v2010_v31 = vld [vmem:[%s2575_s22 + $0x168] sm:$0xf0]  ;;  %v1885_v34 = vor.u32 %v2165_v28, %v1882_v29  ;;  %v2167_v40 = vld [vmem:[%s2575_s22 + $0x74] sm:$0xf]  ;;  %v1890_v41 = vld [vmem:[%s2575_s22 + $0x78] sm:$0xf0] }
  0x22   : > { %1085 = vmatpush.bf16.msra.mxu1 %v2227_v11  ;;  %2437 = vmatpush.bf16.msra.mxu3 %v2227_v11  ;;  %v1997_v11 = vor.u32 %v2193_v6, %v1994_v7  ;;  %v2013_v35 = vor.u32 %v2197_v30, %v2010_v31  ;;  %v2199_v42 = vld [vmem:[%s2575_s22 + $0x174] sm:$0xf]  ;;  %v2018_v43 = vld [vmem:[%s2575_s22 + $0x178] sm:$0xf0]  ;;  %v1893_v46 = vor.u32 %v2167_v40, %v1890_v41  ;;  %v2169_v52 = vld [vmem:[%s2575_s22 + $0x84] sm:$0xf] }
  0x23   : > { %v2021_v47 = vor.u32 %v2199_v42, %v2018_v43  ;;  %v1898_v53 = vld [vmem:[%s2575_s22 + $0x88] sm:$0xf0]  ;;  %v2201_v54 = vld [vmem:[%s2575_s22 + $0x184] sm:$0xf]  ;;  %v1904_v6 = vld [vmem:[%s2575_s22 + $0x90] sm:$0xf] }
  0x24   : > { %v2026_v55 = vld [vmem:[%s2575_s22 + $0x188] sm:$0xf0]  ;;  %v1901_v59 = vor.u32 %v2169_v52, %v1898_v53  ;;  %v2172_v7 = vld [vmem:[%s2575_s22 + $0x94] sm:$0xf0]  ;;  %v1912_v40 = vld [vmem:[%s2575_s22 + $0xa0] sm:$0xf] }
  0x25   : > { %917 = vmatpush.bf16.msra.mxu0 %v2218_v12  ;;  %2430 = vmatpush.bf16.msra.mxu2 %v2218_v12  ;;  %v1872_v12 = vld [vmem:[%s2575_s22 + $0x50] sm:$0xf]  ;;  %v2174_v41 = vld [vmem:[%s2575_s22 + $0xa4] sm:$0xf0]  ;;  %v2040_v42 = vld [vmem:[%s2575_s22 + $0x1a0] sm:$0xf] }
  0x26   : > { %1086 = vmatpush.bf16.msra.mxu1 %v2226_v13  ;;  %2438 = vmatpush.bf16.msra.mxu3 %v2226_v13  ;;  %v2164_v13 = vld [vmem:[%s2575_s22 + $0x54] sm:$0xf0] }
  0x27   : > { %v1873_v20 = vor.u32 %v2164_v13, %v1872_v12  ;;  %v2171_v12 = vld [vmem:[%s2575_s22 + $0x94] sm:$0xf]  ;;  %v1906_v13 = vld [vmem:[%s2575_s22 + $0x98] sm:$0xf0] }
  0x29   : > { %918 = vmatpush.bf16.msra.mxu0 %v2217_v14  ;;  %2431 = vmatpush.bf16.msra.mxu2 %v2217_v14  ;;  %v2000_v14 = vld [vmem:[%s2575_s22 + $0x150] sm:$0xf] }
  0x2a   : > { %1087 = vmatpush.bf16.msra.mxu1 %v2225_v15  ;;  %2439 = vmatpush.bf16.msra.mxu3 %v2225_v15  ;;  %v2196_v15 = vld [vmem:[%s2575_s22 + $0x154] sm:$0xf0] }
  0x2b   : > { %v2001_v21 = vor.u32 %v2196_v15, %v2000_v14  ;;  %v2203_v14 = vld [vmem:[%s2575_s22 + $0x194] sm:$0xf]  ;;  %v2034_v15 = vld [vmem:[%s2575_s22 + $0x198] sm:$0xf0] }
  0x2c   : > { %919 = vmatmul.bf16.vlgmr.msra.gmra.mxu0 %v1833_v24  ;;  %999 = vmatmul.bf16.vlgmr.msra.gmra.mxu2 %v1961_v25  ;;  %v1880_v24 = vld [vmem:[%s2575_s22 + $0x60] sm:$0xf]  ;;  %v2166_v25 = vld [vmem:[%s2575_s22 + $0x64] sm:$0xf0] }
  0x2d   : > { %1088 = vmatmul.bf16.vlgmr.msra.gmra.mxu1 %v1837_v26  ;;  %1168 = vmatmul.bf16.vlgmr.msra.gmra.mxu3 %v1965_v27  ;;  %v2008_v26 = vld [vmem:[%s2575_s22 + $0x160] sm:$0xf]  ;;  %v2198_v27 = vld [vmem:[%s2575_s22 + $0x164] sm:$0xf0]  ;;  %v1881_v32 = vor.u32 %v2166_v25, %v1880_v24 }
  0x2e   : > { %v2009_v33 = vor.u32 %v2198_v27, %v2008_v26  ;;  %v2037_v27 = vor.u32 %v2203_v14, %v2034_v15 }
  0x3c   : > { %924 = vmatmul.bf16.gmra.mxu0 %v1841_v36  ;;  %1004 = vmatmul.bf16.gmra.mxu2 %v1969_v37  ;;  %v1888_v36 = vld [vmem:[%s2575_s22 + $0x70] sm:$0xf]  ;;  %v2168_v37 = vld [vmem:[%s2575_s22 + $0x74] sm:$0xf0] }
  0x3d   : > { %1093 = vmatmul.bf16.gmra.mxu1 %v1845_v38  ;;  %1173 = vmatmul.bf16.gmra.mxu3 %v1973_v39  ;;  %v2016_v38 = vld [vmem:[%s2575_s22 + $0x170] sm:$0xf]  ;;  %v2200_v39 = vld [vmem:[%s2575_s22 + $0x174] sm:$0xf0]  ;;  %v1889_v44 = vor.u32 %v2168_v37, %v1888_v36 }
  0x3e   : > { %v2017_v45 = vor.u32 %v2200_v39, %v2016_v38 }
  0x4c   : > { %929 = vmatmul.bf16.gmra.mxu0 %v1849_v48  ;;  %1009 = vmatmul.bf16.gmra.mxu2 %v1977_v49  ;;  %v1896_v48 = vld [vmem:[%s2575_s22 + $0x80] sm:$0xf]  ;;  %v2170_v49 = vld [vmem:[%s2575_s22 + $0x84] sm:$0xf0] }
  0x4d   : > { %1098 = vmatmul.bf16.gmra.mxu1 %v1853_v50  ;;  %1178 = vmatmul.bf16.gmra.mxu3 %v1981_v51  ;;  %v2024_v50 = vld [vmem:[%s2575_s22 + $0x180] sm:$0xf]  ;;  %v2202_v51 = vld [vmem:[%s2575_s22 + $0x184] sm:$0xf0]  ;;  %v1897_v56 = vor.u32 %v2170_v49, %v1896_v48  ;;  %v2205_v48 = vld [vmem:[%s2575_s22 + $0x1a4] sm:$0xf] }
  0x4e   : > { %v2025_v57 = vor.u32 %v2202_v51, %v2024_v50  ;;  %v2042_v49 = vld [vmem:[%s2575_s22 + $0x1a8] sm:$0xf0] }
  0x5c   : > { %934 = vmatmul.bf16.gmra.mxu0 %v1857_v60  ;;  %1014 = vmatmul.bf16.gmra.mxu2 %v1985_v61  ;;  %v2029_v60 = vor.u32 %v2201_v54, %v2026_v55  ;;  %v1913_v54 = vor.u32 %v2174_v41, %v1912_v40 }
  0x5d   : > { %1103 = vmatmul.bf16.gmra.mxu1 %v1861_v62  ;;  %1183 = vmatmul.bf16.gmra.mxu3 %v1989_v63  ;;  %v2661_v63 = vld [vmem:[%s2832_s2] ss:$0 sm:$0xff] }
  0x6c   : > { %939 = vmatmul.bf16.gmra.mxu0 %v1865_v8  ;;  %1019 = vmatmul.bf16.gmra.mxu2 %v1993_v9  ;;  %v2032_v8 = vld [vmem:[%s2575_s22 + $0x190] sm:$0xf] }
  0x6d   : > { %1108 = vmatmul.bf16.gmra.mxu1 %v1869_v10  ;;  %1188 = vmatmul.bf16.gmra.mxu3 %v1997_v11  ;;  %v2204_v11 = vld [vmem:[%s2575_s22 + $0x194] sm:$0xf0] }
  0x7c   : > { %944 = vmatmul.bf16.gmra.mxu0 %v1873_v20  ;;  %1024 = vmatmul.bf16.gmra.mxu2 %v2001_v21  ;;  %v1905_v20 = vor.u32 %v2172_v7, %v1904_v6  ;;  %v2033_v21 = vor.u32 %v2204_v11, %v2032_v8  ;;  %v1920_v11 = vld [vmem:[%s2575_s22 + $0xb0] sm:$0xf] }
  0x7d   : > { %1113 = vmatmul.bf16.gmra.mxu1 %v1877_v22  ;;  %1193 = vmatmul.bf16.gmra.mxu3 %v2005_v23  ;;  %v1909_v22 = vor.u32 %v2171_v12, %v1906_v13  ;;  %v2176_v12 = vld [vmem:[%s2575_s22 + $0xb4] sm:$0xf0]  ;;  %v2048_v13 = vld [vmem:[%s2575_s22 + $0x1b0] sm:$0xf] }
  0x8c   : > { %949 = vmatmul.bf16.gmra.mxu0 %v1881_v32  ;;  %1029 = vmatmul.bf16.gmra.mxu2 %v2009_v33 }
  0x8d   : > { %1118 = vmatmul.bf16.gmra.mxu1 %v1885_v34  ;;  %1198 = vmatmul.bf16.gmra.mxu3 %v2013_v35 }
  0x9c   : > { %954 = vmatmul.bf16.gmra.mxu0 %v1889_v44  ;;  %1034 = vmatmul.bf16.gmra.mxu2 %v2017_v45  ;;  %v2206_v45 = vld [vmem:[%s2575_s22 + $0x1a4] sm:$0xf0] }
  0x9d   : > { %1123 = vmatmul.bf16.gmra.mxu1 %v1893_v46  ;;  %1203 = vmatmul.bf16.gmra.mxu3 %v2021_v47  ;;  %v2173_v46 = vld [vmem:[%s2575_s22 + $0xa4] sm:$0xf]  ;;  %v1914_v47 = vld [vmem:[%s2575_s22 + $0xa8] sm:$0xf0]  ;;  %v2041_v55 = vor.u32 %v2206_v45, %v2040_v42  ;;  %v1928_v45 = vld [vmem:[%s2575_s22 + $0xc0] sm:$0xf] }
  0xa9   : > { %v920_v58 = vpop.f32.mrf.mxu0 }
  0xaa   : > { %v1089_v61 = vpop.f32.mrf.mxu1 }
  0xab   : > { %v1090_v62 = vadd.f32 %v1089_v61, %v920_v58  ;;  %v2045_v61 = vor.u32 %v2205_v48, %v2042_v49 }
  0xac   : > { %959 = vmatmul.bf16.gmra.mxu0 %v1897_v56  ;;  %1039 = vmatmul.bf16.gmra.mxu2 %v2025_v57  ;;  %v1917_v56 = vor.u32 %v2173_v46, %v1914_v47  ;;  %v2178_v46 = vld [vmem:[%s2575_s22 + $0xc4] sm:$0xf0]  ;;  %v2056_v47 = vld [vmem:[%s2575_s22 + $0x1c0] sm:$0xf] }
  0xad   : > { %1128 = vmatmul.bf16.gmra.mxu1 %v1901_v59  ;;  %1208 = vmatmul.bf16.gmra.mxu3 %v2029_v60  ;;  %v1448_v4 = vadd.f32 %v2661_v63, %v1090_v62 }
  0xaf   : > { %v1000_v0 = vpop.f32.mrf.mxu2  ;;  %v1512_v16 = vmax.f32 %v1448_v4, 0.0 }
  0xb0   : > { %v1169_v1 = vpop.f32.mrf.mxu3 }
  0xb1   : > { %v922_v2 = vpop.f32.mrf.mxu0  ;;  %v1170_v9 = vadd.f32 %v1169_v1, %v1000_v0 }
  0xb2   : > { %v1091_v3 = vpop.f32.mrf.mxu1 }
  0xb3   : > { %v1092_v5 = vadd.f32 %v1091_v3, %v922_v2  ;;  %v1480_v23 = vadd.f32 %v2661_v63, %v1170_v9 }
  0xb5   : > { %v1449_v10 = vadd.f32 %v2661_v63, %v1092_v5  ;;  %v1544_v30 = vmax.f32 %v1480_v23, 0.0 }
  0xb7   : > { %v1513_v17 = vmax.f32 %v1449_v10, 0.0  ;;  %v1002_v18 = vpop.f32.mrf.mxu2 }
  0xb8   : > { %v1171_v19 = vpop.f32.mrf.mxu3 }
  0xb9   : > { %v2236_v24 = vpack.c.bf16 %v1513_v17, %v1512_v16  ;;  %v1172_v25 = vadd.f32 %v1171_v19, %v1002_v18  ;;  %v925_v26 = vpop.f32.mrf.mxu0  ;;  %v2208_v16 = vld [vmem:[%s2575_s22 + $0x1b4] sm:$0xf0]  ;;  %v2175_v17 = vld [vmem:[%s2575_s22 + $0xb4] sm:$0xf]  ;;  %v1922_v18 = vld [vmem:[%s2575_s22 + $0xb8] sm:$0xf0] }
  0xba   : > { %v1094_v28 = vpop.f32.mrf.mxu1  ;;  %v2207_v19 = vld [vmem:[%s2575_s22 + $0x1b4] sm:$0xf] }
  0xbb   : > { %2237 = vst [vmem:[%s2677_s8] sm:$0xff] %v2236_v24   ;;  %v1481_v29 = vadd.f32 %v2661_v63, %v1172_v25  ;;  %v1095_v33 = vadd.f32 %v1094_v28, %v925_v26  ;;  %v1921_v25 = vor.u32 %v2176_v12, %v1920_v11  ;;  %v2049_v26 = vor.u32 %v2208_v16, %v2048_v13  ;;  %v1936_v16 = vld [vmem:[%s2575_s22 + $0xd0] sm:$0xf] }
  0xbc   : > { %964 = vmatmul.bf16.gmra.mxu0 %v1905_v20  ;;  %1044 = vmatmul.bf16.gmra.mxu2 %v2033_v21  ;;  %v2050_v20 = vld [vmem:[%s2575_s22 + $0x1b8] sm:$0xf0] }
  0xbd   : > { %v1545_v31 = vmax.f32 %v1481_v29, 0.0  ;;  %1133 = vmatmul.bf16.gmra.mxu1 %v1909_v22  ;;  %1213 = vmatmul.bf16.gmra.mxu3 %v2037_v27  ;;  %v1450_v38 = vadd.f32 %v2661_v63, %v1095_v33  ;;  %v1925_v27 = vor.u32 %v2175_v17, %v1922_v18  ;;  %v2180_v17 = vld [vmem:[%s2575_s22 + $0xd4] sm:$0xf0]  ;;  %v2064_v18 = vld [vmem:[%s2575_s22 + $0x1d0] sm:$0xf] }
  0xbf   : > { %v2316_v32 = vpack.c.bf16 %v1545_v31, %v1544_v30  ;;  %v1005_v34 = vpop.f32.mrf.mxu2  ;;  %v1514_v50 = vmax.f32 %v1450_v38, 0.0 }
  0xc0   : > { %v1174_v35 = vpop.f32.mrf.mxu3 }
  0xc1   : > { %2408 = vst [vmem:[%s2677_s8 + $0x80] sm:$0xff] %v2316_v32   ;;  %v927_v36 = vpop.f32.mrf.mxu0  ;;  %v1175_v43 = vadd.f32 %v1174_v35, %v1005_v34  ;;  %v2053_v32 = vor.u32 %v2207_v19, %v2050_v20 }
  0xc2   : > { %v1096_v37 = vpop.f32.mrf.mxu1 }
  0xc3   : > { %v1097_v39 = vadd.f32 %v1096_v37, %v927_v36  ;;  %v1482_v57 = vadd.f32 %v2661_v63, %v1175_v43 }
  0xc5   : > { %v1451_v44 = vadd.f32 %v2661_v63, %v1097_v39  ;;  %v1546_v1 = vmax.f32 %v1482_v57, 0.0 }
  0xc7   : > { %v1515_v51 = vmax.f32 %v1451_v44, 0.0  ;;  %v1007_v52 = vpop.f32.mrf.mxu2 }
  0xc8   : > { %v1176_v53 = vpop.f32.mrf.mxu3 }
  0xc9   : > { %v2241_v58 = vpack.c.bf16 %v1515_v51, %v1514_v50  ;;  %v1177_v59 = vadd.f32 %v1176_v53, %v1007_v52  ;;  %v930_v60 = vpop.f32.mrf.mxu0  ;;  %v2210_v50 = vld [vmem:[%s2575_s22 + $0x1c4] sm:$0xf0]  ;;  %v2177_v51 = vld [vmem:[%s2575_s22 + $0xc4] sm:$0xf]  ;;  %v1930_v52 = vld [vmem:[%s2575_s22 + $0xc8] sm:$0xf0] }
  0xca   : > { %v1099_v62 = vpop.f32.mrf.mxu1  ;;  %v2209_v53 = vld [vmem:[%s2575_s22 + $0x1c4] sm:$0xf] }
  0xcb   : > { %2393 = vst [vmem:[%s2677_s8 + $0x8] sm:$0xff] %v2241_v58   ;;  %v1483_v0 = vadd.f32 %v2661_v63, %v1177_v59  ;;  %v1100_v4 = vadd.f32 %v1099_v62, %v930_v60  ;;  %v1929_v59 = vor.u32 %v2178_v46, %v1928_v45  ;;  %v2057_v60 = vor.u32 %v2210_v50, %v2056_v47  ;;  %v1944_v50 = vld [vmem:[%s2575_s22 + $0xe0] sm:$0xf] }
  0xcc   : > { %969 = vmatmul.bf16.gmra.mxu0 %v1913_v54  ;;  %1049 = vmatmul.bf16.gmra.mxu2 %v2041_v55  ;;  %v2058_v54 = vld [vmem:[%s2575_s22 + $0x1c8] sm:$0xf0] }
  0xcd   : > { %v1547_v2 = vmax.f32 %v1483_v0, 0.0  ;;  %1138 = vmatmul.bf16.gmra.mxu1 %v1917_v56  ;;  %1218 = vmatmul.bf16.gmra.mxu3 %v2045_v61  ;;  %v1452_v9 = vadd.f32 %v2661_v63, %v1100_v4  ;;  %v1933_v61 = vor.u32 %v2177_v51, %v1930_v52  ;;  %v2182_v51 = vld [vmem:[%s2575_s22 + $0xe4] sm:$0xf0]  ;;  %v2072_v52 = vld [vmem:[%s2575_s22 + $0x1e0] sm:$0xf] }
  0xcf   : > { %v2321_v3 = vpack.c.bf16 %v1547_v2, %v1546_v1  ;;  %v1010_v5 = vpop.f32.mrf.mxu2  ;;  %v1516_v21 = vmax.f32 %v1452_v9, 0.0 }
  0xd0   : > { %v1179_v6 = vpop.f32.mrf.mxu3 }
  0xd1   : > { %2409 = vst [vmem:[%s2677_s8 + $0x88] sm:$0xff] %v2321_v3   ;;  %v932_v7 = vpop.f32.mrf.mxu0  ;;  %v1180_v14 = vadd.f32 %v1179_v6, %v1010_v5  ;;  %v2061_v3 = vor.u32 %v2209_v53, %v2058_v54 }
  0xd2   : > { %v1101_v8 = vpop.f32.mrf.mxu1 }
  0xd3   : > { %v1102_v10 = vadd.f32 %v1101_v8, %v932_v7  ;;  %v1484_v28 = vadd.f32 %v2661_v63, %v1180_v14 }
  0xd5   : > { %v1453_v15 = vadd.f32 %v2661_v63, %v1102_v10  ;;  %v1548_v35 = vmax.f32 %v1484_v28, 0.0 }
  0xd7   : > { %v1517_v22 = vmax.f32 %v1453_v15, 0.0  ;;  %v1012_v23 = vpop.f32.mrf.mxu2 }
  0xd8   : > { %v1181_v24 = vpop.f32.mrf.mxu3 }
  0xd9   : > { %v2246_v29 = vpack.c.bf16 %v1517_v22, %v1516_v21  ;;  %v1182_v30 = vadd.f32 %v1181_v24, %v1012_v23  ;;  %v935_v31 = vpop.f32.mrf.mxu0  ;;  %v2212_v21 = vld [vmem:[%s2575_s22 + $0x1d4] sm:$0xf0]  ;;  %v2179_v22 = vld [vmem:[%s2575_s22 + $0xd4] sm:$0xf]  ;;  %v1938_v23 = vld [vmem:[%s2575_s22 + $0xd8] sm:$0xf0] }
  0xda   : > { %v1104_v33 = vpop.f32.mrf.mxu1  ;;  %v2211_v24 = vld [vmem:[%s2575_s22 + $0x1d4] sm:$0xf] }
  0xdb   : > { %2394 = vst [vmem:[%s2677_s8 + $0x10] sm:$0xff] %v2246_v29   ;;  %v1485_v34 = vadd.f32 %v2661_v63, %v1182_v30  ;;  %v1105_v38 = vadd.f32 %v1104_v33, %v935_v31  ;;  %v1937_v30 = vor.u32 %v2180_v17, %v1936_v16  ;;  %v2065_v31 = vor.u32 %v2212_v21, %v2064_v18  ;;  %v1952_v21 = vld [vmem:[%s2575_s22 + $0xf0] sm:$0xf] }
  0xdc   : > { %974 = vmatmul.bf16.gmra.mxu0 %v1921_v25  ;;  %1054 = vmatmul.bf16.gmra.mxu2 %v2049_v26  ;;  %v2066_v25 = vld [vmem:[%s2575_s22 + $0x1d8] sm:$0xf0] }
  0xdd   : > { %v1549_v36 = vmax.f32 %v1485_v34, 0.0  ;;  %1143 = vmatmul.bf16.gmra.mxu1 %v1925_v27  ;;  %1223 = vmatmul.bf16.gmra.mxu3 %v2053_v32  ;;  %v1454_v43 = vadd.f32 %v2661_v63, %v1105_v38  ;;  %v1941_v32 = vor.u32 %v2179_v22, %v1938_v23  ;;  %v2184_v22 = vld [vmem:[%s2575_s22 + $0xf4] sm:$0xf0]  ;;  %v2080_v23 = vld [vmem:[%s2575_s22 + $0x1f0] sm:$0xf] }
  0xdf   : > { %v2326_v37 = vpack.c.bf16 %v1549_v36, %v1548_v35  ;;  %v1015_v39 = vpop.f32.mrf.mxu2  ;;  %v1518_v55 = vmax.f32 %v1454_v43, 0.0 }
  0xe0   : > { %v1184_v40 = vpop.f32.mrf.mxu3 }
  0xe1   : > { %2410 = vst [vmem:[%s2677_s8 + $0x90] sm:$0xff] %v2326_v37   ;;  %v937_v41 = vpop.f32.mrf.mxu0  ;;  %v1185_v48 = vadd.f32 %v1184_v40, %v1015_v39  ;;  %v2069_v37 = vor.u32 %v2211_v24, %v2066_v25 }
  0xe2   : > { %v1106_v42 = vpop.f32.mrf.mxu1 }
  0xe3   : > { %v1107_v44 = vadd.f32 %v1106_v42, %v937_v41  ;;  %v1486_v62 = vadd.f32 %v2661_v63, %v1185_v48 }
  0xe5   : > { %v1455_v49 = vadd.f32 %v2661_v63, %v1107_v44  ;;  %v1550_v6 = vmax.f32 %v1486_v62, 0.0 }
  0xe7   : > { %v1519_v56 = vmax.f32 %v1455_v49, 0.0  ;;  %v1017_v57 = vpop.f32.mrf.mxu2 }
  0xe8   : > { %v1186_v58 = vpop.f32.mrf.mxu3 }
  0xe9   : > { %v2251_v0 = vpack.c.bf16 %v1519_v56, %v1518_v55  ;;  %v1187_v1 = vadd.f32 %v1186_v58, %v1017_v57  ;;  %v940_v2 = vpop.f32.mrf.mxu0  ;;  %v2214_v55 = vld [vmem:[%s2575_s22 + $0x1e4] sm:$0xf0]  ;;  %v2181_v56 = vld [vmem:[%s2575_s22 + $0xe4] sm:$0xf]  ;;  %v1946_v57 = vld [vmem:[%s2575_s22 + $0xe8] sm:$0xf0] }
  0xea   : > { %v1109_v4 = vpop.f32.mrf.mxu1  ;;  %v2213_v58 = vld [vmem:[%s2575_s22 + $0x1e4] sm:$0xf] }
  0xeb   : > { %2395 = vst [vmem:[%s2677_s8 + $0x18] sm:$0xff] %v2251_v0   ;;  %v1487_v5 = vadd.f32 %v2661_v63, %v1187_v1  ;;  %v1110_v9 = vadd.f32 %v1109_v4, %v940_v2  ;;  %v1945_v1 = vor.u32 %v2182_v51, %v1944_v50  ;;  %v2073_v2 = vor.u32 %v2214_v55, %v2072_v52 }
  0xec   : > { %979 = vmatmul.bf16.gmra.mxu0 %v1929_v59  ;;  %1059 = vmatmul.bf16.gmra.mxu2 %v2057_v60  ;;  %v2074_v59 = vld [vmem:[%s2575_s22 + $0x1e8] sm:$0xf0] }
  0xed   : > { %v1551_v7 = vmax.f32 %v1487_v5, 0.0  ;;  %1148 = vmatmul.bf16.gmra.mxu1 %v1933_v61  ;;  %1228 = vmatmul.bf16.gmra.mxu3 %v2061_v3  ;;  %v1456_v14 = vadd.f32 %v2661_v63, %v1110_v9  ;;  %v1949_v3 = vor.u32 %v2181_v56, %v1946_v57 }
  0xef   : > { %v2331_v8 = vpack.c.bf16 %v1551_v7, %v1550_v6  ;;  %v1020_v10 = vpop.f32.mrf.mxu2  ;;  %v1520_v26 = vmax.f32 %v1456_v14, 0.0 }
  0xf0   : > { %v1189_v11 = vpop.f32.mrf.mxu3 }
  0xf1   : > { %2411 = vst [vmem:[%s2677_s8 + $0x98] sm:$0xff] %v2331_v8   ;;  %v942_v12 = vpop.f32.mrf.mxu0  ;;  %v1190_v19 = vadd.f32 %v1189_v11, %v1020_v10  ;;  %v2077_v8 = vor.u32 %v2213_v58, %v2074_v59 }
  0xf2   : > { %v1111_v13 = vpop.f32.mrf.mxu1 }
  0xf3   : > { %v1112_v15 = vadd.f32 %v1111_v13, %v942_v12  ;;  %v1488_v33 = vadd.f32 %v2661_v63, %v1190_v19 }
  0xf5   : > { %v1457_v20 = vadd.f32 %v2661_v63, %v1112_v15  ;;  %v1552_v40 = vmax.f32 %v1488_v33, 0.0 }
  0xf7   : > { %v1521_v27 = vmax.f32 %v1457_v20, 0.0  ;;  %v1022_v28 = vpop.f32.mrf.mxu2 }
  0xf8   : > { %v1191_v29 = vpop.f32.mrf.mxu3 }
  0xf9   : > { %v2256_v34 = vpack.c.bf16 %v1521_v27, %v1520_v26  ;;  %v1192_v35 = vadd.f32 %v1191_v29, %v1022_v28  ;;  %v945_v36 = vpop.f32.mrf.mxu0  ;;  %v2216_v26 = vld [vmem:[%s2575_s22 + $0x1f4] sm:$0xf0]  ;;  %v2183_v27 = vld [vmem:[%s2575_s22 + $0xf4] sm:$0xf]  ;;  %v1954_v28 = vld [vmem:[%s2575_s22 + $0xf8] sm:$0xf0] }
  0xfa   : > { %v1114_v38 = vpop.f32.mrf.mxu1  ;;  %v2215_v29 = vld [vmem:[%s2575_s22 + $0x1f4] sm:$0xf] }
  0xfb   : > { %2396 = vst [vmem:[%s2677_s8 + $0x20] sm:$0xff] %v2256_v34   ;;  %v1489_v39 = vadd.f32 %v2661_v63, %v1192_v35  ;;  %v1115_v43 = vadd.f32 %v1114_v38, %v945_v36  ;;  %v1953_v35 = vor.u32 %v2184_v22, %v1952_v21  ;;  %v2081_v36 = vor.u32 %v2216_v26, %v2080_v23 }
  0xfc   : > { %984 = vmatmul.bf16.gmra.mxu0 %v1937_v30  ;;  %1064 = vmatmul.bf16.gmra.mxu2 %v2065_v31  ;;  %v2082_v30 = vld [vmem:[%s2575_s22 + $0x1f8] sm:$0xf0] }
  0xfd   : > { %v1553_v41 = vmax.f32 %v1489_v39, 0.0  ;;  %1153 = vmatmul.bf16.gmra.mxu1 %v1941_v32  ;;  %1233 = vmatmul.bf16.gmra.mxu3 %v2069_v37  ;;  %v1458_v48 = vadd.f32 %v2661_v63, %v1115_v43  ;;  %v1957_v37 = vor.u32 %v2183_v27, %v1954_v28 }
  0xff   : > { %v2336_v42 = vpack.c.bf16 %v1553_v41, %v1552_v40  ;;  %v1025_v44 = vpop.f32.mrf.mxu2  ;;  %v1522_v60 = vmax.f32 %v1458_v48, 0.0 }
 0x100   : > { %v1194_v45 = vpop.f32.mrf.mxu3 }
 0x101   : > { %2412 = vst [vmem:[%s2677_s8 + $0xa0] sm:$0xff] %v2336_v42   ;;  %v947_v46 = vpop.f32.mrf.mxu0  ;;  %v1195_v53 = vadd.f32 %v1194_v45, %v1025_v44  ;;  %v2085_v42 = vor.u32 %v2215_v29, %v2082_v30 }
 0x102   : > { %v1116_v47 = vpop.f32.mrf.mxu1 }
 0x103   : > { %v1117_v49 = vadd.f32 %v1116_v47, %v947_v46  ;;  %v1490_v4 = vadd.f32 %v2661_v63, %v1195_v53 }
 0x105   : > { %v1459_v54 = vadd.f32 %v2661_v63, %v1117_v49  ;;  %v1554_v11 = vmax.f32 %v1490_v4, 0.0 }
 0x107   : > { %v1523_v61 = vmax.f32 %v1459_v54, 0.0  ;;  %v1027_v62 = vpop.f32.mrf.mxu2 }
 0x108   : > { %v1196_v0 = vpop.f32.mrf.mxu3 }
 0x109   : > { %v2261_v5 = vpack.c.bf16 %v1523_v61, %v1522_v60  ;;  %v1197_v6 = vadd.f32 %v1196_v0, %v1027_v62  ;;  %v950_v7 = vpop.f32.mrf.mxu0 }
 0x10a   : > { %v1119_v9 = vpop.f32.mrf.mxu1 }
 0x10b   : > { %2397 = vst [vmem:[%s2677_s8 + $0x28] sm:$0xff] %v2261_v5   ;;  %v1491_v10 = vadd.f32 %v2661_v63, %v1197_v6  ;;  %v1120_v14 = vadd.f32 %v1119_v9, %v950_v7 }
 0x10c   : > { %989 = vmatmul.bf16.gmra.mxu0 %v1945_v1  ;;  %1069 = vmatmul.bf16.gmra.mxu2 %v2073_v2 }
 0x10d   : > { %v1555_v12 = vmax.f32 %v1491_v10, 0.0  ;;  %1158 = vmatmul.bf16.gmra.mxu1 %v1949_v3  ;;  %1238 = vmatmul.bf16.gmra.mxu3 %v2077_v8  ;;  %v1460_v19 = vadd.f32 %v2661_v63, %v1120_v14 }
 0x10f   : > { %v2341_v13 = vpack.c.bf16 %v1555_v12, %v1554_v11  ;;  %v1030_v15 = vpop.f32.mrf.mxu2  ;;  %v1524_v31 = vmax.f32 %v1460_v19, 0.0 }
 0x110   : > { %v1199_v16 = vpop.f32.mrf.mxu3 }
 0x111   : > { %2413 = vst [vmem:[%s2677_s8 + $0xa8] sm:$0xff] %v2341_v13   ;;  %v952_v17 = vpop.f32.mrf.mxu0  ;;  %v1200_v24 = vadd.f32 %v1199_v16, %v1030_v15 }
 0x112   : > { %v1121_v18 = vpop.f32.mrf.mxu1 }
 0x113   : > { %v1122_v20 = vadd.f32 %v1121_v18, %v952_v17  ;;  %v1492_v38 = vadd.f32 %v2661_v63, %v1200_v24 }
 0x115   : > { %v1461_v25 = vadd.f32 %v2661_v63, %v1122_v20  ;;  %v1556_v45 = vmax.f32 %v1492_v38, 0.0 }
 0x117   : > { %v1525_v32 = vmax.f32 %v1461_v25, 0.0  ;;  %v1032_v33 = vpop.f32.mrf.mxu2 }
 0x118   : > { %v1201_v34 = vpop.f32.mrf.mxu3 }
 0x119   : > { %v2266_v39 = vpack.c.bf16 %v1525_v32, %v1524_v31  ;;  %v1202_v40 = vadd.f32 %v1201_v34, %v1032_v33  ;;  %v955_v41 = vpop.f32.mrf.mxu0 }
 0x11a   : > { %v1124_v43 = vpop.f32.mrf.mxu1 }
 0x11b   : > { %2398 = vst [vmem:[%s2677_s8 + $0x30] sm:$0xff] %v2266_v39   ;;  %v1493_v44 = vadd.f32 %v2661_v63, %v1202_v40  ;;  %v1125_v48 = vadd.f32 %v1124_v43, %v955_v41 }
 0x11c   : > { %994 = vmatmul.bf16.gmra.mxu0 %v1953_v35  ;;  %1074 = vmatmul.bf16.gmra.mxu2 %v2081_v36 }
 0x11d   : > { %v1557_v46 = vmax.f32 %v1493_v44, 0.0  ;;  %1163 = vmatmul.bf16.gmra.mxu1 %v1957_v37  ;;  %1243 = vmatmul.bf16.gmra.mxu3 %v2085_v42  ;;  %v1462_v53 = vadd.f32 %v2661_v63, %v1125_v48 }
 0x11f   : > { %v2346_v47 = vpack.c.bf16 %v1557_v46, %v1556_v45  ;;  %v1035_v49 = vpop.f32.mrf.mxu2  ;;  %v1526_v57 = vmax.f32 %v1462_v53, 0.0 }
 0x120   : > { %v1204_v50 = vpop.f32.mrf.mxu3 }
 0x121   : > { %2414 = vst [vmem:[%s2677_s8 + $0xb0] sm:$0xff] %v2346_v47   ;;  %v957_v51 = vpop.f32.mrf.mxu0  ;;  %v1205_v55 = vadd.f32 %v1204_v50, %v1035_v49 }
 0x122   : > { %v1126_v52 = vpop.f32.mrf.mxu1 }
 0x123   : > { %v1127_v54 = vadd.f32 %v1126_v52, %v957_v51  ;;  %v1494_v61 = vadd.f32 %v2661_v63, %v1205_v55 }
 0x125   : > { %v1463_v56 = vadd.f32 %v2661_v63, %v1127_v54  ;;  %v1558_v4 = vmax.f32 %v1494_v61, 0.0 }
 0x127   : > { %v1527_v58 = vmax.f32 %v1463_v56, 0.0  ;;  %v1037_v59 = vpop.f32.mrf.mxu2 }
 0x128   : > { %v1206_v60 = vpop.f32.mrf.mxu3 }
 0x129   : > { %v2271_v62 = vpack.c.bf16 %v1527_v58, %v1526_v57  ;;  %v1207_v0 = vadd.f32 %v1206_v60, %v1037_v59  ;;  %v960_v1 = vpop.f32.mrf.mxu0 }
 0x12a   : > { %v1129_v2 = vpop.f32.mrf.mxu1 }
 0x12b   : > { %2399 = vst [vmem:[%s2677_s8 + $0x38] sm:$0xff] %v2271_v62   ;;  %v1495_v3 = vadd.f32 %v2661_v63, %v1207_v0  ;;  %v1130_v7 = vadd.f32 %v1129_v2, %v960_v1 }
 0x12d   : > { %v1559_v5 = vmax.f32 %v1495_v3, 0.0  ;;  %v1464_v12 = vadd.f32 %v2661_v63, %v1130_v7 }
 0x12f   : > { %v2351_v6 = vpack.c.bf16 %v1559_v5, %v1558_v4  ;;  %v1040_v8 = vpop.f32.mrf.mxu2  ;;  %v1528_v16 = vmax.f32 %v1464_v12, 0.0 }
 0x130   : > { %v1209_v9 = vpop.f32.mrf.mxu3 }
 0x131   : > { %2415 = vst [vmem:[%s2677_s8 + $0xb8] sm:$0xff] %v2351_v6   ;;  %v962_v10 = vpop.f32.mrf.mxu0  ;;  %v1210_v14 = vadd.f32 %v1209_v9, %v1040_v8 }
 0x132   : > { %v1131_v11 = vpop.f32.mrf.mxu1 }
 0x133   : > { %v1132_v13 = vadd.f32 %v1131_v11, %v962_v10  ;;  %v1496_v20 = vadd.f32 %v2661_v63, %v1210_v14 }
 0x135   : > { %v1465_v15 = vadd.f32 %v2661_v63, %v1132_v13  ;;  %v1560_v26 = vmax.f32 %v1496_v20, 0.0 }
 0x137   : > { %v1529_v17 = vmax.f32 %v1465_v15, 0.0  ;;  %v1042_v18 = vpop.f32.mrf.mxu2 }
 0x138   : > { %v1211_v19 = vpop.f32.mrf.mxu3 }
 0x139   : > { %v2276_v21 = vpack.c.bf16 %v1529_v17, %v1528_v16  ;;  %v1212_v22 = vadd.f32 %v1211_v19, %v1042_v18  ;;  %v965_v23 = vpop.f32.mrf.mxu0 }
 0x13a   : > { %v1134_v24 = vpop.f32.mrf.mxu1 }
 0x13b   : > { %2400 = vst [vmem:[%s2677_s8 + $0x40] sm:$0xff] %v2276_v21   ;;  %v1497_v25 = vadd.f32 %v2661_v63, %v1212_v22  ;;  %v1135_v29 = vadd.f32 %v1134_v24, %v965_v23 }
 0x13d   : > { %v1561_v27 = vmax.f32 %v1497_v25, 0.0  ;;  %v1466_v34 = vadd.f32 %v2661_v63, %v1135_v29 }
 0x13f   : > { %v2356_v28 = vpack.c.bf16 %v1561_v27, %v1560_v26  ;;  %v1045_v30 = vpop.f32.mrf.mxu2  ;;  %v1530_v38 = vmax.f32 %v1466_v34, 0.0 }
 0x140   : > { %v1214_v31 = vpop.f32.mrf.mxu3 }
 0x141   : > { %2416 = vst [vmem:[%s2677_s8 + $0xc0] sm:$0xff] %v2356_v28   ;;  %v967_v32 = vpop.f32.mrf.mxu0  ;;  %v1215_v36 = vadd.f32 %v1214_v31, %v1045_v30 }
 0x142   : > { %v1136_v33 = vpop.f32.mrf.mxu1 }
 0x143   : > { %v1137_v35 = vadd.f32 %v1136_v33, %v967_v32  ;;  %v1498_v42 = vadd.f32 %v2661_v63, %v1215_v36 }
 0x145   : > { %v1467_v37 = vadd.f32 %v2661_v63, %v1137_v35  ;;  %v1562_v48 = vmax.f32 %v1498_v42, 0.0 }
 0x147   : > { %v1531_v39 = vmax.f32 %v1467_v37, 0.0  ;;  %v1047_v40 = vpop.f32.mrf.mxu2 }
 0x148   : > { %v1216_v41 = vpop.f32.mrf.mxu3 }
 0x149   : > { %v2281_v43 = vpack.c.bf16 %v1531_v39, %v1530_v38  ;;  %v1217_v44 = vadd.f32 %v1216_v41, %v1047_v40  ;;  %v970_v45 = vpop.f32.mrf.mxu0 }
 0x14a   : > { %v1139_v46 = vpop.f32.mrf.mxu1 }
 0x14b   : > { %2401 = vst [vmem:[%s2677_s8 + $0x48] sm:$0xff] %v2281_v43   ;;  %v1499_v47 = vadd.f32 %v2661_v63, %v1217_v44  ;;  %v1140_v51 = vadd.f32 %v1139_v46, %v970_v45 }
 0x14d   : > { %v1563_v49 = vmax.f32 %v1499_v47, 0.0  ;;  %v1468_v56 = vadd.f32 %v2661_v63, %v1140_v51 }
 0x14f   : > { %v2361_v50 = vpack.c.bf16 %v1563_v49, %v1562_v48  ;;  %v1050_v52 = vpop.f32.mrf.mxu2  ;;  %v1532_v60 = vmax.f32 %v1468_v56, 0.0 }
 0x150   : > { %v1219_v53 = vpop.f32.mrf.mxu3 }
 0x151   : > { %2417 = vst [vmem:[%s2677_s8 + $0xc8] sm:$0xff] %v2361_v50   ;;  %v972_v54 = vpop.f32.mrf.mxu0  ;;  %v1220_v58 = vadd.f32 %v1219_v53, %v1050_v52 }
 0x152   : > { %v1141_v55 = vpop.f32.mrf.mxu1 }
 0x153   : > { %v1142_v57 = vadd.f32 %v1141_v55, %v972_v54  ;;  %v1500_v1 = vadd.f32 %v2661_v63, %v1220_v58 }
 0x155   : > { %v1469_v59 = vadd.f32 %v2661_v63, %v1142_v57  ;;  %v1564_v7 = vmax.f32 %v1500_v1, 0.0 }
 0x157   : > { %v1533_v61 = vmax.f32 %v1469_v59, 0.0  ;;  %v1052_v62 = vpop.f32.mrf.mxu2 }
 0x158   : > { %v1221_v0 = vpop.f32.mrf.mxu3 }
 0x159   : > { %v2286_v2 = vpack.c.bf16 %v1533_v61, %v1532_v60  ;;  %v1222_v3 = vadd.f32 %v1221_v0, %v1052_v62  ;;  %v975_v4 = vpop.f32.mrf.mxu0 }
 0x15a   : > { %v1144_v5 = vpop.f32.mrf.mxu1 }
 0x15b   : > { %2402 = vst [vmem:[%s2677_s8 + $0x50] sm:$0xff] %v2286_v2   ;;  %v1501_v6 = vadd.f32 %v2661_v63, %v1222_v3  ;;  %v1145_v10 = vadd.f32 %v1144_v5, %v975_v4 }
 0x15d   : > { %v1565_v8 = vmax.f32 %v1501_v6, 0.0  ;;  %v1470_v15 = vadd.f32 %v2661_v63, %v1145_v10 }
 0x15f   : > { %v2366_v9 = vpack.c.bf16 %v1565_v8, %v1564_v7  ;;  %v1055_v11 = vpop.f32.mrf.mxu2  ;;  %v1534_v19 = vmax.f32 %v1470_v15, 0.0 }
 0x160   : > { %v1224_v12 = vpop.f32.mrf.mxu3 }
 0x161   : > { %2418 = vst [vmem:[%s2677_s8 + $0xd0] sm:$0xff] %v2366_v9   ;;  %v977_v13 = vpop.f32.mrf.mxu0  ;;  %v1225_v17 = vadd.f32 %v1224_v12, %v1055_v11 }
 0x162   : > { %v1146_v14 = vpop.f32.mrf.mxu1 }
 0x163   : > { %v1147_v16 = vadd.f32 %v1146_v14, %v977_v13  ;;  %v1502_v23 = vadd.f32 %v2661_v63, %v1225_v17 }
 0x165   : > { %v1471_v18 = vadd.f32 %v2661_v63, %v1147_v16  ;;  %v1566_v29 = vmax.f32 %v1502_v23, 0.0 }
 0x167   : > { %v1535_v20 = vmax.f32 %v1471_v18, 0.0  ;;  %v1057_v21 = vpop.f32.mrf.mxu2 }
 0x168   : > { %v1226_v22 = vpop.f32.mrf.mxu3 }
 0x169   : > { %v2291_v24 = vpack.c.bf16 %v1535_v20, %v1534_v19  ;;  %v1227_v25 = vadd.f32 %v1226_v22, %v1057_v21  ;;  %v980_v26 = vpop.f32.mrf.mxu0 }
 0x16a   : > { %v1149_v27 = vpop.f32.mrf.mxu1 }
 0x16b   : > { %2403 = vst [vmem:[%s2677_s8 + $0x58] sm:$0xff] %v2291_v24   ;;  %v1503_v28 = vadd.f32 %v2661_v63, %v1227_v25  ;;  %v1150_v32 = vadd.f32 %v1149_v27, %v980_v26 }
 0x16d   : > { %v1567_v30 = vmax.f32 %v1503_v28, 0.0  ;;  %v1472_v37 = vadd.f32 %v2661_v63, %v1150_v32 }
 0x16f   : > { %v2371_v31 = vpack.c.bf16 %v1567_v30, %v1566_v29  ;;  %v1060_v33 = vpop.f32.mrf.mxu2  ;;  %v1536_v41 = vmax.f32 %v1472_v37, 0.0 }
 0x170   : > { %v1229_v34 = vpop.f32.mrf.mxu3 }
 0x171   : > { %2419 = vst [vmem:[%s2677_s8 + $0xd8] sm:$0xff] %v2371_v31   ;;  %v982_v35 = vpop.f32.mrf.mxu0  ;;  %v1230_v39 = vadd.f32 %v1229_v34, %v1060_v33 }
 0x172   : > { %v1151_v36 = vpop.f32.mrf.mxu1 }
 0x173   : > { %v1152_v38 = vadd.f32 %v1151_v36, %v982_v35  ;;  %v1504_v45 = vadd.f32 %v2661_v63, %v1230_v39 }
 0x175   : > { %v1473_v40 = vadd.f32 %v2661_v63, %v1152_v38  ;;  %v1568_v51 = vmax.f32 %v1504_v45, 0.0 }
 0x177   : > { %v1537_v42 = vmax.f32 %v1473_v40, 0.0  ;;  %v1062_v43 = vpop.f32.mrf.mxu2 }
 0x178   : > { %v1231_v44 = vpop.f32.mrf.mxu3 }
 0x179   : > { %v2296_v46 = vpack.c.bf16 %v1537_v42, %v1536_v41  ;;  %v1232_v47 = vadd.f32 %v1231_v44, %v1062_v43  ;;  %v985_v48 = vpop.f32.mrf.mxu0 }
 0x17a   : > { %v1154_v49 = vpop.f32.mrf.mxu1 }
 0x17b   : > { %2404 = vst [vmem:[%s2677_s8 + $0x60] sm:$0xff] %v2296_v46   ;;  %v1505_v50 = vadd.f32 %v2661_v63, %v1232_v47  ;;  %v1155_v54 = vadd.f32 %v1154_v49, %v985_v48 }
 0x17d   : > { %v1569_v52 = vmax.f32 %v1505_v50, 0.0  ;;  %v1474_v59 = vadd.f32 %v2661_v63, %v1155_v54 }
 0x17f   : > { %v2376_v53 = vpack.c.bf16 %v1569_v52, %v1568_v51  ;;  %v1065_v55 = vpop.f32.mrf.mxu2  ;;  %v1538_v0 = vmax.f32 %v1474_v59, 0.0 }
 0x180   : > { %v1234_v56 = vpop.f32.mrf.mxu3 }
 0x181   : > { %2420 = vst [vmem:[%s2677_s8 + $0xe0] sm:$0xff] %v2376_v53   ;;  %v987_v57 = vpop.f32.mrf.mxu0  ;;  %v1235_v61 = vadd.f32 %v1234_v56, %v1065_v55 }
 0x182   : > { %v1156_v58 = vpop.f32.mrf.mxu1 }
 0x183   : > { %v1157_v60 = vadd.f32 %v1156_v58, %v987_v57  ;;  %v1506_v4 = vadd.f32 %v2661_v63, %v1235_v61 }
 0x185   : > { %v1475_v62 = vadd.f32 %v2661_v63, %v1157_v60  ;;  %v1570_v10 = vmax.f32 %v1506_v4, 0.0 }
 0x187   : > { %v1539_v1 = vmax.f32 %v1475_v62, 0.0  ;;  %v1067_v2 = vpop.f32.mrf.mxu2 }
 0x188   : > { %v1236_v3 = vpop.f32.mrf.mxu3 }
 0x189   : > { %v2301_v5 = vpack.c.bf16 %v1539_v1, %v1538_v0  ;;  %v1237_v6 = vadd.f32 %v1236_v3, %v1067_v2  ;;  %v990_v7 = vpop.f32.mrf.mxu0 }
 0x18a   : > { %v1159_v8 = vpop.f32.mrf.mxu1 }
 0x18b   : > { %2405 = vst [vmem:[%s2677_s8 + $0x68] sm:$0xff] %v2301_v5   ;;  %v1507_v9 = vadd.f32 %v2661_v63, %v1237_v6  ;;  %v1160_v13 = vadd.f32 %v1159_v8, %v990_v7 }
 0x18d   : > { %v1571_v11 = vmax.f32 %v1507_v9, 0.0  ;;  %v1476_v18 = vadd.f32 %v2661_v63, %v1160_v13 }
 0x18f   : > { %v2381_v12 = vpack.c.bf16 %v1571_v11, %v1570_v10  ;;  %v1070_v14 = vpop.f32.mrf.mxu2  ;;  %v1540_v22 = vmax.f32 %v1476_v18, 0.0 }
 0x190   : > { %v1239_v15 = vpop.f32.mrf.mxu3 }
 0x191   : > { %2421 = vst [vmem:[%s2677_s8 + $0xe8] sm:$0xff] %v2381_v12   ;;  %v992_v16 = vpop.f32.mrf.mxu0  ;;  %v1240_v20 = vadd.f32 %v1239_v15, %v1070_v14 }
 0x192   : > { %v1161_v17 = vpop.f32.mrf.mxu1 }
 0x193   : > { %v1162_v19 = vadd.f32 %v1161_v17, %v992_v16  ;;  %v1508_v26 = vadd.f32 %v2661_v63, %v1240_v20 }
 0x195   : > { %v1477_v21 = vadd.f32 %v2661_v63, %v1162_v19  ;;  %v1572_v32 = vmax.f32 %v1508_v26, 0.0 }
 0x197   : > { %v1541_v23 = vmax.f32 %v1477_v21, 0.0  ;;  %v1072_v24 = vpop.f32.mrf.mxu2 }
 0x198   : > { %v1241_v25 = vpop.f32.mrf.mxu3 }
 0x199   : > { %v2306_v27 = vpack.c.bf16 %v1541_v23, %v1540_v22  ;;  %v1242_v28 = vadd.f32 %v1241_v25, %v1072_v24  ;;  %v995_v29 = vpop.f32.mrf.mxu0 }
 0x19a   : > { %v1164_v30 = vpop.f32.mrf.mxu1 }
 0x19b   : > { %2406 = vst [vmem:[%s2677_s8 + $0x70] sm:$0xff] %v2306_v27   ;;  %v1509_v31 = vadd.f32 %v2661_v63, %v1242_v28  ;;  %v1165_v35 = vadd.f32 %v1164_v30, %v995_v29 }
 0x19d   : > { %v1573_v33 = vmax.f32 %v1509_v31, 0.0  ;;  %v1478_v40 = vadd.f32 %v2661_v63, %v1165_v35 }
 0x19f   : > { %v2386_v34 = vpack.c.bf16 %v1573_v33, %v1572_v32  ;;  %v1075_v36 = vpop.f32.mrf.mxu2  ;;  %v1542_v44 = vmax.f32 %v1478_v40, 0.0 }
 0x1a0   : > { %v1244_v37 = vpop.f32.mrf.mxu3 }
 0x1a1   : > { %2422 = vst [vmem:[%s2677_s8 + $0xf0] sm:$0xff] %v2386_v34   ;;  %v997_v38 = vpop.f32.mrf.mxu0  ;;  %v1245_v42 = vadd.f32 %v1244_v37, %v1075_v36 }
 0x1a2   : > { %v1166_v39 = vpop.f32.mrf.mxu1 }
 0x1a3   : > { %v1167_v41 = vadd.f32 %v1166_v39, %v997_v38  ;;  %v1510_v48 = vadd.f32 %v2661_v63, %v1245_v42 }
 0x1a5   : > { %v1479_v43 = vadd.f32 %v2661_v63, %v1167_v41  ;;  %v1574_v52 = vmax.f32 %v1510_v48, 0.0 }
 0x1a7   : > { %v1543_v45 = vmax.f32 %v1479_v43, 0.0  ;;  %v1077_v46 = vpop.f32.mrf.mxu2 }
 0x1a8   : > { %v1246_v47 = vpop.f32.mrf.mxu3 }
 0x1a9   : > { %v2311_v49 = vpack.c.bf16 %v1543_v45, %v1542_v44  ;;  %v1247_v50 = vadd.f32 %v1246_v47, %v1077_v46 }
 0x1ab   : > { %2407 = vst [vmem:[%s2677_s8 + $0x78] sm:$0xff] %v2311_v49   ;;  %v1511_v51 = vadd.f32 %v2661_v63, %v1247_v50 }
 0x1ad   : > { %v1575_v53 = vmax.f32 %v1511_v51, 0.0 }
 0x1af   : > { %v2391_v54 = vpack.c.bf16 %v1575_v53, %v1574_v52 }
 0x1b1   : > { %2423 = vst [vmem:[%s2677_s8 + $0xf8] sm:$0xff] %v2391_v54  }
 0x1b2 PF: > { %s13_s14 = sadd.s32 1, %s2487_s14   ;;  %s2834_s12 = smov %s2483_s13 }
 0x1b3   : > { %p10_p5 = scmp.ge.s32.totalorder %s13_s14, 6   ;;  %s2835_s13 = smov %s2837_s15 }
 0x1b5   :  { %12 = sbr.rel (!%p10_p5) target bundleno = 2 (0x2), region = 76 }

// kernel: densenet_forward.27
= control target key start
LH: loop header
LB: loop body
LE: loop exit
PB: predicated region body
PF: predicated region fallthrough
CT: control target
= control target key end

     0   :  { %s1446_s18 = smov 0   ;;  %s1448_s19 = smov 0   ;;  %s1657_s0 = inlined_call_operand.vmem [shape: bf16[512,128], index: 0, kind: input, shape index: {}]   ;;  %s1658_s1 = inlined_call_operand.vmem [shape: bf16[128,128], index: 1, kind: input, shape index: {}]   ;;  %s1659_s2 = inlined_call_operand.vmem [shape: f32[1,128], index: 2, kind: input, shape index: {}]   ;;  %s1660_s3 = inlined_call_operand.vmem [shape: f32[1,128], index: 3, kind: input, shape index: {}]   ;;  %s1661_s4 = inlined_call_operand.vmem [shape: f32[1,128], index: 4, kind: input, shape index: {}]   ;;  %s1662_s5 = inlined_call_operand.vmem [shape: bf16[512,128], index: 5, kind: output, shape index: {}]  }
   0x1   :  { %s1450_s20 = smov 0  }
   0x2 LB: > { %s34_s21 = sadd.s32 1, %s1410_s19  ;;  %p1120_p0 = scmp.ge.s32.totalorder %s1414_s20, 1  ;;  %s1414_s20 = sphi %s1450_s20, %s15_s20   ;;  %s1410_s19 = sphi %s1448_s19, %s1664_s19   ;;  %s1406_s18 = sphi %s1446_s18, %s1663_s18  }
   0x3   : > { %p36_p1 = scmp.ge.s32.totalorder %s34_s21, 2  ;;  %p254_p2 = scmp.lt.s32.totalorder %s1414_s20, 3 }
   0x5   : > { %s1666_s21 = smov (%p36_p1, %s34_s21), 0  ;;  %p255_p3 = pnand %p1120_p0, %p254_p2 }
   0x6   : > { %s1121_s24 = sshll.u32 (!%p255_p3), %s1406_s18, 5 }
   0x7   : > { %258 = sbr.rel (%p255_p3) target bundleno = 241 (0xf1), region = 40  ;;  %p306_p4 = scmp.lt.s32.totalorder (!%p255_p3), %s1121_s24, 63 }
   0xc   : > { %v1166_v0 = vld [vmem:[%s1658_s1 + $0x38] sm:$0xff]  ;;  %v1165_v1 = vld [vmem:[%s1658_s1 + $0x30] sm:$0xff]  ;;  %s1668_s24 = smov (!%p306_p4, %s1121_s24), 63  ;;  %v1164_v2 = vld [vmem:[%s1658_s1 + $0x28] sm:$0xff] }
   0xd   : > { %657 = vmatpush.bf16.msra.mxu0 %v1166_v0  ;;  %1341 = vmatpush.bf16.msra.mxu1 %v1166_v0  ;;  %s1122_s27 = sshll.u32 %s1668_s24, 2  ;;  %v1163_v5 = vld [vmem:[%s1658_s1 + $0x20] sm:$0xff]  ;;  %v1162_v15 = vld [vmem:[%s1658_s1 + $0x18] sm:$0xff]  ;;  %v1161_v25 = vld [vmem:[%s1658_s1 + $0x10] sm:$0xff] }
   0xe   : > { %1342 = vmatpush.bf16.msra.mxu2 %v1166_v0  ;;  %1343 = vmatpush.bf16.msra.mxu3 %v1166_v0  ;;  %s1481_s7 = scalar_lea.vmem %s1657_s0, %s1122_s27  ;;  %v1493_v10 = vld [vmem:[%s1659_s2] ss:$0 sm:$0xff]  ;;  %v1160_v34 = vld [vmem:[%s1658_s1 + $0x8] sm:$0xff]  ;;  %s1602_s6 = scalar_lea.vmem %s1662_s5, %s1122_s27 }
   0xf   : > { %v1168_v3 = vld [vmem:[%s1481_s7] sm:$0xff]   ;;  %v1311_v43 = vld [vmem:[%s1481_s7 + $0x8] sm:$0xff]  }
  0x10   : > { %v1314_v4 = vld [vmem:[%s1481_s7 + $0x20] sm:$0xff]   ;;  %v1169_v8 = vunpack.c.l.bf16 %v1168_v3  ;;  %v1170_v9 = vunpack.c.h.bf16 %v1168_v3  ;;  %v1315_v47 = vld [vmem:[%s1481_s7 + $0x28] sm:$0xff]   ;;  %v1173_v52 = vunpack.c.l.bf16 %v1311_v43  ;;  %v1174_v53 = vunpack.c.h.bf16 %v1311_v43 }
  0x11   : > { %658 = vmatpush.bf16.msra.mxu0 %v1165_v1  ;;  %1344 = vmatpush.bf16.msra.mxu1 %v1165_v1  ;;  %v1318_v6 = vld [vmem:[%s1481_s7 + $0x40] sm:$0xff]   ;;  %v1185_v11 = vunpack.c.l.bf16 %v1314_v4  ;;  %v1186_v12 = vunpack.c.h.bf16 %v1314_v4  ;;  %v1319_v48 = vld [vmem:[%s1481_s7 + $0x48] sm:$0xff]   ;;  %v1189_v55 = vunpack.c.l.bf16 %v1315_v47  ;;  %v1190_v56 = vunpack.c.h.bf16 %v1315_v47 }
  0x12   : > { %1345 = vmatpush.bf16.msra.mxu2 %v1165_v1  ;;  %1346 = vmatpush.bf16.msra.mxu3 %v1165_v1  ;;  %v1322_v7 = vld [vmem:[%s1481_s7 + $0x60] sm:$0xff]   ;;  %v1201_v13 = vunpack.c.l.bf16 %v1318_v6  ;;  %v1202_v14 = vunpack.c.h.bf16 %v1318_v6  ;;  %v445_v18 = vmul.f32 %v1493_v10, %v1169_v8  ;;  %v446_v19 = vmul.f32 %v1493_v10, %v1170_v9  ;;  %v1323_v49 = vld [vmem:[%s1481_s7 + $0x68] sm:$0xff]  }
  0x13   : > { %v1217_v16 = vunpack.c.l.bf16 %v1322_v7  ;;  %v1218_v17 = vunpack.c.h.bf16 %v1322_v7  ;;  %v1503_v20 = vld [vmem:[%s1660_s3] ss:$0 sm:$0xff]  ;;  %v453_v21 = vmul.f32 %v1493_v10, %v1185_v11  ;;  %v454_v22 = vmul.f32 %v1493_v10, %v1186_v12 }
  0x14   : > { %v461_v23 = vmul.f32 %v1493_v10, %v1201_v13  ;;  %v462_v24 = vmul.f32 %v1493_v10, %v1202_v14  ;;  %v481_v28 = vadd.f32 %v1503_v20, %v445_v18  ;;  %v482_v29 = vadd.f32 %v1503_v20, %v446_v19  ;;  %v1159_v44 = vld [vmem:[%s1658_s1] sm:$0xff]  ;;  %v1312_v19 = vld [vmem:[%s1481_s7 + $0x10] sm:$0xff]  }
  0x15   : > { %659 = vmatpush.bf16.msra.mxu0 %v1164_v2  ;;  %1347 = vmatpush.bf16.msra.mxu1 %v1164_v2  ;;  %v469_v26 = vmul.f32 %v1493_v10, %v1217_v16  ;;  %v470_v27 = vmul.f32 %v1493_v10, %v1218_v17  ;;  %v489_v30 = vadd.f32 %v1503_v20, %v453_v21  ;;  %v1205_v57 = vunpack.c.l.bf16 %v1319_v48  ;;  %v1316_v21 = vld [vmem:[%s1481_s7 + $0x30] sm:$0xff]  }
  0x16   : > { %1348 = vmatpush.bf16.msra.mxu2 %v1164_v2  ;;  %1349 = vmatpush.bf16.msra.mxu3 %v1164_v2  ;;  %v490_v31 = vadd.f32 %v1503_v20, %v454_v22  ;;  %v497_v32 = vadd.f32 %v1503_v20, %v461_v23  ;;  %v498_v33 = vadd.f32 %v1503_v20, %v462_v24  ;;  %v513_v37 = vmax.f32 %v481_v28, 0.0 }
  0x17   : > { %v505_v35 = vadd.f32 %v1503_v20, %v469_v26  ;;  %v506_v36 = vadd.f32 %v1503_v20, %v470_v27  ;;  %v514_v38 = vmax.f32 %v482_v29, 0.0  ;;  %v521_v39 = vmax.f32 %v489_v30, 0.0  ;;  %v1320_v26 = vld [vmem:[%s1481_s7 + $0x50] sm:$0xff]  }
  0x18   : > { %v522_v40 = vmax.f32 %v490_v31, 0.0  ;;  %v529_v41 = vmax.f32 %v497_v32, 0.0  ;;  %v530_v42 = vmax.f32 %v498_v33, 0.0  ;;  %v1206_v59 = vunpack.c.h.bf16 %v1319_v48  ;;  %v1324_v27 = vld [vmem:[%s1481_s7 + $0x70] sm:$0xff]  }
  0x19   : > { %660 = vmatpush.bf16.msra.mxu0 %v1163_v5  ;;  %1350 = vmatpush.bf16.msra.mxu1 %v1163_v5  ;;  %v537_v45 = vmax.f32 %v505_v35, 0.0  ;;  %v538_v46 = vmax.f32 %v506_v36, 0.0  ;;  %v545_v50 = vpack.c.bf16 %v514_v38, %v513_v37  ;;  %v1221_v60 = vunpack.c.l.bf16 %v1323_v49 }
  0x1a   : > { %1351 = vmatpush.bf16.msra.mxu2 %v1163_v5  ;;  %1352 = vmatpush.bf16.msra.mxu3 %v1163_v5  ;;  %v549_v51 = vpack.c.bf16 %v522_v40, %v521_v39  ;;  %v553_v54 = vpack.c.bf16 %v530_v42, %v529_v41  ;;  %v1222_v61 = vunpack.c.h.bf16 %v1323_v49  ;;  %v447_v62 = vmul.f32 %v1493_v10, %v1173_v52 }
  0x1b   : > { %v557_v58 = vpack.c.bf16 %v538_v46, %v537_v45  ;;  %v448_v63 = vmul.f32 %v1493_v10, %v1174_v53  ;;  %v455_v0 = vmul.f32 %v1493_v10, %v1189_v55  ;;  %v456_v1 = vmul.f32 %v1493_v10, %v1190_v56 }
  0x1c   : > { %v463_v2 = vmul.f32 %v1493_v10, %v1205_v57  ;;  %v464_v3 = vmul.f32 %v1493_v10, %v1206_v59  ;;  %v471_v4 = vmul.f32 %v1493_v10, %v1221_v60  ;;  %v472_v5 = vmul.f32 %v1493_v10, %v1222_v61 }
  0x1d   : > { %661 = vmatpush.bf16.msra.mxu0 %v1162_v15  ;;  %1353 = vmatpush.bf16.msra.mxu1 %v1162_v15  ;;  %v483_v6 = vadd.f32 %v1503_v20, %v447_v62  ;;  %v484_v7 = vadd.f32 %v1503_v20, %v448_v63  ;;  %v491_v8 = vadd.f32 %v1503_v20, %v455_v0  ;;  %v1177_v28 = vunpack.c.l.bf16 %v1312_v19  ;;  %v1313_v62 = vld [vmem:[%s1481_s7 + $0x18] sm:$0xff]  }
  0x1e   : > { %1354 = vmatpush.bf16.msra.mxu2 %v1162_v15  ;;  %1355 = vmatpush.bf16.msra.mxu3 %v1162_v15  ;;  %v492_v9 = vadd.f32 %v1503_v20, %v456_v1  ;;  %v499_v11 = vadd.f32 %v1503_v20, %v463_v2  ;;  %v500_v12 = vadd.f32 %v1503_v20, %v464_v3  ;;  %v1178_v29 = vunpack.c.h.bf16 %v1312_v19  ;;  %v1317_v1 = vld [vmem:[%s1481_s7 + $0x38] sm:$0xff]  }
  0x1f   : > { %v507_v13 = vadd.f32 %v1503_v20, %v471_v4  ;;  %v508_v14 = vadd.f32 %v1503_v20, %v472_v5  ;;  %v515_v15 = vmax.f32 %v483_v6, 0.0  ;;  %v516_v16 = vmax.f32 %v484_v7, 0.0  ;;  %v1321_v2 = vld [vmem:[%s1481_s7 + $0x58] sm:$0xff]  }
  0x20   : > { %v523_v17 = vmax.f32 %v491_v8, 0.0  ;;  %v524_v18 = vmax.f32 %v492_v9, 0.0  ;;  %v531_v22 = vmax.f32 %v499_v11, 0.0  ;;  %v532_v23 = vmax.f32 %v500_v12, 0.0  ;;  %v1325_v3 = vld [vmem:[%s1481_s7 + $0x78] sm:$0xff]  }
  0x21   : > { %662 = vmatpush.bf16.msra.mxu0 %v1161_v25  ;;  %1356 = vmatpush.bf16.msra.mxu1 %v1161_v25  ;;  %v539_v24 = vmax.f32 %v507_v13, 0.0  ;;  %v1193_v30 = vunpack.c.l.bf16 %v1316_v21  ;;  %v1194_v31 = vunpack.c.h.bf16 %v1316_v21  ;;  %v546_v32 = vpack.c.bf16 %v516_v16, %v515_v15 }
  0x22   : > { %1357 = vmatpush.bf16.msra.mxu2 %v1161_v25  ;;  %1358 = vmatpush.bf16.msra.mxu3 %v1161_v25  ;;  %v540_v25 = vmax.f32 %v508_v14, 0.0  ;;  %v550_v33 = vpack.c.bf16 %v524_v18, %v523_v17  ;;  %v1210_v35 = vunpack.c.h.bf16 %v1320_v26  ;;  %v554_v36 = vpack.c.bf16 %v532_v23, %v531_v22 }
  0x23   : > { %v1225_v38 = vunpack.c.l.bf16 %v1324_v27  ;;  %v1226_v39 = vunpack.c.h.bf16 %v1324_v27  ;;  %v449_v40 = vmul.f32 %v1493_v10, %v1177_v28  ;;  %v450_v41 = vmul.f32 %v1493_v10, %v1178_v29 }
  0x24   : > { %v558_v37 = vpack.c.bf16 %v540_v25, %v539_v24  ;;  %v457_v42 = vmul.f32 %v1493_v10, %v1193_v30  ;;  %v458_v43 = vmul.f32 %v1493_v10, %v1194_v31  ;;  %v466_v45 = vmul.f32 %v1493_v10, %v1210_v35 }
  0x25   : > { %663 = vmatpush.bf16.msra.mxu0 %v1160_v34  ;;  %1359 = vmatpush.bf16.msra.mxu1 %v1160_v34  ;;  %v473_v46 = vmul.f32 %v1493_v10, %v1225_v38  ;;  %v474_v47 = vmul.f32 %v1493_v10, %v1226_v39  ;;  %v485_v48 = vadd.f32 %v1503_v20, %v449_v40  ;;  %v1181_v6 = vunpack.c.l.bf16 %v1313_v62 }
  0x26   : > { %1360 = vmatpush.bf16.msra.mxu2 %v1160_v34  ;;  %1361 = vmatpush.bf16.msra.mxu3 %v1160_v34  ;;  %v1209_v34 = vunpack.c.l.bf16 %v1320_v26  ;;  %v486_v49 = vadd.f32 %v1503_v20, %v450_v41  ;;  %v502_v53 = vadd.f32 %v1503_v20, %v466_v45  ;;  %v1182_v7 = vunpack.c.h.bf16 %v1313_v62 }
  0x27   : > { %v510_v55 = vadd.f32 %v1503_v20, %v474_v47  ;;  %v517_v56 = vmax.f32 %v485_v48, 0.0  ;;  %v1197_v9 = vunpack.c.l.bf16 %v1317_v1  ;;  %v1198_v11 = vunpack.c.h.bf16 %v1317_v1 }
  0x28   : > { %v518_v57 = vmax.f32 %v486_v49, 0.0  ;;  %v534_v61 = vmax.f32 %v502_v53, 0.0  ;;  %v1213_v12 = vunpack.c.l.bf16 %v1321_v2  ;;  %v1214_v14 = vunpack.c.h.bf16 %v1321_v2 }
  0x29   : > { %664 = vmatpush.bf16.msra.mxu0 %v1159_v44  ;;  %1362 = vmatpush.bf16.msra.mxu1 %v1159_v44  ;;  %v542_v0 = vmax.f32 %v510_v55, 0.0  ;;  %v1229_v15 = vunpack.c.l.bf16 %v1325_v3  ;;  %v1230_v16 = vunpack.c.h.bf16 %v1325_v3  ;;  %v451_v17 = vmul.f32 %v1493_v10, %v1181_v6 }
  0x2a   : > { %1363 = vmatpush.bf16.msra.mxu2 %v1159_v44  ;;  %1364 = vmatpush.bf16.msra.mxu3 %v1159_v44  ;;  %v465_v44 = vmul.f32 %v1493_v10, %v1209_v34  ;;  %v547_v4 = vpack.c.bf16 %v518_v57, %v517_v56  ;;  %v452_v18 = vmul.f32 %v1493_v10, %v1182_v7 }
  0x2b   : > { %v459_v19 = vmul.f32 %v1493_v10, %v1197_v9  ;;  %v460_v21 = vmul.f32 %v1493_v10, %v1198_v11  ;;  %v467_v22 = vmul.f32 %v1493_v10, %v1213_v12  ;;  %v468_v23 = vmul.f32 %v1493_v10, %v1214_v14 }
  0x2c   : > { %665 = vmatmul.bf16.vlgmr.msra.gmra.mxu0 %v545_v50  ;;  %685 = vmatmul.bf16.vlgmr.msra.gmra.mxu1 %v549_v51  ;;  %v493_v50 = vadd.f32 %v1503_v20, %v457_v42  ;;  %v494_v51 = vadd.f32 %v1503_v20, %v458_v43  ;;  %v501_v52 = vadd.f32 %v1503_v20, %v465_v44 }
  0x2d   : > { %705 = vmatmul.bf16.vlgmr.msra.gmra.mxu2 %v553_v54  ;;  %725 = vmatmul.bf16.vlgmr.msra.gmra.mxu3 %v557_v58  ;;  %v509_v54 = vadd.f32 %v1503_v20, %v473_v46  ;;  %v475_v24 = vmul.f32 %v1493_v10, %v1229_v15  ;;  %v476_v25 = vmul.f32 %v1493_v10, %v1230_v16 }
  0x2e   : > { %v525_v58 = vmax.f32 %v493_v50, 0.0  ;;  %v526_v59 = vmax.f32 %v494_v51, 0.0  ;;  %v533_v60 = vmax.f32 %v501_v52, 0.0  ;;  %v487_v26 = vadd.f32 %v1503_v20, %v451_v17 }
  0x2f   : > { %v541_v63 = vmax.f32 %v509_v54, 0.0  ;;  %v488_v27 = vadd.f32 %v1503_v20, %v452_v18  ;;  %v495_v28 = vadd.f32 %v1503_v20, %v459_v19  ;;  %v496_v29 = vadd.f32 %v1503_v20, %v460_v21 }
  0x30   : > { %v551_v5 = vpack.c.bf16 %v526_v59, %v525_v58  ;;  %v555_v8 = vpack.c.bf16 %v534_v61, %v533_v60  ;;  %v503_v30 = vadd.f32 %v1503_v20, %v467_v22  ;;  %v504_v31 = vadd.f32 %v1503_v20, %v468_v23 }
  0x31   : > { %v559_v13 = vpack.c.bf16 %v542_v0, %v541_v63  ;;  %v519_v34 = vmax.f32 %v487_v26, 0.0  ;;  %v520_v35 = vmax.f32 %v488_v27, 0.0  ;;  %v528_v10 = vmax.f32 %v496_v29, 0.0 }
  0x32   : > { %v536_v38 = vmax.f32 %v504_v31, 0.0 }
  0x33   : > { %v548_v41 = vpack.c.bf16 %v520_v35, %v519_v34 }
  0x3c   : > { %670 = vmatmul.bf16.gmra.mxu0 %v546_v32  ;;  %690 = vmatmul.bf16.gmra.mxu1 %v550_v33  ;;  %v511_v32 = vadd.f32 %v1503_v20, %v475_v24  ;;  %v512_v33 = vadd.f32 %v1503_v20, %v476_v25  ;;  %v1591_v20 = vld [vmem:[%s1661_s4] ss:$0 sm:$0xff] }
  0x3d   : > { %710 = vmatmul.bf16.gmra.mxu2 %v554_v36  ;;  %730 = vmatmul.bf16.gmra.mxu3 %v558_v37  ;;  %v527_v36 = vmax.f32 %v495_v28, 0.0  ;;  %v535_v37 = vmax.f32 %v503_v30, 0.0 }
  0x3e   : > { %v543_v39 = vmax.f32 %v511_v32, 0.0  ;;  %v544_v40 = vmax.f32 %v512_v33, 0.0 }
  0x3f   : > { %v552_v42 = vpack.c.bf16 %v528_v10, %v527_v36  ;;  %v556_v43 = vpack.c.bf16 %v536_v38, %v535_v37 }
  0x40   : > { %v560_v44 = vpack.c.bf16 %v544_v40, %v543_v39 }
  0x4c   : > { %675 = vmatmul.bf16.gmra.mxu0 %v547_v4  ;;  %695 = vmatmul.bf16.gmra.mxu1 %v551_v5 }
  0x4d   : > { %715 = vmatmul.bf16.gmra.mxu2 %v555_v8  ;;  %735 = vmatmul.bf16.gmra.mxu3 %v559_v13 }
  0x5c   : > { %680 = vmatmul.bf16.gmra.mxu0 %v548_v41  ;;  %700 = vmatmul.bf16.gmra.mxu1 %v552_v42 }
  0x5d   : > { %720 = vmatmul.bf16.gmra.mxu2 %v556_v43  ;;  %740 = vmatmul.bf16.gmra.mxu3 %v560_v44 }
  0xa9   : > { %v666_v45 = vpop.f32.mrf.mxu0  ;;  %v686_v46 = vpop.f32.mrf.mxu1 }
  0xaa   : > { %v849_v47 = vadd.f32 %v1591_v20, %v666_v45  ;;  %v857_v48 = vadd.f32 %v1591_v20, %v686_v46 }
  0xac   : > { %v881_v55 = vmax.f32 %v849_v47, 0.0  ;;  %v889_v56 = vmax.f32 %v857_v48, 0.0 }
  0xb0   : > { %v706_v49 = vpop.f32.mrf.mxu2  ;;  %v726_v50 = vpop.f32.mrf.mxu3 }
  0xb1   : > { %v668_v51 = vpop.f32.mrf.mxu0  ;;  %v688_v52 = vpop.f32.mrf.mxu1  ;;  %v865_v61 = vadd.f32 %v1591_v20, %v706_v49  ;;  %v873_v62 = vadd.f32 %v1591_v20, %v726_v50 }
  0xb2   : > { %v850_v53 = vadd.f32 %v1591_v20, %v668_v51  ;;  %v858_v54 = vadd.f32 %v1591_v20, %v688_v52 }
  0xb3   : > { %v897_v5 = vmax.f32 %v865_v61, 0.0  ;;  %v905_v6 = vmax.f32 %v873_v62, 0.0 }
  0xb4   : > { %v882_v57 = vmax.f32 %v850_v53, 0.0  ;;  %v890_v58 = vmax.f32 %v858_v54, 0.0 }
  0xb6   : > { %v1234_v59 = vpack.c.bf16 %v882_v57, %v881_v55  ;;  %v1254_v60 = vpack.c.bf16 %v890_v58, %v889_v56 }
  0xb8   : > { %1235 = vst [vmem:[%s1602_s6] sm:$0xff] %v1234_v59   ;;  %v708_v63 = vpop.f32.mrf.mxu2  ;;  %v728_v0 = vpop.f32.mrf.mxu3 }
  0xb9   : > { %1329 = vst [vmem:[%s1602_s6 + $0x20] sm:$0xff] %v1254_v60   ;;  %v866_v1 = vadd.f32 %v1591_v20, %v708_v63  ;;  %v874_v2 = vadd.f32 %v1591_v20, %v728_v0  ;;  %v671_v3 = vpop.f32.mrf.mxu0  ;;  %v691_v4 = vpop.f32.mrf.mxu1 }
  0xba   : > { %v851_v12 = vadd.f32 %v1591_v20, %v671_v3  ;;  %v859_v13 = vadd.f32 %v1591_v20, %v691_v4 }
  0xbb   : > { %v898_v7 = vmax.f32 %v866_v1, 0.0  ;;  %v906_v8 = vmax.f32 %v874_v2, 0.0 }
  0xbc   : > { %v883_v21 = vmax.f32 %v851_v12, 0.0  ;;  %v891_v22 = vmax.f32 %v859_v13, 0.0 }
  0xbd   : > { %v1274_v9 = vpack.c.bf16 %v898_v7, %v897_v5  ;;  %v1294_v11 = vpack.c.bf16 %v906_v8, %v905_v6 }
  0xbf   : > { %1333 = vst [vmem:[%s1602_s6 + $0x40] sm:$0xff] %v1274_v9  }
  0xc0   : > { %1337 = vst [vmem:[%s1602_s6 + $0x60] sm:$0xff] %v1294_v11   ;;  %v711_v14 = vpop.f32.mrf.mxu2  ;;  %v731_v15 = vpop.f32.mrf.mxu3 }
  0xc1   : > { %v673_v16 = vpop.f32.mrf.mxu0  ;;  %v693_v17 = vpop.f32.mrf.mxu1  ;;  %v867_v27 = vadd.f32 %v1591_v20, %v711_v14  ;;  %v875_v28 = vadd.f32 %v1591_v20, %v731_v15 }
  0xc2   : > { %v852_v18 = vadd.f32 %v1591_v20, %v673_v16  ;;  %v860_v19 = vadd.f32 %v1591_v20, %v693_v17 }
  0xc3   : > { %v899_v35 = vmax.f32 %v867_v27, 0.0  ;;  %v907_v36 = vmax.f32 %v875_v28, 0.0 }
  0xc4   : > { %v884_v23 = vmax.f32 %v852_v18, 0.0  ;;  %v892_v24 = vmax.f32 %v860_v19, 0.0 }
  0xc6   : > { %v1239_v25 = vpack.c.bf16 %v884_v23, %v883_v21  ;;  %v1259_v26 = vpack.c.bf16 %v892_v24, %v891_v22 }
  0xc8   : > { %1326 = vst [vmem:[%s1602_s6 + $0x8] sm:$0xff] %v1239_v25   ;;  %v713_v29 = vpop.f32.mrf.mxu2  ;;  %v733_v30 = vpop.f32.mrf.mxu3 }
  0xc9   : > { %1330 = vst [vmem:[%s1602_s6 + $0x28] sm:$0xff] %v1259_v26   ;;  %v868_v31 = vadd.f32 %v1591_v20, %v713_v29  ;;  %v876_v32 = vadd.f32 %v1591_v20, %v733_v30  ;;  %v676_v33 = vpop.f32.mrf.mxu0  ;;  %v696_v34 = vpop.f32.mrf.mxu1 }
  0xca   : > { %v853_v40 = vadd.f32 %v1591_v20, %v676_v33  ;;  %v861_v41 = vadd.f32 %v1591_v20, %v696_v34 }
  0xcb   : > { %v900_v10 = vmax.f32 %v868_v31, 0.0  ;;  %v908_v37 = vmax.f32 %v876_v32, 0.0 }
  0xcc   : > { %v885_v48 = vmax.f32 %v853_v40, 0.0  ;;  %v893_v49 = vmax.f32 %v861_v41, 0.0 }
  0xcd   : > { %v1279_v38 = vpack.c.bf16 %v900_v10, %v899_v35  ;;  %v1299_v39 = vpack.c.bf16 %v908_v37, %v907_v36 }
  0xcf   : > { %1334 = vst [vmem:[%s1602_s6 + $0x48] sm:$0xff] %v1279_v38  }
  0xd0   : > { %1338 = vst [vmem:[%s1602_s6 + $0x68] sm:$0xff] %v1299_v39   ;;  %v716_v42 = vpop.f32.mrf.mxu2  ;;  %v736_v43 = vpop.f32.mrf.mxu3 }
  0xd1   : > { %v678_v44 = vpop.f32.mrf.mxu0  ;;  %v698_v45 = vpop.f32.mrf.mxu1  ;;  %v869_v54 = vadd.f32 %v1591_v20, %v716_v42  ;;  %v877_v55 = vadd.f32 %v1591_v20, %v736_v43 }
  0xd2   : > { %v854_v46 = vadd.f32 %v1591_v20, %v678_v44  ;;  %v862_v47 = vadd.f32 %v1591_v20, %v698_v45 }
  0xd3   : > { %v901_v62 = vmax.f32 %v869_v54, 0.0  ;;  %v909_v63 = vmax.f32 %v877_v55, 0.0 }
  0xd4   : > { %v886_v50 = vmax.f32 %v854_v46, 0.0  ;;  %v894_v51 = vmax.f32 %v862_v47, 0.0 }
  0xd6   : > { %v1244_v52 = vpack.c.bf16 %v886_v50, %v885_v48  ;;  %v1264_v53 = vpack.c.bf16 %v894_v51, %v893_v49 }
  0xd8   : > { %1327 = vst [vmem:[%s1602_s6 + $0x10] sm:$0xff] %v1244_v52   ;;  %v718_v56 = vpop.f32.mrf.mxu2  ;;  %v738_v57 = vpop.f32.mrf.mxu3 }
  0xd9   : > { %1331 = vst [vmem:[%s1602_s6 + $0x30] sm:$0xff] %v1264_v53   ;;  %v870_v58 = vadd.f32 %v1591_v20, %v718_v56  ;;  %v878_v59 = vadd.f32 %v1591_v20, %v738_v57  ;;  %v681_v60 = vpop.f32.mrf.mxu0  ;;  %v701_v61 = vpop.f32.mrf.mxu1 }
  0xda   : > { %v855_v4 = vadd.f32 %v1591_v20, %v681_v60  ;;  %v863_v5 = vadd.f32 %v1591_v20, %v701_v61 }
  0xdb   : > { %v902_v0 = vmax.f32 %v870_v58, 0.0  ;;  %v910_v1 = vmax.f32 %v878_v59, 0.0 }
  0xdc   : > { %v887_v13 = vmax.f32 %v855_v4, 0.0  ;;  %v895_v14 = vmax.f32 %v863_v5, 0.0 }
  0xdd   : > { %v1284_v2 = vpack.c.bf16 %v902_v0, %v901_v62  ;;  %v1304_v3 = vpack.c.bf16 %v910_v1, %v909_v63 }
  0xdf   : > { %1335 = vst [vmem:[%s1602_s6 + $0x50] sm:$0xff] %v1284_v2  }
  0xe0   : > { %1339 = vst [vmem:[%s1602_s6 + $0x70] sm:$0xff] %v1304_v3   ;;  %v721_v6 = vpop.f32.mrf.mxu2  ;;  %v741_v7 = vpop.f32.mrf.mxu3 }
  0xe1   : > { %v683_v8 = vpop.f32.mrf.mxu0  ;;  %v703_v9 = vpop.f32.mrf.mxu1  ;;  %v871_v19 = vadd.f32 %v1591_v20, %v721_v6  ;;  %v879_v21 = vadd.f32 %v1591_v20, %v741_v7 }
  0xe2   : > { %v856_v11 = vadd.f32 %v1591_v20, %v683_v8  ;;  %v864_v12 = vadd.f32 %v1591_v20, %v703_v9 }
  0xe3   : > { %v903_v26 = vmax.f32 %v871_v19, 0.0  ;;  %v911_v27 = vmax.f32 %v879_v21, 0.0 }
  0xe4   : > { %v888_v15 = vmax.f32 %v856_v11, 0.0  ;;  %v896_v16 = vmax.f32 %v864_v12, 0.0 }
  0xe6   : > { %v1249_v17 = vpack.c.bf16 %v888_v15, %v887_v13  ;;  %v1269_v18 = vpack.c.bf16 %v896_v16, %v895_v14 }
  0xe8   : > { %1328 = vst [vmem:[%s1602_s6 + $0x18] sm:$0xff] %v1249_v17   ;;  %v723_v22 = vpop.f32.mrf.mxu2  ;;  %v743_v23 = vpop.f32.mrf.mxu3 }
  0xe9   : > { %1332 = vst [vmem:[%s1602_s6 + $0x38] sm:$0xff] %v1269_v18   ;;  %v872_v24 = vadd.f32 %v1591_v20, %v723_v22  ;;  %v880_v25 = vadd.f32 %v1591_v20, %v743_v23 }
  0xeb   : > { %v904_v28 = vmax.f32 %v872_v24, 0.0  ;;  %v912_v29 = vmax.f32 %v880_v25, 0.0 }
  0xed   : > { %v1289_v30 = vpack.c.bf16 %v904_v28, %v903_v26  ;;  %v1309_v31 = vpack.c.bf16 %v912_v29, %v911_v27 }
  0xef   : > { %1336 = vst [vmem:[%s1602_s6 + $0x58] sm:$0xff] %v1289_v30  }
  0xf0   : > { %1340 = vst [vmem:[%s1602_s6 + $0x78] sm:$0xff] %v1309_v31  }
  0xf1 PF: > { %s15_s20 = sadd.s32 1, %s1414_s20   ;;  %s1663_s18 = smov %s1410_s19 }
  0xf2   : > { %p12_p5 = scmp.ge.s32.totalorder %s15_s20, 4   ;;  %s1664_s19 = smov %s1666_s21 }
  0xf4   :  { %14 = sbr.rel (!%p12_p5) target bundleno = 2 (0x2), region = 90 }

// kernel: densenet_forward.26
= control target key start
LH: loop header
LB: loop body
LE: loop exit
PB: predicated region body
PF: predicated region fallthrough
CT: control target
= control target key end

     0   :  { %s2212_s0 = inlined_call_operand.vmem [shape: bf16[9,256,128], index: 0, kind: input, shape index: {}]   ;;  %s2213_s1 = inlined_call_operand.vmem [shape: bf16[256,128], index: 1, kind: output, shape index: {}]  }
   0x1   :  { %v909_v0 = vld [vmem:[%s2212_s0] sm:$0xff]   ;;  %v1564_v16 = vld [vmem:[%s2212_s0 + $0x8] sm:$0xff]   ;;  %v1565_v56 = vld [vmem:[%s2212_s0 + $0x10] sm:$0xff]  }
   0x2   :  { %v1579_v1 = vld [vmem:[%s2212_s0 + $0x80] sm:$0xff]   ;;  %v910_v3 = vunpack.c.l.bf16 %v909_v0  ;;  %v911_v4 = vunpack.c.h.bf16 %v909_v0  ;;  %v1580_v17 = vld [vmem:[%s2212_s0 + $0x88] sm:$0xff]   ;;  %v914_v28 = vunpack.c.l.bf16 %v1564_v16  ;;  %v915_v29 = vunpack.c.h.bf16 %v1564_v16  ;;  %v1581_v61 = vld [vmem:[%s2212_s0 + $0x90] sm:$0xff]  }
   0x3   :  { %v1595_v2 = vld [vmem:[%s2212_s0 + $0x100] sm:$0xff]   ;;  %v974_v5 = vunpack.c.l.bf16 %v1579_v1  ;;  %v975_v6 = vunpack.c.h.bf16 %v1579_v1  ;;  %v1596_v26 = vld [vmem:[%s2212_s0 + $0x108] sm:$0xff]   ;;  %v978_v30 = vunpack.c.l.bf16 %v1580_v17  ;;  %v979_v31 = vunpack.c.h.bf16 %v1580_v17 }
   0x4   :  { %v1611_v7 = vld [vmem:[%s2212_s0 + $0x180] sm:$0xff]   ;;  %v1038_v8 = vunpack.c.l.bf16 %v1595_v2  ;;  %v1039_v9 = vunpack.c.h.bf16 %v1595_v2  ;;  %v1612_v36 = vld [vmem:[%s2212_s0 + $0x188] sm:$0xff]   ;;  %v1042_v39 = vunpack.c.l.bf16 %v1596_v26  ;;  %v1043_v40 = vunpack.c.h.bf16 %v1596_v26 }
   0x5   :  { %v1627_v10 = vld [vmem:[%s2212_s0 + $0x200] sm:$0xff]   ;;  %v1102_v12 = vunpack.c.l.bf16 %v1611_v7  ;;  %v1103_v13 = vunpack.c.h.bf16 %v1611_v7  ;;  %v584_v14 = vmax.f32 %v910_v3, %v974_v5  ;;  %v592_v15 = vmax.f32 %v911_v4, %v975_v6  ;;  %v1628_v41 = vld [vmem:[%s2212_s0 + $0x208] sm:$0xff]   ;;  %v1597_v7 = vld [vmem:[%s2212_s0 + $0x110] sm:$0xff]  }
   0x6   :  { %v1643_v11 = vld [vmem:[%s2212_s0 + $0x280] sm:$0xff]   ;;  %v1166_v18 = vunpack.c.l.bf16 %v1627_v10  ;;  %v1167_v19 = vunpack.c.h.bf16 %v1627_v10  ;;  %v1644_v46 = vld [vmem:[%s2212_s0 + $0x288] sm:$0xff]   ;;  %v1106_v47 = vunpack.c.l.bf16 %v1612_v36  ;;  %v1107_v48 = vunpack.c.h.bf16 %v1612_v36 }
   0x7   :  { %v1659_v20 = vld [vmem:[%s2212_s0 + $0x300] sm:$0xff]   ;;  %v1230_v21 = vunpack.c.l.bf16 %v1643_v11  ;;  %v1231_v22 = vunpack.c.h.bf16 %v1643_v11  ;;  %v585_v24 = vmax.f32 %v584_v14, %v1038_v8  ;;  %v593_v25 = vmax.f32 %v592_v15, %v1039_v9  ;;  %v1660_v49 = vld [vmem:[%s2212_s0 + $0x308] sm:$0xff]  }
   0x8   :  { %v1675_v23 = vld [vmem:[%s2212_s0 + $0x380] sm:$0xff]   ;;  %v1294_v32 = vunpack.c.l.bf16 %v1659_v20  ;;  %v1295_v33 = vunpack.c.h.bf16 %v1659_v20  ;;  %v600_v50 = vmax.f32 %v914_v28, %v978_v30  ;;  %v608_v51 = vmax.f32 %v915_v29, %v979_v31  ;;  %v1676_v2 = vld [vmem:[%s2212_s0 + $0x388] sm:$0xff]   ;;  %v1661_v30 = vld [vmem:[%s2212_s0 + $0x310] sm:$0xff]  }
   0x9   :  { %v1691_v27 = vld [vmem:[%s2212_s0 + $0x400] sm:$0xff]   ;;  %v586_v34 = vmax.f32 %v585_v24, %v1102_v12  ;;  %v594_v35 = vmax.f32 %v593_v25, %v1103_v13  ;;  %v1358_v37 = vunpack.c.l.bf16 %v1675_v23  ;;  %v1359_v38 = vunpack.c.h.bf16 %v1675_v23  ;;  %v1692_v10 = vld [vmem:[%s2212_s0 + $0x408] sm:$0xff]   ;;  %v1613_v13 = vld [vmem:[%s2212_s0 + $0x190] sm:$0xff]  }
   0xa   :  { %v1422_v42 = vunpack.c.l.bf16 %v1691_v27  ;;  %v1423_v43 = vunpack.c.h.bf16 %v1691_v27  ;;  %v1170_v54 = vunpack.c.l.bf16 %v1628_v41  ;;  %v1171_v55 = vunpack.c.h.bf16 %v1628_v41  ;;  %v1645_v27 = vld [vmem:[%s2212_s0 + $0x290] sm:$0xff]  }
   0xb   :  { %v587_v44 = vmax.f32 %v586_v34, %v1166_v18  ;;  %v595_v45 = vmax.f32 %v594_v35, %v1167_v19  ;;  %v1234_v57 = vunpack.c.l.bf16 %v1644_v46  ;;  %v1235_v58 = vunpack.c.h.bf16 %v1644_v46 }
   0xc   :  { %v601_v59 = vmax.f32 %v600_v50, %v1042_v39  ;;  %v609_v60 = vmax.f32 %v608_v51, %v1043_v40  ;;  %v1298_v0 = vunpack.c.l.bf16 %v1660_v49  ;;  %v1299_v1 = vunpack.c.h.bf16 %v1660_v49 }
   0xd   :  { %v588_v52 = vmax.f32 %v587_v44, %v1230_v21  ;;  %v596_v53 = vmax.f32 %v595_v45, %v1231_v22  ;;  %v918_v5 = vunpack.c.l.bf16 %v1565_v56  ;;  %v919_v6 = vunpack.c.h.bf16 %v1565_v56  ;;  %v1629_v22 = vld [vmem:[%s2212_s0 + $0x210] sm:$0xff]  }
   0xe   :  { %v602_v3 = vmax.f32 %v601_v59, %v1106_v47  ;;  %v610_v4 = vmax.f32 %v609_v60, %v1107_v48  ;;  %v982_v11 = vunpack.c.l.bf16 %v1581_v61  ;;  %v983_v12 = vunpack.c.h.bf16 %v1581_v61  ;;  %v1677_v47 = vld [vmem:[%s2212_s0 + $0x390] sm:$0xff]  }
   0xf   :  { %v589_v62 = vmax.f32 %v588_v52, %v1294_v32  ;;  %v597_v63 = vmax.f32 %v596_v53, %v1295_v33  ;;  %v1362_v14 = vunpack.c.l.bf16 %v1676_v2  ;;  %v1363_v15 = vunpack.c.h.bf16 %v1676_v2  ;;  %v1598_v52 = vld [vmem:[%s2212_s0 + $0x118] sm:$0xff]  }
  0x10   :  { %v603_v16 = vmax.f32 %v602_v3, %v1170_v54  ;;  %v611_v17 = vmax.f32 %v610_v4, %v1171_v55  ;;  %v1046_v20 = vunpack.c.l.bf16 %v1597_v7  ;;  %v1047_v21 = vunpack.c.h.bf16 %v1597_v7  ;;  %v1693_v55 = vld [vmem:[%s2212_s0 + $0x410] sm:$0xff]   ;;  %v1630_v3 = vld [vmem:[%s2212_s0 + $0x218] sm:$0xff]  }
  0x11   :  { %v590_v8 = vmax.f32 %v589_v62, %v1358_v37  ;;  %v598_v9 = vmax.f32 %v597_v63, %v1359_v38  ;;  %v1426_v23 = vunpack.c.l.bf16 %v1692_v10  ;;  %v1110_v26 = vunpack.c.l.bf16 %v1613_v13  ;;  %v1566_v37 = vld [vmem:[%s2212_s0 + $0x18] sm:$0xff]  }
  0x12   :  { %v604_v24 = vmax.f32 %v603_v16, %v1234_v57  ;;  %v612_v25 = vmax.f32 %v611_v17, %v1235_v58  ;;  %v1111_v29 = vunpack.c.h.bf16 %v1613_v13  ;;  %v616_v31 = vmax.f32 %v918_v5, %v982_v11  ;;  %v1614_v62 = vld [vmem:[%s2212_s0 + $0x198] sm:$0xff]  }
  0x13   :  { %v591_v18 = vmax.f32 %v590_v8, %v1422_v42  ;;  %v599_v19 = vmax.f32 %v598_v9, %v1423_v43  ;;  %v624_v32 = vmax.f32 %v919_v6, %v983_v12  ;;  %v1427_v33 = vunpack.c.h.bf16 %v1692_v10  ;;  %v1582_v42 = vld [vmem:[%s2212_s0 + $0x98] sm:$0xff]  }
  0x14   :  { %v605_v34 = vmax.f32 %v604_v24, %v1298_v0  ;;  %v613_v35 = vmax.f32 %v612_v25, %v1299_v1  ;;  %v1174_v36 = vunpack.c.l.bf16 %v1629_v22  ;;  %v1175_v38 = vunpack.c.h.bf16 %v1629_v22  ;;  %v1646_v8 = vld [vmem:[%s2212_s0 + $0x298] sm:$0xff]  }
  0x15   :  { %v1487_v28 = vpack.c.bf16 %v599_v19, %v591_v18  ;;  %v1238_v39 = vunpack.c.l.bf16 %v1645_v27  ;;  %v617_v40 = vmax.f32 %v616_v31, %v1046_v20  ;;  %v625_v41 = vmax.f32 %v624_v32, %v1047_v21  ;;  %v1662_v11 = vld [vmem:[%s2212_s0 + $0x318] sm:$0xff]   ;;  %v1567_v18 = vld [vmem:[%s2212_s0 + $0x20] sm:$0xff]  }
  0x16   :  { %v606_v43 = vmax.f32 %v605_v34, %v1362_v14  ;;  %v614_v44 = vmax.f32 %v613_v35, %v1363_v15  ;;  %v1239_v45 = vunpack.c.h.bf16 %v1645_v27  ;;  %v1302_v46 = vunpack.c.l.bf16 %v1661_v30  ;;  %v1583_v19 = vld [vmem:[%s2212_s0 + $0xa0] sm:$0xff]  }
  0x17   :  { %1488 = vst [vmem:[%s2213_s1] sm:$0xff] %v1487_v28   ;;  %v618_v48 = vmax.f32 %v617_v40, %v1110_v26  ;;  %v626_v49 = vmax.f32 %v625_v41, %v1111_v29  ;;  %v922_v50 = vunpack.c.l.bf16 %v1566_v37  ;;  %v923_v51 = vunpack.c.h.bf16 %v1566_v37  ;;  %v1678_v28 = vld [vmem:[%s2212_s0 + $0x398] sm:$0xff]   ;;  %v1599_v29 = vld [vmem:[%s2212_s0 + $0x120] sm:$0xff]  }
  0x18   :  { %v607_v53 = vmax.f32 %v606_v43, %v1426_v23  ;;  %v615_v54 = vmax.f32 %v614_v44, %v1427_v33  ;;  %v986_v56 = vunpack.c.l.bf16 %v1582_v42  ;;  %v987_v57 = vunpack.c.h.bf16 %v1582_v42  ;;  %v1631_v44 = vld [vmem:[%s2212_s0 + $0x220] sm:$0xff]  }
  0x19   :  { %v1303_v58 = vunpack.c.h.bf16 %v1661_v30  ;;  %v1366_v59 = vunpack.c.l.bf16 %v1677_v47  ;;  %v619_v60 = vmax.f32 %v618_v48, %v1174_v36  ;;  %v627_v61 = vmax.f32 %v626_v49, %v1175_v38  ;;  %v1694_v30 = vld [vmem:[%s2212_s0 + $0x418] sm:$0xff]  }
  0x1a   :  { %v1492_v63 = vpack.c.bf16 %v615_v54, %v607_v53  ;;  %v1367_v0 = vunpack.c.h.bf16 %v1677_v47  ;;  %v1050_v1 = vunpack.c.l.bf16 %v1598_v52  ;;  %v1051_v2 = vunpack.c.h.bf16 %v1598_v52  ;;  %v1647_v52 = vld [vmem:[%s2212_s0 + $0x2a0] sm:$0xff]  }
  0x1b   :  { %v1430_v4 = vunpack.c.l.bf16 %v1693_v55  ;;  %v1431_v5 = vunpack.c.h.bf16 %v1693_v55  ;;  %v620_v6 = vmax.f32 %v619_v60, %v1238_v39  ;;  %v628_v7 = vmax.f32 %v627_v61, %v1239_v45  ;;  %v1615_v39 = vld [vmem:[%s2212_s0 + $0x1a0] sm:$0xff]  }
  0x1c   :  { %1707 = vst [vmem:[%s2213_s1 + $0x8] sm:$0xff] %v1492_v63   ;;  %v1114_v9 = vunpack.c.l.bf16 %v1614_v62  ;;  %v1115_v10 = vunpack.c.h.bf16 %v1614_v62  ;;  %v632_v12 = vmax.f32 %v922_v50, %v986_v56  ;;  %v640_v13 = vmax.f32 %v923_v51, %v987_v57  ;;  %v1663_v53 = vld [vmem:[%s2212_s0 + $0x320] sm:$0xff]  }
  0x1d   :  { %v621_v14 = vmax.f32 %v620_v6, %v1302_v46  ;;  %v629_v15 = vmax.f32 %v628_v7, %v1303_v58  ;;  %v1178_v16 = vunpack.c.l.bf16 %v1630_v3  ;;  %v1179_v17 = vunpack.c.h.bf16 %v1630_v3  ;;  %v1679_v7 = vld [vmem:[%s2212_s0 + $0x3a0] sm:$0xff]  }
  0x1e   :  { %v1242_v20 = vunpack.c.l.bf16 %v1646_v8  ;;  %v1243_v21 = vunpack.c.h.bf16 %v1646_v8  ;;  %v633_v22 = vmax.f32 %v632_v12, %v1050_v1  ;;  %v641_v23 = vmax.f32 %v640_v13, %v1051_v2 }
  0x1f   :  { %v622_v24 = vmax.f32 %v621_v14, %v1366_v59  ;;  %v630_v25 = vmax.f32 %v629_v15, %v1367_v0  ;;  %v1306_v26 = vunpack.c.l.bf16 %v1662_v11  ;;  %v1307_v27 = vunpack.c.h.bf16 %v1662_v11  ;;  %v1568_v59 = vld [vmem:[%s2212_s0 + $0x28] sm:$0xff]  }
  0x20   :  { %v634_v31 = vmax.f32 %v633_v22, %v1114_v9  ;;  %v642_v32 = vmax.f32 %v641_v23, %v1115_v10  ;;  %v926_v33 = vunpack.c.l.bf16 %v1567_v18  ;;  %v990_v34 = vunpack.c.l.bf16 %v1583_v19  ;;  %v1584_v0 = vld [vmem:[%s2212_s0 + $0xa8] sm:$0xff]  }
  0x21   :  { %v623_v35 = vmax.f32 %v622_v24, %v1430_v4  ;;  %v631_v36 = vmax.f32 %v630_v25, %v1431_v5  ;;  %v927_v37 = vunpack.c.h.bf16 %v1567_v18  ;;  %v991_v38 = vunpack.c.h.bf16 %v1583_v19  ;;  %v1600_v10 = vld [vmem:[%s2212_s0 + $0x128] sm:$0xff]  }
  0x22   :  { %v1370_v40 = vunpack.c.l.bf16 %v1678_v28  ;;  %v635_v41 = vmax.f32 %v634_v31, %v1178_v16  ;;  %v643_v42 = vmax.f32 %v642_v32, %v1179_v17  ;;  %v1054_v43 = vunpack.c.l.bf16 %v1599_v29  ;;  %v1616_v15 = vld [vmem:[%s2212_s0 + $0x1a8] sm:$0xff]  }
  0x23   :  { %v1497_v45 = vpack.c.bf16 %v631_v36, %v623_v35  ;;  %v1371_v46 = vunpack.c.h.bf16 %v1678_v28  ;;  %v1434_v47 = vunpack.c.l.bf16 %v1694_v30  ;;  %v1055_v48 = vunpack.c.h.bf16 %v1599_v29  ;;  %v1632_v25 = vld [vmem:[%s2212_s0 + $0x228] sm:$0xff]  }
  0x24   :  { %v636_v49 = vmax.f32 %v635_v41, %v1242_v20  ;;  %v644_v50 = vmax.f32 %v643_v42, %v1243_v21  ;;  %v1118_v51 = vunpack.c.l.bf16 %v1615_v39  ;;  %v648_v54 = vmax.f32 %v926_v33, %v990_v34  ;;  %v1695_v21 = vld [vmem:[%s2212_s0 + $0x420] sm:$0xff]   ;;  %v1648_v32 = vld [vmem:[%s2212_s0 + $0x2a8] sm:$0xff]  }
  0x25   :  { %1708 = vst [vmem:[%s2213_s1 + $0x10] sm:$0xff] %v1497_v45   ;;  %v1435_v55 = vunpack.c.h.bf16 %v1694_v30  ;;  %v1119_v56 = vunpack.c.h.bf16 %v1615_v39  ;;  %v1182_v57 = vunpack.c.l.bf16 %v1631_v44  ;;  %v656_v58 = vmax.f32 %v927_v37, %v991_v38  ;;  %v1664_v33 = vld [vmem:[%s2212_s0 + $0x328] sm:$0xff]   ;;  %v1585_v45 = vld [vmem:[%s2212_s0 + $0xb0] sm:$0xff]  }
  0x26   :  { %v637_v60 = vmax.f32 %v636_v49, %v1306_v26  ;;  %v645_v61 = vmax.f32 %v644_v50, %v1307_v27  ;;  %v1183_v62 = vunpack.c.h.bf16 %v1631_v44  ;;  %v649_v63 = vmax.f32 %v648_v54, %v1054_v43 }
  0x27   :  { %v1246_v1 = vunpack.c.l.bf16 %v1647_v52  ;;  %v1247_v2 = vunpack.c.h.bf16 %v1647_v52  ;;  %v1310_v3 = vunpack.c.l.bf16 %v1663_v53  ;;  %v657_v4 = vmax.f32 %v656_v58, %v1055_v48 }
  0x28   :  { %v638_v5 = vmax.f32 %v637_v60, %v1370_v40  ;;  %v646_v6 = vmax.f32 %v645_v61, %v1371_v46  ;;  %v650_v8 = vmax.f32 %v649_v63, %v1118_v51  ;;  %v930_v9 = vunpack.c.l.bf16 %v1568_v59  ;;  %v1569_v40 = vld [vmem:[%s2212_s0 + $0x30] sm:$0xff]   ;;  %v1680_v51 = vld [vmem:[%s2212_s0 + $0x3a8] sm:$0xff]  }
  0x29   :  { %v658_v11 = vmax.f32 %v657_v4, %v1119_v56  ;;  %v931_v12 = vunpack.c.h.bf16 %v1568_v59  ;;  %v994_v13 = vunpack.c.l.bf16 %v1584_v0  ;;  %v995_v14 = vunpack.c.h.bf16 %v1584_v0 }
  0x2a   :  { %v639_v16 = vmax.f32 %v638_v5, %v1434_v47  ;;  %v647_v17 = vmax.f32 %v646_v6, %v1435_v55  ;;  %v1311_v18 = vunpack.c.h.bf16 %v1663_v53  ;;  %v651_v19 = vmax.f32 %v650_v8, %v1182_v57  ;;  %v1601_v55 = vld [vmem:[%s2212_s0 + $0x130] sm:$0xff]   ;;  %v1696_v57 = vld [vmem:[%s2212_s0 + $0x428] sm:$0xff]  }
  0x2b   :  { %v1374_v20 = vunpack.c.l.bf16 %v1679_v7  ;;  %v659_v22 = vmax.f32 %v658_v11, %v1183_v62  ;;  %v1058_v23 = vunpack.c.l.bf16 %v1600_v10  ;;  %v1059_v24 = vunpack.c.h.bf16 %v1600_v10  ;;  %v1633_v6 = vld [vmem:[%s2212_s0 + $0x230] sm:$0xff]  }
  0x2c   :  { %v1502_v26 = vpack.c.bf16 %v647_v17, %v639_v16  ;;  %v1375_v27 = vunpack.c.h.bf16 %v1679_v7  ;;  %v652_v28 = vmax.f32 %v651_v19, %v1246_v1  ;;  %v1122_v29 = vunpack.c.l.bf16 %v1616_v15  ;;  %v1617_v1 = vld [vmem:[%s2212_s0 + $0x1b0] sm:$0xff]  }
  0x2d   :  { %v660_v30 = vmax.f32 %v659_v22, %v1247_v2  ;;  %v1123_v31 = vunpack.c.h.bf16 %v1616_v15  ;;  %v664_v34 = vmax.f32 %v930_v9, %v994_v13  ;;  %v672_v35 = vmax.f32 %v931_v12, %v995_v14  ;;  %v1649_v11 = vld [vmem:[%s2212_s0 + $0x2b0] sm:$0xff]  }
  0x2e   :  { %1709 = vst [vmem:[%s2213_s1 + $0x18] sm:$0xff] %v1502_v26   ;;  %v1438_v36 = vunpack.c.l.bf16 %v1695_v21  ;;  %v1439_v37 = vunpack.c.h.bf16 %v1695_v21  ;;  %v653_v38 = vmax.f32 %v652_v28, %v1310_v3  ;;  %v1186_v39 = vunpack.c.l.bf16 %v1632_v25  ;;  %v1665_v14 = vld [vmem:[%s2212_s0 + $0x330] sm:$0xff]   ;;  %v1570_v21 = vld [vmem:[%s2212_s0 + $0x38] sm:$0xff]  }
  0x2f   :  { %v661_v41 = vmax.f32 %v660_v30, %v1311_v18  ;;  %v1187_v42 = vunpack.c.h.bf16 %v1632_v25  ;;  %v665_v43 = vmax.f32 %v664_v34, %v1058_v23  ;;  %v673_v44 = vmax.f32 %v672_v35, %v1059_v24  ;;  %v1586_v26 = vld [vmem:[%s2212_s0 + $0xb8] sm:$0xff]  }
  0x30   :  { %v654_v46 = vmax.f32 %v653_v38, %v1374_v20  ;;  %v1250_v47 = vunpack.c.l.bf16 %v1648_v32  ;;  %v1251_v48 = vunpack.c.h.bf16 %v1648_v32  ;;  %v1314_v49 = vunpack.c.l.bf16 %v1664_v33 }
  0x31   :  { %v662_v50 = vmax.f32 %v661_v41, %v1375_v27  ;;  %v666_v52 = vmax.f32 %v665_v43, %v1122_v29  ;;  %v674_v53 = vmax.f32 %v673_v44, %v1123_v31  ;;  %v934_v54 = vunpack.c.l.bf16 %v1569_v40  ;;  %v1681_v31 = vld [vmem:[%s2212_s0 + $0x3b0] sm:$0xff]  }
  0x32   :  { %v655_v56 = vmax.f32 %v654_v46, %v1438_v36  ;;  %v935_v58 = vunpack.c.h.bf16 %v1569_v40  ;;  %v998_v59 = vunpack.c.l.bf16 %v1585_v45  ;;  %v999_v60 = vunpack.c.h.bf16 %v1585_v45  ;;  %v1602_v36 = vld [vmem:[%s2212_s0 + $0x138] sm:$0xff]  }
  0x33   :  { %v663_v61 = vmax.f32 %v662_v50, %v1439_v37  ;;  %v1315_v62 = vunpack.c.h.bf16 %v1664_v33  ;;  %v667_v63 = vmax.f32 %v666_v52, %v1186_v39  ;;  %v675_v0 = vmax.f32 %v674_v53, %v1187_v42  ;;  %v1697_v39 = vld [vmem:[%s2212_s0 + $0x430] sm:$0xff]   ;;  %v1618_v46 = vld [vmem:[%s2212_s0 + $0x1b8] sm:$0xff]  }
  0x34   :  { %v1378_v2 = vunpack.c.l.bf16 %v1680_v51  ;;  %v1379_v3 = vunpack.c.h.bf16 %v1680_v51  ;;  %v1062_v4 = vunpack.c.l.bf16 %v1601_v55  ;;  %v1063_v5 = vunpack.c.h.bf16 %v1601_v55  ;;  %v1634_v51 = vld [vmem:[%s2212_s0 + $0x238] sm:$0xff]  }
  0x35   :  { %v1507_v7 = vpack.c.bf16 %v663_v61, %v655_v56  ;;  %v1442_v8 = vunpack.c.l.bf16 %v1696_v57  ;;  %v668_v9 = vmax.f32 %v667_v63, %v1250_v47  ;;  %v676_v10 = vmax.f32 %v675_v0, %v1251_v48  ;;  %v1650_v56 = vld [vmem:[%s2212_s0 + $0x2b8] sm:$0xff]  }
  0x36   :  { %v1126_v12 = vunpack.c.l.bf16 %v1617_v1  ;;  %v1127_v13 = vunpack.c.h.bf16 %v1617_v1  ;;  %v680_v15 = vmax.f32 %v934_v54, %v998_v59  ;;  %v688_v16 = vmax.f32 %v935_v58, %v999_v60  ;;  %v1666_v59 = vld [vmem:[%s2212_s0 + $0x338] sm:$0xff]  }
  0x37   :  { %1710 = vst [vmem:[%s2213_s1 + $0x20] sm:$0xff] %v1507_v7   ;;  %v1443_v17 = vunpack.c.h.bf16 %v1696_v57  ;;  %v669_v18 = vmax.f32 %v668_v9, %v1314_v49  ;;  %v677_v19 = vmax.f32 %v676_v10, %v1315_v62  ;;  %v1190_v20 = vunpack.c.l.bf16 %v1633_v6 }
  0x38   :  { %v1191_v22 = vunpack.c.h.bf16 %v1633_v6  ;;  %v1254_v23 = vunpack.c.l.bf16 %v1649_v11  ;;  %v681_v24 = vmax.f32 %v680_v15, %v1062_v4  ;;  %v689_v25 = vmax.f32 %v688_v16, %v1063_v5 }
  0x39   :  { %v670_v27 = vmax.f32 %v669_v18, %v1378_v2  ;;  %v678_v28 = vmax.f32 %v677_v19, %v1379_v3  ;;  %v1255_v29 = vunpack.c.h.bf16 %v1649_v11  ;;  %v1318_v30 = vunpack.c.l.bf16 %v1665_v14  ;;  %v1571_v2 = vld [vmem:[%s2212_s0 + $0x40] sm:$0xff]  }
  0x3a   :  { %v682_v32 = vmax.f32 %v681_v24, %v1126_v12  ;;  %v690_v33 = vmax.f32 %v689_v25, %v1127_v13  ;;  %v938_v34 = vunpack.c.l.bf16 %v1570_v21  ;;  %v939_v35 = vunpack.c.h.bf16 %v1570_v21  ;;  %v1587_v3 = vld [vmem:[%s2212_s0 + $0xc0] sm:$0xff]   ;;  %v1682_v12 = vld [vmem:[%s2212_s0 + $0x3b8] sm:$0xff]  }
  0x3b   :  { %v671_v37 = vmax.f32 %v670_v27, %v1442_v8  ;;  %v679_v38 = vmax.f32 %v678_v28, %v1443_v17  ;;  %v1002_v40 = vunpack.c.l.bf16 %v1586_v26  ;;  %v1003_v41 = vunpack.c.h.bf16 %v1586_v26  ;;  %v1603_v13 = vld [vmem:[%s2212_s0 + $0x140] sm:$0xff]  }
  0x3c   :  { %v1319_v42 = vunpack.c.h.bf16 %v1665_v14  ;;  %v1382_v43 = vunpack.c.l.bf16 %v1681_v31  ;;  %v683_v44 = vmax.f32 %v682_v32, %v1190_v20  ;;  %v691_v45 = vmax.f32 %v690_v33, %v1191_v22  ;;  %v1698_v14 = vld [vmem:[%s2212_s0 + $0x438] sm:$0xff]   ;;  %v1635_v28 = vld [vmem:[%s2212_s0 + $0x240] sm:$0xff]  }
  0x3d   :  { %v1512_v47 = vpack.c.bf16 %v679_v38, %v671_v37  ;;  %v1383_v48 = vunpack.c.h.bf16 %v1681_v31  ;;  %v1066_v49 = vunpack.c.l.bf16 %v1602_v36  ;;  %v1067_v50 = vunpack.c.h.bf16 %v1602_v36  ;;  %v1651_v36 = vld [vmem:[%s2212_s0 + $0x2c0] sm:$0xff]  }
  0x3e   :  { %v1446_v52 = vunpack.c.l.bf16 %v1697_v39  ;;  %v1447_v53 = vunpack.c.h.bf16 %v1697_v39  ;;  %v684_v54 = vmax.f32 %v683_v44, %v1254_v23  ;;  %v692_v55 = vmax.f32 %v691_v45, %v1255_v29  ;;  %v1619_v23 = vld [vmem:[%s2212_s0 + $0x1c0] sm:$0xff]  }
  0x3f   :  { %1711 = vst [vmem:[%s2213_s1 + $0x28] sm:$0xff] %v1512_v47   ;;  %v1130_v57 = vunpack.c.l.bf16 %v1618_v46  ;;  %v1131_v58 = vunpack.c.h.bf16 %v1618_v46  ;;  %v696_v60 = vmax.f32 %v938_v34, %v1002_v40  ;;  %v704_v61 = vmax.f32 %v939_v35, %v1003_v41  ;;  %v1667_v37 = vld [vmem:[%s2212_s0 + $0x340] sm:$0xff]  }
  0x40   :  { %v685_v62 = vmax.f32 %v684_v54, %v1318_v30  ;;  %v693_v63 = vmax.f32 %v692_v55, %v1319_v42  ;;  %v1194_v0 = vunpack.c.l.bf16 %v1634_v51  ;;  %v1195_v1 = vunpack.c.h.bf16 %v1634_v51  ;;  %v1683_v55 = vld [vmem:[%s2212_s0 + $0x3c0] sm:$0xff]  }
  0x41   :  { %v1258_v4 = vunpack.c.l.bf16 %v1650_v56  ;;  %v1259_v5 = vunpack.c.h.bf16 %v1650_v56  ;;  %v697_v6 = vmax.f32 %v696_v60, %v1066_v49  ;;  %v705_v7 = vmax.f32 %v704_v61, %v1067_v50 }
  0x42   :  { %v686_v8 = vmax.f32 %v685_v62, %v1382_v43  ;;  %v694_v9 = vmax.f32 %v693_v63, %v1383_v48  ;;  %v1322_v10 = vunpack.c.l.bf16 %v1666_v59  ;;  %v1323_v11 = vunpack.c.h.bf16 %v1666_v59  ;;  %v1572_v43 = vld [vmem:[%s2212_s0 + $0x48] sm:$0xff]  }
  0x43   :  { %v698_v15 = vmax.f32 %v697_v6, %v1130_v57  ;;  %v706_v16 = vmax.f32 %v705_v7, %v1131_v58  ;;  %v942_v17 = vunpack.c.l.bf16 %v1571_v2  ;;  %v1006_v18 = vunpack.c.l.bf16 %v1587_v3  ;;  %v1588_v48 = vld [vmem:[%s2212_s0 + $0xc8] sm:$0xff]  }
  0x44   :  { %v687_v19 = vmax.f32 %v686_v8, %v1446_v52  ;;  %v695_v20 = vmax.f32 %v694_v9, %v1447_v53  ;;  %v943_v21 = vunpack.c.h.bf16 %v1571_v2  ;;  %v1007_v22 = vunpack.c.h.bf16 %v1587_v3  ;;  %v1604_v58 = vld [vmem:[%s2212_s0 + $0x148] sm:$0xff]  }
  0x45   :  { %v1386_v24 = vunpack.c.l.bf16 %v1682_v12  ;;  %v699_v25 = vmax.f32 %v698_v15, %v1194_v0  ;;  %v707_v26 = vmax.f32 %v706_v16, %v1195_v1  ;;  %v1070_v27 = vunpack.c.l.bf16 %v1603_v13  ;;  %v1620_v63 = vld [vmem:[%s2212_s0 + $0x1c8] sm:$0xff]  }
  0x46   :  { %v1517_v29 = vpack.c.bf16 %v695_v20, %v687_v19  ;;  %v1387_v30 = vunpack.c.h.bf16 %v1682_v12  ;;  %v1450_v31 = vunpack.c.l.bf16 %v1698_v14  ;;  %v1071_v32 = vunpack.c.h.bf16 %v1603_v13  ;;  %v1636_v9 = vld [vmem:[%s2212_s0 + $0x248] sm:$0xff]  }
  0x47   :  { %v700_v33 = vmax.f32 %v699_v25, %v1258_v4  ;;  %v708_v34 = vmax.f32 %v707_v26, %v1259_v5  ;;  %v1134_v35 = vunpack.c.l.bf16 %v1619_v23  ;;  %v712_v38 = vmax.f32 %v942_v17, %v1006_v18  ;;  %v1699_v5 = vld [vmem:[%s2212_s0 + $0x440] sm:$0xff]   ;;  %v1652_v16 = vld [vmem:[%s2212_s0 + $0x2c8] sm:$0xff]  }
  0x48   :  { %1712 = vst [vmem:[%s2213_s1 + $0x30] sm:$0xff] %v1517_v29   ;;  %v1451_v39 = vunpack.c.h.bf16 %v1698_v14  ;;  %v1135_v40 = vunpack.c.h.bf16 %v1619_v23  ;;  %v1198_v41 = vunpack.c.l.bf16 %v1635_v28  ;;  %v720_v42 = vmax.f32 %v943_v21, %v1007_v22  ;;  %v1668_v17 = vld [vmem:[%s2212_s0 + $0x348] sm:$0xff]   ;;  %v1589_v29 = vld [vmem:[%s2212_s0 + $0xd0] sm:$0xff]  }
  0x49   :  { %v701_v44 = vmax.f32 %v700_v33, %v1322_v10  ;;  %v709_v45 = vmax.f32 %v708_v34, %v1323_v11  ;;  %v1199_v46 = vunpack.c.h.bf16 %v1635_v28  ;;  %v713_v47 = vmax.f32 %v712_v38, %v1070_v27 }
  0x4a   :  { %v1262_v49 = vunpack.c.l.bf16 %v1651_v36  ;;  %v1263_v50 = vunpack.c.h.bf16 %v1651_v36  ;;  %v1326_v51 = vunpack.c.l.bf16 %v1667_v37  ;;  %v721_v52 = vmax.f32 %v720_v42, %v1071_v32 }
  0x4b   :  { %v702_v53 = vmax.f32 %v701_v44, %v1386_v24  ;;  %v710_v54 = vmax.f32 %v709_v45, %v1387_v30  ;;  %v714_v56 = vmax.f32 %v713_v47, %v1134_v35  ;;  %v946_v57 = vunpack.c.l.bf16 %v1572_v43  ;;  %v1573_v24 = vld [vmem:[%s2212_s0 + $0x50] sm:$0xff]   ;;  %v1684_v35 = vld [vmem:[%s2212_s0 + $0x3c8] sm:$0xff]  }
  0x4c   :  { %v722_v59 = vmax.f32 %v721_v52, %v1135_v40  ;;  %v947_v60 = vunpack.c.h.bf16 %v1572_v43  ;;  %v1010_v61 = vunpack.c.l.bf16 %v1588_v48  ;;  %v1011_v62 = vunpack.c.h.bf16 %v1588_v48 }
  0x4d   :  { %v703_v0 = vmax.f32 %v702_v53, %v1450_v31  ;;  %v711_v1 = vmax.f32 %v710_v54, %v1451_v39  ;;  %v1327_v2 = vunpack.c.h.bf16 %v1667_v37  ;;  %v715_v3 = vmax.f32 %v714_v56, %v1198_v41  ;;  %v1605_v39 = vld [vmem:[%s2212_s0 + $0x150] sm:$0xff]   ;;  %v1700_v41 = vld [vmem:[%s2212_s0 + $0x448] sm:$0xff]  }
  0x4e   :  { %v1390_v4 = vunpack.c.l.bf16 %v1683_v55  ;;  %v723_v6 = vmax.f32 %v722_v59, %v1199_v46  ;;  %v1074_v7 = vunpack.c.l.bf16 %v1604_v58  ;;  %v1075_v8 = vunpack.c.h.bf16 %v1604_v58  ;;  %v1637_v54 = vld [vmem:[%s2212_s0 + $0x250] sm:$0xff]  }
  0x4f   :  { %v1522_v10 = vpack.c.bf16 %v711_v1, %v703_v0  ;;  %v1391_v11 = vunpack.c.h.bf16 %v1683_v55  ;;  %v716_v12 = vmax.f32 %v715_v3, %v1262_v49  ;;  %v1138_v13 = vunpack.c.l.bf16 %v1620_v63  ;;  %v1621_v49 = vld [vmem:[%s2212_s0 + $0x1d0] sm:$0xff]  }
  0x50   :  { %v724_v14 = vmax.f32 %v723_v6, %v1263_v50  ;;  %v1139_v15 = vunpack.c.h.bf16 %v1620_v63  ;;  %v728_v18 = vmax.f32 %v946_v57, %v1010_v61  ;;  %v736_v19 = vmax.f32 %v947_v60, %v1011_v62  ;;  %v1653_v59 = vld [vmem:[%s2212_s0 + $0x2d0] sm:$0xff]  }
  0x51   :  { %1713 = vst [vmem:[%s2213_s1 + $0x38] sm:$0xff] %v1522_v10   ;;  %v1454_v20 = vunpack.c.l.bf16 %v1699_v5  ;;  %v1455_v21 = vunpack.c.h.bf16 %v1699_v5  ;;  %v717_v22 = vmax.f32 %v716_v12, %v1326_v51  ;;  %v1202_v23 = vunpack.c.l.bf16 %v1636_v9  ;;  %v1669_v62 = vld [vmem:[%s2212_s0 + $0x350] sm:$0xff]   ;;  %v1574_v5 = vld [vmem:[%s2212_s0 + $0x58] sm:$0xff]  }
  0x52   :  { %v725_v25 = vmax.f32 %v724_v14, %v1327_v2  ;;  %v1203_v26 = vunpack.c.h.bf16 %v1636_v9  ;;  %v729_v27 = vmax.f32 %v728_v18, %v1074_v7  ;;  %v737_v28 = vmax.f32 %v736_v19, %v1075_v8  ;;  %v1590_v10 = vld [vmem:[%s2212_s0 + $0xd8] sm:$0xff]  }
  0x53   :  { %v718_v30 = vmax.f32 %v717_v22, %v1390_v4  ;;  %v1266_v31 = vunpack.c.l.bf16 %v1652_v16  ;;  %v1267_v32 = vunpack.c.h.bf16 %v1652_v16  ;;  %v1330_v33 = vunpack.c.l.bf16 %v1668_v17 }
  0x54   :  { %v726_v34 = vmax.f32 %v725_v25, %v1391_v11  ;;  %v730_v36 = vmax.f32 %v729_v27, %v1138_v13  ;;  %v738_v37 = vmax.f32 %v737_v28, %v1139_v15  ;;  %v950_v38 = vunpack.c.l.bf16 %v1573_v24  ;;  %v1685_v15 = vld [vmem:[%s2212_s0 + $0x3d0] sm:$0xff]  }
  0x55   :  { %v719_v40 = vmax.f32 %v718_v30, %v1454_v20  ;;  %v951_v42 = vunpack.c.h.bf16 %v1573_v24  ;;  %v1014_v43 = vunpack.c.l.bf16 %v1589_v29  ;;  %v1015_v44 = vunpack.c.h.bf16 %v1589_v29  ;;  %v1606_v20 = vld [vmem:[%s2212_s0 + $0x158] sm:$0xff]  }
  0x56   :  { %v727_v45 = vmax.f32 %v726_v34, %v1455_v21  ;;  %v1331_v46 = vunpack.c.h.bf16 %v1668_v17  ;;  %v731_v47 = vmax.f32 %v730_v36, %v1202_v23  ;;  %v739_v48 = vmax.f32 %v738_v37, %v1203_v26  ;;  %v1701_v23 = vld [vmem:[%s2212_s0 + $0x450] sm:$0xff]   ;;  %v1622_v30 = vld [vmem:[%s2212_s0 + $0x1d8] sm:$0xff]  }
  0x57   :  { %v1394_v50 = vunpack.c.l.bf16 %v1684_v35  ;;  %v1395_v51 = vunpack.c.h.bf16 %v1684_v35  ;;  %v1078_v52 = vunpack.c.l.bf16 %v1605_v39  ;;  %v1079_v53 = vunpack.c.h.bf16 %v1605_v39  ;;  %v1638_v35 = vld [vmem:[%s2212_s0 + $0x258] sm:$0xff]  }
  0x58   :  { %v1527_v55 = vpack.c.bf16 %v727_v45, %v719_v40  ;;  %v1458_v56 = vunpack.c.l.bf16 %v1700_v41  ;;  %v732_v57 = vmax.f32 %v731_v47, %v1266_v31  ;;  %v740_v58 = vmax.f32 %v739_v48, %v1267_v32  ;;  %v1654_v40 = vld [vmem:[%s2212_s0 + $0x2d8] sm:$0xff]  }
  0x59   :  { %v1142_v60 = vunpack.c.l.bf16 %v1621_v49  ;;  %v1143_v61 = vunpack.c.h.bf16 %v1621_v49  ;;  %v744_v63 = vmax.f32 %v950_v38, %v1014_v43  ;;  %v752_v0 = vmax.f32 %v951_v42, %v1015_v44  ;;  %v1670_v43 = vld [vmem:[%s2212_s0 + $0x358] sm:$0xff]  }
  0x5a   :  { %1714 = vst [vmem:[%s2213_s1 + $0x40] sm:$0xff] %v1527_v55   ;;  %v1459_v1 = vunpack.c.h.bf16 %v1700_v41  ;;  %v733_v2 = vmax.f32 %v732_v57, %v1330_v33  ;;  %v741_v3 = vmax.f32 %v740_v58, %v1331_v46  ;;  %v1206_v4 = vunpack.c.l.bf16 %v1637_v54 }
  0x5b   :  { %v1207_v6 = vunpack.c.h.bf16 %v1637_v54  ;;  %v1270_v7 = vunpack.c.l.bf16 %v1653_v59  ;;  %v745_v8 = vmax.f32 %v744_v63, %v1078_v52  ;;  %v753_v9 = vmax.f32 %v752_v0, %v1079_v53 }
  0x5c   :  { %v734_v11 = vmax.f32 %v733_v2, %v1394_v50  ;;  %v742_v12 = vmax.f32 %v741_v3, %v1395_v51  ;;  %v1271_v13 = vunpack.c.h.bf16 %v1653_v59  ;;  %v1334_v14 = vunpack.c.l.bf16 %v1669_v62  ;;  %v1575_v50 = vld [vmem:[%s2212_s0 + $0x60] sm:$0xff]  }
  0x5d   :  { %v746_v16 = vmax.f32 %v745_v8, %v1142_v60  ;;  %v754_v17 = vmax.f32 %v753_v9, %v1143_v61  ;;  %v954_v18 = vunpack.c.l.bf16 %v1574_v5  ;;  %v955_v19 = vunpack.c.h.bf16 %v1574_v5  ;;  %v1591_v51 = vld [vmem:[%s2212_s0 + $0xe0] sm:$0xff]   ;;  %v1686_v60 = vld [vmem:[%s2212_s0 + $0x3d8] sm:$0xff]  }
  0x5e   :  { %v735_v21 = vmax.f32 %v734_v11, %v1458_v56  ;;  %v743_v22 = vmax.f32 %v742_v12, %v1459_v1  ;;  %v1018_v24 = vunpack.c.l.bf16 %v1590_v10  ;;  %v1019_v25 = vunpack.c.h.bf16 %v1590_v10  ;;  %v1607_v61 = vld [vmem:[%s2212_s0 + $0x160] sm:$0xff]  }
  0x5f   :  { %v1335_v26 = vunpack.c.h.bf16 %v1669_v62  ;;  %v1398_v27 = vunpack.c.l.bf16 %v1685_v15  ;;  %v747_v28 = vmax.f32 %v746_v16, %v1206_v4  ;;  %v755_v29 = vmax.f32 %v754_v17, %v1207_v6  ;;  %v1702_v62 = vld [vmem:[%s2212_s0 + $0x458] sm:$0xff]   ;;  %v1639_v12 = vld [vmem:[%s2212_s0 + $0x260] sm:$0xff]  }
  0x60   :  { %v1532_v31 = vpack.c.bf16 %v743_v22, %v735_v21  ;;  %v1399_v32 = vunpack.c.h.bf16 %v1685_v15  ;;  %v1082_v33 = vunpack.c.l.bf16 %v1606_v20  ;;  %v1083_v34 = vunpack.c.h.bf16 %v1606_v20  ;;  %v1655_v20 = vld [vmem:[%s2212_s0 + $0x2e0] sm:$0xff]  }
  0x61   :  { %v1462_v36 = vunpack.c.l.bf16 %v1701_v23  ;;  %v1463_v37 = vunpack.c.h.bf16 %v1701_v23  ;;  %v748_v38 = vmax.f32 %v747_v28, %v1270_v7  ;;  %v756_v39 = vmax.f32 %v755_v29, %v1271_v13  ;;  %v1623_v7 = vld [vmem:[%s2212_s0 + $0x1e0] sm:$0xff]  }
  0x62   :  { %1715 = vst [vmem:[%s2213_s1 + $0x48] sm:$0xff] %v1532_v31   ;;  %v1146_v41 = vunpack.c.l.bf16 %v1622_v30  ;;  %v1147_v42 = vunpack.c.h.bf16 %v1622_v30  ;;  %v760_v44 = vmax.f32 %v954_v18, %v1018_v24  ;;  %v768_v45 = vmax.f32 %v955_v19, %v1019_v25  ;;  %v1671_v21 = vld [vmem:[%s2212_s0 + $0x360] sm:$0xff]  }
  0x63   :  { %v749_v46 = vmax.f32 %v748_v38, %v1334_v14  ;;  %v757_v47 = vmax.f32 %v756_v39, %v1335_v26  ;;  %v1210_v48 = vunpack.c.l.bf16 %v1638_v35  ;;  %v1211_v49 = vunpack.c.h.bf16 %v1638_v35  ;;  %v1687_v39 = vld [vmem:[%s2212_s0 + $0x3e0] sm:$0xff]  }
  0x64   :  { %v1274_v52 = vunpack.c.l.bf16 %v1654_v40  ;;  %v1275_v53 = vunpack.c.h.bf16 %v1654_v40  ;;  %v761_v54 = vmax.f32 %v760_v44, %v1082_v33  ;;  %v769_v55 = vmax.f32 %v768_v45, %v1083_v34 }
  0x65   :  { %v750_v56 = vmax.f32 %v749_v46, %v1398_v27  ;;  %v758_v57 = vmax.f32 %v757_v47, %v1399_v32  ;;  %v1338_v58 = vunpack.c.l.bf16 %v1670_v43  ;;  %v1339_v59 = vunpack.c.h.bf16 %v1670_v43  ;;  %v1576_v27 = vld [vmem:[%s2212_s0 + $0x68] sm:$0xff]  }
  0x66   :  { %v762_v63 = vmax.f32 %v761_v54, %v1146_v41  ;;  %v770_v0 = vmax.f32 %v769_v55, %v1147_v42  ;;  %v958_v1 = vunpack.c.l.bf16 %v1575_v50  ;;  %v1022_v2 = vunpack.c.l.bf16 %v1591_v51  ;;  %v1592_v32 = vld [vmem:[%s2212_s0 + $0xe8] sm:$0xff]  }
  0x67   :  { %v751_v3 = vmax.f32 %v750_v56, %v1462_v36  ;;  %v759_v4 = vmax.f32 %v758_v57, %v1463_v37  ;;  %v959_v5 = vunpack.c.h.bf16 %v1575_v50  ;;  %v1023_v6 = vunpack.c.h.bf16 %v1591_v51  ;;  %v1608_v42 = vld [vmem:[%s2212_s0 + $0x168] sm:$0xff]  }
  0x68   :  { %v1402_v8 = vunpack.c.l.bf16 %v1686_v60  ;;  %v763_v9 = vmax.f32 %v762_v63, %v1210_v48  ;;  %v771_v10 = vmax.f32 %v770_v0, %v1211_v49  ;;  %v1086_v11 = vunpack.c.l.bf16 %v1607_v61  ;;  %v1624_v47 = vld [vmem:[%s2212_s0 + $0x1e8] sm:$0xff]  }
  0x69   :  { %v1537_v13 = vpack.c.bf16 %v759_v4, %v751_v3  ;;  %v1403_v14 = vunpack.c.h.bf16 %v1686_v60  ;;  %v1466_v15 = vunpack.c.l.bf16 %v1702_v62  ;;  %v1087_v16 = vunpack.c.h.bf16 %v1607_v61  ;;  %v1640_v57 = vld [vmem:[%s2212_s0 + $0x268] sm:$0xff]  }
  0x6a   :  { %v764_v17 = vmax.f32 %v763_v9, %v1274_v52  ;;  %v772_v18 = vmax.f32 %v771_v10, %v1275_v53  ;;  %v1150_v19 = vunpack.c.l.bf16 %v1623_v7  ;;  %v776_v22 = vmax.f32 %v958_v1, %v1022_v2  ;;  %v1703_v53 = vld [vmem:[%s2212_s0 + $0x460] sm:$0xff]   ;;  %v1656_v0 = vld [vmem:[%s2212_s0 + $0x2e8] sm:$0xff]  }
  0x6b   :  { %1716 = vst [vmem:[%s2213_s1 + $0x50] sm:$0xff] %v1537_v13   ;;  %v1467_v23 = vunpack.c.h.bf16 %v1702_v62  ;;  %v1151_v24 = vunpack.c.h.bf16 %v1623_v7  ;;  %v1214_v25 = vunpack.c.l.bf16 %v1639_v12  ;;  %v784_v26 = vmax.f32 %v959_v5, %v1023_v6  ;;  %v1672_v1 = vld [vmem:[%s2212_s0 + $0x368] sm:$0xff]   ;;  %v1593_v13 = vld [vmem:[%s2212_s0 + $0xf0] sm:$0xff]  }
  0x6c   :  { %v765_v28 = vmax.f32 %v764_v17, %v1338_v58  ;;  %v773_v29 = vmax.f32 %v772_v18, %v1339_v59  ;;  %v1215_v30 = vunpack.c.h.bf16 %v1639_v12  ;;  %v777_v31 = vmax.f32 %v776_v22, %v1086_v11 }
  0x6d   :  { %v1278_v33 = vunpack.c.l.bf16 %v1655_v20  ;;  %v1279_v34 = vunpack.c.h.bf16 %v1655_v20  ;;  %v1342_v35 = vunpack.c.l.bf16 %v1671_v21  ;;  %v785_v36 = vmax.f32 %v784_v26, %v1087_v16 }
  0x6e   :  { %v766_v37 = vmax.f32 %v765_v28, %v1402_v8  ;;  %v774_v38 = vmax.f32 %v773_v29, %v1403_v14  ;;  %v778_v40 = vmax.f32 %v777_v31, %v1150_v19  ;;  %v962_v41 = vunpack.c.l.bf16 %v1576_v27  ;;  %v1577_v8 = vld [vmem:[%s2212_s0 + $0x70] sm:$0xff]   ;;  %v1688_v19 = vld [vmem:[%s2212_s0 + $0x3e8] sm:$0xff]  }
  0x6f   :  { %v786_v43 = vmax.f32 %v785_v36, %v1151_v24  ;;  %v963_v44 = vunpack.c.h.bf16 %v1576_v27  ;;  %v1026_v45 = vunpack.c.l.bf16 %v1592_v32  ;;  %v1027_v46 = vunpack.c.h.bf16 %v1592_v32  ;;  %v1625_v32 = vld [vmem:[%s2212_s0 + $0x1f0] sm:$0xff]  }
  0x70   :  { %v767_v48 = vmax.f32 %v766_v37, %v1466_v15  ;;  %v775_v49 = vmax.f32 %v774_v38, %v1467_v23  ;;  %v1343_v50 = vunpack.c.h.bf16 %v1671_v21  ;;  %v779_v51 = vmax.f32 %v778_v40, %v1214_v25  ;;  %v1609_v23 = vld [vmem:[%s2212_s0 + $0x170] sm:$0xff]  }
  0x71   :  { %v1406_v52 = vunpack.c.l.bf16 %v1687_v39  ;;  %v787_v54 = vmax.f32 %v786_v43, %v1215_v30  ;;  %v1090_v55 = vunpack.c.l.bf16 %v1608_v42  ;;  %v1091_v56 = vunpack.c.h.bf16 %v1608_v42 }
  0x72   :  { %v1542_v58 = vpack.c.bf16 %v775_v49, %v767_v48  ;;  %v1407_v59 = vunpack.c.h.bf16 %v1687_v39  ;;  %v780_v60 = vmax.f32 %v779_v51, %v1278_v33  ;;  %v1154_v61 = vunpack.c.l.bf16 %v1624_v47  ;;  %v1578_v51 = vld [vmem:[%s2212_s0 + $0x78] sm:$0xff]  }
  0x73   :  { %v788_v62 = vmax.f32 %v787_v54, %v1279_v34  ;;  %v1155_v63 = vunpack.c.h.bf16 %v1624_v47  ;;  %v792_v2 = vmax.f32 %v962_v41, %v1026_v45  ;;  %v800_v3 = vmax.f32 %v963_v44, %v1027_v46  ;;  %v1704_v34 = vld [vmem:[%s2212_s0 + $0x468] sm:$0xff]   ;;  %v1641_v41 = vld [vmem:[%s2212_s0 + $0x270] sm:$0xff]  }
  0x74   :  { %1717 = vst [vmem:[%s2213_s1 + $0x58] sm:$0xff] %v1542_v58   ;;  %v1470_v4 = vunpack.c.l.bf16 %v1703_v53  ;;  %v1471_v5 = vunpack.c.h.bf16 %v1703_v53  ;;  %v781_v6 = vmax.f32 %v780_v60, %v1342_v35  ;;  %v1218_v7 = vunpack.c.l.bf16 %v1640_v57  ;;  %v1657_v44 = vld [vmem:[%s2212_s0 + $0x2f0] sm:$0xff]  }
  0x75   :  { %v789_v9 = vmax.f32 %v788_v62, %v1343_v50  ;;  %v1219_v10 = vunpack.c.h.bf16 %v1640_v57  ;;  %v793_v11 = vmax.f32 %v792_v2, %v1090_v55  ;;  %v801_v12 = vmax.f32 %v800_v3, %v1091_v56  ;;  %v1594_v56 = vld [vmem:[%s2212_s0 + $0xf8] sm:$0xff]  }
  0x76   :  { %v782_v14 = vmax.f32 %v781_v6, %v1406_v52  ;;  %v1282_v15 = vunpack.c.l.bf16 %v1656_v0  ;;  %v1283_v16 = vunpack.c.h.bf16 %v1656_v0  ;;  %v1346_v17 = vunpack.c.l.bf16 %v1672_v1  ;;  %v1610_v2 = vld [vmem:[%s2212_s0 + $0x178] sm:$0xff]  }
  0x77   :  { %v790_v18 = vmax.f32 %v789_v9, %v1407_v59  ;;  %v794_v20 = vmax.f32 %v793_v11, %v1154_v61  ;;  %v802_v21 = vmax.f32 %v801_v12, %v1155_v63  ;;  %v966_v22 = vunpack.c.l.bf16 %v1577_v8  ;;  %v1673_v61 = vld [vmem:[%s2212_s0 + $0x370] sm:$0xff]   ;;  %v1626_v12 = vld [vmem:[%s2212_s0 + $0x1f8] sm:$0xff]  }
  0x78   :  { %v783_v24 = vmax.f32 %v782_v14, %v1470_v4  ;;  %v967_v25 = vunpack.c.h.bf16 %v1577_v8  ;;  %v1030_v26 = vunpack.c.l.bf16 %v1593_v13  ;;  %v1031_v27 = vunpack.c.h.bf16 %v1593_v13  ;;  %v1705_v14 = vld [vmem:[%s2212_s0 + $0x470] sm:$0xff]  }
  0x79   :  { %v791_v28 = vmax.f32 %v790_v18, %v1471_v5  ;;  %v1347_v29 = vunpack.c.h.bf16 %v1672_v1  ;;  %v795_v30 = vmax.f32 %v794_v20, %v1218_v7  ;;  %v803_v31 = vmax.f32 %v802_v21, %v1219_v10  ;;  %v1689_v5 = vld [vmem:[%s2212_s0 + $0x3f0] sm:$0xff]   ;;  %v1642_v21 = vld [vmem:[%s2212_s0 + $0x278] sm:$0xff]  }
  0x7a   :  { %v1410_v33 = vunpack.c.l.bf16 %v1688_v19  ;;  %v1094_v35 = vunpack.c.l.bf16 %v1609_v23  ;;  %v1095_v36 = vunpack.c.h.bf16 %v1609_v23  ;;  %v1411_v38 = vunpack.c.h.bf16 %v1688_v19 }
  0x7b   :  { %v1547_v37 = vpack.c.bf16 %v791_v28, %v783_v24  ;;  %v796_v39 = vmax.f32 %v795_v30, %v1282_v15  ;;  %v804_v40 = vmax.f32 %v803_v31, %v1283_v16  ;;  %v1158_v42 = vunpack.c.l.bf16 %v1625_v32  ;;  %v1658_v30 = vld [vmem:[%s2212_s0 + $0x2f8] sm:$0xff]  }
  0x7c   :  { %v1159_v43 = vunpack.c.h.bf16 %v1625_v32  ;;  %v808_v45 = vmax.f32 %v966_v22, %v1030_v26  ;;  %v816_v46 = vmax.f32 %v967_v25, %v1031_v27  ;;  %v1474_v47 = vunpack.c.l.bf16 %v1704_v34 }
  0x7d   :  { %1718 = vst [vmem:[%s2213_s1 + $0x60] sm:$0xff] %v1547_v37   ;;  %v1475_v48 = vunpack.c.h.bf16 %v1704_v34  ;;  %v797_v49 = vmax.f32 %v796_v39, %v1346_v17  ;;  %v805_v50 = vmax.f32 %v804_v40, %v1347_v29  ;;  %v1222_v52 = vunpack.c.l.bf16 %v1641_v41  ;;  %v1674_v37 = vld [vmem:[%s2212_s0 + $0x378] sm:$0xff]  }
  0x7e   :  { %v1223_v53 = vunpack.c.h.bf16 %v1641_v41  ;;  %v809_v54 = vmax.f32 %v808_v45, %v1094_v35  ;;  %v817_v55 = vmax.f32 %v816_v46, %v1095_v36  ;;  %v1286_v59 = vunpack.c.l.bf16 %v1657_v44 }
  0x7f   :  { %v798_v57 = vmax.f32 %v797_v49, %v1410_v33  ;;  %v806_v58 = vmax.f32 %v805_v50, %v1411_v38  ;;  %v1287_v60 = vunpack.c.h.bf16 %v1657_v44  ;;  %v970_v0 = vunpack.c.l.bf16 %v1578_v51  ;;  %v1690_v44 = vld [vmem:[%s2212_s0 + $0x3f8] sm:$0xff]  }
  0x80   :  { %v810_v62 = vmax.f32 %v809_v54, %v1158_v42  ;;  %v818_v63 = vmax.f32 %v817_v55, %v1159_v43  ;;  %v971_v1 = vunpack.c.h.bf16 %v1578_v51  ;;  %v1034_v6 = vunpack.c.l.bf16 %v1594_v56  ;;  %v1706_v50 = vld [vmem:[%s2212_s0 + $0x478] sm:$0xff]  }
  0x81   :  { %v799_v3 = vmax.f32 %v798_v57, %v1474_v47  ;;  %v807_v4 = vmax.f32 %v806_v58, %v1475_v48  ;;  %v1035_v7 = vunpack.c.h.bf16 %v1594_v56  ;;  %v1350_v8 = vunpack.c.l.bf16 %v1673_v61 }
  0x82   :  { %v1351_v9 = vunpack.c.h.bf16 %v1673_v61  ;;  %v811_v10 = vmax.f32 %v810_v62, %v1222_v52  ;;  %v819_v11 = vmax.f32 %v818_v63, %v1223_v53  ;;  %v1098_v15 = vunpack.c.l.bf16 %v1610_v2 }
  0x83   :  { %v1552_v13 = vpack.c.bf16 %v807_v4, %v799_v3  ;;  %v1099_v16 = vunpack.c.h.bf16 %v1610_v2  ;;  %v1414_v17 = vunpack.c.l.bf16 %v1689_v5  ;;  %v1415_v18 = vunpack.c.h.bf16 %v1689_v5 }
  0x84   :  { %v812_v19 = vmax.f32 %v811_v10, %v1286_v59  ;;  %v820_v20 = vmax.f32 %v819_v11, %v1287_v60  ;;  %v1162_v22 = vunpack.c.l.bf16 %v1626_v12  ;;  %v1163_v23 = vunpack.c.h.bf16 %v1626_v12 }
  0x85   :  { %1719 = vst [vmem:[%s2213_s1 + $0x68] sm:$0xff] %v1552_v13   ;;  %v824_v24 = vmax.f32 %v970_v0, %v1034_v6  ;;  %v832_v25 = vmax.f32 %v971_v1, %v1035_v7  ;;  %v1478_v26 = vunpack.c.l.bf16 %v1705_v14  ;;  %v1479_v27 = vunpack.c.h.bf16 %v1705_v14 }
  0x86   :  { %v813_v28 = vmax.f32 %v812_v19, %v1350_v8  ;;  %v821_v29 = vmax.f32 %v820_v20, %v1351_v9  ;;  %v1226_v31 = vunpack.c.l.bf16 %v1642_v21  ;;  %v1227_v32 = vunpack.c.h.bf16 %v1642_v21 }
  0x87   :  { %v825_v33 = vmax.f32 %v824_v24, %v1098_v15  ;;  %v833_v34 = vmax.f32 %v832_v25, %v1099_v16  ;;  %v1290_v38 = vunpack.c.l.bf16 %v1658_v30  ;;  %v1291_v39 = vunpack.c.h.bf16 %v1658_v30 }
  0x88   :  { %v814_v35 = vmax.f32 %v813_v28, %v1414_v17  ;;  %v822_v36 = vmax.f32 %v821_v29, %v1415_v18  ;;  %v1354_v45 = vunpack.c.l.bf16 %v1674_v37  ;;  %v1355_v46 = vunpack.c.h.bf16 %v1674_v37 }
  0x89   :  { %v826_v40 = vmax.f32 %v825_v33, %v1162_v22  ;;  %v834_v41 = vmax.f32 %v833_v34, %v1163_v23  ;;  %v1418_v51 = vunpack.c.l.bf16 %v1690_v44  ;;  %v1419_v52 = vunpack.c.h.bf16 %v1690_v44 }
  0x8a   :  { %v815_v42 = vmax.f32 %v814_v35, %v1478_v26  ;;  %v823_v43 = vmax.f32 %v822_v36, %v1479_v27  ;;  %v1482_v55 = vunpack.c.l.bf16 %v1706_v50  ;;  %v1483_v56 = vunpack.c.h.bf16 %v1706_v50 }
  0x8b   :  { %v827_v47 = vmax.f32 %v826_v40, %v1226_v31  ;;  %v835_v48 = vmax.f32 %v834_v41, %v1227_v32 }
  0x8c   :  { %v1557_v49 = vpack.c.bf16 %v823_v43, %v815_v42 }
  0x8d   :  { %v828_v53 = vmax.f32 %v827_v47, %v1290_v38  ;;  %v836_v54 = vmax.f32 %v835_v48, %v1291_v39 }
  0x8e   :  { %1720 = vst [vmem:[%s2213_s1 + $0x70] sm:$0xff] %v1557_v49  }
  0x8f   :  { %v829_v57 = vmax.f32 %v828_v53, %v1354_v45  ;;  %v837_v58 = vmax.f32 %v836_v54, %v1355_v46 }
  0x91   :  { %v830_v59 = vmax.f32 %v829_v57, %v1418_v51  ;;  %v838_v60 = vmax.f32 %v837_v58, %v1419_v52 }
  0x93   :  { %v831_v61 = vmax.f32 %v830_v59, %v1482_v55  ;;  %v839_v62 = vmax.f32 %v838_v60, %v1483_v56 }
  0x95   :  { %v1562_v63 = vpack.c.bf16 %v839_v62, %v831_v61 }
  0x97   :  { %1721 = vst [vmem:[%s2213_s1 + $0x78] sm:$0xff] %v1562_v63  }

// kernel: densenet_forward.28
= control target key start
LH: loop header
LB: loop body
LE: loop exit
PB: predicated region body
PF: predicated region fallthrough
CT: control target
= control target key end

     0   :  { %s4107_s9 = smov 0   ;;  %s4109_s10 = smov 0   ;;  %s4863_s0 = inlined_call_operand.vmem [shape: bf16[512,1152], index: 0, kind: input, shape index: {}]   ;;  %s4864_s1 = inlined_call_operand.vmem [shape: bf16[1152,128], index: 1, kind: input, shape index: {}]   ;;  %s4865_s2 = inlined_call_operand.vmem [shape: bf16[512,128], index: 2, kind: output, shape index: {}]  }
   0x1   :  { %s4111_s11 = smov 0  }
   0x2 LB: > { %s31_s12 = sadd.s32 1, %s4086_s10  ;;  %p2837_p0 = scmp.ge.s32.totalorder %s4090_s11, 1  ;;  %s4090_s11 = sphi %s4111_s11, %s12_s11   ;;  %s4086_s10 = sphi %s4109_s10, %s4867_s10   ;;  %s4082_s9 = sphi %s4107_s9, %s4866_s9  }
   0x3   : > { %p33_p1 = scmp.ge.s32.totalorder %s31_s12, 2  ;;  %p158_p2 = scmp.lt.s32.totalorder %s4090_s11, 3 }
   0x5   : > { %s4869_s12 = smov (%p33_p1, %s31_s12), 0  ;;  %p159_p3 = pnand %p2837_p0, %p158_p2 }
   0x6   : > { %s2838_s19 = sshll.u32 (!%p159_p3), %s4082_s9, 5 }
   0x7   : > { %162 = sbr.rel (%p159_p3) target bundleno = 753 (0x2f1), region = 28  ;;  %p198_p4 = scmp.lt.s32.totalorder (!%p159_p3), %s2838_s19, 63 }
   0xc   : > { %v3859_v0 = vld [vmem:[%s4864_s1 + $0x38] sm:$0xff]  ;;  %v3858_v1 = vld [vmem:[%s4864_s1 + $0x30] sm:$0xff]  ;;  %v3857_v2 = vld [vmem:[%s4864_s1 + $0x28] sm:$0xff]  ;;  %s4871_s19 = smov (!%p198_p4, %s2838_s19), 63 }
   0xd   : > { %4019 = vmatpush.bf16.msra.mxu1 %v3859_v0  ;;  %4020 = vmatpush.bf16.msra.mxu2 %v3859_v0  ;;  %v3856_v3 = vld [vmem:[%s4864_s1 + $0x20] sm:$0xff]  ;;  %v3855_v4 = vld [vmem:[%s4864_s1 + $0x18] sm:$0xff]  ;;  %v3854_v5 = vld [vmem:[%s4864_s1 + $0x10] sm:$0xff]  ;;  %s4043_s26 = smul.u32 36, %s4871_s19  ;;  %s2841_s23 = sshll.u32 %s4871_s19, 2 }
   0xe   : > { %4021 = vmatpush.bf16.msra.mxu3 %v3859_v0  ;;  %1766 = vmatpush.bf16.msra.mxu0 %v3859_v0  ;;  %v3853_v6 = vld [vmem:[%s4864_s1 + $0x8] sm:$0xff]  ;;  %v3852_v7 = vld [vmem:[%s4864_s1] sm:$0xff]  ;;  %v3875_v16 = vld [vmem:[%s4864_s1 + $0xb8] sm:$0xff] }
   0xf   : > { %s4155_s3 = scalar_lea.vmem %s4863_s0, %s4043_s26  ;;  %v3883_v17 = vld [vmem:[%s4864_s1 + $0xf8] sm:$0xff]  ;;  %v3874_v24 = vld [vmem:[%s4864_s1 + $0xb0] sm:$0xff]  ;;  %v3873_v28 = vld [vmem:[%s4864_s1 + $0xa8] sm:$0xff]  ;;  %s4758_s26 = scalar_lea.vmem %s4865_s2, %s2841_s23 }
  0x10   : > { %v2988_v8 = vld [vmem:[%s4155_s3 + $0x120] sm:$0xf]  ;;  %v3748_v9 = vld [vmem:[%s4155_s3 + $0x140] sm:$0xf0]  ;;  %v3867_v22 = vld [vmem:[%s4864_s1 + $0x78] sm:$0xff] }
  0x11   : > { %4022 = vmatpush.bf16.msra.mxu1 %v3858_v1  ;;  %4023 = vmatpush.bf16.msra.mxu2 %v3858_v1  ;;  %v3132_v10 = vld [vmem:[%s4155_s3 + $0x240] sm:$0xf]  ;;  %v3784_v11 = vld [vmem:[%s4155_s3 + $0x260] sm:$0xf0]  ;;  %v2989_v18 = vor.u32 %v3748_v9, %v2988_v8  ;;  %v3891_v23 = vld [vmem:[%s4864_s1 + $0x138] sm:$0xff] }
  0x12   : > { %4024 = vmatpush.bf16.msra.mxu3 %v3858_v1  ;;  %1767 = vmatpush.bf16.msra.mxu0 %v3858_v1  ;;  %v3276_v12 = vld [vmem:[%s4155_s3 + $0x360] sm:$0xf]  ;;  %v3820_v13 = vld [vmem:[%s4155_s3 + $0x380] sm:$0xf0]  ;;  %v3133_v19 = vor.u32 %v3784_v11, %v3132_v10  ;;  %v3882_v25 = vld [vmem:[%s4864_s1 + $0xf0] sm:$0xff] }
  0x13   : > { %v2844_v14 = vld [vmem:[%s4155_s3] sm:$0xf]  ;;  %v3712_v15 = vld [vmem:[%s4155_s3 + $0x20] sm:$0xf0]  ;;  %v3277_v20 = vor.u32 %v3820_v13, %v3276_v12  ;;  %v3866_v26 = vld [vmem:[%s4864_s1 + $0x70] sm:$0xff] }
  0x14   : > { %v2845_v21 = vor.u32 %v3712_v15, %v2844_v14  ;;  %v3890_v27 = vld [vmem:[%s4864_s1 + $0x130] sm:$0xff]  ;;  %v3881_v29 = vld [vmem:[%s4864_s1 + $0xe8] sm:$0xff]  ;;  %v3872_v33 = vld [vmem:[%s4864_s1 + $0xa0] sm:$0xff] }
  0x15   : > { %4025 = vmatpush.bf16.msra.mxu1 %v3857_v2  ;;  %4026 = vmatpush.bf16.msra.mxu2 %v3857_v2  ;;  %v3865_v30 = vld [vmem:[%s4864_s1 + $0x68] sm:$0xff]  ;;  %v3880_v34 = vld [vmem:[%s4864_s1 + $0xe0] sm:$0xff]  ;;  %v3871_v44 = vld [vmem:[%s4864_s1 + $0x98] sm:$0xff] }
  0x16   : > { %4027 = vmatpush.bf16.msra.mxu3 %v3857_v2  ;;  %1768 = vmatpush.bf16.msra.mxu0 %v3857_v2  ;;  %v3889_v31 = vld [vmem:[%s4864_s1 + $0x128] sm:$0xff]  ;;  %v3864_v42 = vld [vmem:[%s4864_s1 + $0x60] sm:$0xff]  ;;  %v3879_v45 = vld [vmem:[%s4864_s1 + $0xd8] sm:$0xff] }
  0x17   : > { %v3024_v32 = vld [vmem:[%s4155_s3 + $0x168] sm:$0xf]  ;;  %v3757_v35 = vld [vmem:[%s4155_s3 + $0x188] sm:$0xf0]  ;;  %v3888_v43 = vld [vmem:[%s4864_s1 + $0x120] sm:$0xff] }
  0x18   : > { %v3168_v36 = vld [vmem:[%s4155_s3 + $0x288] sm:$0xf]  ;;  %v3793_v37 = vld [vmem:[%s4155_s3 + $0x2a8] sm:$0xf0]  ;;  %v3025_v46 = vor.u32 %v3757_v35, %v3024_v32  ;;  %v3863_v50 = vld [vmem:[%s4864_s1 + $0x58] sm:$0xff] }
  0x19   : > { %4028 = vmatpush.bf16.msra.mxu1 %v3856_v3  ;;  %4029 = vmatpush.bf16.msra.mxu2 %v3856_v3  ;;  %v3312_v38 = vld [vmem:[%s4155_s3 + $0x3a8] sm:$0xf]  ;;  %v3829_v39 = vld [vmem:[%s4155_s3 + $0x3c8] sm:$0xf0]  ;;  %v3169_v47 = vor.u32 %v3793_v37, %v3168_v36  ;;  %v3887_v51 = vld [vmem:[%s4864_s1 + $0x118] sm:$0xff] }
  0x1a   : > { %4030 = vmatpush.bf16.msra.mxu3 %v3856_v3  ;;  %1769 = vmatpush.bf16.msra.mxu0 %v3856_v3  ;;  %v2880_v40 = vld [vmem:[%s4155_s3 + $0x48] sm:$0xf]  ;;  %v3721_v41 = vld [vmem:[%s4155_s3 + $0x68] sm:$0xf0]  ;;  %v3313_v48 = vor.u32 %v3829_v39, %v3312_v38  ;;  %v3870_v52 = vld [vmem:[%s4864_s1 + $0x90] sm:$0xff] }
  0x1b   : > { %v2881_v49 = vor.u32 %v3721_v41, %v2880_v40  ;;  %v3878_v53 = vld [vmem:[%s4864_s1 + $0xd0] sm:$0xff]  ;;  %v3869_v56 = vld [vmem:[%s4864_s1 + $0x88] sm:$0xff]  ;;  %v3868_v61 = vld [vmem:[%s4864_s1 + $0x80] sm:$0xff] }
  0x1c   : > { %v3862_v54 = vld [vmem:[%s4864_s1 + $0x50] sm:$0xff]  ;;  %v3877_v57 = vld [vmem:[%s4864_s1 + $0xc8] sm:$0xff]  ;;  %v3876_v62 = vld [vmem:[%s4864_s1 + $0xc0] sm:$0xff] }
  0x1d   : > { %4031 = vmatpush.bf16.msra.mxu1 %v3855_v4  ;;  %4032 = vmatpush.bf16.msra.mxu2 %v3855_v4  ;;  %v3886_v55 = vld [vmem:[%s4864_s1 + $0x110] sm:$0xff]  ;;  %v3861_v58 = vld [vmem:[%s4864_s1 + $0x48] sm:$0xff]  ;;  %v3907_v12 = vld [vmem:[%s4864_s1 + $0x1b8] sm:$0xff] }
  0x1e   : > { %4033 = vmatpush.bf16.msra.mxu3 %v3855_v4  ;;  %1770 = vmatpush.bf16.msra.mxu0 %v3855_v4  ;;  %v3885_v59 = vld [vmem:[%s4864_s1 + $0x108] sm:$0xff]  ;;  %v3060_v60 = vld [vmem:[%s4155_s3 + $0x1b0] sm:$0xf]  ;;  %v3766_v63 = vld [vmem:[%s4155_s3 + $0x1d0] sm:$0xf0] }
  0x1f   : > { %v3204_v0 = vld [vmem:[%s4155_s3 + $0x2d0] sm:$0xf]  ;;  %v3802_v1 = vld [vmem:[%s4155_s3 + $0x2f0] sm:$0xf0]  ;;  %v3061_v8 = vor.u32 %v3766_v63, %v3060_v60  ;;  %v3915_v13 = vld [vmem:[%s4864_s1 + $0x1f8] sm:$0xff] }
  0x20   : > { %v3348_v2 = vld [vmem:[%s4155_s3 + $0x3f0] sm:$0xf]  ;;  %v3838_v3 = vld [vmem:[%s4155_s3 + $0x410] sm:$0xf0]  ;;  %v3205_v9 = vor.u32 %v3802_v1, %v3204_v0  ;;  %v3899_v14 = vld [vmem:[%s4864_s1 + $0x178] sm:$0xff] }
  0x21   : > { %4034 = vmatpush.bf16.msra.mxu1 %v3854_v5  ;;  %4035 = vmatpush.bf16.msra.mxu2 %v3854_v5  ;;  %v2916_v4 = vld [vmem:[%s4155_s3 + $0x90] sm:$0xf]  ;;  %v3349_v10 = vor.u32 %v3838_v3, %v3348_v2  ;;  %v3923_v15 = vld [vmem:[%s4864_s1 + $0x238] sm:$0xff]  ;;  %v3709_v32 = vld [vmem:[%s4155_s3 + $0xc] sm:$0xf] }
  0x22   : > { %4036 = vmatpush.bf16.msra.mxu3 %v3854_v5  ;;  %1771 = vmatpush.bf16.msra.mxu0 %v3854_v5  ;;  %v3730_v5 = vld [vmem:[%s4155_s3 + $0xb0] sm:$0xf0]  ;;  %v3727_v60 = vld [vmem:[%s4155_s3 + $0x9c] sm:$0xf]  ;;  %v3732_v63 = vld [vmem:[%s4155_s3 + $0xc0] sm:$0xf0] }
  0x23   : > { %v2917_v11 = vor.u32 %v3730_v5, %v2916_v4  ;;  %v3714_v35 = vld [vmem:[%s4155_s3 + $0x30] sm:$0xf0]  ;;  %v3905_v4 = vld [vmem:[%s4864_s1 + $0x1a8] sm:$0xff] }
  0x24   : > { %v3906_v40 = vld [vmem:[%s4864_s1 + $0x1b0] sm:$0xff]  ;;  %v3913_v5 = vld [vmem:[%s4864_s1 + $0x1e8] sm:$0xff] }
  0x25   : > { %4037 = vmatpush.bf16.msra.mxu1 %v3853_v6  ;;  %4038 = vmatpush.bf16.msra.mxu2 %v3853_v6  ;;  %v3914_v41 = vld [vmem:[%s4864_s1 + $0x1f0] sm:$0xff] }
  0x26   : > { %4039 = vmatpush.bf16.msra.mxu3 %v3853_v6  ;;  %1772 = vmatpush.bf16.msra.mxu0 %v3853_v6  ;;  %v3860_v6 = vld [vmem:[%s4864_s1 + $0x40] sm:$0xff] }
  0x29   : > { %4040 = vmatpush.bf16.msra.mxu1 %v3852_v7  ;;  %4041 = vmatpush.bf16.msra.mxu2 %v3852_v7 }
  0x2a   : > { %4042 = vmatpush.bf16.msra.mxu3 %v3852_v7  ;;  %1773 = vmatpush.bf16.msra.mxu0 %v3852_v7  ;;  %v3884_v7 = vld [vmem:[%s4864_s1 + $0x100] sm:$0xff] }
  0x2c   : > { %1794 = vmatmul.bf16.vlgmr.msra.gmra.mxu1 %v2989_v18  ;;  %1814 = vmatmul.bf16.vlgmr.msra.gmra.mxu2 %v3133_v19  ;;  %v3240_v18 = vld [vmem:[%s4155_s3 + $0x318] sm:$0xf]  ;;  %v3811_v19 = vld [vmem:[%s4155_s3 + $0x338] sm:$0xf0] }
  0x2d   : > { %1944 = vmatpush.bf16.msrb.mxu2 %v3875_v16  ;;  %1834 = vmatmul.bf16.vlgmr.msra.gmra.mxu3 %v3277_v20  ;;  %v3096_v16 = vld [vmem:[%s4155_s3 + $0x1f8] sm:$0xf] }
  0x2e   : > { %2033 = vmatpush.bf16.msrb.mxu3 %v3883_v17  ;;  %1774 = vmatmul.bf16.vlgmr.msra.gmra.mxu0 %v2845_v21  ;;  %v3775_v17 = vld [vmem:[%s4155_s3 + $0x218] sm:$0xf0]  ;;  %v3384_v20 = vld [vmem:[%s4155_s3 + $0x438] sm:$0xf] }
  0x2f   : > { %1855 = vmatpush.bf16.msrb.mxu1 %v3867_v22  ;;  %2122 = vmatpush.bf16.msrb.mxu0 %v3891_v23  ;;  %v3847_v21 = vld [vmem:[%s4155_s3 + $0x458] sm:$0xf0]  ;;  %v2952_v22 = vld [vmem:[%s4155_s3 + $0xd8] sm:$0xf] }
  0x30   : > { %v3739_v23 = vld [vmem:[%s4155_s3 + $0xf8] sm:$0xf0] }
  0x31   : > { %1945 = vmatpush.bf16.msrb.mxu2 %v3874_v24  ;;  %v3097_v24 = vor.u32 %v3775_v17, %v3096_v16 }
  0x32   : > { %2034 = vmatpush.bf16.msrb.mxu3 %v3882_v25  ;;  %v3241_v25 = vor.u32 %v3811_v19, %v3240_v18 }
  0x33   : > { %1856 = vmatpush.bf16.msrb.mxu1 %v3866_v26  ;;  %2123 = vmatpush.bf16.msrb.mxu0 %v3890_v27  ;;  %v3385_v26 = vor.u32 %v3847_v21, %v3384_v20  ;;  %v2953_v27 = vor.u32 %v3739_v23, %v2952_v22  ;;  %v3744_v20 = vld [vmem:[%s4155_s3 + $0x124] sm:$0xf]  ;;  %v2990_v21 = vld [vmem:[%s4155_s3 + $0x144] sm:$0xf0]  ;;  %v3749_v23 = vld [vmem:[%s4155_s3 + $0x148] sm:$0xf0] }
  0x34   : > { %v2996_v22 = vld [vmem:[%s4155_s3 + $0x128] sm:$0xf] }
  0x35   : > { %1946 = vmatpush.bf16.msrb.mxu2 %v3873_v28  ;;  %v3708_v28 = vld [vmem:[%s4155_s3 + $0x4] sm:$0xf] }
  0x36   : > { %2035 = vmatpush.bf16.msrb.mxu3 %v3881_v29  ;;  %v2846_v29 = vld [vmem:[%s4155_s3 + $0x24] sm:$0xf0] }
  0x37   : > { %1857 = vmatpush.bf16.msrb.mxu1 %v3865_v30  ;;  %2124 = vmatpush.bf16.msrb.mxu0 %v3889_v31  ;;  %v2852_v30 = vld [vmem:[%s4155_s3 + $0x8] sm:$0xf]  ;;  %v3713_v31 = vld [vmem:[%s4155_s3 + $0x28] sm:$0xf0]  ;;  %v2849_v36 = vor.u32 %v3708_v28, %v2846_v29  ;;  %v2993_v28 = vor.u32 %v3744_v20, %v2990_v21  ;;  %v2997_v29 = vor.u32 %v3749_v23, %v2996_v22  ;;  %v3895_v20 = vld [vmem:[%s4864_s1 + $0x158] sm:$0xff] }
  0x38   : > { %v2853_v37 = vor.u32 %v3713_v31, %v2852_v30  ;;  %v3919_v21 = vld [vmem:[%s4864_s1 + $0x218] sm:$0xff]  ;;  %v3098_v23 = vld [vmem:[%s4155_s3 + $0x21c] sm:$0xf0] }
  0x39   : > { %1947 = vmatpush.bf16.msrb.mxu2 %v3872_v33  ;;  %v2854_v33 = vld [vmem:[%s4155_s3 + $0x2c] sm:$0xf0]  ;;  %v3771_v22 = vld [vmem:[%s4155_s3 + $0x1fc] sm:$0xf] }
  0x3a   : > { %2036 = vmatpush.bf16.msrb.mxu3 %v3880_v34  ;;  %v2860_v34 = vld [vmem:[%s4155_s3 + $0x10] sm:$0xf]  ;;  %v2857_v38 = vor.u32 %v3709_v32, %v2854_v33 }
  0x3b   : > { %1858 = vmatpush.bf16.msrb.mxu1 %v3864_v42  ;;  %2125 = vmatpush.bf16.msrb.mxu0 %v3888_v43  ;;  %v2861_v39 = vor.u32 %v3714_v35, %v2860_v34  ;;  %v3898_v42 = vld [vmem:[%s4864_s1 + $0x170] sm:$0xff]  ;;  %v3904_v34 = vld [vmem:[%s4864_s1 + $0x1a0] sm:$0xff] }
  0x3c   : > { %1799 = vmatmul.bf16.gmra.mxu1 %v3025_v46  ;;  %1819 = vmatmul.bf16.gmra.mxu2 %v3169_v47  ;;  %v3922_v43 = vld [vmem:[%s4864_s1 + $0x230] sm:$0xff]  ;;  %v3912_v35 = vld [vmem:[%s4864_s1 + $0x1e0] sm:$0xff] }
  0x3d   : > { %1948 = vmatpush.bf16.msrb.mxu2 %v3871_v44  ;;  %1839 = vmatmul.bf16.gmra.mxu3 %v3313_v48  ;;  %v3717_v44 = vld [vmem:[%s4155_s3 + $0x4c] sm:$0xf]  ;;  %v2888_v46 = vld [vmem:[%s4155_s3 + $0x50] sm:$0xf]  ;;  %v3722_v47 = vld [vmem:[%s4155_s3 + $0x70] sm:$0xf0] }
  0x3e   : > { %2037 = vmatpush.bf16.msrb.mxu3 %v3879_v45  ;;  %1779 = vmatmul.bf16.gmra.mxu0 %v2881_v49  ;;  %v2882_v45 = vld [vmem:[%s4155_s3 + $0x6c] sm:$0xf0]  ;;  %v3718_v48 = vld [vmem:[%s4155_s3 + $0x54] sm:$0xf]  ;;  %v2890_v49 = vld [vmem:[%s4155_s3 + $0x74] sm:$0xf0] }
  0x3f   : > { %1859 = vmatpush.bf16.msrb.mxu1 %v3863_v50  ;;  %2126 = vmatpush.bf16.msrb.mxu0 %v3887_v51  ;;  %v2896_v50 = vld [vmem:[%s4155_s3 + $0x58] sm:$0xf]  ;;  %v3723_v51 = vld [vmem:[%s4155_s3 + $0x78] sm:$0xf0] }
  0x41   : > { %1949 = vmatpush.bf16.msrb.mxu2 %v3870_v52  ;;  %v2885_v52 = vor.u32 %v3717_v44, %v2882_v45  ;;  %v3032_v44 = vld [vmem:[%s4155_s3 + $0x170] sm:$0xf]  ;;  %v3758_v45 = vld [vmem:[%s4155_s3 + $0x190] sm:$0xf0] }
  0x42   : > { %2038 = vmatpush.bf16.msrb.mxu3 %v3878_v53  ;;  %v2889_v53 = vor.u32 %v3722_v47, %v2888_v46  ;;  %v3754_v46 = vld [vmem:[%s4155_s3 + $0x174] sm:$0xf]  ;;  %v3034_v47 = vld [vmem:[%s4155_s3 + $0x194] sm:$0xf0] }
  0x43   : > { %1860 = vmatpush.bf16.msrb.mxu1 %v3862_v54  ;;  %2127 = vmatpush.bf16.msrb.mxu0 %v3886_v55  ;;  %v2893_v54 = vor.u32 %v3718_v48, %v2890_v49  ;;  %v2897_v55 = vor.u32 %v3723_v51, %v2896_v50  ;;  %v3040_v48 = vld [vmem:[%s4155_s3 + $0x178] sm:$0xf]  ;;  %v3759_v49 = vld [vmem:[%s4155_s3 + $0x198] sm:$0xf0] }
  0x45   : > { %1950 = vmatpush.bf16.msrb.mxu2 %v3869_v56  ;;  %v3726_v56 = vld [vmem:[%s4155_s3 + $0x94] sm:$0xf] }
  0x46   : > { %2039 = vmatpush.bf16.msrb.mxu3 %v3877_v57  ;;  %v2918_v57 = vld [vmem:[%s4155_s3 + $0xb4] sm:$0xf0] }
  0x47   : > { %1861 = vmatpush.bf16.msrb.mxu1 %v3861_v58  ;;  %2128 = vmatpush.bf16.msrb.mxu0 %v3885_v59  ;;  %v2924_v58 = vld [vmem:[%s4155_s3 + $0x98] sm:$0xf]  ;;  %v3731_v59 = vld [vmem:[%s4155_s3 + $0xb8] sm:$0xf0]  ;;  %v2921_v0 = vor.u32 %v3726_v56, %v2918_v57  ;;  %v3041_v56 = vor.u32 %v3759_v49, %v3040_v48  ;;  %v3780_v48 = vld [vmem:[%s4155_s3 + $0x244] sm:$0xf] }
  0x48   : > { %v2925_v1 = vor.u32 %v3731_v59, %v2924_v58  ;;  %v3134_v49 = vld [vmem:[%s4155_s3 + $0x264] sm:$0xf0] }
  0x49   : > { %1951 = vmatpush.bf16.msrb.mxu2 %v3868_v61  ;;  %v2926_v61 = vld [vmem:[%s4155_s3 + $0xbc] sm:$0xf0] }
  0x4a   : > { %2040 = vmatpush.bf16.msrb.mxu3 %v3876_v62  ;;  %v2932_v62 = vld [vmem:[%s4155_s3 + $0xa0] sm:$0xf]  ;;  %v2929_v2 = vor.u32 %v3727_v60, %v2926_v61 }
  0x4b   : > { %1862 = vmatpush.bf16.msrb.mxu1 %v3860_v6  ;;  %2129 = vmatpush.bf16.msrb.mxu0 %v3884_v7  ;;  %v2933_v3 = vor.u32 %v3732_v63, %v2932_v62  ;;  %v3897_v6 = vld [vmem:[%s4864_s1 + $0x168] sm:$0xff]  ;;  %v3762_v62 = vld [vmem:[%s4155_s3 + $0x1b4] sm:$0xf]  ;;  %v3062_v63 = vld [vmem:[%s4155_s3 + $0x1d4] sm:$0xf0] }
  0x4c   : > { %1804 = vmatmul.bf16.gmra.mxu1 %v3061_v8  ;;  %1824 = vmatmul.bf16.gmra.mxu2 %v3205_v9  ;;  %v3921_v7 = vld [vmem:[%s4864_s1 + $0x228] sm:$0xff]  ;;  %v3735_v8 = vld [vmem:[%s4155_s3 + $0xdc] sm:$0xf]  ;;  %v2954_v9 = vld [vmem:[%s4155_s3 + $0xfc] sm:$0xf0] }
  0x4d   : > { %1844 = vmatmul.bf16.gmra.mxu3 %v3349_v10  ;;  %2300 = vmatpush.bf16.msra.mxu2 %v3907_v12  ;;  %v2960_v10 = vld [vmem:[%s4155_s3 + $0xe0] sm:$0xf]  ;;  %v3736_v12 = vld [vmem:[%s4155_s3 + $0xe4] sm:$0xf]  ;;  %v2957_v16 = vor.u32 %v3735_v8, %v2954_v9  ;;  %v3065_v8 = vor.u32 %v3762_v62, %v3062_v63  ;;  %v3148_v62 = vld [vmem:[%s4155_s3 + $0x250] sm:$0xf] }
  0x4e   : > { %1784 = vmatmul.bf16.gmra.mxu0 %v2917_v11  ;;  %2389 = vmatpush.bf16.msra.mxu3 %v3915_v13  ;;  %v3740_v11 = vld [vmem:[%s4155_s3 + $0x100] sm:$0xf0]  ;;  %v2962_v13 = vld [vmem:[%s4155_s3 + $0x104] sm:$0xf0]  ;;  %v3786_v63 = vld [vmem:[%s4155_s3 + $0x270] sm:$0xf0] }
  0x4f   : > { %2211 = vmatpush.bf16.msra.mxu1 %v3899_v14  ;;  %2478 = vmatpush.bf16.msra.mxu0 %v3923_v15  ;;  %v2968_v14 = vld [vmem:[%s4155_s3 + $0xe8] sm:$0xf]  ;;  %v3741_v15 = vld [vmem:[%s4155_s3 + $0x108] sm:$0xf0]  ;;  %v2961_v17 = vor.u32 %v3740_v11, %v2960_v10  ;;  %v2965_v18 = vor.u32 %v3736_v12, %v2962_v13 }
  0x50   : > { %v2969_v19 = vor.u32 %v3741_v15, %v2968_v14  ;;  %v3903_v14 = vld [vmem:[%s4864_s1 + $0x198] sm:$0xff] }
  0x51   : > { %2301 = vmatpush.bf16.msra.mxu2 %v3906_v40  ;;  %v3911_v15 = vld [vmem:[%s4864_s1 + $0x1d8] sm:$0xff] }
  0x52   : > { %2390 = vmatpush.bf16.msra.mxu3 %v3914_v41  ;;  %v3920_v41 = vld [vmem:[%s4864_s1 + $0x220] sm:$0xff] }
  0x53   : > { %2212 = vmatpush.bf16.msra.mxu1 %v3898_v42  ;;  %2479 = vmatpush.bf16.msra.mxu0 %v3922_v43  ;;  %v3753_v42 = vld [vmem:[%s4155_s3 + $0x16c] sm:$0xf]  ;;  %v3026_v43 = vld [vmem:[%s4155_s3 + $0x18c] sm:$0xf0] }
  0x55   : > { %2302 = vmatpush.bf16.msra.mxu2 %v3905_v4  ;;  %v3076_v4 = vld [vmem:[%s4155_s3 + $0x1c0] sm:$0xf] }
  0x56   : > { %2391 = vmatpush.bf16.msra.mxu3 %v3913_v5  ;;  %v3768_v5 = vld [vmem:[%s4155_s3 + $0x1e0] sm:$0xf0] }
  0x57   : > { %2213 = vmatpush.bf16.msra.mxu1 %v3897_v6  ;;  %2480 = vmatpush.bf16.msra.mxu0 %v3921_v7  ;;  %v3077_v12 = vor.u32 %v3768_v5, %v3076_v4 }
  0x59   : > { %2303 = vmatpush.bf16.msra.mxu2 %v3904_v34  ;;  %v3101_v34 = vor.u32 %v3771_v22, %v3098_v23 }
  0x5a   : > { %2392 = vmatpush.bf16.msra.mxu3 %v3912_v35 }
  0x5b   : > { %2481 = vmatpush.bf16.msra.mxu0 %v3920_v41 }
  0x5c   : > { %1809 = vmatmul.bf16.gmra.mxu1 %v3097_v24  ;;  %1829 = vmatmul.bf16.gmra.mxu2 %v3241_v25  ;;  %v3745_v24 = vld [vmem:[%s4155_s3 + $0x12c] sm:$0xf]  ;;  %v2998_v25 = vld [vmem:[%s4155_s3 + $0x14c] sm:$0xf0] }
  0x5d   : > { %1849 = vmatmul.bf16.gmra.mxu3 %v3385_v26  ;;  %v3004_v26 = vld [vmem:[%s4155_s3 + $0x130] sm:$0xf]  ;;  %v3001_v31 = vor.u32 %v3745_v24, %v2998_v25  ;;  %2304 = vmatpush.bf16.msra.mxu2 %v3903_v14  ;;  %v3104_v24 = vld [vmem:[%s4155_s3 + $0x200] sm:$0xf]  ;;  %v3776_v25 = vld [vmem:[%s4155_s3 + $0x220] sm:$0xf0] }
  0x5e   : > { %1789 = vmatmul.bf16.gmra.mxu0 %v2953_v27  ;;  %v3750_v27 = vld [vmem:[%s4155_s3 + $0x150] sm:$0xf0]  ;;  %2393 = vmatpush.bf16.msra.mxu3 %v3911_v15  ;;  %v3105_v35 = vor.u32 %v3776_v25, %v3104_v24 }
  0x5f   : > { %v3005_v32 = vor.u32 %v3750_v27, %v3004_v26  ;;  %2482 = vmatpush.bf16.msra.mxu0 %v3919_v21  ;;  %v3772_v26 = vld [vmem:[%s4155_s3 + $0x204] sm:$0xf]  ;;  %v3106_v27 = vld [vmem:[%s4155_s3 + $0x224] sm:$0xf0]  ;;  %v3910_v14 = vld [vmem:[%s4864_s1 + $0x1d0] sm:$0xff] }
  0x60   : > { %v3109_v41 = vor.u32 %v3772_v26, %v3106_v27  ;;  %v3894_v25 = vld [vmem:[%s4864_s1 + $0x150] sm:$0xff]  ;;  %v3789_v27 = vld [vmem:[%s4155_s3 + $0x28c] sm:$0xf] }
  0x61   : > { %v3918_v26 = vld [vmem:[%s4864_s1 + $0x210] sm:$0xff] }
  0x62   : > { %2394 = vmatpush.bf16.msra.mxu3 %v3910_v14 }
  0x63   : > { %2483 = vmatpush.bf16.msra.mxu0 %v3918_v26  ;;  %v3214_v26 = vld [vmem:[%s4155_s3 + $0x2fc] sm:$0xf0] }
  0x6c   : > { %1863 = vmatmul.bf16.vlgmr.msrb.gmra.mxu1 %v2849_v36  ;;  %1952 = vmatmul.bf16.vlgmr.msrb.gmra.mxu2 %v2853_v37 }
  0x6d   : > { %2041 = vmatmul.bf16.vlgmr.msrb.gmra.mxu3 %v2857_v38  ;;  %v3896_v38 = vld [vmem:[%s4864_s1 + $0x160] sm:$0xff] }
  0x6e   : > { %2130 = vmatmul.bf16.vlgmr.msrb.gmra.mxu0 %v2861_v39  ;;  %2214 = vmatpush.bf16.msra.mxu1 %v3896_v38 }
  0x72   : > { %2215 = vmatpush.bf16.msra.mxu1 %v3895_v20 }
  0x76   : > { %2216 = vmatpush.bf16.msra.mxu1 %v3894_v25  ;;  %v3799_v25 = vld [vmem:[%s4155_s3 + $0x2dc] sm:$0xf] }
  0x7c   : > { %1868 = vmatmul.bf16.gmra.mxu1 %v2885_v52  ;;  %1957 = vmatmul.bf16.gmra.mxu2 %v2889_v53  ;;  %v3029_v52 = vor.u32 %v3753_v42, %v3026_v43  ;;  %v3033_v53 = vor.u32 %v3758_v45, %v3032_v44 }
  0x7d   : > { %2046 = vmatmul.bf16.gmra.mxu3 %v2893_v54 }
  0x7e   : > { %2135 = vmatmul.bf16.gmra.mxu0 %v2897_v55  ;;  %v3037_v55 = vor.u32 %v3754_v46, %v3034_v47 }
  0x8c   : > { %1873 = vmatmul.bf16.gmra.mxu1 %v2921_v0  ;;  %1962 = vmatmul.bf16.gmra.mxu2 %v2925_v1  ;;  %v3068_v0 = vld [vmem:[%s4155_s3 + $0x1b8] sm:$0xf]  ;;  %v3767_v1 = vld [vmem:[%s4155_s3 + $0x1d8] sm:$0xf0] }
  0x8d   : > { %2051 = vmatmul.bf16.gmra.mxu3 %v2929_v2  ;;  %v3763_v2 = vld [vmem:[%s4155_s3 + $0x1bc] sm:$0xf]  ;;  %v3069_v9 = vor.u32 %v3767_v1, %v3068_v0 }
  0x8e   : > { %2140 = vmatmul.bf16.gmra.mxu0 %v2933_v3  ;;  %v3070_v3 = vld [vmem:[%s4155_s3 + $0x1dc] sm:$0xf0] }
  0x8f   : > { %v3073_v11 = vor.u32 %v3763_v2, %v3070_v3  ;;  %v3137_v2 = vor.u32 %v3780_v48, %v3134_v49  ;;  %v3795_v48 = vld [vmem:[%s4155_s3 + $0x2b8] sm:$0xf0] }
  0x9c   : > { %1878 = vmatmul.bf16.gmra.mxu1 %v2957_v16  ;;  %1967 = vmatmul.bf16.gmra.mxu2 %v2961_v17 }
  0x9d   : > { %2056 = vmatmul.bf16.gmra.mxu3 %v2965_v18 }
  0x9e   : > { %2145 = vmatmul.bf16.gmra.mxu0 %v2969_v19 }
  0xa9   : > { %v4364_v30 = vpop.f32.mrf.mxu1 }
  0xab   : > { %v4366_v33 = vpop.f32.mrf.mxu0 }
  0xac   : > { %1883 = vmatmul.bf16.gmra.mxu1 %v2993_v28  ;;  %1972 = vmatmul.bf16.gmra.mxu2 %v2997_v29  ;;  %v3112_v28 = vld [vmem:[%s4155_s3 + $0x208] sm:$0xf]  ;;  %v3777_v29 = vld [vmem:[%s4155_s3 + $0x228] sm:$0xf0] }
  0xad   : > { %2061 = vmatmul.bf16.gmra.mxu3 %v3001_v31  ;;  %v3113_v42 = vor.u32 %v3777_v29, %v3112_v28  ;;  %v3170_v28 = vld [vmem:[%s4155_s3 + $0x2ac] sm:$0xf0] }
  0xae   : > { %2150 = vmatmul.bf16.gmra.mxu0 %v3005_v32 }
  0xaf   : > { %v4374_v36 = vpop.f32.mrf.mxu2 }
  0xb0   : > { %v4376_v37 = vpop.f32.mrf.mxu3 }
  0xb1   : > { %v4381_v39 = vpop.f32.mrf.mxu1 }
  0xb3   : > { %v4383_v40 = vpop.f32.mrf.mxu0 }
  0xb7   : > { %v4396_v50 = vpop.f32.mrf.mxu2 }
  0xb8   : > { %v4398_v51 = vpop.f32.mrf.mxu3 }
  0xb9   : > { %v4400_v54 = vpop.f32.mrf.mxu1 }
  0xbb   : > { %v4402_v57 = vpop.f32.mrf.mxu0 }
  0xbc   : > { %1888 = vmatmul.bf16.gmra.mxu1 %v3029_v52  ;;  %1977 = vmatmul.bf16.gmra.mxu2 %v3033_v53  ;;  %v3140_v52 = vld [vmem:[%s4155_s3 + $0x248] sm:$0xf]  ;;  %v3785_v53 = vld [vmem:[%s4155_s3 + $0x268] sm:$0xf0] }
  0xbd   : > { %2066 = vmatmul.bf16.gmra.mxu3 %v3037_v55  ;;  %v3781_v55 = vld [vmem:[%s4155_s3 + $0x24c] sm:$0xf]  ;;  %v3141_v3 = vor.u32 %v3785_v53, %v3140_v52 }
  0xbe   : > { %2155 = vmatmul.bf16.gmra.mxu0 %v3041_v56  ;;  %v3142_v56 = vld [vmem:[%s4155_s3 + $0x26c] sm:$0xf0] }
  0xbf   : > { %v4404_v58 = vpop.f32.mrf.mxu2  ;;  %v3145_v5 = vor.u32 %v3781_v55, %v3142_v56  ;;  %v3173_v55 = vor.u32 %v3789_v27, %v3170_v28  ;;  %v3220_v27 = vld [vmem:[%s4155_s3 + $0x2e0] sm:$0xf]  ;;  %v3804_v28 = vld [vmem:[%s4155_s3 + $0x300] sm:$0xf0] }
  0xc0   : > { %v4406_v59 = vpop.f32.mrf.mxu3 }
  0xc1   : > { %v4408_v60 = vpop.f32.mrf.mxu1 }
  0xc3   : > { %v4410_v61 = vpop.f32.mrf.mxu0 }
  0xc7   : > { %v4420_v6 = vpop.f32.mrf.mxu2 }
  0xc8   : > { %v4422_v7 = vpop.f32.mrf.mxu3 }
  0xc9   : > { %v4424_v10 = vpop.f32.mrf.mxu1 }
  0xcb   : > { %v4426_v13 = vpop.f32.mrf.mxu0 }
  0xcc   : > { %1893 = vmatmul.bf16.gmra.mxu1 %v3065_v8  ;;  %1982 = vmatmul.bf16.gmra.mxu2 %v3069_v9  ;;  %v3149_v8 = vor.u32 %v3786_v63, %v3148_v62 }
  0xcd   : > { %2071 = vmatmul.bf16.gmra.mxu3 %v3073_v11 }
  0xce   : > { %2160 = vmatmul.bf16.gmra.mxu0 %v3077_v12  ;;  %v3902_v12 = vld [vmem:[%s4864_s1 + $0x190] sm:$0xff] }
  0xcf   : > { %v4434_v16 = vpop.f32.mrf.mxu2  ;;  %2305 = vmatpush.bf16.msra.mxu2 %v3902_v12 }
  0xd0   : > { %v4436_v17 = vpop.f32.mrf.mxu3 }
  0xd1   : > { %v4438_v18 = vpop.f32.mrf.mxu1 }
  0xd3   : > { %v4440_v19 = vpop.f32.mrf.mxu0 }
  0xd7   : > { %v4456_v31 = vpop.f32.mrf.mxu2 }
  0xd8   : > { %v4458_v32 = vpop.f32.mrf.mxu3 }
  0xd9   : > { %v4460_v38 = vpop.f32.mrf.mxu1 }
  0xdb   : > { %v4462_v43 = vpop.f32.mrf.mxu0 }
  0xdc   : > { %1898 = vmatmul.bf16.gmra.mxu1 %v3101_v34  ;;  %1987 = vmatmul.bf16.gmra.mxu2 %v3105_v35  ;;  %v3176_v34 = vld [vmem:[%s4155_s3 + $0x290] sm:$0xf]  ;;  %v3794_v35 = vld [vmem:[%s4155_s3 + $0x2b0] sm:$0xf0] }
  0xdd   : > { %2076 = vmatmul.bf16.gmra.mxu3 %v3109_v41  ;;  %v3790_v41 = vld [vmem:[%s4155_s3 + $0x294] sm:$0xf]  ;;  %v3177_v56 = vor.u32 %v3794_v35, %v3176_v34 }
  0xde   : > { %2165 = vmatmul.bf16.gmra.mxu0 %v3113_v42  ;;  %v3178_v42 = vld [vmem:[%s4155_s3 + $0x2b4] sm:$0xf0] }
  0xdf   : > { %v4464_v44 = vpop.f32.mrf.mxu2  ;;  %v3181_v63 = vor.u32 %v3790_v41, %v3178_v42 }
  0xe0   : > { %v4466_v45 = vpop.f32.mrf.mxu3 }
  0xe1   : > { %v4468_v46 = vpop.f32.mrf.mxu1 }
  0xe3   : > { %v4470_v47 = vpop.f32.mrf.mxu0 }
  0xe7   : > { %v4480_v0 = vpop.f32.mrf.mxu2 }
  0xe8   : > { %v4482_v1 = vpop.f32.mrf.mxu3 }
  0xe9   : > { %v1864_v4 = vpop.f32.mrf.mxu1 }
  0xea   : > { %v1865_v9 = vadd.f32 %v1864_v4, %v4366_v33 }
  0xeb   : > { %v2131_v11 = vpop.f32.mrf.mxu0 }
  0xec   : > { %1903 = vmatmul.bf16.gmra.mxu1 %v3137_v2  ;;  %1992 = vmatmul.bf16.gmra.mxu2 %v3141_v3 }
  0xed   : > { %2081 = vmatmul.bf16.gmra.mxu3 %v3145_v5 }
  0xee   : > { %2170 = vmatmul.bf16.gmra.mxu0 %v3149_v8 }
  0xef   : > { %v1953_v15 = vpop.f32.mrf.mxu2 }
  0xf0   : > { %v1954_v33 = vadd.f32 %v1953_v15, %v1865_v9  ;;  %v2042_v20 = vpop.f32.mrf.mxu3 }
  0xf1   : > { %v1866_v21 = vpop.f32.mrf.mxu1 }
  0xf2   : > { %v2043_v22 = vadd.f32 %v2042_v20, %v1954_v33  ;;  %v1867_v23 = vadd.f32 %v1866_v21, %v4383_v40  ;;  %v3184_v40 = vld [vmem:[%s4155_s3 + $0x298] sm:$0xf]  ;;  %v3798_v20 = vld [vmem:[%s4155_s3 + $0x2d4] sm:$0xf] }
  0xf3   : > { %v2133_v24 = vpop.f32.mrf.mxu0  ;;  %v3185_v2 = vor.u32 %v3795_v48, %v3184_v40  ;;  %v3206_v21 = vld [vmem:[%s4155_s3 + $0x2f4] sm:$0xf0] }
  0xf4   : > { %v4500_v29 = vadd.f32 %v2131_v11, %v2043_v22  ;;  %v3209_v42 = vor.u32 %v3798_v20, %v3206_v21  ;;  %v3248_v20 = vld [vmem:[%s4155_s3 + $0x320] sm:$0xf]  ;;  %v3812_v21 = vld [vmem:[%s4155_s3 + $0x340] sm:$0xf0] }
  0xf7   : > { %v1955_v49 = vpop.f32.mrf.mxu2 }
  0xf8   : > { %v1956_v52 = vadd.f32 %v1955_v49, %v1867_v23  ;;  %v2044_v53 = vpop.f32.mrf.mxu3  ;;  %v3212_v23 = vld [vmem:[%s4155_s3 + $0x2d8] sm:$0xf]  ;;  %v3217_v49 = vor.u32 %v3799_v25, %v3214_v26  ;;  %v3813_v25 = vld [vmem:[%s4155_s3 + $0x348] sm:$0xf0] }
  0xf9   : > { %v1869_v62 = vpop.f32.mrf.mxu1 }
  0xfa   : > { %v2045_v3 = vadd.f32 %v2044_v53, %v1956_v52  ;;  %v1870_v4 = vadd.f32 %v1869_v62, %v4402_v57  ;;  %v3221_v52 = vor.u32 %v3804_v28, %v3220_v27  ;;  %v3901_v62 = vld [vmem:[%s4864_s1 + $0x188] sm:$0xff] }
  0xfb   : > { %v2136_v5 = vpop.f32.mrf.mxu0  ;;  %2306 = vmatpush.bf16.msra.mxu2 %v3901_v62 }
  0xfc   : > { %1908 = vmatmul.bf16.gmra.mxu1 %v3173_v55  ;;  %1997 = vmatmul.bf16.gmra.mxu2 %v3177_v56  ;;  %v4509_v8 = vadd.f32 %v2133_v24, %v2045_v3  ;;  %v3803_v24 = vld [vmem:[%s4155_s3 + $0x2f8] sm:$0xf0] }
  0xfd   : > { %2086 = vmatmul.bf16.gmra.mxu3 %v3181_v63  ;;  %v3213_v40 = vor.u32 %v3803_v24, %v3212_v23  ;;  %v3909_v63 = vld [vmem:[%s4864_s1 + $0x1c8] sm:$0xff]  ;;  %v3808_v23 = vld [vmem:[%s4155_s3 + $0x324] sm:$0xf] }
  0xfe   : > { %2175 = vmatmul.bf16.gmra.mxu0 %v3185_v2  ;;  %2395 = vmatpush.bf16.msra.mxu3 %v3909_v63  ;;  %v3250_v24 = vld [vmem:[%s4155_s3 + $0x344] sm:$0xf0] }
  0xff   : > { %v1958_v9 = vpop.f32.mrf.mxu2 }
 0x100   : > { %v1959_v11 = vadd.f32 %v1958_v9, %v1870_v4  ;;  %v2047_v12 = vpop.f32.mrf.mxu3 }
 0x101   : > { %v1871_v14 = vpop.f32.mrf.mxu1 }
 0x102   : > { %v2048_v15 = vadd.f32 %v2047_v12, %v1959_v11  ;;  %v1872_v57 = vadd.f32 %v1871_v14, %v4410_v61  ;;  %v3893_v12 = vld [vmem:[%s4864_s1 + $0x148] sm:$0xff] }
 0x103   : > { %v2138_v33 = vpop.f32.mrf.mxu0  ;;  %v3917_v14 = vld [vmem:[%s4864_s1 + $0x208] sm:$0xff]  ;;  %2217 = vmatpush.bf16.msra.mxu1 %v3893_v12 }
 0x104   : > { %v4514_v22 = vadd.f32 %v2136_v5, %v2048_v15  ;;  %v3807_v15 = vld [vmem:[%s4155_s3 + $0x31c] sm:$0xf]  ;;  %2484 = vmatpush.bf16.msra.mxu0 %v3917_v14  ;;  %v3817_v12 = vld [vmem:[%s4155_s3 + $0x36c] sm:$0xf]  ;;  %v3286_v14 = vld [vmem:[%s4155_s3 + $0x38c] sm:$0xf0] }
 0x107   : > { %v1960_v34 = vpop.f32.mrf.mxu2 }
 0x108   : > { %v1961_v35 = vadd.f32 %v1960_v34, %v1872_v57  ;;  %v2049_v41 = vpop.f32.mrf.mxu3  ;;  %v3242_v57 = vld [vmem:[%s4155_s3 + $0x33c] sm:$0xf0] }
 0x109   : > { %v1874_v48 = vpop.f32.mrf.mxu1  ;;  %v3245_v34 = vor.u32 %v3807_v15, %v3242_v57  ;;  %v3292_v15 = vld [vmem:[%s4155_s3 + $0x370] sm:$0xf]  ;;  %v3822_v57 = vld [vmem:[%s4155_s3 + $0x390] sm:$0xf0] }
 0x10a   : > { %v2050_v61 = vadd.f32 %v2049_v41, %v1961_v35  ;;  %v1875_v53 = vadd.f32 %v1874_v48, %v4426_v13  ;;  %v3249_v35 = vor.u32 %v3812_v21, %v3248_v20 }
 0x10b   : > { %v2141_v55 = vpop.f32.mrf.mxu0 }
 0x10c   : > { %1913 = vmatmul.bf16.gmra.mxu1 %v3209_v42  ;;  %2002 = vmatmul.bf16.gmra.mxu2 %v3213_v40  ;;  %v4523_v56 = vadd.f32 %v2138_v33, %v2050_v61  ;;  %v3253_v42 = vor.u32 %v3808_v23, %v3250_v24 }
 0x10d   : > { %2091 = vmatmul.bf16.gmra.mxu3 %v3217_v49 }
 0x10e   : > { %2180 = vmatmul.bf16.gmra.mxu0 %v3221_v52 }
 0x10f   : > { %v1963_v2 = vpop.f32.mrf.mxu2 }
 0x110   : > { %v1964_v13 = vadd.f32 %v1963_v2, %v1875_v53  ;;  %v2052_v3 = vpop.f32.mrf.mxu3 }
 0x111   : > { %v1876_v4 = vpop.f32.mrf.mxu1 }
 0x112   : > { %v2053_v5 = vadd.f32 %v2052_v3, %v1964_v13  ;;  %v1877_v9 = vadd.f32 %v1876_v4, %v4440_v19  ;;  %v3256_v19 = vld [vmem:[%s4155_s3 + $0x328] sm:$0xf]  ;;  %v3816_v3 = vld [vmem:[%s4155_s3 + $0x364] sm:$0xf] }
 0x113   : > { %v2143_v11 = vpop.f32.mrf.mxu0  ;;  %v3257_v40 = vor.u32 %v3813_v25, %v3256_v19  ;;  %v3278_v4 = vld [vmem:[%s4155_s3 + $0x384] sm:$0xf0] }
 0x114   : > { %v4540_v33 = vadd.f32 %v2141_v55, %v2053_v5  ;;  %v3281_v24 = vor.u32 %v3816_v3, %v3278_v4  ;;  %v3830_v3 = vld [vmem:[%s4155_s3 + $0x3d0] sm:$0xf0] }
 0x115   : > { %v3826_v4 = vld [vmem:[%s4155_s3 + $0x3b4] sm:$0xf] }
 0x117   : > { %v1965_v26 = vpop.f32.mrf.mxu2 }
 0x118   : > { %v1966_v27 = vadd.f32 %v1965_v26, %v1877_v9  ;;  %v2054_v28 = vpop.f32.mrf.mxu3  ;;  %v3284_v9 = vld [vmem:[%s4155_s3 + $0x368] sm:$0xf]  ;;  %v3289_v26 = vor.u32 %v3817_v12, %v3286_v14  ;;  %v3328_v12 = vld [vmem:[%s4155_s3 + $0x3b8] sm:$0xf]  ;;  %v3831_v14 = vld [vmem:[%s4155_s3 + $0x3d8] sm:$0xf0] }
 0x119   : > { %v1879_v41 = vpop.f32.mrf.mxu1 }
 0x11a   : > { %v2055_v48 = vadd.f32 %v2054_v28, %v1966_v27  ;;  %v1880_v49 = vadd.f32 %v1879_v41, %v4462_v43  ;;  %v3293_v27 = vor.u32 %v3822_v57, %v3292_v15  ;;  %v3908_v41 = vld [vmem:[%s4864_s1 + $0x1c0] sm:$0xff] }
 0x11b   : > { %v2146_v52 = vpop.f32.mrf.mxu0  ;;  %2396 = vmatpush.bf16.msra.mxu3 %v3908_v41 }
 0x11c   : > { %1918 = vmatmul.bf16.gmra.mxu1 %v3245_v34  ;;  %2007 = vmatmul.bf16.gmra.mxu2 %v3249_v35  ;;  %v4549_v61 = vadd.f32 %v2143_v11, %v2055_v48  ;;  %v3821_v11 = vld [vmem:[%s4155_s3 + $0x388] sm:$0xf0]  ;;  %v3900_v35 = vld [vmem:[%s4864_s1 + $0x180] sm:$0xff] }
 0x11d   : > { %2096 = vmatmul.bf16.gmra.mxu3 %v3253_v42  ;;  %v3285_v19 = vor.u32 %v3821_v11, %v3284_v9  ;;  %2307 = vmatpush.bf16.msra.mxu2 %v3900_v35  ;;  %v3322_v11 = vld [vmem:[%s4155_s3 + $0x3d4] sm:$0xf0] }
 0x11e   : > { %2185 = vmatmul.bf16.gmra.mxu0 %v3257_v40 }
 0x11f   : > { %v1968_v53 = vpop.f32.mrf.mxu2 }
 0x120   : > { %v1969_v55 = vadd.f32 %v1968_v53, %v1880_v49  ;;  %v2057_v62 = vpop.f32.mrf.mxu3 }
 0x121   : > { %v1881_v63 = vpop.f32.mrf.mxu1 }
 0x122   : > { %v2058_v2 = vadd.f32 %v2057_v62, %v1969_v55  ;;  %v1882_v43 = vadd.f32 %v1881_v63, %v4470_v47  ;;  %v3892_v62 = vld [vmem:[%s4864_s1 + $0x140] sm:$0xff]  ;;  %v3825_v63 = vld [vmem:[%s4155_s3 + $0x3ac] sm:$0xf] }
 0x123   : > { %v2148_v13 = vpop.f32.mrf.mxu0  ;;  %2218 = vmatpush.bf16.msra.mxu1 %v3892_v62  ;;  %v3356_v62 = vld [vmem:[%s4155_s3 + $0x3f8] sm:$0xf] }
 0x124   : > { %v4554_v5 = vadd.f32 %v2146_v52, %v2058_v2  ;;  %v3314_v2 = vld [vmem:[%s4155_s3 + $0x3cc] sm:$0xf0] }
 0x127   : > { %v1970_v20 = vpop.f32.mrf.mxu2 }
 0x128   : > { %v1971_v21 = vadd.f32 %v1970_v20, %v1882_v43  ;;  %v2059_v23 = vpop.f32.mrf.mxu3 }
 0x129   : > { %v1884_v25 = vpop.f32.mrf.mxu1 }
 0x12a   : > { %v2060_v47 = vadd.f32 %v2059_v23, %v1971_v21  ;;  %v1885_v42 = vadd.f32 %v1884_v25, %v4364_v30  ;;  %v3916_v30 = vld [vmem:[%s4864_s1 + $0x200] sm:$0xff]  ;;  %v3317_v21 = vor.u32 %v3825_v63, %v3314_v2  ;;  %v3329_v25 = vor.u32 %v3831_v14, %v3328_v12 }
 0x12b   : > { %v2151_v28 = vpop.f32.mrf.mxu0  ;;  %2485 = vmatpush.bf16.msra.mxu0 %v3916_v30  ;;  %v3835_v30 = vld [vmem:[%s4155_s3 + $0x3fc] sm:$0xf]  ;;  %v3358_v2 = vld [vmem:[%s4155_s3 + $0x41c] sm:$0xf0] }
 0x12c   : > { %1923 = vmatmul.bf16.gmra.mxu1 %v3281_v24  ;;  %2012 = vmatmul.bf16.gmra.mxu2 %v3285_v19  ;;  %v4562_v34 = vadd.f32 %v2148_v13, %v2060_v47  ;;  %v3320_v13 = vld [vmem:[%s4155_s3 + $0x3b0] sm:$0xf]  ;;  %v3325_v19 = vor.u32 %v3826_v4, %v3322_v11 }
 0x12d   : > { %2101 = vmatmul.bf16.gmra.mxu3 %v3289_v26  ;;  %v3321_v23 = vor.u32 %v3830_v3, %v3320_v13  ;;  %v3364_v13 = vld [vmem:[%s4155_s3 + $0x400] sm:$0xf]  ;;  %v3840_v3 = vld [vmem:[%s4155_s3 + $0x420] sm:$0xf0] }
 0x12e   : > { %2190 = vmatmul.bf16.gmra.mxu0 %v3293_v27 }
 0x12f   : > { %v1973_v40 = vpop.f32.mrf.mxu2 }
 0x130   : > { %v1974_v48 = vadd.f32 %v1973_v40, %v1885_v42  ;;  %v2062_v49 = vpop.f32.mrf.mxu3 }
 0x131   : > { %v1886_v52 = vpop.f32.mrf.mxu1 }
 0x132   : > { %v2063_v53 = vadd.f32 %v2062_v49, %v1974_v48  ;;  %v1887_v9 = vadd.f32 %v1886_v52, %v4381_v39  ;;  %v3834_v49 = vld [vmem:[%s4155_s3 + $0x3f4] sm:$0xf]  ;;  %v3350_v52 = vld [vmem:[%s4155_s3 + $0x414] sm:$0xf0] }
 0x133   : > { %v2153_v55 = vpop.f32.mrf.mxu0  ;;  %v3353_v11 = vor.u32 %v3834_v49, %v3350_v52  ;;  %v3394_v52 = vld [vmem:[%s4155_s3 + $0x464] sm:$0xf0] }
 0x134   : > { %v4579_v43 = vadd.f32 %v2151_v28, %v2063_v53 }
 0x137   : > { %v1975_v15 = vpop.f32.mrf.mxu2 }
 0x138   : > { %v1976_v57 = vadd.f32 %v1975_v15, %v1887_v9  ;;  %v2064_v20 = vpop.f32.mrf.mxu3  ;;  %v3361_v15 = vor.u32 %v3835_v30, %v3358_v2 }
 0x139   : > { %v1889_v24 = vpop.f32.mrf.mxu1 }
 0x13a   : > { %v2065_v26 = vadd.f32 %v2064_v20, %v1976_v57  ;;  %v1890_v47 = vadd.f32 %v1889_v24, %v4400_v54  ;;  %v3365_v57 = vor.u32 %v3840_v3, %v3364_v13 }
 0x13b   : > { %v2156_v27 = vpop.f32.mrf.mxu0 }
 0x13c   : > { %1928 = vmatmul.bf16.gmra.mxu1 %v3317_v21  ;;  %2017 = vmatmul.bf16.gmra.mxu2 %v3321_v23  ;;  %v4588_v39 = vadd.f32 %v2153_v55, %v2065_v26  ;;  %v3839_v55 = vld [vmem:[%s4155_s3 + $0x418] sm:$0xf0] }
 0x13d   : > { %2106 = vmatmul.bf16.gmra.mxu3 %v3325_v19  ;;  %v3357_v12 = vor.u32 %v3839_v55, %v3356_v62  ;;  %v3400_v62 = vld [vmem:[%s4155_s3 + $0x448] sm:$0xf]  ;;  %v3849_v55 = vld [vmem:[%s4155_s3 + $0x468] sm:$0xf0] }
 0x13e   : > { %2195 = vmatmul.bf16.gmra.mxu0 %v3329_v25 }
 0x13f   : > { %v1978_v28 = vpop.f32.mrf.mxu2 }
 0x140   : > { %v1979_v35 = vadd.f32 %v1978_v28, %v1890_v47  ;;  %v2067_v41 = vpop.f32.mrf.mxu3  ;;  %v3843_v28 = vld [vmem:[%s4155_s3 + $0x43c] sm:$0xf] }
 0x141   : > { %v1891_v42 = vpop.f32.mrf.mxu1 }
 0x142   : > { %v2068_v40 = vadd.f32 %v2067_v41, %v1979_v35  ;;  %v1892_v63 = vadd.f32 %v1891_v42, %v4408_v60  ;;  %v3386_v35 = vld [vmem:[%s4155_s3 + $0x45c] sm:$0xf0] }
 0x143   : > { %v2158_v48 = vpop.f32.mrf.mxu0  ;;  %v3392_v42 = vld [vmem:[%s4155_s3 + $0x440] sm:$0xf]  ;;  %v3389_v2 = vor.u32 %v3843_v28, %v3386_v35 }
 0x144   : > { %v4593_v53 = vadd.f32 %v2156_v27, %v2068_v40  ;;  %v3848_v40 = vld [vmem:[%s4155_s3 + $0x460] sm:$0xf0]  ;;  %v2870_v35 = vld [vmem:[%s4155_s3 + $0x3c] sm:$0xf0] }
 0x145   : > { %v3393_v13 = vor.u32 %v3848_v40, %v3392_v42  ;;  %v2876_v42 = vld [vmem:[%s4155_s3 + $0x20] sm:$0xf]  ;;  %v3716_v40 = vld [vmem:[%s4155_s3 + $0x40] sm:$0xf0] }
 0x147   : > { %v1980_v54 = vpop.f32.mrf.mxu2 }
 0x148   : > { %v1981_v4 = vadd.f32 %v1980_v54, %v1892_v63  ;;  %v2069_v9 = vpop.f32.mrf.mxu3 }
 0x149   : > { %v1894_v14 = vpop.f32.mrf.mxu1 }
 0x14a   : > { %v2070_v20 = vadd.f32 %v2069_v9, %v1981_v4  ;;  %v1895_v23 = vadd.f32 %v1894_v14, %v4424_v10  ;;  %v3401_v4 = vor.u32 %v3849_v55, %v3400_v62 }
 0x14b   : > { %v2161_v21 = vpop.f32.mrf.mxu0 }
 0x14c   : > { %1933 = vmatmul.bf16.gmra.mxu1 %v3353_v11  ;;  %2022 = vmatmul.bf16.gmra.mxu2 %v3357_v12  ;;  %v4602_v60 = vadd.f32 %v2158_v48, %v2070_v20  ;;  %v3844_v48 = vld [vmem:[%s4155_s3 + $0x444] sm:$0xf] }
 0x14d   : > { %2111 = vmatmul.bf16.gmra.mxu3 %v3361_v15  ;;  %v3397_v54 = vor.u32 %v3844_v48, %v3394_v52 }
 0x14e   : > { %2200 = vmatmul.bf16.gmra.mxu0 %v3365_v57 }
 0x14f   : > { %v1983_v24 = vpop.f32.mrf.mxu2 }
 0x150   : > { %v1984_v19 = vadd.f32 %v1983_v24, %v1895_v23  ;;  %v2072_v25 = vpop.f32.mrf.mxu3  ;;  %v3710_v24 = vld [vmem:[%s4155_s3 + $0x14] sm:$0xf] }
 0x151   : > { %v1896_v26 = vpop.f32.mrf.mxu1 }
 0x152   : > { %v2073_v27 = vadd.f32 %v2072_v25, %v1984_v19  ;;  %v1897_v49 = vadd.f32 %v1896_v26, %v4438_v18  ;;  %v2862_v19 = vld [vmem:[%s4155_s3 + $0x34] sm:$0xf0] }
 0x153   : > { %v2163_v47 = vpop.f32.mrf.mxu0  ;;  %v2868_v26 = vld [vmem:[%s4155_s3 + $0x18] sm:$0xf]  ;;  %v2865_v52 = vor.u32 %v3710_v24, %v2862_v19  ;;  %v2906_v19 = vld [vmem:[%s4155_s3 + $0x84] sm:$0xf0] }
 0x154   : > { %v4607_v41 = vadd.f32 %v2161_v21, %v2073_v27  ;;  %v3715_v27 = vld [vmem:[%s4155_s3 + $0x38] sm:$0xf0] }
 0x155   : > { %v2869_v62 = vor.u32 %v3715_v27, %v2868_v26  ;;  %v2912_v26 = vld [vmem:[%s4155_s3 + $0x68] sm:$0xf]  ;;  %v3725_v27 = vld [vmem:[%s4155_s3 + $0x88] sm:$0xf0] }
 0x157   : > { %v1985_v10 = vpop.f32.mrf.mxu2 }
 0x158   : > { %v1986_v30 = vadd.f32 %v1985_v10, %v1897_v49  ;;  %v2074_v63 = vpop.f32.mrf.mxu3 }
 0x159   : > { %v1899_v3 = vpop.f32.mrf.mxu1 }
 0x15a   : > { %v2075_v9 = vadd.f32 %v2074_v63, %v1986_v30  ;;  %v1900_v12 = vadd.f32 %v1899_v3, %v4460_v38  ;;  %v2877_v30 = vor.u32 %v3716_v40, %v2876_v42 }
 0x15b   : > { %v2166_v11 = vpop.f32.mrf.mxu0 }
 0x15c   : > { %1938 = vmatmul.bf16.gmra.mxu1 %v3389_v2  ;;  %2027 = vmatmul.bf16.gmra.mxu2 %v3393_v13  ;;  %v4616_v18 = vadd.f32 %v2163_v47, %v2075_v9  ;;  %v3711_v47 = vld [vmem:[%s4155_s3 + $0x1c] sm:$0xf] }
 0x15d   : > { %2116 = vmatmul.bf16.gmra.mxu3 %v3397_v54  ;;  %v2873_v10 = vor.u32 %v3711_v47, %v2870_v35 }
 0x15e   : > { %2205 = vmatmul.bf16.gmra.mxu0 %v3401_v4 }
 0x15f   : > { %v1988_v14 = vpop.f32.mrf.mxu2 }
 0x160   : > { %v1989_v15 = vadd.f32 %v1988_v14, %v1900_v12  ;;  %v2077_v57 = vpop.f32.mrf.mxu3  ;;  %v3719_v14 = vld [vmem:[%s4155_s3 + $0x5c] sm:$0xf] }
 0x161   : > { %v1901_v20 = vpop.f32.mrf.mxu1 }
 0x162   : > { %v2078_v21 = vadd.f32 %v2077_v57, %v1989_v15  ;;  %v1902_v28 = vadd.f32 %v1901_v20, %v4468_v46  ;;  %v2898_v15 = vld [vmem:[%s4155_s3 + $0x7c] sm:$0xf0] }
 0x163   : > { %v2168_v23 = vpop.f32.mrf.mxu0  ;;  %v2904_v20 = vld [vmem:[%s4155_s3 + $0x60] sm:$0xf]  ;;  %v2901_v35 = vor.u32 %v3719_v14, %v2898_v15  ;;  %v2942_v15 = vld [vmem:[%s4155_s3 + $0xcc] sm:$0xf0] }
 0x164   : > { %v4621_v25 = vadd.f32 %v2166_v11, %v2078_v21  ;;  %v3724_v21 = vld [vmem:[%s4155_s3 + $0x80] sm:$0xf0] }
 0x165   : > { %v2905_v42 = vor.u32 %v3724_v21, %v2904_v20  ;;  %v2948_v20 = vld [vmem:[%s4155_s3 + $0xb0] sm:$0xf]  ;;  %v3734_v21 = vld [vmem:[%s4155_s3 + $0xd0] sm:$0xf0] }
 0x167   : > { %v1990_v38 = vpop.f32.mrf.mxu2 }
 0x168   : > { %v1991_v48 = vadd.f32 %v1990_v38, %v1902_v28  ;;  %v2079_v49 = vpop.f32.mrf.mxu3 }
 0x169   : > { %v1904_v55 = vpop.f32.mrf.mxu1 }
 0x16a   : > { %v2080_v63 = vadd.f32 %v2079_v49, %v1991_v48  ;;  %v1905_v13 = vadd.f32 %v1904_v55, %v4374_v36  ;;  %v2913_v48 = vor.u32 %v3725_v27, %v2912_v26 }
 0x16b   : > { %v2171_v2 = vpop.f32.mrf.mxu0 }
 0x16c   : > { %2219 = vmatmul.bf16.vlgmr.msra.gmra.mxu1 %v2865_v52  ;;  %2308 = vmatmul.bf16.vlgmr.msra.gmra.mxu2 %v2869_v62  ;;  %v4630_v46 = vadd.f32 %v2168_v23, %v2080_v63  ;;  %v3720_v23 = vld [vmem:[%s4155_s3 + $0x64] sm:$0xf] }
 0x16d   : > { %2397 = vmatmul.bf16.vlgmr.msra.gmra.mxu3 %v2873_v10  ;;  %v2909_v38 = vor.u32 %v3720_v23, %v2906_v19 }
 0x16e   : > { %2486 = vmatmul.bf16.vlgmr.msra.gmra.mxu0 %v2877_v30 }
 0x16f   : > { %v1993_v3 = vpop.f32.mrf.mxu2 }
 0x170   : > { %v1994_v54 = vadd.f32 %v1993_v3, %v1905_v13  ;;  %v2082_v4 = vpop.f32.mrf.mxu3  ;;  %v3728_v3 = vld [vmem:[%s4155_s3 + $0xa4] sm:$0xf] }
 0x171   : > { %v1906_v9 = vpop.f32.mrf.mxu1 }
 0x172   : > { %v2083_v11 = vadd.f32 %v2082_v4, %v1994_v54  ;;  %v1907_v24 = vadd.f32 %v1906_v9, %v4396_v50  ;;  %v2934_v54 = vld [vmem:[%s4155_s3 + $0xc4] sm:$0xf0] }
 0x173   : > { %v2173_v12 = vpop.f32.mrf.mxu0  ;;  %v2940_v9 = vld [vmem:[%s4155_s3 + $0xa8] sm:$0xf]  ;;  %v2937_v19 = vor.u32 %v3728_v3, %v2934_v54  ;;  %v2978_v54 = vld [vmem:[%s4155_s3 + $0x114] sm:$0xf0] }
 0x174   : > { %v4635_v57 = vadd.f32 %v2171_v2, %v2083_v11  ;;  %v3733_v11 = vld [vmem:[%s4155_s3 + $0xc8] sm:$0xf0] }
 0x175   : > { %v2941_v26 = vor.u32 %v3733_v11, %v2940_v9  ;;  %v2984_v9 = vld [vmem:[%s4155_s3 + $0xf8] sm:$0xf]  ;;  %v3743_v11 = vld [vmem:[%s4155_s3 + $0x118] sm:$0xf0] }
 0x177   : > { %v1995_v36 = vpop.f32.mrf.mxu2 }
 0x178   : > { %v1996_v47 = vadd.f32 %v1995_v36, %v1907_v24  ;;  %v2084_v28 = vpop.f32.mrf.mxu3 }
 0x179   : > { %v1909_v40 = vpop.f32.mrf.mxu1 }
 0x17a   : > { %v2085_v49 = vadd.f32 %v2084_v28, %v1996_v47  ;;  %v1910_v62 = vadd.f32 %v1909_v40, %v4404_v58  ;;  %v2949_v47 = vor.u32 %v3734_v21, %v2948_v20 }
 0x17b   : > { %v2176_v52 = vpop.f32.mrf.mxu0 }
 0x17c   : > { %2224 = vmatmul.bf16.gmra.mxu1 %v2901_v35  ;;  %2313 = vmatmul.bf16.gmra.mxu2 %v2905_v42  ;;  %v4644_v50 = vadd.f32 %v2173_v12, %v2085_v49  ;;  %v3729_v12 = vld [vmem:[%s4155_s3 + $0xac] sm:$0xf] }
 0x17d   : > { %2402 = vmatmul.bf16.gmra.mxu3 %v2909_v38  ;;  %v2945_v36 = vor.u32 %v3729_v12, %v2942_v15 }
 0x17e   : > { %2491 = vmatmul.bf16.gmra.mxu0 %v2913_v48 }
 0x17f   : > { %v1998_v55 = vpop.f32.mrf.mxu2 }
 0x180   : > { %v1999_v10 = vadd.f32 %v1998_v55, %v1910_v62  ;;  %v2087_v30 = vpop.f32.mrf.mxu3  ;;  %v3737_v55 = vld [vmem:[%s4155_s3 + $0xec] sm:$0xf] }
 0x181   : > { %v1911_v63 = vpop.f32.mrf.mxu1 }
 0x182   : > { %v2088_v2 = vadd.f32 %v2087_v30, %v1999_v10  ;;  %v1912_v14 = vadd.f32 %v1911_v63, %v4420_v6  ;;  %v2970_v10 = vld [vmem:[%s4155_s3 + $0x10c] sm:$0xf0] }
 0x183   : > { %v2178_v13 = vpop.f32.mrf.mxu0  ;;  %v2976_v63 = vld [vmem:[%s4155_s3 + $0xf0] sm:$0xf]  ;;  %v2973_v15 = vor.u32 %v3737_v55, %v2970_v10  ;;  %v3014_v10 = vld [vmem:[%s4155_s3 + $0x15c] sm:$0xf0] }
 0x184   : > { %v4649_v4 = vadd.f32 %v2176_v52, %v2088_v2  ;;  %v3742_v2 = vld [vmem:[%s4155_s3 + $0x110] sm:$0xf0] }
 0x185   : > { %v2977_v20 = vor.u32 %v3742_v2, %v2976_v63  ;;  %v3020_v63 = vld [vmem:[%s4155_s3 + $0x140] sm:$0xf]  ;;  %v3752_v2 = vld [vmem:[%s4155_s3 + $0x160] sm:$0xf0] }
 0x187   : > { %v2000_v58 = vpop.f32.mrf.mxu2 }
 0x188   : > { %v2001_v23 = vadd.f32 %v2000_v58, %v1912_v14  ;;  %v2089_v24 = vpop.f32.mrf.mxu3 }
 0x189   : > { %v1914_v27 = vpop.f32.mrf.mxu1 }
 0x18a   : > { %v2090_v28 = vadd.f32 %v2089_v24, %v2001_v23  ;;  %v1915_v42 = vadd.f32 %v1914_v27, %v4434_v16  ;;  %v2985_v23 = vor.u32 %v3743_v11, %v2984_v9 }
 0x18b   : > { %v2181_v35 = vpop.f32.mrf.mxu0 }
 0x18c   : > { %2229 = vmatmul.bf16.gmra.mxu1 %v2937_v19  ;;  %2318 = vmatmul.bf16.gmra.mxu2 %v2941_v26  ;;  %v4658_v6 = vadd.f32 %v2178_v13, %v2090_v28  ;;  %v3738_v13 = vld [vmem:[%s4155_s3 + $0xf4] sm:$0xf] }
 0x18d   : > { %2407 = vmatmul.bf16.gmra.mxu3 %v2945_v36  ;;  %v2981_v58 = vor.u32 %v3738_v13, %v2978_v54 }
 0x18e   : > { %2496 = vmatmul.bf16.gmra.mxu0 %v2949_v47 }
 0x18f   : > { %v2003_v40 = vpop.f32.mrf.mxu2 }
 0x190   : > { %v2004_v38 = vadd.f32 %v2003_v40, %v1915_v42  ;;  %v2092_v48 = vpop.f32.mrf.mxu3  ;;  %v3746_v40 = vld [vmem:[%s4155_s3 + $0x134] sm:$0xf] }
 0x191   : > { %v1916_v49 = vpop.f32.mrf.mxu1 }
 0x192   : > { %v2093_v52 = vadd.f32 %v2092_v48, %v2004_v38  ;;  %v1917_v3 = vadd.f32 %v1916_v49, %v4456_v31  ;;  %v3006_v38 = vld [vmem:[%s4155_s3 + $0x154] sm:$0xf0] }
 0x193   : > { %v2183_v62 = vpop.f32.mrf.mxu0  ;;  %v3012_v49 = vld [vmem:[%s4155_s3 + $0x138] sm:$0xf]  ;;  %v3009_v54 = vor.u32 %v3746_v40, %v3006_v38  ;;  %v3050_v38 = vld [vmem:[%s4155_s3 + $0x1a4] sm:$0xf0] }
 0x194   : > { %v4663_v30 = vadd.f32 %v2181_v35, %v2093_v52  ;;  %v3751_v52 = vld [vmem:[%s4155_s3 + $0x158] sm:$0xf0] }
 0x195   : > { %v3013_v9 = vor.u32 %v3751_v52, %v3012_v49  ;;  %v3056_v49 = vld [vmem:[%s4155_s3 + $0x188] sm:$0xf]  ;;  %v3761_v52 = vld [vmem:[%s4155_s3 + $0x1a8] sm:$0xf0] }
 0x197   : > { %v2005_v16 = vpop.f32.mrf.mxu2 }
 0x198   : > { %v2006_v12 = vadd.f32 %v2005_v16, %v1917_v3  ;;  %v2094_v14 = vpop.f32.mrf.mxu3 }
 0x199   : > { %v1919_v21 = vpop.f32.mrf.mxu1 }
 0x19a   : > { %v2095_v24 = vadd.f32 %v2094_v14, %v2006_v12  ;;  %v1920_v26 = vadd.f32 %v1919_v21, %v4464_v44  ;;  %v3021_v12 = vor.u32 %v3752_v2, %v3020_v63 }
 0x19b   : > { %v2186_v19 = vpop.f32.mrf.mxu0 }
 0x19c   : > { %2234 = vmatmul.bf16.gmra.mxu1 %v2973_v15  ;;  %2323 = vmatmul.bf16.gmra.mxu2 %v2977_v20  ;;  %v4672_v31 = vadd.f32 %v2183_v62, %v2095_v24  ;;  %v3747_v62 = vld [vmem:[%s4155_s3 + $0x13c] sm:$0xf] }
 0x19d   : > { %2412 = vmatmul.bf16.gmra.mxu3 %v2981_v58  ;;  %v3017_v16 = vor.u32 %v3747_v62, %v3014_v10 }
 0x19e   : > { %2501 = vmatmul.bf16.gmra.mxu0 %v2985_v23 }
 0x19f   : > { %v2008_v27 = vpop.f32.mrf.mxu2 }
 0x1a0   : > { %v2009_v36 = vadd.f32 %v2008_v27, %v1920_v26  ;;  %v2097_v47 = vpop.f32.mrf.mxu3  ;;  %v3755_v27 = vld [vmem:[%s4155_s3 + $0x17c] sm:$0xf] }
 0x1a1   : > { %v1921_v28 = vpop.f32.mrf.mxu1 }
 0x1a2   : > { %v2098_v35 = vadd.f32 %v2097_v47, %v2009_v36  ;;  %v1922_v55 = vadd.f32 %v1921_v28, %v4480_v0  ;;  %v3042_v36 = vld [vmem:[%s4155_s3 + $0x19c] sm:$0xf0] }
 0x1a3   : > { %v2188_v42 = vpop.f32.mrf.mxu0  ;;  %v3048_v28 = vld [vmem:[%s4155_s3 + $0x180] sm:$0xf]  ;;  %v3045_v10 = vor.u32 %v3755_v27, %v3042_v36  ;;  %v3086_v36 = vld [vmem:[%s4155_s3 + $0x1ec] sm:$0xf0] }
 0x1a4   : > { %v4677_v48 = vadd.f32 %v2186_v19, %v2098_v35  ;;  %v3760_v35 = vld [vmem:[%s4155_s3 + $0x1a0] sm:$0xf0] }
 0x1a5   : > { %v3049_v63 = vor.u32 %v3760_v35, %v3048_v28  ;;  %v3092_v28 = vld [vmem:[%s4155_s3 + $0x1d0] sm:$0xf]  ;;  %v3770_v35 = vld [vmem:[%s4155_s3 + $0x1f0] sm:$0xf0] }
 0x1a7   : > { %v2010_v44 = vpop.f32.mrf.mxu2 }
 0x1a8   : > { %v2011_v13 = vadd.f32 %v2010_v44, %v1922_v55  ;;  %v2099_v3 = vpop.f32.mrf.mxu3 }
 0x1a9   : > { %v1924_v11 = vpop.f32.mrf.mxu1 }
 0x1aa   : > { %v2100_v14 = vadd.f32 %v2099_v3, %v2011_v13  ;;  %v1925_v20 = vadd.f32 %v1924_v11, %v4376_v37  ;;  %v3057_v13 = vor.u32 %v3761_v52, %v3056_v49 }
 0x1ab   : > { %v2191_v15 = vpop.f32.mrf.mxu0 }
 0x1ac   : > { %2239 = vmatmul.bf16.gmra.mxu1 %v3009_v54  ;;  %2328 = vmatmul.bf16.gmra.mxu2 %v3013_v9  ;;  %v4686_v0 = vadd.f32 %v2188_v42, %v2100_v14  ;;  %v3756_v42 = vld [vmem:[%s4155_s3 + $0x184] sm:$0xf] }
 0x1ad   : > { %2417 = vmatmul.bf16.gmra.mxu3 %v3017_v16  ;;  %v3053_v44 = vor.u32 %v3756_v42, %v3050_v38 }
 0x1ae   : > { %2506 = vmatmul.bf16.gmra.mxu0 %v3021_v12 }
 0x1af   : > { %v2013_v21 = vpop.f32.mrf.mxu2 }
 0x1b0   : > { %v2014_v58 = vadd.f32 %v2013_v21, %v1925_v20  ;;  %v2102_v23 = vpop.f32.mrf.mxu3  ;;  %v3764_v21 = vld [vmem:[%s4155_s3 + $0x1c4] sm:$0xf] }
 0x1b1   : > { %v1926_v24 = vpop.f32.mrf.mxu1 }
 0x1b2   : > { %v2103_v19 = vadd.f32 %v2102_v23, %v2014_v58  ;;  %v1927_v40 = vadd.f32 %v1926_v24, %v4398_v51  ;;  %v3078_v58 = vld [vmem:[%s4155_s3 + $0x1e4] sm:$0xf0] }
 0x1b3   : > { %v2193_v26 = vpop.f32.mrf.mxu0  ;;  %v3084_v24 = vld [vmem:[%s4155_s3 + $0x1c8] sm:$0xf]  ;;  %v3081_v38 = vor.u32 %v3764_v21, %v3078_v58  ;;  %v3122_v58 = vld [vmem:[%s4155_s3 + $0x234] sm:$0xf0] }
 0x1b4   : > { %v4691_v47 = vadd.f32 %v2191_v15, %v2103_v19  ;;  %v3769_v19 = vld [vmem:[%s4155_s3 + $0x1e8] sm:$0xf0] }
 0x1b5   : > { %v3085_v49 = vor.u32 %v3769_v19, %v3084_v24  ;;  %v3128_v24 = vld [vmem:[%s4155_s3 + $0x218] sm:$0xf]  ;;  %v3779_v19 = vld [vmem:[%s4155_s3 + $0x238] sm:$0xf0] }
 0x1b7   : > { %v2015_v37 = vpop.f32.mrf.mxu2 }
 0x1b8   : > { %v2016_v62 = vadd.f32 %v2015_v37, %v1927_v40  ;;  %v2104_v55 = vpop.f32.mrf.mxu3 }
 0x1b9   : > { %v1929_v2 = vpop.f32.mrf.mxu1 }
 0x1ba   : > { %v2105_v3 = vadd.f32 %v2104_v55, %v2016_v62  ;;  %v1930_v9 = vadd.f32 %v1929_v2, %v4406_v59  ;;  %v3093_v62 = vor.u32 %v3770_v35, %v3092_v28 }
 0x1bb   : > { %v2196_v54 = vpop.f32.mrf.mxu0 }
 0x1bc   : > { %2244 = vmatmul.bf16.gmra.mxu1 %v3045_v10  ;;  %2333 = vmatmul.bf16.gmra.mxu2 %v3049_v63  ;;  %v4700_v51 = vadd.f32 %v2193_v26, %v2105_v3  ;;  %v3765_v26 = vld [vmem:[%s4155_s3 + $0x1cc] sm:$0xf] }
 0x1bd   : > { %2422 = vmatmul.bf16.gmra.mxu3 %v3053_v44  ;;  %v3089_v37 = vor.u32 %v3765_v26, %v3086_v36 }
 0x1be   : > { %2511 = vmatmul.bf16.gmra.mxu0 %v3057_v13 }
 0x1bf   : > { %v2018_v11 = vpop.f32.mrf.mxu2 }
 0x1c0   : > { %v2019_v16 = vadd.f32 %v2018_v11, %v1930_v9  ;;  %v2107_v12 = vpop.f32.mrf.mxu3  ;;  %v3773_v11 = vld [vmem:[%s4155_s3 + $0x20c] sm:$0xf] }
 0x1c1   : > { %v1931_v14 = vpop.f32.mrf.mxu1 }
 0x1c2   : > { %v2108_v15 = vadd.f32 %v2107_v12, %v2019_v16  ;;  %v1932_v27 = vadd.f32 %v1931_v14, %v4422_v7  ;;  %v3114_v16 = vld [vmem:[%s4155_s3 + $0x22c] sm:$0xf0] }
 0x1c3   : > { %v2198_v20 = vpop.f32.mrf.mxu0  ;;  %v3120_v14 = vld [vmem:[%s4155_s3 + $0x210] sm:$0xf]  ;;  %v3117_v36 = vor.u32 %v3773_v11, %v3114_v16  ;;  %v3158_v16 = vld [vmem:[%s4155_s3 + $0x27c] sm:$0xf0] }
 0x1c4   : > { %v4705_v23 = vadd.f32 %v2196_v54, %v2108_v15  ;;  %v3778_v15 = vld [vmem:[%s4155_s3 + $0x230] sm:$0xf0] }
 0x1c5   : > { %v3121_v28 = vor.u32 %v3778_v15, %v3120_v14  ;;  %v3164_v14 = vld [vmem:[%s4155_s3 + $0x260] sm:$0xf]  ;;  %v3788_v15 = vld [vmem:[%s4155_s3 + $0x280] sm:$0xf0] }
 0x1c7   : > { %v2020_v59 = vpop.f32.mrf.mxu2 }
 0x1c8   : > { %v2021_v42 = vadd.f32 %v2020_v59, %v1932_v27  ;;  %v2109_v40 = vpop.f32.mrf.mxu3 }
 0x1c9   : > { %v1934_v52 = vpop.f32.mrf.mxu1 }
 0x1ca   : > { %v2110_v55 = vadd.f32 %v2109_v40, %v2021_v42  ;;  %v1935_v63 = vadd.f32 %v1934_v52, %v4436_v17  ;;  %v3129_v42 = vor.u32 %v3779_v19, %v3128_v24 }
 0x1cb   : > { %v2201_v10 = vpop.f32.mrf.mxu0 }
 0x1cc   : > { %2249 = vmatmul.bf16.gmra.mxu1 %v3081_v38  ;;  %2338 = vmatmul.bf16.gmra.mxu2 %v3085_v49  ;;  %v4714_v7 = vadd.f32 %v2198_v20, %v2110_v55  ;;  %v3774_v20 = vld [vmem:[%s4155_s3 + $0x214] sm:$0xf] }
 0x1cd   : > { %2427 = vmatmul.bf16.gmra.mxu3 %v3089_v37  ;;  %v3125_v59 = vor.u32 %v3774_v20, %v3122_v58 }
 0x1ce   : > { %2516 = vmatmul.bf16.gmra.mxu0 %v3093_v62 }
 0x1cf   : > { %v2023_v2 = vpop.f32.mrf.mxu2 }
 0x1d0   : > { %v2024_v44 = vadd.f32 %v2023_v2, %v1935_v63  ;;  %v2112_v13 = vpop.f32.mrf.mxu3  ;;  %v3782_v2 = vld [vmem:[%s4155_s3 + $0x254] sm:$0xf] }
 0x1d1   : > { %v1936_v3 = vpop.f32.mrf.mxu1 }
 0x1d2   : > { %v2113_v54 = vadd.f32 %v2112_v13, %v2024_v44  ;;  %v1937_v21 = vadd.f32 %v1936_v3, %v4458_v32  ;;  %v3150_v44 = vld [vmem:[%s4155_s3 + $0x274] sm:$0xf0] }
 0x1d3   : > { %v2203_v9 = vpop.f32.mrf.mxu0  ;;  %v3156_v3 = vld [vmem:[%s4155_s3 + $0x258] sm:$0xf]  ;;  %v3153_v58 = vor.u32 %v3782_v2, %v3150_v44  ;;  %v3200_v2 = vld [vmem:[%s4155_s3 + $0x2a8] sm:$0xf]  ;;  %v3797_v44 = vld [vmem:[%s4155_s3 + $0x2c8] sm:$0xf0] }
 0x1d4   : > { %v4719_v12 = vadd.f32 %v2201_v10, %v2113_v54  ;;  %v3787_v54 = vld [vmem:[%s4155_s3 + $0x278] sm:$0xf0] }
 0x1d5   : > { %v3157_v24 = vor.u32 %v3787_v54, %v3156_v3 }
 0x1d7   : > { %v2025_v17 = vpop.f32.mrf.mxu2 }
 0x1d8   : > { %v2026_v26 = vadd.f32 %v2025_v17, %v1937_v21  ;;  %v2114_v27 = vpop.f32.mrf.mxu3 }
 0x1d9   : > { %v1939_v35 = vpop.f32.mrf.mxu1 }
 0x1da   : > { %v2115_v40 = vadd.f32 %v2114_v27, %v2026_v26  ;;  %v1940_v49 = vadd.f32 %v1939_v35, %v4466_v45  ;;  %v3165_v26 = vor.u32 %v3788_v15, %v3164_v14 }
 0x1db   : > { %v2206_v38 = vpop.f32.mrf.mxu0 }
 0x1dc   : > { %2254 = vmatmul.bf16.gmra.mxu1 %v3117_v36  ;;  %2343 = vmatmul.bf16.gmra.mxu2 %v3121_v28  ;;  %v4728_v32 = vadd.f32 %v2203_v9, %v2115_v40  ;;  %v3783_v9 = vld [vmem:[%s4155_s3 + $0x25c] sm:$0xf] }
 0x1dd   : > { %2432 = vmatmul.bf16.gmra.mxu3 %v3125_v59  ;;  %v3161_v17 = vor.u32 %v3783_v9, %v3158_v16 }
 0x1de   : > { %2521 = vmatmul.bf16.gmra.mxu0 %v3129_v42 }
 0x1df   : > { %v2028_v52 = vpop.f32.mrf.mxu2 }
 0x1e0   : > { %v2029_v37 = vadd.f32 %v2028_v52, %v1940_v49  ;;  %v2117_v62 = vpop.f32.mrf.mxu3  ;;  %v3791_v49 = vld [vmem:[%s4155_s3 + $0x29c] sm:$0xf]  ;;  %v3186_v52 = vld [vmem:[%s4155_s3 + $0x2bc] sm:$0xf0] }
 0x1e1   : > { %v1941_v55 = vpop.f32.mrf.mxu1  ;;  %v3189_v16 = vor.u32 %v3791_v49, %v3186_v52  ;;  %v3230_v52 = vld [vmem:[%s4155_s3 + $0x30c] sm:$0xf0] }
 0x1e2   : > { %v2118_v10 = vadd.f32 %v2117_v62, %v2029_v37  ;;  %v1942_v11 = vadd.f32 %v1941_v55, %v4482_v1  ;;  %v3192_v37 = vld [vmem:[%s4155_s3 + $0x2a0] sm:$0xf]  ;;  %v3796_v62 = vld [vmem:[%s4155_s3 + $0x2c0] sm:$0xf0] }
 0x1e3   : > { %v2208_v63 = vpop.f32.mrf.mxu0  ;;  %v3792_v55 = vld [vmem:[%s4155_s3 + $0x2a4] sm:$0xf]  ;;  %v3193_v14 = vor.u32 %v3796_v62, %v3192_v37  ;;  %v3236_v37 = vld [vmem:[%s4155_s3 + $0x2f0] sm:$0xf]  ;;  %v3806_v62 = vld [vmem:[%s4155_s3 + $0x310] sm:$0xf0] }
 0x1e4   : > { %v4733_v13 = vadd.f32 %v2206_v38, %v2118_v10 }
 0x1e7   : > { %v2030_v45 = vpop.f32.mrf.mxu2 }
 0x1e8   : > { %v2031_v20 = vadd.f32 %v2030_v45, %v1942_v11  ;;  %v2119_v21 = vpop.f32.mrf.mxu3  ;;  %v3201_v45 = vor.u32 %v3797_v44, %v3200_v2 }
 0x1e9   : > { %v2220_v19 = vpop.f32.mrf.mxu1 }
 0x1ea   : > { %v2120_v27 = vadd.f32 %v2119_v21, %v2031_v20  ;;  %v2221_v42 = vadd.f32 %v2220_v19, %v4500_v29 }
 0x1eb   : > { %v2487_v36 = vpop.f32.mrf.mxu0 }
 0x1ec   : > { %2259 = vmatmul.bf16.gmra.mxu1 %v3153_v58  ;;  %2348 = vmatmul.bf16.gmra.mxu2 %v3157_v24  ;;  %v4742_v1 = vadd.f32 %v2208_v63, %v2120_v27  ;;  %v3194_v63 = vld [vmem:[%s4155_s3 + $0x2c4] sm:$0xf0] }
 0x1ed   : > { %2437 = vmatmul.bf16.gmra.mxu3 %v3161_v17  ;;  %v3197_v15 = vor.u32 %v3792_v55, %v3194_v63 }
 0x1ee   : > { %2526 = vmatmul.bf16.gmra.mxu0 %v3165_v26 }
 0x1ef   : > { %v2309_v28 = vpop.f32.mrf.mxu2 }
 0x1f0   : > { %v2398_v35 = vpop.f32.mrf.mxu3  ;;  %v2310_v38 = vadd.f32 %v2309_v28, %v2221_v42  ;;  %v3228_v42 = vld [vmem:[%s4155_s3 + $0x2e8] sm:$0xf] }
 0x1f1   : > { %v2222_v59 = vpop.f32.mrf.mxu1 }
 0x1f2   : > { %v2223_v10 = vadd.f32 %v2222_v59, %v4509_v8  ;;  %v2399_v54 = vadd.f32 %v2398_v35, %v2310_v38  ;;  %v3800_v35 = vld [vmem:[%s4155_s3 + $0x2e4] sm:$0xf]  ;;  %v3222_v59 = vld [vmem:[%s4155_s3 + $0x304] sm:$0xf0]  ;;  %v3801_v38 = vld [vmem:[%s4155_s3 + $0x2ec] sm:$0xf] }
 0x1f3   : > { %v2489_v40 = vpop.f32.mrf.mxu0  ;;  %v3225_v44 = vor.u32 %v3800_v35, %v3222_v59  ;;  %v3272_v35 = vld [vmem:[%s4155_s3 + $0x338] sm:$0xf]  ;;  %v3815_v59 = vld [vmem:[%s4155_s3 + $0x358] sm:$0xf0] }
 0x1f4   : > { %v2488_v58 = vadd.f32 %v2487_v36, %v2399_v54  ;;  %v3233_v54 = vor.u32 %v3801_v38, %v3230_v52 }
 0x1f7   : > { %v2311_v3 = vpop.f32.mrf.mxu2 }
 0x1f8   : > { %v2312_v9 = vadd.f32 %v2311_v3, %v2223_v10  ;;  %v2400_v11 = vpop.f32.mrf.mxu3 }
 0x1f9   : > { %v2225_v29 = vpop.f32.mrf.mxu1 }
 0x1fa   : > { %v2401_v20 = vadd.f32 %v2400_v11, %v2312_v9  ;;  %v2226_v27 = vadd.f32 %v2225_v29, %v4514_v22  ;;  %v3237_v9 = vor.u32 %v3806_v62, %v3236_v37 }
 0x1fb   : > { %v2492_v21 = vpop.f32.mrf.mxu0 }
 0x1fc   : > { %v2490_v24 = vadd.f32 %v2489_v40, %v2401_v20  ;;  %2264 = vmatmul.bf16.gmra.mxu1 %v3189_v16  ;;  %2353 = vmatmul.bf16.gmra.mxu2 %v3193_v14  ;;  %v3805_v40 = vld [vmem:[%s4155_s3 + $0x308] sm:$0xf0] }
 0x1fd   : > { %2442 = vmatmul.bf16.gmra.mxu3 %v3197_v15  ;;  %v3229_v3 = vor.u32 %v3805_v40, %v3228_v42 }
 0x1fe   : > { %2531 = vmatmul.bf16.gmra.mxu0 %v3201_v45  ;;  %v3927_v8 = vpack.c.bf16 %v2490_v24, %v2488_v58 }
 0x1ff   : > { %v2314_v19 = vpop.f32.mrf.mxu2 }
 0x200   : > { %3928 = vst [vmem:[%s4758_s26] sm:$0xff] %v3927_v8   ;;  %v2403_v17 = vpop.f32.mrf.mxu3  ;;  %v2315_v28 = vadd.f32 %v2314_v19, %v2226_v27  ;;  %v3809_v8 = vld [vmem:[%s4155_s3 + $0x32c] sm:$0xf]  ;;  %v3258_v19 = vld [vmem:[%s4155_s3 + $0x34c] sm:$0xf0]  ;;  %v3810_v27 = vld [vmem:[%s4155_s3 + $0x334] sm:$0xf] }
 0x201   : > { %v2227_v26 = vpop.f32.mrf.mxu1  ;;  %v3261_v52 = vor.u32 %v3809_v8, %v3258_v19 }
 0x202   : > { %v2228_v49 = vadd.f32 %v2227_v26, %v4523_v56  ;;  %v2404_v10 = vadd.f32 %v2403_v17, %v2315_v28  ;;  %v3264_v17 = vld [vmem:[%s4155_s3 + $0x330] sm:$0xf]  ;;  %v3814_v26 = vld [vmem:[%s4155_s3 + $0x350] sm:$0xf0]  ;;  %v3266_v28 = vld [vmem:[%s4155_s3 + $0x354] sm:$0xf0] }
 0x203   : > { %v2494_v36 = vpop.f32.mrf.mxu0  ;;  %v3265_v37 = vor.u32 %v3814_v26, %v3264_v17  ;;  %v3269_v62 = vor.u32 %v3810_v27, %v3266_v28 }
 0x204   : > { %v2493_v14 = vadd.f32 %v2492_v21, %v2404_v10 }
 0x207   : > { %v2316_v55 = vpop.f32.mrf.mxu2 }
 0x208   : > { %v2317_v63 = vadd.f32 %v2316_v55, %v2228_v49  ;;  %v2405_v2 = vpop.f32.mrf.mxu3  ;;  %v3273_v55 = vor.u32 %v3815_v59, %v3272_v35 }
 0x209   : > { %v2230_v22 = vpop.f32.mrf.mxu1 }
 0x20a   : > { %v2406_v11 = vadd.f32 %v2405_v2, %v2317_v63  ;;  %v2231_v58 = vadd.f32 %v2230_v22, %v4540_v33 }
 0x20b   : > { %v2497_v16 = vpop.f32.mrf.mxu0 }
 0x20c   : > { %v2495_v56 = vadd.f32 %v2494_v36, %v2406_v11  ;;  %2269 = vmatmul.bf16.gmra.mxu1 %v3225_v44  ;;  %2358 = vmatmul.bf16.gmra.mxu2 %v3229_v3 }
 0x20d   : > { %2447 = vmatmul.bf16.gmra.mxu3 %v3233_v54 }
 0x20e   : > { %2536 = vmatmul.bf16.gmra.mxu0 %v3237_v9  ;;  %v3932_v29 = vpack.c.bf16 %v2495_v56, %v2493_v14  ;;  %v3818_v14 = vld [vmem:[%s4155_s3 + $0x374] sm:$0xf]  ;;  %v3294_v56 = vld [vmem:[%s4155_s3 + $0x394] sm:$0xf0] }
 0x20f   : > { %v2319_v15 = vpop.f32.mrf.mxu2  ;;  %v3297_v27 = vor.u32 %v3818_v14, %v3294_v56 }
 0x210   : > { %4004 = vst [vmem:[%s4758_s26 + $0x8] sm:$0xff] %v3932_v29   ;;  %v2408_v45 = vpop.f32.mrf.mxu3  ;;  %v2320_v21 = vadd.f32 %v2319_v15, %v2231_v58  ;;  %v3300_v29 = vld [vmem:[%s4155_s3 + $0x378] sm:$0xf]  ;;  %v3823_v15 = vld [vmem:[%s4155_s3 + $0x398] sm:$0xf0] }
 0x211   : > { %v2232_v20 = vpop.f32.mrf.mxu1  ;;  %v3302_v58 = vld [vmem:[%s4155_s3 + $0x39c] sm:$0xf0] }
 0x212   : > { %v2233_v36 = vadd.f32 %v2232_v20, %v4549_v61  ;;  %v2409_v40 = vadd.f32 %v2408_v45, %v2320_v21  ;;  %v3819_v45 = vld [vmem:[%s4155_s3 + $0x37c] sm:$0xf]  ;;  %v3824_v21 = vld [vmem:[%s4155_s3 + $0x3a0] sm:$0xf0] }
 0x213   : > { %v2499_v24 = vpop.f32.mrf.mxu0  ;;  %v3305_v28 = vor.u32 %v3819_v45, %v3302_v58 }
 0x214   : > { %v2498_v2 = vadd.f32 %v2497_v16, %v2409_v40 }
 0x217   : > { %v2321_v42 = vpop.f32.mrf.mxu2 }
 0x218   : > { %v2322_v38 = vadd.f32 %v2321_v42, %v2233_v36  ;;  %v2410_v49 = vpop.f32.mrf.mxu3  ;;  %v3301_v36 = vor.u32 %v3823_v15, %v3300_v29 }
 0x219   : > { %v2235_v33 = vpop.f32.mrf.mxu1 }
 0x21a   : > { %v2411_v10 = vadd.f32 %v2410_v49, %v2322_v38  ;;  %v2236_v9 = vadd.f32 %v2235_v33, %v4554_v5 }
 0x21b   : > { %v2502_v63 = vpop.f32.mrf.mxu0 }
 0x21c   : > { %v2500_v61 = vadd.f32 %v2499_v24, %v2411_v10  ;;  %2274 = vmatmul.bf16.gmra.mxu1 %v3261_v52  ;;  %2363 = vmatmul.bf16.gmra.mxu2 %v3265_v37  ;;  %v3308_v24 = vld [vmem:[%s4155_s3 + $0x380] sm:$0xf]  ;;  %v3827_v10 = vld [vmem:[%s4155_s3 + $0x3bc] sm:$0xf] }
 0x21d   : > { %2452 = vmatmul.bf16.gmra.mxu3 %v3269_v62  ;;  %v3309_v35 = vor.u32 %v3824_v21, %v3308_v24 }
 0x21e   : > { %2541 = vmatmul.bf16.gmra.mxu0 %v3273_v55  ;;  %v3937_v44 = vpack.c.bf16 %v2500_v61, %v2498_v2  ;;  %v3336_v2 = vld [vmem:[%s4155_s3 + $0x3c0] sm:$0xf]  ;;  %v3832_v61 = vld [vmem:[%s4155_s3 + $0x3e0] sm:$0xf0] }
 0x21f   : > { %v2324_v3 = vpop.f32.mrf.mxu2  ;;  %v3337_v15 = vor.u32 %v3832_v61, %v3336_v2 }
 0x220   : > { %4005 = vst [vmem:[%s4758_s26 + $0x10] sm:$0xff] %v3937_v44   ;;  %v2413_v22 = vpop.f32.mrf.mxu3  ;;  %v2325_v16 = vadd.f32 %v2324_v3, %v2236_v9  ;;  %v3828_v44 = vld [vmem:[%s4155_s3 + $0x3c4] sm:$0xf]  ;;  %v3833_v9 = vld [vmem:[%s4155_s3 + $0x3e8] sm:$0xf0] }
 0x221   : > { %v2237_v54 = vpop.f32.mrf.mxu1 }
 0x222   : > { %v2238_v20 = vadd.f32 %v2237_v54, %v4562_v34  ;;  %v2414_v19 = vadd.f32 %v2413_v22, %v2325_v16  ;;  %v3338_v22 = vld [vmem:[%s4155_s3 + $0x3e4] sm:$0xf0] }
 0x223   : > { %v2504_v11 = vpop.f32.mrf.mxu0  ;;  %v3344_v54 = vld [vmem:[%s4155_s3 + $0x3c8] sm:$0xf]  ;;  %v3341_v45 = vor.u32 %v3828_v44, %v3338_v22 }
 0x224   : > { %v2503_v40 = vadd.f32 %v2502_v63, %v2414_v19  ;;  %v3330_v63 = vld [vmem:[%s4155_s3 + $0x3dc] sm:$0xf0] }
 0x225   : > { %v3333_v29 = vor.u32 %v3827_v10, %v3330_v63 }
 0x227   : > { %v2326_v8 = vpop.f32.mrf.mxu2 }
 0x228   : > { %v2327_v17 = vadd.f32 %v2326_v8, %v2238_v20  ;;  %v2415_v26 = vpop.f32.mrf.mxu3  ;;  %v3345_v20 = vor.u32 %v3833_v9, %v3344_v54 }
 0x229   : > { %v2240_v5 = vpop.f32.mrf.mxu1 }
 0x22a   : > { %v2416_v59 = vadd.f32 %v2415_v26, %v2327_v17  ;;  %v2241_v33 = vadd.f32 %v2240_v5, %v4579_v43 }
 0x22b   : > { %v2507_v42 = vpop.f32.mrf.mxu0 }
 0x22c   : > { %v2505_v34 = vadd.f32 %v2504_v11, %v2416_v59  ;;  %2279 = vmatmul.bf16.gmra.mxu1 %v3297_v27  ;;  %2368 = vmatmul.bf16.gmra.mxu2 %v3301_v36  ;;  %v3372_v59 = vld [vmem:[%s4155_s3 + $0x408] sm:$0xf] }
 0x22d   : > { %2457 = vmatmul.bf16.gmra.mxu3 %v3305_v28  ;;  %v3836_v28 = vld [vmem:[%s4155_s3 + $0x404] sm:$0xf] }
 0x22e   : > { %2546 = vmatmul.bf16.gmra.mxu0 %v3309_v35  ;;  %v3942_v38 = vpack.c.bf16 %v2505_v34, %v2503_v40  ;;  %v3366_v35 = vld [vmem:[%s4155_s3 + $0x424] sm:$0xf0]  ;;  %v3837_v40 = vld [vmem:[%s4155_s3 + $0x40c] sm:$0xf] }
 0x22f   : > { %v2329_v49 = vpop.f32.mrf.mxu2  ;;  %v3369_v10 = vor.u32 %v3836_v28, %v3366_v35 }
 0x230   : > { %4006 = vst [vmem:[%s4758_s26 + $0x18] sm:$0xff] %v3942_v38   ;;  %v2418_v52 = vpop.f32.mrf.mxu3  ;;  %v2330_v55 = vadd.f32 %v2329_v49, %v2241_v33  ;;  %v3374_v38 = vld [vmem:[%s4155_s3 + $0x42c] sm:$0xf0] }
 0x231   : > { %v2242_v37 = vpop.f32.mrf.mxu1  ;;  %v3380_v49 = vld [vmem:[%s4155_s3 + $0x410] sm:$0xf]  ;;  %v3377_v2 = vor.u32 %v3837_v40, %v3374_v38 }
 0x232   : > { %v2243_v3 = vadd.f32 %v2242_v37, %v4588_v39  ;;  %v2419_v16 = vadd.f32 %v2418_v52, %v2330_v55  ;;  %v3842_v52 = vld [vmem:[%s4155_s3 + $0x430] sm:$0xf0] }
 0x233   : > { %v2509_v62 = vpop.f32.mrf.mxu0  ;;  %v3381_v61 = vor.u32 %v3842_v52, %v3380_v49 }
 0x234   : > { %v2508_v21 = vadd.f32 %v2507_v42, %v2419_v16  ;;  %v3841_v42 = vld [vmem:[%s4155_s3 + $0x428] sm:$0xf0] }
 0x235   : > { %v3373_v63 = vor.u32 %v3841_v42, %v3372_v59 }
 0x237   : > { %v2331_v11 = vpop.f32.mrf.mxu2 }
 0x238   : > { %v2332_v14 = vadd.f32 %v2331_v11, %v2243_v3  ;;  %v2420_v56 = vpop.f32.mrf.mxu3 }
 0x239   : > { %v2245_v43 = vpop.f32.mrf.mxu1 }
 0x23a   : > { %v2421_v58 = vadd.f32 %v2420_v56, %v2332_v14  ;;  %v2246_v27 = vadd.f32 %v2245_v43, %v4593_v53  ;;  %v3402_v43 = vld [vmem:[%s4155_s3 + $0x46c] sm:$0xf0] }
 0x23b   : > { %v2512_v24 = vpop.f32.mrf.mxu0 }
 0x23c   : > { %v2510_v39 = vadd.f32 %v2509_v62, %v2421_v58  ;;  %2284 = vmatmul.bf16.gmra.mxu1 %v3333_v29  ;;  %2373 = vmatmul.bf16.gmra.mxu2 %v3337_v15  ;;  %v3845_v15 = vld [vmem:[%s4155_s3 + $0x44c] sm:$0xf]  ;;  %v3846_v58 = vld [vmem:[%s4155_s3 + $0x454] sm:$0xf] }
 0x23d   : > { %2462 = vmatmul.bf16.gmra.mxu3 %v3341_v45  ;;  %v3408_v45 = vld [vmem:[%s4155_s3 + $0x450] sm:$0xf] }
 0x23e   : > { %2551 = vmatmul.bf16.gmra.mxu0 %v3345_v20  ;;  %v3947_v8 = vpack.c.bf16 %v2510_v39, %v2508_v21  ;;  %v3850_v20 = vld [vmem:[%s4155_s3 + $0x470] sm:$0xf0]  ;;  %v3410_v21 = vld [vmem:[%s4155_s3 + $0x474] sm:$0xf0] }
 0x23f   : > { %v2334_v19 = vpop.f32.mrf.mxu2  ;;  %v3416_v39 = vld [vmem:[%s4155_s3 + $0x458] sm:$0xf]  ;;  %v3413_v28 = vor.u32 %v3846_v58, %v3410_v21 }
 0x240   : > { %4007 = vst [vmem:[%s4758_s26 + $0x20] sm:$0xff] %v3947_v8   ;;  %v2423_v17 = vpop.f32.mrf.mxu3  ;;  %v2335_v5 = vadd.f32 %v2334_v19, %v2246_v27  ;;  %v3851_v8 = vld [vmem:[%s4155_s3 + $0x478] sm:$0xf0] }
 0x241   : > { %v2247_v26 = vpop.f32.mrf.mxu1  ;;  %v3417_v35 = vor.u32 %v3851_v8, %v3416_v39 }
 0x242   : > { %v2248_v34 = vadd.f32 %v2247_v26, %v4602_v60  ;;  %v2424_v33 = vadd.f32 %v2423_v17, %v2335_v5  ;;  %v3409_v5 = vor.u32 %v3850_v20, %v3408_v45 }
 0x243   : > { %v2514_v36 = vpop.f32.mrf.mxu0 }
 0x244   : > { %v2513_v22 = vadd.f32 %v2512_v24, %v2424_v33 }
 0x247   : > { %v2336_v37 = vpop.f32.mrf.mxu2 }
 0x248   : > { %v2337_v62 = vadd.f32 %v2336_v37, %v2248_v34  ;;  %v2425_v55 = vpop.f32.mrf.mxu3 }
 0x249   : > { %v2250_v53 = vpop.f32.mrf.mxu1 }
 0x24a   : > { %v2426_v44 = vadd.f32 %v2425_v55, %v2337_v62  ;;  %v2251_v14 = vadd.f32 %v2250_v53, %v4607_v41 }
 0x24b   : > { %v2517_v3 = vpop.f32.mrf.mxu0 }
 0x24c   : > { %v2515_v60 = vadd.f32 %v2514_v36, %v2426_v44  ;;  %2289 = vmatmul.bf16.gmra.mxu1 %v3369_v10  ;;  %2378 = vmatmul.bf16.gmra.mxu2 %v3373_v63  ;;  %v3405_v36 = vor.u32 %v3845_v15, %v3402_v43 }
 0x24d   : > { %2467 = vmatmul.bf16.gmra.mxu3 %v3377_v2 }
 0x24e   : > { %2556 = vmatmul.bf16.gmra.mxu0 %v3381_v61  ;;  %v3952_v54 = vpack.c.bf16 %v2515_v60, %v2513_v22 }
 0x24f   : > { %v2339_v9 = vpop.f32.mrf.mxu2 }
 0x250   : > { %4008 = vst [vmem:[%s4758_s26 + $0x28] sm:$0xff] %v3952_v54   ;;  %v2428_v11 = vpop.f32.mrf.mxu3  ;;  %v2340_v29 = vadd.f32 %v2339_v9, %v2251_v14 }
 0x251   : > { %v2252_v16 = vpop.f32.mrf.mxu1 }
 0x252   : > { %v2253_v24 = vadd.f32 %v2252_v16, %v4616_v18  ;;  %v2429_v17 = vadd.f32 %v2428_v11, %v2340_v29 }
 0x253   : > { %v2519_v56 = vpop.f32.mrf.mxu0 }
 0x254   : > { %v2518_v40 = vadd.f32 %v2517_v3, %v2429_v17 }
 0x257   : > { %v2341_v19 = vpop.f32.mrf.mxu2 }
 0x258   : > { %v2342_v26 = vadd.f32 %v2341_v19, %v2253_v24  ;;  %v2430_v27 = vpop.f32.mrf.mxu3 }
 0x259   : > { %v2255_v41 = vpop.f32.mrf.mxu1 }
 0x25a   : > { %v2431_v59 = vadd.f32 %v2430_v27, %v2342_v26  ;;  %v2256_v37 = vadd.f32 %v2255_v41, %v4621_v25 }
 0x25b   : > { %v2522_v42 = vpop.f32.mrf.mxu0 }
 0x25c   : > { %v2520_v34 = vadd.f32 %v2519_v56, %v2431_v59  ;;  %2294 = vmatmul.bf16.gmra.mxu1 %v3405_v36  ;;  %2383 = vmatmul.bf16.gmra.mxu2 %v3409_v5 }
 0x25d   : > { %2472 = vmatmul.bf16.gmra.mxu3 %v3413_v28 }
 0x25e   : > { %2561 = vmatmul.bf16.gmra.mxu0 %v3417_v35  ;;  %v3957_v18 = vpack.c.bf16 %v2520_v34, %v2518_v40 }
 0x25f   : > { %v2344_v38 = vpop.f32.mrf.mxu2 }
 0x260   : > { %4009 = vst [vmem:[%s4758_s26 + $0x30] sm:$0xff] %v3957_v18   ;;  %v2433_v49 = vpop.f32.mrf.mxu3  ;;  %v2345_v62 = vadd.f32 %v2344_v38, %v2256_v37 }
 0x261   : > { %v2257_v52 = vpop.f32.mrf.mxu1 }
 0x262   : > { %v2258_v55 = vadd.f32 %v2257_v52, %v4630_v46  ;;  %v2434_v63 = vadd.f32 %v2433_v49, %v2345_v62 }
 0x263   : > { %v2524_v33 = vpop.f32.mrf.mxu0 }
 0x264   : > { %v2523_v22 = vadd.f32 %v2522_v42, %v2434_v63 }
 0x267   : > { %v2346_v10 = vpop.f32.mrf.mxu2 }
 0x268   : > { %v2347_v53 = vadd.f32 %v2346_v10, %v2258_v55  ;;  %v2435_v2 = vpop.f32.mrf.mxu3 }
 0x269   : > { %v2260_v61 = vpop.f32.mrf.mxu1 }
 0x26a   : > { %v2436_v44 = vadd.f32 %v2435_v2, %v2347_v53  ;;  %v2261_v25 = vadd.f32 %v2260_v61, %v4635_v57 }
 0x26b   : > { %v2527_v3 = vpop.f32.mrf.mxu0 }
 0x26c   : > { %v2525_v60 = vadd.f32 %v2524_v33, %v2436_v44 }
 0x26e   : > { %v3962_v54 = vpack.c.bf16 %v2525_v60, %v2523_v22 }
 0x26f   : > { %v2349_v9 = vpop.f32.mrf.mxu2 }
 0x270   : > { %4010 = vst [vmem:[%s4758_s26 + $0x38] sm:$0xff] %v3962_v54   ;;  %v2438_v11 = vpop.f32.mrf.mxu3  ;;  %v2350_v56 = vadd.f32 %v2349_v9, %v2261_v25 }
 0x271   : > { %v2262_v16 = vpop.f32.mrf.mxu1 }
 0x272   : > { %v2263_v46 = vadd.f32 %v2262_v16, %v4644_v50  ;;  %v2439_v15 = vadd.f32 %v2438_v11, %v2350_v56 }
 0x273   : > { %v2529_v14 = vpop.f32.mrf.mxu0 }
 0x274   : > { %v2528_v21 = vadd.f32 %v2527_v3, %v2439_v15 }
 0x277   : > { %v2351_v29 = vpop.f32.mrf.mxu2 }
 0x278   : > { %v2352_v43 = vadd.f32 %v2351_v29, %v2263_v46  ;;  %v2440_v45 = vpop.f32.mrf.mxu3 }
 0x279   : > { %v2265_v20 = vpop.f32.mrf.mxu1 }
 0x27a   : > { %v2441_v58 = vadd.f32 %v2440_v45, %v2352_v43  ;;  %v2266_v57 = vadd.f32 %v2265_v20, %v4649_v4 }
 0x27b   : > { %v2532_v24 = vpop.f32.mrf.mxu0 }
 0x27c   : > { %v2530_v39 = vadd.f32 %v2529_v14, %v2441_v58 }
 0x27e   : > { %v3967_v8 = vpack.c.bf16 %v2530_v39, %v2528_v21 }
 0x27f   : > { %v2354_v19 = vpop.f32.mrf.mxu2 }
 0x280   : > { %4011 = vst [vmem:[%s4758_s26 + $0x40] sm:$0xff] %v3967_v8   ;;  %v2443_v17 = vpop.f32.mrf.mxu3  ;;  %v2355_v36 = vadd.f32 %v2354_v19, %v2266_v57 }
 0x281   : > { %v2267_v26 = vpop.f32.mrf.mxu1 }
 0x282   : > { %v2268_v50 = vadd.f32 %v2267_v26, %v4658_v6  ;;  %v2444_v41 = vadd.f32 %v2443_v17, %v2355_v36 }
 0x283   : > { %v2534_v27 = vpop.f32.mrf.mxu0 }
 0x284   : > { %v2533_v34 = vadd.f32 %v2532_v24, %v2444_v41 }
 0x287   : > { %v2356_v5 = vpop.f32.mrf.mxu2 }
 0x288   : > { %v2357_v28 = vadd.f32 %v2356_v5, %v2268_v50  ;;  %v2445_v35 = vpop.f32.mrf.mxu3 }
 0x289   : > { %v2270_v59 = vpop.f32.mrf.mxu1 }
 0x28a   : > { %v2446_v42 = vadd.f32 %v2445_v35, %v2357_v28  ;;  %v2271_v4 = vadd.f32 %v2270_v59, %v4663_v30 }
 0x28b   : > { %v2537_v40 = vpop.f32.mrf.mxu0 }
 0x28c   : > { %v2535_v18 = vadd.f32 %v2534_v27, %v2446_v42 }
 0x28e   : > { %v3972_v38 = vpack.c.bf16 %v2535_v18, %v2533_v34 }
 0x28f   : > { %v2359_v49 = vpop.f32.mrf.mxu2 }
 0x290   : > { %4012 = vst [vmem:[%s4758_s26 + $0x48] sm:$0xff] %v3972_v38   ;;  %v2448_v52 = vpop.f32.mrf.mxu3  ;;  %v2360_v62 = vadd.f32 %v2359_v49, %v2271_v4 }
 0x291   : > { %v2272_v37 = vpop.f32.mrf.mxu1 }
 0x292   : > { %v2273_v6 = vadd.f32 %v2272_v37, %v4672_v31  ;;  %v2449_v10 = vadd.f32 %v2448_v52, %v2360_v62 }
 0x293   : > { %v2539_v33 = vpop.f32.mrf.mxu0 }
 0x294   : > { %v2538_v3 = vadd.f32 %v2537_v40, %v2449_v10 }
 0x297   : > { %v2361_v55 = vpop.f32.mrf.mxu2 }
 0x298   : > { %v2362_v63 = vadd.f32 %v2361_v55, %v2273_v6  ;;  %v2450_v53 = vpop.f32.mrf.mxu3 }
 0x299   : > { %v2275_v2 = vpop.f32.mrf.mxu1 }
 0x29a   : > { %v2451_v61 = vadd.f32 %v2450_v53, %v2362_v63  ;;  %v2276_v30 = vadd.f32 %v2275_v2, %v4677_v48 }
 0x29b   : > { %v2542_v44 = vpop.f32.mrf.mxu0 }
 0x29c   : > { %v2540_v22 = vadd.f32 %v2539_v33, %v2451_v61 }
 0x29e   : > { %v3977_v60 = vpack.c.bf16 %v2540_v22, %v2538_v3 }
 0x29f   : > { %v2364_v54 = vpop.f32.mrf.mxu2 }
 0x2a0   : > { %4013 = vst [vmem:[%s4758_s26 + $0x50] sm:$0xff] %v3977_v60   ;;  %v2453_v9 = vpop.f32.mrf.mxu3  ;;  %v2365_v25 = vadd.f32 %v2364_v54, %v2276_v30 }
 0x2a1   : > { %v2277_v11 = vpop.f32.mrf.mxu1 }
 0x2a2   : > { %v2278_v31 = vadd.f32 %v2277_v11, %v4686_v0  ;;  %v2454_v56 = vadd.f32 %v2453_v9, %v2365_v25 }
 0x2a3   : > { %v2544_v16 = vpop.f32.mrf.mxu0 }
 0x2a4   : > { %v2543_v20 = vadd.f32 %v2542_v44, %v2454_v56 }
 0x2a7   : > { %v2366_v14 = vpop.f32.mrf.mxu2 }
 0x2a8   : > { %v2367_v46 = vadd.f32 %v2366_v14, %v2278_v31  ;;  %v2455_v29 = vpop.f32.mrf.mxu3 }
 0x2a9   : > { %v2280_v15 = vpop.f32.mrf.mxu1 }
 0x2aa   : > { %v2456_v43 = vadd.f32 %v2455_v29, %v2367_v46  ;;  %v2281_v48 = vadd.f32 %v2280_v15, %v4691_v47 }
 0x2ab   : > { %v2547_v45 = vpop.f32.mrf.mxu0 }
 0x2ac   : > { %v2545_v58 = vadd.f32 %v2544_v16, %v2456_v43 }
 0x2ae   : > { %v3982_v24 = vpack.c.bf16 %v2545_v58, %v2543_v20 }
 0x2af   : > { %v2369_v21 = vpop.f32.mrf.mxu2 }
 0x2b0   : > { %4014 = vst [vmem:[%s4758_s26 + $0x58] sm:$0xff] %v3982_v24   ;;  %v2458_v39 = vpop.f32.mrf.mxu3  ;;  %v2370_v17 = vadd.f32 %v2369_v21, %v2281_v48 }
 0x2b1   : > { %v2282_v8 = vpop.f32.mrf.mxu1 }
 0x2b2   : > { %v2283_v0 = vadd.f32 %v2282_v8, %v4700_v51  ;;  %v2459_v57 = vadd.f32 %v2458_v39, %v2370_v17 }
 0x2b3   : > { %v2549_v19 = vpop.f32.mrf.mxu0 }
 0x2b4   : > { %v2548_v28 = vadd.f32 %v2547_v45, %v2459_v57 }
 0x2b7   : > { %v2371_v26 = vpop.f32.mrf.mxu2 }
 0x2b8   : > { %v2372_v27 = vadd.f32 %v2371_v26, %v2283_v0  ;;  %v2460_v36 = vpop.f32.mrf.mxu3 }
 0x2b9   : > { %v2285_v50 = vpop.f32.mrf.mxu1 }
 0x2ba   : > { %v2461_v5 = vadd.f32 %v2460_v36, %v2372_v27  ;;  %v2286_v47 = vadd.f32 %v2285_v50, %v4705_v23 }
 0x2bb   : > { %v2552_v41 = vpop.f32.mrf.mxu0 }
 0x2bc   : > { %v2550_v35 = vadd.f32 %v2549_v19, %v2461_v5 }
 0x2be   : > { %v3987_v59 = vpack.c.bf16 %v2550_v35, %v2548_v28 }
 0x2bf   : > { %v2374_v42 = vpop.f32.mrf.mxu2 }
 0x2c0   : > { %4015 = vst [vmem:[%s4758_s26 + $0x60] sm:$0xff] %v3987_v59   ;;  %v2463_v40 = vpop.f32.mrf.mxu3  ;;  %v2375_v38 = vadd.f32 %v2374_v42, %v2286_v47 }
 0x2c1   : > { %v2287_v34 = vpop.f32.mrf.mxu1 }
 0x2c2   : > { %v2288_v51 = vadd.f32 %v2287_v34, %v4714_v7  ;;  %v2464_v52 = vadd.f32 %v2463_v40, %v2375_v38 }
 0x2c3   : > { %v2554_v18 = vpop.f32.mrf.mxu0 }
 0x2c4   : > { %v2553_v6 = vadd.f32 %v2552_v41, %v2464_v52 }
 0x2c7   : > { %v2376_v49 = vpop.f32.mrf.mxu2 }
 0x2c8   : > { %v2377_v37 = vadd.f32 %v2376_v49, %v2288_v51  ;;  %v2465_v4 = vpop.f32.mrf.mxu3 }
 0x2c9   : > { %v2290_v33 = vpop.f32.mrf.mxu1 }
 0x2ca   : > { %v2466_v62 = vadd.f32 %v2465_v4, %v2377_v37  ;;  %v2291_v23 = vadd.f32 %v2290_v33, %v4719_v12 }
 0x2cb   : > { %v2557_v10 = vpop.f32.mrf.mxu0 }
 0x2cc   : > { %v2555_v55 = vadd.f32 %v2554_v18, %v2466_v62 }
 0x2ce   : > { %v3992_v63 = vpack.c.bf16 %v2555_v55, %v2553_v6 }
 0x2cf   : > { %v2379_v53 = vpop.f32.mrf.mxu2 }
 0x2d0   : > { %4016 = vst [vmem:[%s4758_s26 + $0x68] sm:$0xff] %v3992_v63   ;;  %v2468_v2 = vpop.f32.mrf.mxu3  ;;  %v2380_v44 = vadd.f32 %v2379_v53, %v2291_v23 }
 0x2d1   : > { %v2292_v61 = vpop.f32.mrf.mxu1 }
 0x2d2   : > { %v2293_v7 = vadd.f32 %v2292_v61, %v4728_v32  ;;  %v2469_v60 = vadd.f32 %v2468_v2, %v2380_v44 }
 0x2d3   : > { %v2559_v3 = vpop.f32.mrf.mxu0 }
 0x2d4   : > { %v2558_v16 = vadd.f32 %v2557_v10, %v2469_v60 }
 0x2d7   : > { %v2381_v22 = vpop.f32.mrf.mxu2 }
 0x2d8   : > { %v2382_v54 = vadd.f32 %v2381_v22, %v2293_v7  ;;  %v2470_v9 = vpop.f32.mrf.mxu3 }
 0x2d9   : > { %v2295_v11 = vpop.f32.mrf.mxu1 }
 0x2da   : > { %v2471_v30 = vadd.f32 %v2470_v9, %v2382_v54  ;;  %v2296_v12 = vadd.f32 %v2295_v11, %v4733_v13 }
 0x2db   : > { %v2562_v46 = vpop.f32.mrf.mxu0 }
 0x2dc   : > { %v2560_v25 = vadd.f32 %v2559_v3, %v2471_v30 }
 0x2de   : > { %v3997_v31 = vpack.c.bf16 %v2560_v25, %v2558_v16 }
 0x2df   : > { %v2384_v14 = vpop.f32.mrf.mxu2 }
 0x2e0   : > { %4017 = vst [vmem:[%s4758_s26 + $0x70] sm:$0xff] %v3997_v31   ;;  %v2473_v56 = vpop.f32.mrf.mxu3  ;;  %v2385_v15 = vadd.f32 %v2384_v14, %v2296_v12 }
 0x2e1   : > { %v2297_v29 = vpop.f32.mrf.mxu1 }
 0x2e2   : > { %v2298_v32 = vadd.f32 %v2297_v29, %v4742_v1  ;;  %v2474_v45 = vadd.f32 %v2473_v56, %v2385_v15 }
 0x2e3   : > { %v2564_v21 = vpop.f32.mrf.mxu0 }
 0x2e4   : > { %v2563_v39 = vadd.f32 %v2562_v46, %v2474_v45 }
 0x2e7   : > { %v2386_v43 = vpop.f32.mrf.mxu2 }
 0x2e8   : > { %v2387_v20 = vadd.f32 %v2386_v43, %v2298_v32  ;;  %v2475_v58 = vpop.f32.mrf.mxu3 }
 0x2ea   : > { %v2476_v24 = vadd.f32 %v2475_v58, %v2387_v20 }
 0x2ec   : > { %v2565_v8 = vadd.f32 %v2564_v21, %v2476_v24 }
 0x2ee   : > { %v4002_v48 = vpack.c.bf16 %v2565_v8, %v2563_v39 }
 0x2f0   : > { %4018 = vst [vmem:[%s4758_s26 + $0x78] sm:$0xff] %v4002_v48  }
 0x2f1 PF: > { %s12_s11 = sadd.s32 1, %s4090_s11   ;;  %s4866_s9 = smov %s4086_s10 }
 0x2f2   : > { %p9_p5 = scmp.ge.s32.totalorder %s12_s11, 4   ;;  %s4867_s10 = smov %s4869_s12 }
 0x2f4   :  { %11 = sbr.rel (!%p9_p5) target bundleno = 2 (0x2), region = 69 }

// kernel: densenet_forward.31
= control target key start
LH: loop header
LB: loop body
LE: loop exit
PB: predicated region body
PF: predicated region fallthrough
CT: control target
= control target key end

     0   :  { %s979_s0 = inlined_call_operand.vmem [shape: bf16[4,128,128], index: 0, kind: input, shape index: {}]   ;;  %s980_s1 = inlined_call_operand.vmem [shape: f32[1,128], index: 1, kind: input, shape index: {}]   ;;  %s981_s2 = inlined_call_operand.vmem [shape: f32[1,128], index: 2, kind: input, shape index: {}]   ;;  %s982_s3 = inlined_call_operand.vmem [shape: bf16[128,128], index: 3, kind: output, shape index: {}]  }
   0x1   :  { %v494_v0 = vld [vmem:[%s979_s0] sm:$0xff]   ;;  %v661_v26 = vld [vmem:[%s979_s0 + $0x8] sm:$0xff]  }
   0x2   :  { %v495_v1 = vunpack.c.l.bf16 %v494_v0  ;;  %v496_v2 = vunpack.c.h.bf16 %v494_v0  ;;  %v727_v3 = vld [vmem:[%s980_s1] ss:$0 sm:$0xff]  ;;  %v669_v35 = vld [vmem:[%s979_s0 + $0x48] sm:$0xff]   ;;  %v499_v38 = vunpack.c.l.bf16 %v661_v26  ;;  %v500_v39 = vunpack.c.h.bf16 %v661_v26  ;;  %v678_v26 = vld [vmem:[%s979_s0 + $0x90] sm:$0xff]  }
   0x3   :  { %v732_v4 = vld [vmem:[%s981_s2] ss:$0 sm:$0xff]  ;;  %v677_v40 = vld [vmem:[%s979_s0 + $0x88] sm:$0xff]   ;;  %v531_v47 = vunpack.c.l.bf16 %v669_v35  ;;  %v532_v48 = vunpack.c.h.bf16 %v669_v35 }
   0x4   :  { %v668_v5 = vld [vmem:[%s979_s0 + $0x40] sm:$0xff]   ;;  %v51_v10 = vmul.f32 %v727_v3, %v495_v1  ;;  %v52_v11 = vmul.f32 %v727_v3, %v496_v2  ;;  %v53_v45 = vmul.f32 %v727_v3, %v499_v38  ;;  %v54_v46 = vmul.f32 %v727_v3, %v500_v39  ;;  %v685_v61 = vld [vmem:[%s979_s0 + $0xc8] sm:$0xff]   ;;  %v662_v2 = vld [vmem:[%s979_s0 + $0x10] sm:$0xff]  }
   0x5   :  { %v527_v6 = vunpack.c.l.bf16 %v668_v5  ;;  %v528_v7 = vunpack.c.h.bf16 %v668_v5  ;;  %v676_v8 = vld [vmem:[%s979_s0 + $0x80] sm:$0xff]   ;;  %v563_v51 = vunpack.c.l.bf16 %v677_v40  ;;  %v564_v52 = vunpack.c.h.bf16 %v677_v40  ;;  %v686_v39 = vld [vmem:[%s979_s0 + $0xd0] sm:$0xff]  }
   0x6   :  { %v684_v9 = vld [vmem:[%s979_s0 + $0xc0] sm:$0xff]   ;;  %v559_v12 = vunpack.c.l.bf16 %v676_v8  ;;  %v560_v13 = vunpack.c.h.bf16 %v676_v8  ;;  %v70_v18 = vadd.f32 %v732_v4, %v51_v10  ;;  %v71_v19 = vadd.f32 %v732_v4, %v52_v11 }
   0x7   :  { %v135_v14 = vmul.f32 %v727_v3, %v527_v6  ;;  %v136_v15 = vmul.f32 %v727_v3, %v528_v7  ;;  %v591_v16 = vunpack.c.l.bf16 %v684_v9  ;;  %v592_v17 = vunpack.c.h.bf16 %v684_v9 }
   0x8   :  { %v232_v20 = vmul.f32 %v727_v3, %v559_v12  ;;  %v233_v21 = vmul.f32 %v727_v3, %v560_v13  ;;  %v86_v27 = vmax.f32 %v70_v18, 0.0  ;;  %v87_v28 = vmax.f32 %v71_v19, 0.0  ;;  %v670_v13 = vld [vmem:[%s979_s0 + $0x50] sm:$0xff]  }
   0x9   :  { %v151_v22 = vadd.f32 %v732_v4, %v135_v14  ;;  %v152_v23 = vadd.f32 %v732_v4, %v136_v15  ;;  %v329_v24 = vmul.f32 %v727_v3, %v591_v16  ;;  %v330_v25 = vmul.f32 %v727_v3, %v592_v17 }
   0xa   :  { %v248_v29 = vadd.f32 %v732_v4, %v232_v20  ;;  %v249_v30 = vadd.f32 %v732_v4, %v233_v21  ;;  %v72_v53 = vadd.f32 %v732_v4, %v53_v45  ;;  %v73_v54 = vadd.f32 %v732_v4, %v54_v46 }
   0xb   :  { %v167_v31 = vmax.f32 %v151_v22, 0.0  ;;  %v168_v32 = vmax.f32 %v152_v23, 0.0  ;;  %v345_v33 = vadd.f32 %v732_v4, %v329_v24  ;;  %v346_v34 = vadd.f32 %v732_v4, %v330_v25 }
   0xc   :  { %v264_v36 = vmax.f32 %v248_v29, 0.0  ;;  %v265_v37 = vmax.f32 %v249_v30, 0.0  ;;  %v137_v55 = vmul.f32 %v727_v3, %v531_v47  ;;  %v138_v56 = vmul.f32 %v727_v3, %v532_v48 }
   0xd   :  { %v183_v41 = vadd.f32 %v167_v31, %v86_v27  ;;  %v184_v42 = vadd.f32 %v168_v32, %v87_v28  ;;  %v361_v43 = vmax.f32 %v345_v33, 0.0  ;;  %v362_v44 = vmax.f32 %v346_v34, 0.0 }
   0xe   :  { %v234_v59 = vmul.f32 %v727_v3, %v563_v51  ;;  %v235_v60 = vmul.f32 %v727_v3, %v564_v52  ;;  %v88_v62 = vmax.f32 %v72_v53, 0.0  ;;  %v89_v63 = vmax.f32 %v73_v54, 0.0  ;;  %v663_v52 = vld [vmem:[%s979_s0 + $0x18] sm:$0xff]  }
   0xf   :  { %v280_v49 = vadd.f32 %v264_v36, %v183_v41  ;;  %v281_v50 = vadd.f32 %v265_v37, %v184_v42  ;;  %v153_v0 = vadd.f32 %v732_v4, %v137_v55  ;;  %v154_v1 = vadd.f32 %v732_v4, %v138_v56 }
  0x10   :  { %v250_v7 = vadd.f32 %v732_v4, %v234_v59  ;;  %v251_v8 = vadd.f32 %v732_v4, %v235_v60  ;;  %v595_v11 = vunpack.c.l.bf16 %v685_v61  ;;  %v596_v12 = vunpack.c.h.bf16 %v685_v61 }
  0x11   :  { %v377_v57 = vadd.f32 %v361_v43, %v280_v49  ;;  %v378_v58 = vadd.f32 %v362_v44, %v281_v50  ;;  %v169_v9 = vmax.f32 %v153_v0, 0.0  ;;  %v170_v10 = vmax.f32 %v154_v1, 0.0 }
  0x12   :  { %v266_v15 = vmax.f32 %v250_v7, 0.0  ;;  %v267_v16 = vmax.f32 %v251_v8, 0.0  ;;  %v503_v17 = vunpack.c.l.bf16 %v662_v2  ;;  %v331_v20 = vmul.f32 %v727_v3, %v595_v11  ;;  %v679_v8 = vld [vmem:[%s979_s0 + $0x98] sm:$0xff]  }
  0x13   :  { %v393_v5 = vmul.f32 0.25, %v377_v57  ;;  %v394_v6 = vmul.f32 0.25, %v378_v58  ;;  %v185_v18 = vadd.f32 %v169_v9, %v88_v62  ;;  %v186_v19 = vadd.f32 %v170_v10, %v89_v63  ;;  %v671_v57 = vld [vmem:[%s979_s0 + $0x58] sm:$0xff]  }
  0x14   :  { %v332_v21 = vmul.f32 %v727_v3, %v596_v12  ;;  %v504_v22 = vunpack.c.h.bf16 %v662_v2  ;;  %v55_v23 = vmul.f32 %v727_v3, %v503_v17  ;;  %v535_v24 = vunpack.c.l.bf16 %v670_v13 }
  0x15   :  { %v624_v14 = vpack.c.bf16 %v394_v6, %v393_v5  ;;  %v536_v25 = vunpack.c.h.bf16 %v670_v13  ;;  %v282_v27 = vadd.f32 %v266_v15, %v185_v18  ;;  %v283_v28 = vadd.f32 %v267_v16, %v186_v19 }
  0x16   :  { %v347_v29 = vadd.f32 %v732_v4, %v331_v20  ;;  %v348_v30 = vadd.f32 %v732_v4, %v332_v21  ;;  %v56_v31 = vmul.f32 %v727_v3, %v504_v22  ;;  %v74_v32 = vadd.f32 %v732_v4, %v55_v23 }
  0x17   :  { %625 = vst [vmem:[%s982_s3] sm:$0xff] %v624_v14   ;;  %v139_v33 = vmul.f32 %v727_v3, %v535_v24  ;;  %v140_v34 = vmul.f32 %v727_v3, %v536_v25  ;;  %v567_v37 = vunpack.c.l.bf16 %v678_v26  ;;  %v568_v38 = vunpack.c.h.bf16 %v678_v26  ;;  %v687_v25 = vld [vmem:[%s979_s0 + $0xd8] sm:$0xff]  }
  0x18   :  { %v363_v35 = vmax.f32 %v347_v29, 0.0  ;;  %v364_v36 = vmax.f32 %v348_v30, 0.0  ;;  %v75_v40 = vadd.f32 %v732_v4, %v56_v31  ;;  %v90_v41 = vmax.f32 %v74_v32, 0.0  ;;  %v664_v30 = vld [vmem:[%s979_s0 + $0x20] sm:$0xff]  }
  0x19   :  { %v155_v42 = vadd.f32 %v732_v4, %v139_v33  ;;  %v156_v43 = vadd.f32 %v732_v4, %v140_v34  ;;  %v236_v46 = vmul.f32 %v727_v3, %v567_v37  ;;  %v237_v47 = vmul.f32 %v727_v3, %v568_v38 }
  0x1a   :  { %v379_v44 = vadd.f32 %v363_v35, %v282_v27  ;;  %v380_v45 = vadd.f32 %v364_v36, %v283_v28  ;;  %v91_v48 = vmax.f32 %v75_v40, 0.0  ;;  %v599_v51 = vunpack.c.l.bf16 %v686_v39 }
  0x1b   :  { %v171_v49 = vmax.f32 %v155_v42, 0.0  ;;  %v172_v50 = vmax.f32 %v156_v43, 0.0  ;;  %v252_v55 = vadd.f32 %v732_v4, %v236_v46  ;;  %v253_v56 = vadd.f32 %v732_v4, %v237_v47  ;;  %v672_v43 = vld [vmem:[%s979_s0 + $0x60] sm:$0xff]  }
  0x1c   :  { %v395_v53 = vmul.f32 0.25, %v379_v44  ;;  %v396_v54 = vmul.f32 0.25, %v380_v45  ;;  %v600_v60 = vunpack.c.h.bf16 %v686_v39  ;;  %v333_v61 = vmul.f32 %v727_v3, %v599_v51 }
  0x1d   :  { %v187_v58 = vadd.f32 %v171_v49, %v90_v41  ;;  %v188_v59 = vadd.f32 %v172_v50, %v91_v48  ;;  %v268_v63 = vmax.f32 %v252_v55, 0.0  ;;  %v269_v0 = vmax.f32 %v253_v56, 0.0 }
  0x1e   :  { %v629_v62 = vpack.c.bf16 %v396_v54, %v395_v53  ;;  %v507_v1 = vunpack.c.l.bf16 %v663_v52  ;;  %v334_v2 = vmul.f32 %v727_v3, %v600_v60  ;;  %v349_v5 = vadd.f32 %v732_v4, %v333_v61 }
  0x1f   :  { %v508_v6 = vunpack.c.h.bf16 %v663_v52  ;;  %v539_v7 = vunpack.c.l.bf16 %v671_v57  ;;  %v284_v9 = vadd.f32 %v268_v63, %v187_v58  ;;  %v285_v10 = vadd.f32 %v269_v0, %v188_v59  ;;  %v680_v52 = vld [vmem:[%s979_s0 + $0xa0] sm:$0xff]  }
  0x20   :  { %692 = vst [vmem:[%s982_s3 + $0x8] sm:$0xff] %v629_v62   ;;  %v57_v11 = vmul.f32 %v727_v3, %v507_v1  ;;  %v540_v12 = vunpack.c.h.bf16 %v671_v57  ;;  %v350_v13 = vadd.f32 %v732_v4, %v334_v2  ;;  %v365_v14 = vmax.f32 %v349_v5, 0.0  ;;  %v688_v1 = vld [vmem:[%s979_s0 + $0xe0] sm:$0xff]  }
  0x21   :  { %v58_v15 = vmul.f32 %v727_v3, %v508_v6  ;;  %v141_v16 = vmul.f32 %v727_v3, %v539_v7  ;;  %v571_v19 = vunpack.c.l.bf16 %v679_v8  ;;  %v572_v20 = vunpack.c.h.bf16 %v679_v8 }
  0x22   :  { %v76_v17 = vadd.f32 %v732_v4, %v57_v11  ;;  %v142_v18 = vmul.f32 %v727_v3, %v540_v12  ;;  %v366_v21 = vmax.f32 %v350_v13, 0.0  ;;  %v381_v22 = vadd.f32 %v365_v14, %v284_v9 }
  0x23   :  { %v77_v23 = vadd.f32 %v732_v4, %v58_v15  ;;  %v157_v24 = vadd.f32 %v732_v4, %v141_v16  ;;  %v238_v28 = vmul.f32 %v727_v3, %v571_v19  ;;  %v239_v29 = vmul.f32 %v727_v3, %v572_v20  ;;  %v665_v16 = vld [vmem:[%s979_s0 + $0x28] sm:$0xff]  }
  0x24   :  { %v92_v26 = vmax.f32 %v76_v17, 0.0  ;;  %v158_v27 = vadd.f32 %v732_v4, %v142_v18  ;;  %v382_v31 = vadd.f32 %v366_v21, %v285_v10  ;;  %v397_v32 = vmul.f32 0.25, %v381_v22 }
  0x25   :  { %v93_v33 = vmax.f32 %v77_v23, 0.0  ;;  %v173_v34 = vmax.f32 %v157_v24, 0.0  ;;  %v254_v36 = vadd.f32 %v732_v4, %v238_v28  ;;  %v255_v37 = vadd.f32 %v732_v4, %v239_v29 }
  0x26   :  { %v174_v35 = vmax.f32 %v158_v27, 0.0  ;;  %v603_v38 = vunpack.c.l.bf16 %v687_v25  ;;  %v398_v39 = vmul.f32 0.25, %v382_v31  ;;  %v604_v41 = vunpack.c.h.bf16 %v687_v25  ;;  %v673_v25 = vld [vmem:[%s979_s0 + $0x68] sm:$0xff]  }
  0x27   :  { %v189_v40 = vadd.f32 %v173_v34, %v92_v26  ;;  %v511_v42 = vunpack.c.l.bf16 %v664_v30  ;;  %v270_v45 = vmax.f32 %v254_v36, 0.0  ;;  %v271_v46 = vmax.f32 %v255_v37, 0.0  ;;  %v681_v34 = vld [vmem:[%s979_s0 + $0xa8] sm:$0xff]  }
  0x28   :  { %v190_v44 = vadd.f32 %v174_v35, %v93_v33  ;;  %v335_v47 = vmul.f32 %v727_v3, %v603_v38  ;;  %v634_v48 = vpack.c.bf16 %v398_v39, %v397_v32  ;;  %v336_v49 = vmul.f32 %v727_v3, %v604_v41 }
  0x29   :  { %v512_v50 = vunpack.c.h.bf16 %v664_v30  ;;  %v59_v51 = vmul.f32 %v727_v3, %v511_v42  ;;  %v286_v53 = vadd.f32 %v270_v45, %v189_v40  ;;  %v543_v56 = vunpack.c.l.bf16 %v672_v43 }
  0x2a   :  { %v287_v54 = vadd.f32 %v271_v46, %v190_v44  ;;  %v351_v55 = vadd.f32 %v732_v4, %v335_v47  ;;  %693 = vst [vmem:[%s982_s3 + $0x10] sm:$0xff] %v634_v48   ;;  %v352_v57 = vadd.f32 %v732_v4, %v336_v49  ;;  %v544_v60 = vunpack.c.h.bf16 %v672_v43 }
  0x2b   :  { %v60_v58 = vmul.f32 %v727_v3, %v512_v50  ;;  %v78_v59 = vadd.f32 %v732_v4, %v59_v51  ;;  %v143_v62 = vmul.f32 %v727_v3, %v543_v56  ;;  %v575_v63 = vunpack.c.l.bf16 %v680_v52  ;;  %v689_v51 = vld [vmem:[%s979_s0 + $0xe8] sm:$0xff]  }
  0x2c   :  { %v367_v61 = vmax.f32 %v351_v55, 0.0  ;;  %v576_v0 = vunpack.c.h.bf16 %v680_v52  ;;  %v368_v2 = vmax.f32 %v352_v57, 0.0  ;;  %v144_v7 = vmul.f32 %v727_v3, %v544_v60  ;;  %v666_v60 = vld [vmem:[%s979_s0 + $0x30] sm:$0xff]  }
  0x2d   :  { %v79_v5 = vadd.f32 %v732_v4, %v60_v58  ;;  %v94_v6 = vmax.f32 %v78_v59, 0.0  ;;  %v159_v9 = vadd.f32 %v732_v4, %v143_v62  ;;  %v240_v10 = vmul.f32 %v727_v3, %v575_v63 }
  0x2e   :  { %v383_v8 = vadd.f32 %v367_v61, %v286_v53  ;;  %v241_v11 = vmul.f32 %v727_v3, %v576_v0  ;;  %v384_v12 = vadd.f32 %v368_v2, %v287_v54  ;;  %v160_v14 = vadd.f32 %v732_v4, %v144_v7 }
  0x2f   :  { %v95_v13 = vmax.f32 %v79_v5, 0.0  ;;  %v607_v15 = vunpack.c.l.bf16 %v688_v1  ;;  %v175_v18 = vmax.f32 %v159_v9, 0.0  ;;  %v256_v19 = vadd.f32 %v732_v4, %v240_v10 }
  0x30   :  { %v399_v17 = vmul.f32 0.25, %v383_v8  ;;  %v257_v20 = vadd.f32 %v732_v4, %v241_v11  ;;  %v400_v21 = vmul.f32 0.25, %v384_v12  ;;  %v176_v22 = vmax.f32 %v160_v14, 0.0  ;;  %v674_v11 = vld [vmem:[%s979_s0 + $0x70] sm:$0xff]  }
  0x31   :  { %v608_v23 = vunpack.c.h.bf16 %v688_v1  ;;  %v337_v24 = vmul.f32 %v727_v3, %v607_v15  ;;  %v191_v26 = vadd.f32 %v175_v18, %v94_v6  ;;  %v272_v27 = vmax.f32 %v256_v19, 0.0 }
  0x32   :  { %v273_v28 = vmax.f32 %v257_v20, 0.0  ;;  %v515_v29 = vunpack.c.l.bf16 %v665_v16  ;;  %v639_v30 = vpack.c.bf16 %v400_v21, %v399_v17  ;;  %v192_v31 = vadd.f32 %v176_v22, %v95_v13 }
  0x33   :  { %v338_v32 = vmul.f32 %v727_v3, %v608_v23  ;;  %v353_v33 = vadd.f32 %v732_v4, %v337_v24  ;;  %v288_v35 = vadd.f32 %v272_v27, %v191_v26  ;;  %v516_v36 = vunpack.c.h.bf16 %v665_v16  ;;  %v682_v16 = vld [vmem:[%s979_s0 + $0xb0] sm:$0xff]  }
  0x34   :  { %v61_v37 = vmul.f32 %v727_v3, %v515_v29  ;;  %v547_v38 = vunpack.c.l.bf16 %v673_v25  ;;  %694 = vst [vmem:[%s982_s3 + $0x18] sm:$0xff] %v639_v30   ;;  %v289_v39 = vadd.f32 %v273_v28, %v192_v31  ;;  %v548_v42 = vunpack.c.h.bf16 %v673_v25 }
  0x35   :  { %v354_v40 = vadd.f32 %v732_v4, %v338_v32  ;;  %v369_v41 = vmax.f32 %v353_v33, 0.0  ;;  %v62_v43 = vmul.f32 %v727_v3, %v516_v36  ;;  %v579_v46 = vunpack.c.l.bf16 %v681_v34  ;;  %v690_v33 = vld [vmem:[%s979_s0 + $0xf0] sm:$0xff]  }
  0x36   :  { %v80_v44 = vadd.f32 %v732_v4, %v61_v37  ;;  %v145_v45 = vmul.f32 %v727_v3, %v547_v38  ;;  %v146_v49 = vmul.f32 %v727_v3, %v548_v42  ;;  %v580_v50 = vunpack.c.h.bf16 %v681_v34  ;;  %v667_v42 = vld [vmem:[%s979_s0 + $0x38] sm:$0xff]  }
  0x37   :  { %v370_v47 = vmax.f32 %v354_v40, 0.0  ;;  %v385_v48 = vadd.f32 %v369_v41, %v288_v35  ;;  %v81_v52 = vadd.f32 %v732_v4, %v62_v43  ;;  %v242_v55 = vmul.f32 %v727_v3, %v579_v46 }
  0x38   :  { %v96_v53 = vmax.f32 %v80_v44, 0.0  ;;  %v161_v54 = vadd.f32 %v732_v4, %v145_v45  ;;  %v162_v58 = vadd.f32 %v732_v4, %v146_v49  ;;  %v243_v59 = vmul.f32 %v727_v3, %v580_v50 }
  0x39   :  { %v386_v56 = vadd.f32 %v370_v47, %v289_v39  ;;  %v401_v57 = vmul.f32 0.25, %v385_v48  ;;  %v97_v61 = vmax.f32 %v81_v52, 0.0  ;;  %v258_v63 = vadd.f32 %v732_v4, %v242_v55  ;;  %v675_v55 = vld [vmem:[%s979_s0 + $0x78] sm:$0xff]  }
  0x3a   :  { %v177_v62 = vmax.f32 %v161_v54, 0.0  ;;  %v611_v0 = vunpack.c.l.bf16 %v689_v51  ;;  %v178_v2 = vmax.f32 %v162_v58, 0.0  ;;  %v259_v5 = vadd.f32 %v732_v4, %v243_v59 }
  0x3b   :  { %v402_v1 = vmul.f32 0.25, %v386_v56  ;;  %v612_v6 = vunpack.c.h.bf16 %v689_v51  ;;  %v274_v8 = vmax.f32 %v258_v63, 0.0  ;;  %v519_v10 = vunpack.c.l.bf16 %v666_v60 }
  0x3c   :  { %v193_v7 = vadd.f32 %v177_v62, %v96_v53  ;;  %v339_v9 = vmul.f32 %v727_v3, %v611_v0  ;;  %v194_v13 = vadd.f32 %v178_v2, %v97_v61  ;;  %v275_v14 = vmax.f32 %v259_v5, 0.0  ;;  %v683_v0 = vld [vmem:[%s979_s0 + $0xb8] sm:$0xff]  }
  0x3d   :  { %v644_v12 = vpack.c.bf16 %v402_v1, %v401_v57  ;;  %v340_v15 = vmul.f32 %v727_v3, %v612_v6  ;;  %v520_v19 = vunpack.c.h.bf16 %v666_v60  ;;  %v63_v20 = vmul.f32 %v727_v3, %v519_v10 }
  0x3e   :  { %v290_v17 = vadd.f32 %v274_v8, %v193_v7  ;;  %v355_v18 = vadd.f32 %v732_v4, %v339_v9  ;;  %v291_v21 = vadd.f32 %v275_v14, %v194_v13  ;;  %v551_v23 = vunpack.c.l.bf16 %v674_v11 }
  0x3f   :  { %695 = vst [vmem:[%s982_s3 + $0x20] sm:$0xff] %v644_v12   ;;  %v356_v22 = vadd.f32 %v732_v4, %v340_v15  ;;  %v552_v24 = vunpack.c.h.bf16 %v674_v11  ;;  %v64_v26 = vmul.f32 %v727_v3, %v520_v19  ;;  %v82_v27 = vadd.f32 %v732_v4, %v63_v20  ;;  %v691_v15 = vld [vmem:[%s979_s0 + $0xf8] sm:$0xff]  }
  0x40   :  { %v371_v25 = vmax.f32 %v355_v18, 0.0  ;;  %v583_v28 = vunpack.c.l.bf16 %v682_v16  ;;  %v147_v30 = vmul.f32 %v727_v3, %v551_v23  ;;  %v584_v32 = vunpack.c.h.bf16 %v682_v16 }
  0x41   :  { %v372_v29 = vmax.f32 %v356_v22, 0.0  ;;  %v148_v31 = vmul.f32 %v727_v3, %v552_v24  ;;  %v83_v35 = vadd.f32 %v732_v4, %v64_v26  ;;  %v98_v36 = vmax.f32 %v82_v27, 0.0 }
  0x42   :  { %v387_v34 = vadd.f32 %v371_v25, %v290_v17  ;;  %v244_v37 = vmul.f32 %v727_v3, %v583_v28  ;;  %v163_v39 = vadd.f32 %v732_v4, %v147_v30  ;;  %v245_v41 = vmul.f32 %v727_v3, %v584_v32 }
  0x43   :  { %v388_v38 = vadd.f32 %v372_v29, %v291_v21  ;;  %v164_v40 = vadd.f32 %v732_v4, %v148_v31  ;;  %v99_v44 = vmax.f32 %v83_v35, 0.0  ;;  %v615_v46 = vunpack.c.l.bf16 %v690_v33 }
  0x44   :  { %v403_v43 = vmul.f32 0.25, %v387_v34  ;;  %v260_v45 = vadd.f32 %v732_v4, %v244_v37  ;;  %v179_v48 = vmax.f32 %v163_v39, 0.0  ;;  %v261_v50 = vadd.f32 %v732_v4, %v245_v41 }
  0x45   :  { %v404_v47 = vmul.f32 0.25, %v388_v38  ;;  %v180_v49 = vmax.f32 %v164_v40, 0.0  ;;  %v616_v52 = vunpack.c.h.bf16 %v690_v33  ;;  %v341_v53 = vmul.f32 %v727_v3, %v615_v46 }
  0x46   :  { %v276_v51 = vmax.f32 %v260_v45, 0.0  ;;  %v523_v54 = vunpack.c.l.bf16 %v667_v42  ;;  %v195_v57 = vadd.f32 %v179_v48, %v98_v36  ;;  %v277_v59 = vmax.f32 %v261_v50, 0.0 }
  0x47   :  { %v649_v56 = vpack.c.bf16 %v404_v47, %v403_v43  ;;  %v196_v58 = vadd.f32 %v180_v49, %v99_v44  ;;  %v342_v60 = vmul.f32 %v727_v3, %v616_v52  ;;  %v357_v61 = vadd.f32 %v732_v4, %v341_v53 }
  0x48   :  { %v524_v62 = vunpack.c.h.bf16 %v667_v42  ;;  %v65_v63 = vmul.f32 %v727_v3, %v523_v54  ;;  %v292_v1 = vadd.f32 %v276_v51, %v195_v57  ;;  %v555_v5 = vunpack.c.l.bf16 %v675_v55 }
  0x49   :  { %696 = vst [vmem:[%s982_s3 + $0x28] sm:$0xff] %v649_v56   ;;  %v293_v2 = vadd.f32 %v277_v59, %v196_v58  ;;  %v556_v6 = vunpack.c.h.bf16 %v675_v55  ;;  %v358_v7 = vadd.f32 %v732_v4, %v342_v60  ;;  %v373_v8 = vmax.f32 %v357_v61, 0.0 }
  0x4a   :  { %v66_v9 = vmul.f32 %v727_v3, %v524_v62  ;;  %v84_v10 = vadd.f32 %v732_v4, %v65_v63  ;;  %v149_v11 = vmul.f32 %v727_v3, %v555_v5  ;;  %v587_v13 = vunpack.c.l.bf16 %v683_v0 }
  0x4b   :  { %v150_v12 = vmul.f32 %v727_v3, %v556_v6  ;;  %v588_v14 = vunpack.c.h.bf16 %v683_v0  ;;  %v374_v16 = vmax.f32 %v358_v7, 0.0  ;;  %v389_v17 = vadd.f32 %v373_v8, %v292_v1 }
  0x4c   :  { %v85_v18 = vadd.f32 %v732_v4, %v66_v9  ;;  %v100_v19 = vmax.f32 %v84_v10, 0.0  ;;  %v165_v20 = vadd.f32 %v732_v4, %v149_v11  ;;  %v246_v22 = vmul.f32 %v727_v3, %v587_v13 }
  0x4d   :  { %v166_v21 = vadd.f32 %v732_v4, %v150_v12  ;;  %v247_v23 = vmul.f32 %v727_v3, %v588_v14  ;;  %v390_v24 = vadd.f32 %v374_v16, %v293_v2  ;;  %v405_v25 = vmul.f32 0.25, %v389_v17 }
  0x4e   :  { %v101_v26 = vmax.f32 %v85_v18, 0.0  ;;  %v619_v27 = vunpack.c.l.bf16 %v691_v15  ;;  %v181_v28 = vmax.f32 %v165_v20, 0.0  ;;  %v262_v30 = vadd.f32 %v732_v4, %v246_v22 }
  0x4f   :  { %v182_v29 = vmax.f32 %v166_v21, 0.0  ;;  %v263_v31 = vadd.f32 %v732_v4, %v247_v23  ;;  %v406_v32 = vmul.f32 0.25, %v390_v24  ;;  %v620_v33 = vunpack.c.h.bf16 %v691_v15 }
  0x50   :  { %v343_v34 = vmul.f32 %v727_v3, %v619_v27  ;;  %v197_v35 = vadd.f32 %v181_v28, %v100_v19  ;;  %v278_v37 = vmax.f32 %v262_v30, 0.0 }
  0x51   :  { %v198_v36 = vadd.f32 %v182_v29, %v101_v26  ;;  %v279_v38 = vmax.f32 %v263_v31, 0.0  ;;  %v654_v39 = vpack.c.bf16 %v406_v32, %v405_v25  ;;  %v344_v40 = vmul.f32 %v727_v3, %v620_v33 }
  0x52   :  { %v359_v41 = vadd.f32 %v732_v4, %v343_v34  ;;  %v294_v42 = vadd.f32 %v278_v37, %v197_v35 }
  0x53   :  { %697 = vst [vmem:[%s982_s3 + $0x30] sm:$0xff] %v654_v39   ;;  %v295_v43 = vadd.f32 %v279_v38, %v198_v36  ;;  %v360_v44 = vadd.f32 %v732_v4, %v344_v40 }
  0x54   :  { %v375_v45 = vmax.f32 %v359_v41, 0.0 }
  0x55   :  { %v376_v46 = vmax.f32 %v360_v44, 0.0 }
  0x56   :  { %v391_v47 = vadd.f32 %v375_v45, %v294_v42 }
  0x57   :  { %v392_v48 = vadd.f32 %v376_v46, %v295_v43 }
  0x58   :  { %v407_v49 = vmul.f32 0.25, %v391_v47 }
  0x59   :  { %v408_v50 = vmul.f32 0.25, %v392_v48 }
  0x5b   :  { %v659_v51 = vpack.c.bf16 %v408_v50, %v407_v49 }
  0x5d   :  { %698 = vst [vmem:[%s982_s3 + $0x38] sm:$0xff] %v659_v51  }

// kernel: densenet_forward.32
= control target key start
LH: loop header
LB: loop body
LE: loop exit
PB: predicated region body
PF: predicated region fallthrough
CT: control target
= control target key end

     0   :  { %s549_s1 = inlined_call_operand.vmem [shape: bf16[128,128], index: 1, kind: input, shape index: {}]   ;;  %s550_s0 = inlined_call_operand.vmem [shape: bf16[128,128], index: 0, kind: input, shape index: {}]   ;;  %s551_s2 = inlined_call_operand.vmem [shape: bf16[128,128], index: 2, kind: output, shape index: {}]  }
   0x1   :  { %v390_v0 = vld [vmem:[%s549_s1 + $0x38] sm:$0xff]  ;;  %v389_v1 = vld [vmem:[%s549_s1 + $0x30] sm:$0xff]  ;;  %v388_v2 = vld [vmem:[%s549_s1 + $0x28] sm:$0xff] }
   0x2   :  { %175 = vmatpush.bf16.msra.mxu0 %v390_v0  ;;  %438 = vmatpush.bf16.msra.mxu1 %v390_v0  ;;  %v387_v3 = vld [vmem:[%s549_s1 + $0x20] sm:$0xff]  ;;  %v386_v4 = vld [vmem:[%s549_s1 + $0x18] sm:$0xff]  ;;  %v385_v5 = vld [vmem:[%s549_s1 + $0x10] sm:$0xff] }
   0x3   :  { %439 = vmatpush.bf16.msra.mxu2 %v390_v0  ;;  %440 = vmatpush.bf16.msra.mxu3 %v390_v0  ;;  %v384_v6 = vld [vmem:[%s549_s1 + $0x8] sm:$0xff]  ;;  %v383_v7 = vld [vmem:[%s549_s1] sm:$0xff]  ;;  %v377_v9 = vld [vmem:[%s550_s0 + $0x10] sm:$0xff] }
   0x4   :  { %v375_v8 = vld [vmem:[%s550_s0] sm:$0xff]  ;;  %v381_v11 = vld [vmem:[%s550_s0 + $0x30] sm:$0xff]  ;;  %v376_v12 = vld [vmem:[%s550_s0 + $0x8] sm:$0xff] }
   0x5   :  { %v379_v10 = vld [vmem:[%s550_s0 + $0x20] sm:$0xff]  ;;  %v378_v13 = vld [vmem:[%s550_s0 + $0x18] sm:$0xff]  ;;  %v380_v14 = vld [vmem:[%s550_s0 + $0x28] sm:$0xff] }
   0x6   :  { %176 = vmatpush.bf16.msra.mxu0 %v389_v1  ;;  %441 = vmatpush.bf16.msra.mxu1 %v389_v1  ;;  %v382_v15 = vld [vmem:[%s550_s0 + $0x38] sm:$0xff] }
   0x7   :  { %442 = vmatpush.bf16.msra.mxu2 %v389_v1  ;;  %443 = vmatpush.bf16.msra.mxu3 %v389_v1 }
   0xa   :  { %177 = vmatpush.bf16.msra.mxu0 %v388_v2  ;;  %444 = vmatpush.bf16.msra.mxu1 %v388_v2 }
   0xb   :  { %445 = vmatpush.bf16.msra.mxu2 %v388_v2  ;;  %446 = vmatpush.bf16.msra.mxu3 %v388_v2 }
   0xe   :  { %178 = vmatpush.bf16.msra.mxu0 %v387_v3  ;;  %447 = vmatpush.bf16.msra.mxu1 %v387_v3 }
   0xf   :  { %448 = vmatpush.bf16.msra.mxu2 %v387_v3  ;;  %449 = vmatpush.bf16.msra.mxu3 %v387_v3 }
  0x12   :  { %179 = vmatpush.bf16.msra.mxu0 %v386_v4  ;;  %450 = vmatpush.bf16.msra.mxu1 %v386_v4 }
  0x13   :  { %451 = vmatpush.bf16.msra.mxu2 %v386_v4  ;;  %452 = vmatpush.bf16.msra.mxu3 %v386_v4 }
  0x16   :  { %180 = vmatpush.bf16.msra.mxu0 %v385_v5  ;;  %453 = vmatpush.bf16.msra.mxu1 %v385_v5 }
  0x17   :  { %454 = vmatpush.bf16.msra.mxu2 %v385_v5  ;;  %455 = vmatpush.bf16.msra.mxu3 %v385_v5 }
  0x1a   :  { %181 = vmatpush.bf16.msra.mxu0 %v384_v6  ;;  %456 = vmatpush.bf16.msra.mxu1 %v384_v6 }
  0x1b   :  { %457 = vmatpush.bf16.msra.mxu2 %v384_v6  ;;  %458 = vmatpush.bf16.msra.mxu3 %v384_v6 }
  0x1e   :  { %182 = vmatpush.bf16.msra.mxu0 %v383_v7  ;;  %459 = vmatpush.bf16.msra.mxu1 %v383_v7 }
  0x1f   :  { %460 = vmatpush.bf16.msra.mxu2 %v383_v7  ;;  %461 = vmatpush.bf16.msra.mxu3 %v383_v7 }
  0x21   :  { %183 = vmatmul.bf16.vlgmr.msra.gmra.mxu0 %v375_v8  ;;  %193 = vmatmul.bf16.vlgmr.msra.gmra.mxu1 %v377_v9 }
  0x22   :  { %203 = vmatmul.bf16.vlgmr.msra.gmra.mxu2 %v379_v10  ;;  %213 = vmatmul.bf16.vlgmr.msra.gmra.mxu3 %v381_v11 }
  0x31   :  { %188 = vmatmul.bf16.gmra.mxu0 %v376_v12  ;;  %198 = vmatmul.bf16.gmra.mxu1 %v378_v13 }
  0x32   :  { %208 = vmatmul.bf16.gmra.mxu2 %v380_v14  ;;  %218 = vmatmul.bf16.gmra.mxu3 %v382_v15 }
  0x9e   :  { %v184_v16 = vpop.f32.mrf.mxu0  ;;  %v194_v17 = vpop.f32.mrf.mxu1 }
  0xa5   :  { %v204_v18 = vpop.f32.mrf.mxu2  ;;  %v214_v19 = vpop.f32.mrf.mxu3 }
  0xa6   :  { %v186_v20 = vpop.f32.mrf.mxu0  ;;  %v196_v21 = vpop.f32.mrf.mxu1 }
  0xa7   :  { %v394_v22 = vpack.c.bf16 %v186_v20, %v184_v16  ;;  %v404_v23 = vpack.c.bf16 %v196_v21, %v194_v17 }
  0xa9   :  { %395 = vst [vmem:[%s551_s2] sm:$0xff] %v394_v22  }
  0xaa   :  { %432 = vst [vmem:[%s551_s2 + $0x10] sm:$0xff] %v404_v23  }
  0xad   :  { %v206_v24 = vpop.f32.mrf.mxu2  ;;  %v216_v25 = vpop.f32.mrf.mxu3 }
  0xae   :  { %v414_v26 = vpack.c.bf16 %v206_v24, %v204_v18  ;;  %v424_v27 = vpack.c.bf16 %v216_v25, %v214_v19  ;;  %v189_v28 = vpop.f32.mrf.mxu0  ;;  %v199_v29 = vpop.f32.mrf.mxu1 }
  0xb0   :  { %434 = vst [vmem:[%s551_s2 + $0x20] sm:$0xff] %v414_v26  }
  0xb1   :  { %436 = vst [vmem:[%s551_s2 + $0x30] sm:$0xff] %v424_v27  }
  0xb5   :  { %v209_v30 = vpop.f32.mrf.mxu2  ;;  %v219_v31 = vpop.f32.mrf.mxu3 }
  0xb6   :  { %v191_v32 = vpop.f32.mrf.mxu0  ;;  %v201_v33 = vpop.f32.mrf.mxu1 }
  0xb7   :  { %v399_v34 = vpack.c.bf16 %v191_v32, %v189_v28  ;;  %v409_v35 = vpack.c.bf16 %v201_v33, %v199_v29 }
  0xb9   :  { %431 = vst [vmem:[%s551_s2 + $0x8] sm:$0xff] %v399_v34  }
  0xba   :  { %433 = vst [vmem:[%s551_s2 + $0x18] sm:$0xff] %v409_v35  }
  0xbd   :  { %v211_v36 = vpop.f32.mrf.mxu2  ;;  %v221_v37 = vpop.f32.mrf.mxu3 }
  0xbe   :  { %v419_v38 = vpack.c.bf16 %v211_v36, %v209_v30  ;;  %v429_v39 = vpack.c.bf16 %v221_v37, %v219_v31 }
  0xc0   :  { %435 = vst [vmem:[%s551_s2 + $0x28] sm:$0xff] %v419_v38  }
  0xc1   :  { %437 = vst [vmem:[%s551_s2 + $0x38] sm:$0xff] %v429_v39  }

// kernel: densenet_forward.33
= control target key start
LH: loop header
LB: loop body
LE: loop exit
PB: predicated region body
PF: predicated region fallthrough
CT: control target
= control target key end

     0   :  { %s688_s1 = inlined_call_operand.vmem [shape: bf16[128,128], index: 1, kind: input, shape index: {}]   ;;  %s689_s2 = inlined_call_operand.vmem [shape: f32[1,128], index: 2, kind: input, shape index: {}]   ;;  %s690_s3 = inlined_call_operand.vmem [shape: f32[1,128], index: 3, kind: input, shape index: {}]   ;;  %s691_s4 = inlined_call_operand.vmem [shape: f32[1,128], index: 4, kind: input, shape index: {}]   ;;  %s692_s0 = inlined_call_operand.vmem [shape: bf16[128,128], index: 0, kind: input, shape index: {}]   ;;  %s693_s5 = inlined_call_operand.vmem [shape: bf16[128,128], index: 5, kind: output, shape index: {}]  }
   0x1   :  { %v427_v0 = vld [vmem:[%s688_s1 + $0x38] sm:$0xff]  ;;  %v426_v1 = vld [vmem:[%s688_s1 + $0x30] sm:$0xff]  ;;  %v425_v2 = vld [vmem:[%s688_s1 + $0x28] sm:$0xff] }
   0x2   :  { %216 = vmatpush.bf16.msra.mxu0 %v427_v0  ;;  %514 = vmatpush.bf16.msra.mxu1 %v427_v0  ;;  %v429_v3 = vld [vmem:[%s692_s0] sm:$0xff]   ;;  %v501_v5 = vld [vmem:[%s692_s0 + $0x10] sm:$0xff]   ;;  %v423_v15 = vld [vmem:[%s688_s1 + $0x18] sm:$0xff] }
   0x3   :  { %515 = vmatpush.bf16.msra.mxu2 %v427_v0  ;;  %516 = vmatpush.bf16.msra.mxu3 %v427_v0  ;;  %v424_v4 = vld [vmem:[%s688_s1 + $0x20] sm:$0xff]  ;;  %v505_v7 = vld [vmem:[%s692_s0 + $0x30] sm:$0xff]   ;;  %v430_v8 = vunpack.c.l.bf16 %v429_v3  ;;  %v431_v9 = vunpack.c.h.bf16 %v429_v3  ;;  %v438_v11 = vunpack.c.l.bf16 %v501_v5  ;;  %v439_v12 = vunpack.c.h.bf16 %v501_v5  ;;  %v421_v34 = vld [vmem:[%s688_s1 + $0x8] sm:$0xff] }
   0x4   :  { %v503_v6 = vld [vmem:[%s692_s0 + $0x20] sm:$0xff]   ;;  %v454_v16 = vunpack.c.l.bf16 %v505_v7  ;;  %v455_v17 = vunpack.c.h.bf16 %v505_v7  ;;  %v422_v25 = vld [vmem:[%s688_s1 + $0x10] sm:$0xff]  ;;  %v500_v43 = vld [vmem:[%s692_s0 + $0x8] sm:$0xff]  }
   0x5   :  { %v598_v10 = vld [vmem:[%s689_s2] ss:$0 sm:$0xff]  ;;  %v446_v13 = vunpack.c.l.bf16 %v503_v6  ;;  %v447_v14 = vunpack.c.h.bf16 %v503_v6  ;;  %v502_v44 = vld [vmem:[%s692_s0 + $0x18] sm:$0xff]   ;;  %v504_v48 = vld [vmem:[%s692_s0 + $0x28] sm:$0xff]   ;;  %v434_v51 = vunpack.c.l.bf16 %v500_v43  ;;  %v435_v52 = vunpack.c.h.bf16 %v500_v43 }
   0x6   :  { %217 = vmatpush.bf16.msra.mxu0 %v426_v1  ;;  %517 = vmatpush.bf16.msra.mxu1 %v426_v1  ;;  %v76_v18 = vmul.f32 %v598_v10, %v430_v8  ;;  %v77_v19 = vmul.f32 %v598_v10, %v431_v9  ;;  %v608_v20 = vld [vmem:[%s690_s3] ss:$0 sm:$0xff]  ;;  %v80_v21 = vmul.f32 %v598_v10, %v438_v11  ;;  %v506_v49 = vld [vmem:[%s692_s0 + $0x38] sm:$0xff]   ;;  %v442_v53 = vunpack.c.l.bf16 %v502_v44 }
   0x7   :  { %518 = vmatpush.bf16.msra.mxu2 %v426_v1  ;;  %519 = vmatpush.bf16.msra.mxu3 %v426_v1  ;;  %v81_v22 = vmul.f32 %v598_v10, %v439_v12  ;;  %v84_v23 = vmul.f32 %v598_v10, %v446_v13  ;;  %v85_v24 = vmul.f32 %v598_v10, %v447_v14  ;;  %v420_v45 = vld [vmem:[%s688_s1] sm:$0xff]  ;;  %v443_v56 = vunpack.c.h.bf16 %v502_v44 }
   0x8   :  { %v88_v26 = vmul.f32 %v598_v10, %v454_v16  ;;  %v89_v27 = vmul.f32 %v598_v10, %v455_v17  ;;  %v96_v28 = vadd.f32 %v608_v20, %v76_v18  ;;  %v97_v29 = vadd.f32 %v608_v20, %v77_v19 }
   0x9   :  { %v100_v30 = vadd.f32 %v608_v20, %v80_v21  ;;  %v101_v31 = vadd.f32 %v608_v20, %v81_v22  ;;  %v104_v32 = vadd.f32 %v608_v20, %v84_v23  ;;  %v105_v33 = vadd.f32 %v608_v20, %v85_v24 }
   0xa   :  { %218 = vmatpush.bf16.msra.mxu0 %v425_v2  ;;  %520 = vmatpush.bf16.msra.mxu1 %v425_v2  ;;  %v108_v35 = vadd.f32 %v608_v20, %v88_v26  ;;  %v109_v36 = vadd.f32 %v608_v20, %v89_v27  ;;  %v112_v37 = vmax.f32 %v96_v28, 0.0  ;;  %v113_v38 = vmax.f32 %v97_v29, 0.0 }
   0xb   :  { %521 = vmatpush.bf16.msra.mxu2 %v425_v2  ;;  %522 = vmatpush.bf16.msra.mxu3 %v425_v2  ;;  %v116_v39 = vmax.f32 %v100_v30, 0.0  ;;  %v117_v40 = vmax.f32 %v101_v31, 0.0  ;;  %v120_v41 = vmax.f32 %v104_v32, 0.0  ;;  %v121_v42 = vmax.f32 %v105_v33, 0.0 }
   0xc   :  { %v124_v46 = vmax.f32 %v108_v35, 0.0  ;;  %v125_v47 = vmax.f32 %v109_v36, 0.0  ;;  %v128_v50 = vpack.c.bf16 %v113_v38, %v112_v37  ;;  %v450_v57 = vunpack.c.l.bf16 %v504_v48 }
   0xd   :  { %v130_v54 = vpack.c.bf16 %v117_v40, %v116_v39  ;;  %v132_v55 = vpack.c.bf16 %v121_v42, %v120_v41  ;;  %v451_v59 = vunpack.c.h.bf16 %v504_v48  ;;  %v458_v60 = vunpack.c.l.bf16 %v506_v49 }
   0xe   :  { %219 = vmatpush.bf16.msra.mxu0 %v424_v4  ;;  %523 = vmatpush.bf16.msra.mxu1 %v424_v4  ;;  %v134_v58 = vpack.c.bf16 %v125_v47, %v124_v46  ;;  %v459_v61 = vunpack.c.h.bf16 %v506_v49  ;;  %v78_v62 = vmul.f32 %v598_v10, %v434_v51  ;;  %v79_v63 = vmul.f32 %v598_v10, %v435_v52 }
   0xf   :  { %524 = vmatpush.bf16.msra.mxu2 %v424_v4  ;;  %525 = vmatpush.bf16.msra.mxu3 %v424_v4  ;;  %v82_v0 = vmul.f32 %v598_v10, %v442_v53  ;;  %v83_v1 = vmul.f32 %v598_v10, %v443_v56  ;;  %v86_v2 = vmul.f32 %v598_v10, %v450_v57 }
  0x10   :  { %v87_v3 = vmul.f32 %v598_v10, %v451_v59  ;;  %v90_v4 = vmul.f32 %v598_v10, %v458_v60  ;;  %v91_v5 = vmul.f32 %v598_v10, %v459_v61  ;;  %v98_v6 = vadd.f32 %v608_v20, %v78_v62 }
  0x11   :  { %v99_v7 = vadd.f32 %v608_v20, %v79_v63  ;;  %v102_v8 = vadd.f32 %v608_v20, %v82_v0  ;;  %v103_v9 = vadd.f32 %v608_v20, %v83_v1  ;;  %v106_v11 = vadd.f32 %v608_v20, %v86_v2 }
  0x12   :  { %220 = vmatpush.bf16.msra.mxu0 %v423_v15  ;;  %526 = vmatpush.bf16.msra.mxu1 %v423_v15  ;;  %v107_v12 = vadd.f32 %v608_v20, %v87_v3  ;;  %v110_v13 = vadd.f32 %v608_v20, %v90_v4  ;;  %v111_v14 = vadd.f32 %v608_v20, %v91_v5  ;;  %v540_v20 = vld [vmem:[%s691_s4] ss:$0 sm:$0xff] }
  0x13   :  { %527 = vmatpush.bf16.msra.mxu2 %v423_v15  ;;  %528 = vmatpush.bf16.msra.mxu3 %v423_v15  ;;  %v114_v15 = vmax.f32 %v98_v6, 0.0  ;;  %v115_v16 = vmax.f32 %v99_v7, 0.0  ;;  %v118_v17 = vmax.f32 %v102_v8, 0.0  ;;  %v119_v10 = vmax.f32 %v103_v9, 0.0 }
  0x14   :  { %v122_v18 = vmax.f32 %v106_v11, 0.0  ;;  %v123_v19 = vmax.f32 %v107_v12, 0.0  ;;  %v126_v21 = vmax.f32 %v110_v13, 0.0  ;;  %v127_v22 = vmax.f32 %v111_v14, 0.0 }
  0x15   :  { %v129_v23 = vpack.c.bf16 %v115_v16, %v114_v15  ;;  %v131_v24 = vpack.c.bf16 %v119_v10, %v118_v17 }
  0x16   :  { %221 = vmatpush.bf16.msra.mxu0 %v422_v25  ;;  %529 = vmatpush.bf16.msra.mxu1 %v422_v25  ;;  %v135_v26 = vpack.c.bf16 %v127_v22, %v126_v21 }
  0x17   :  { %530 = vmatpush.bf16.msra.mxu2 %v422_v25  ;;  %531 = vmatpush.bf16.msra.mxu3 %v422_v25  ;;  %v133_v25 = vpack.c.bf16 %v123_v19, %v122_v18 }
  0x1a   :  { %222 = vmatpush.bf16.msra.mxu0 %v421_v34  ;;  %532 = vmatpush.bf16.msra.mxu1 %v421_v34 }
  0x1b   :  { %533 = vmatpush.bf16.msra.mxu2 %v421_v34  ;;  %534 = vmatpush.bf16.msra.mxu3 %v421_v34 }
  0x1e   :  { %223 = vmatpush.bf16.msra.mxu0 %v420_v45  ;;  %535 = vmatpush.bf16.msra.mxu1 %v420_v45 }
  0x1f   :  { %536 = vmatpush.bf16.msra.mxu2 %v420_v45  ;;  %537 = vmatpush.bf16.msra.mxu3 %v420_v45 }
  0x21   :  { %224 = vmatmul.bf16.vlgmr.msra.gmra.mxu0 %v128_v50  ;;  %234 = vmatmul.bf16.vlgmr.msra.gmra.mxu1 %v130_v54 }
  0x22   :  { %244 = vmatmul.bf16.vlgmr.msra.gmra.mxu2 %v132_v55  ;;  %254 = vmatmul.bf16.vlgmr.msra.gmra.mxu3 %v134_v58 }
  0x31   :  { %229 = vmatmul.bf16.gmra.mxu0 %v129_v23  ;;  %239 = vmatmul.bf16.gmra.mxu1 %v131_v24 }
  0x32   :  { %249 = vmatmul.bf16.gmra.mxu2 %v133_v25  ;;  %259 = vmatmul.bf16.gmra.mxu3 %v135_v26 }
  0x9e   :  { %v225_v27 = vpop.f32.mrf.mxu0  ;;  %v235_v28 = vpop.f32.mrf.mxu1 }
  0x9f   :  { %v320_v29 = vadd.f32 %v540_v20, %v225_v27  ;;  %v324_v30 = vadd.f32 %v540_v20, %v235_v28 }
  0xa1   :  { %v336_v37 = vmax.f32 %v320_v29, 0.0  ;;  %v340_v38 = vmax.f32 %v324_v30, 0.0 }
  0xa5   :  { %v245_v31 = vpop.f32.mrf.mxu2  ;;  %v255_v32 = vpop.f32.mrf.mxu3 }
  0xa6   :  { %v227_v33 = vpop.f32.mrf.mxu0  ;;  %v237_v34 = vpop.f32.mrf.mxu1  ;;  %v328_v43 = vadd.f32 %v540_v20, %v245_v31  ;;  %v332_v44 = vadd.f32 %v540_v20, %v255_v32 }
  0xa7   :  { %v321_v35 = vadd.f32 %v540_v20, %v227_v33  ;;  %v325_v36 = vadd.f32 %v540_v20, %v237_v34 }
  0xa8   :  { %v344_v51 = vmax.f32 %v328_v43, 0.0  ;;  %v348_v52 = vmax.f32 %v332_v44, 0.0 }
  0xa9   :  { %v337_v39 = vmax.f32 %v321_v35, 0.0  ;;  %v341_v40 = vmax.f32 %v325_v36, 0.0 }
  0xab   :  { %v463_v41 = vpack.c.bf16 %v337_v39, %v336_v37  ;;  %v473_v42 = vpack.c.bf16 %v341_v40, %v340_v38 }
  0xad   :  { %464 = vst [vmem:[%s693_s5] sm:$0xff] %v463_v41   ;;  %v247_v45 = vpop.f32.mrf.mxu2  ;;  %v257_v46 = vpop.f32.mrf.mxu3 }
  0xae   :  { %508 = vst [vmem:[%s693_s5 + $0x10] sm:$0xff] %v473_v42   ;;  %v329_v47 = vadd.f32 %v540_v20, %v247_v45  ;;  %v333_v48 = vadd.f32 %v540_v20, %v257_v46  ;;  %v230_v49 = vpop.f32.mrf.mxu0  ;;  %v240_v50 = vpop.f32.mrf.mxu1 }
  0xaf   :  { %v322_v57 = vadd.f32 %v540_v20, %v230_v49  ;;  %v326_v58 = vadd.f32 %v540_v20, %v240_v50 }
  0xb0   :  { %v345_v53 = vmax.f32 %v329_v47, 0.0  ;;  %v349_v54 = vmax.f32 %v333_v48, 0.0 }
  0xb1   :  { %v338_v1 = vmax.f32 %v322_v57, 0.0  ;;  %v342_v2 = vmax.f32 %v326_v58, 0.0 }
  0xb2   :  { %v483_v55 = vpack.c.bf16 %v345_v53, %v344_v51  ;;  %v493_v56 = vpack.c.bf16 %v349_v54, %v348_v52 }
  0xb4   :  { %510 = vst [vmem:[%s693_s5 + $0x20] sm:$0xff] %v483_v55  }
  0xb5   :  { %512 = vst [vmem:[%s693_s5 + $0x30] sm:$0xff] %v493_v56   ;;  %v250_v59 = vpop.f32.mrf.mxu2  ;;  %v260_v60 = vpop.f32.mrf.mxu3 }
  0xb6   :  { %v232_v61 = vpop.f32.mrf.mxu0  ;;  %v242_v62 = vpop.f32.mrf.mxu1  ;;  %v330_v7 = vadd.f32 %v540_v20, %v250_v59  ;;  %v334_v8 = vadd.f32 %v540_v20, %v260_v60 }
  0xb7   :  { %v323_v63 = vadd.f32 %v540_v20, %v232_v61  ;;  %v327_v0 = vadd.f32 %v540_v20, %v242_v62 }
  0xb8   :  { %v346_v14 = vmax.f32 %v330_v7, 0.0  ;;  %v350_v15 = vmax.f32 %v334_v8, 0.0 }
  0xb9   :  { %v339_v3 = vmax.f32 %v323_v63, 0.0  ;;  %v343_v4 = vmax.f32 %v327_v0, 0.0 }
  0xbb   :  { %v468_v5 = vpack.c.bf16 %v339_v3, %v338_v1  ;;  %v478_v6 = vpack.c.bf16 %v343_v4, %v342_v2 }
  0xbd   :  { %507 = vst [vmem:[%s693_s5 + $0x8] sm:$0xff] %v468_v5   ;;  %v252_v9 = vpop.f32.mrf.mxu2  ;;  %v262_v11 = vpop.f32.mrf.mxu3 }
  0xbe   :  { %509 = vst [vmem:[%s693_s5 + $0x18] sm:$0xff] %v478_v6   ;;  %v331_v12 = vadd.f32 %v540_v20, %v252_v9  ;;  %v335_v13 = vadd.f32 %v540_v20, %v262_v11 }
  0xc0   :  { %v347_v16 = vmax.f32 %v331_v12, 0.0  ;;  %v351_v17 = vmax.f32 %v335_v13, 0.0 }
  0xc2   :  { %v488_v10 = vpack.c.bf16 %v347_v16, %v346_v14  ;;  %v498_v18 = vpack.c.bf16 %v351_v17, %v350_v15 }
  0xc4   :  { %511 = vst [vmem:[%s693_s5 + $0x28] sm:$0xff] %v488_v10  }
  0xc5   :  { %513 = vst [vmem:[%s693_s5 + $0x38] sm:$0xff] %v498_v18  }

// kernel: densenet_forward.34
= control target key start
LH: loop header
LB: loop body
LE: loop exit
PB: predicated region body
PF: predicated region fallthrough
CT: control target
= control target key end

     0   :  { %s3161_s1 = inlined_call_operand.vmem [shape: bf16[1152,128], index: 1, kind: input, shape index: {}]   ;;  %s3162_s0 = inlined_call_operand.vmem [shape: bf16[128,1152], index: 0, kind: input, shape index: {}]   ;;  %s3163_s2 = inlined_call_operand.vmem [shape: bf16[128,128], index: 2, kind: output, shape index: {}]  }
   0x1   :  { %v2254_v0 = vld [vmem:[%s3161_s1 + $0x38] sm:$0xff]  ;;  %v2253_v1 = vld [vmem:[%s3161_s1 + $0x30] sm:$0xff]  ;;  %v2252_v2 = vld [vmem:[%s3161_s1 + $0x28] sm:$0xff] }
   0x2   :  { %2366 = vmatpush.bf16.msra.mxu1 %v2254_v0  ;;  %2367 = vmatpush.bf16.msra.mxu2 %v2254_v0  ;;  %v2251_v3 = vld [vmem:[%s3161_s1 + $0x20] sm:$0xff]  ;;  %v2250_v4 = vld [vmem:[%s3161_s1 + $0x18] sm:$0xff]  ;;  %v2249_v5 = vld [vmem:[%s3161_s1 + $0x10] sm:$0xff] }
   0x3   :  { %2368 = vmatpush.bf16.msra.mxu3 %v2254_v0  ;;  %1071 = vmatpush.bf16.msra.mxu0 %v2254_v0  ;;  %v2248_v6 = vld [vmem:[%s3161_s1 + $0x8] sm:$0xff]  ;;  %v2247_v7 = vld [vmem:[%s3161_s1] sm:$0xff]  ;;  %v1673_v8 = vld [vmem:[%s3162_s0 + $0x90] sm:$0xf] }
   0x4   :  { %v2197_v9 = vld [vmem:[%s3162_s0 + $0xb0] sm:$0xf0]  ;;  %v1745_v10 = vld [vmem:[%s3162_s0 + $0x120] sm:$0xf]  ;;  %v2215_v11 = vld [vmem:[%s3162_s0 + $0x140] sm:$0xf0] }
   0x5   :  { %v1817_v12 = vld [vmem:[%s3162_s0 + $0x1b0] sm:$0xf]  ;;  %v2233_v13 = vld [vmem:[%s3162_s0 + $0x1d0] sm:$0xf0]  ;;  %v1601_v14 = vld [vmem:[%s3162_s0] sm:$0xf]  ;;  %v1674_v18 = vor.u32 %v2197_v9, %v1673_v8  ;;  %v1746_v19 = vor.u32 %v2215_v11, %v1745_v10 }
   0x6   :  { %2369 = vmatpush.bf16.msra.mxu1 %v2253_v1  ;;  %2370 = vmatpush.bf16.msra.mxu2 %v2253_v1  ;;  %v2179_v15 = vld [vmem:[%s3162_s0 + $0x20] sm:$0xf0]  ;;  %v2270_v16 = vld [vmem:[%s3161_s1 + $0xb8] sm:$0xff]  ;;  %v1818_v20 = vor.u32 %v2233_v13, %v1817_v12  ;;  %v2269_v24 = vld [vmem:[%s3161_s1 + $0xb0] sm:$0xff] }
   0x7   :  { %2371 = vmatpush.bf16.msra.mxu3 %v2253_v1  ;;  %1072 = vmatpush.bf16.msra.mxu0 %v2253_v1  ;;  %v2262_v17 = vld [vmem:[%s3161_s1 + $0x78] sm:$0xff]  ;;  %v1602_v21 = vor.u32 %v2179_v15, %v1601_v14  ;;  %v2261_v25 = vld [vmem:[%s3161_s1 + $0x70] sm:$0xff]  ;;  %v2268_v28 = vld [vmem:[%s3161_s1 + $0xa8] sm:$0xff] }
   0x8   :  { %v2278_v22 = vld [vmem:[%s3161_s1 + $0xf8] sm:$0xff]  ;;  %v2277_v26 = vld [vmem:[%s3161_s1 + $0xf0] sm:$0xff]  ;;  %v2260_v29 = vld [vmem:[%s3161_s1 + $0x68] sm:$0xff] }
   0x9   :  { %v2286_v23 = vld [vmem:[%s3161_s1 + $0x138] sm:$0xff]  ;;  %v2285_v27 = vld [vmem:[%s3161_s1 + $0x130] sm:$0xff]  ;;  %v2276_v30 = vld [vmem:[%s3161_s1 + $0xe8] sm:$0xff] }
   0xa   :  { %2372 = vmatpush.bf16.msra.mxu1 %v2252_v2  ;;  %2373 = vmatpush.bf16.msra.mxu2 %v2252_v2  ;;  %v2284_v31 = vld [vmem:[%s3161_s1 + $0x128] sm:$0xff]  ;;  %v2267_v32 = vld [vmem:[%s3161_s1 + $0xa0] sm:$0xff]  ;;  %v1709_v36 = vld [vmem:[%s3162_s0 + $0xd8] sm:$0xf] }
   0xb   :  { %2374 = vmatpush.bf16.msra.mxu3 %v2252_v2  ;;  %1073 = vmatpush.bf16.msra.mxu0 %v2252_v2  ;;  %v2259_v33 = vld [vmem:[%s3161_s1 + $0x60] sm:$0xff]  ;;  %v2206_v37 = vld [vmem:[%s3162_s0 + $0xf8] sm:$0xf0]  ;;  %v1781_v38 = vld [vmem:[%s3162_s0 + $0x168] sm:$0xf] }
   0xc   :  { %v2275_v34 = vld [vmem:[%s3161_s1 + $0xe0] sm:$0xff]  ;;  %v2224_v39 = vld [vmem:[%s3162_s0 + $0x188] sm:$0xf0]  ;;  %v1853_v40 = vld [vmem:[%s3162_s0 + $0x1f8] sm:$0xf]  ;;  %v1710_v46 = vor.u32 %v2206_v37, %v1709_v36 }
   0xd   :  { %v2283_v35 = vld [vmem:[%s3161_s1 + $0x120] sm:$0xff]  ;;  %v2242_v41 = vld [vmem:[%s3162_s0 + $0x218] sm:$0xf0]  ;;  %v1637_v42 = vld [vmem:[%s3162_s0 + $0x48] sm:$0xf]  ;;  %v1782_v47 = vor.u32 %v2224_v39, %v1781_v38 }
   0xe   :  { %2375 = vmatpush.bf16.msra.mxu1 %v2251_v3  ;;  %2376 = vmatpush.bf16.msra.mxu2 %v2251_v3  ;;  %v2188_v43 = vld [vmem:[%s3162_s0 + $0x68] sm:$0xf0]  ;;  %v2266_v44 = vld [vmem:[%s3161_s1 + $0x98] sm:$0xff]  ;;  %v1854_v48 = vor.u32 %v2242_v41, %v1853_v40  ;;  %v2265_v52 = vld [vmem:[%s3161_s1 + $0x90] sm:$0xff] }
   0xf   :  { %2377 = vmatpush.bf16.msra.mxu3 %v2251_v3  ;;  %1074 = vmatpush.bf16.msra.mxu0 %v2251_v3  ;;  %v2258_v45 = vld [vmem:[%s3161_s1 + $0x58] sm:$0xff]  ;;  %v1638_v49 = vor.u32 %v2188_v43, %v1637_v42  ;;  %v2257_v53 = vld [vmem:[%s3161_s1 + $0x50] sm:$0xff]  ;;  %v2264_v56 = vld [vmem:[%s3161_s1 + $0x88] sm:$0xff] }
  0x10   :  { %v2274_v50 = vld [vmem:[%s3161_s1 + $0xd8] sm:$0xff]  ;;  %v2273_v54 = vld [vmem:[%s3161_s1 + $0xd0] sm:$0xff]  ;;  %v2256_v57 = vld [vmem:[%s3161_s1 + $0x48] sm:$0xff] }
  0x11   :  { %v2282_v51 = vld [vmem:[%s3161_s1 + $0x118] sm:$0xff]  ;;  %v2281_v55 = vld [vmem:[%s3161_s1 + $0x110] sm:$0xff]  ;;  %v2272_v58 = vld [vmem:[%s3161_s1 + $0xc8] sm:$0xff] }
  0x12   :  { %2378 = vmatpush.bf16.msra.mxu1 %v2250_v4  ;;  %2379 = vmatpush.bf16.msra.mxu2 %v2250_v4  ;;  %v2280_v59 = vld [vmem:[%s3161_s1 + $0x108] sm:$0xff]  ;;  %v2263_v60 = vld [vmem:[%s3161_s1 + $0x80] sm:$0xff]  ;;  %v2302_v2 = vld [vmem:[%s3161_s1 + $0x1b8] sm:$0xff] }
  0x13   :  { %2380 = vmatpush.bf16.msra.mxu3 %v2250_v4  ;;  %1075 = vmatpush.bf16.msra.mxu0 %v2250_v4  ;;  %v2255_v61 = vld [vmem:[%s3161_s1 + $0x40] sm:$0xff]  ;;  %v1603_v1 = vld [vmem:[%s3162_s0 + $0x24] sm:$0xf0]  ;;  %v2294_v3 = vld [vmem:[%s3161_s1 + $0x178] sm:$0xff] }
  0x14   :  { %v2175_v62 = vld [vmem:[%s3162_s0 + $0x4] sm:$0xf]  ;;  %v1609_v4 = vld [vmem:[%s3162_s0 + $0x8] sm:$0xf]  ;;  %v1617_v8 = vld [vmem:[%s3162_s0 + $0x10] sm:$0xf] }
  0x15   :  { %v2271_v63 = vld [vmem:[%s3161_s1 + $0xc0] sm:$0xff]  ;;  %v2181_v9 = vld [vmem:[%s3162_s0 + $0x30] sm:$0xf0]  ;;  %v2310_v10 = vld [vmem:[%s3161_s1 + $0x1f8] sm:$0xff]  ;;  %v1606_v12 = vor.u32 %v2175_v62, %v1603_v1 }
  0x16   :  { %2381 = vmatpush.bf16.msra.mxu1 %v2249_v5  ;;  %2382 = vmatpush.bf16.msra.mxu2 %v2249_v5  ;;  %v2279_v0 = vld [vmem:[%s3161_s1 + $0x100] sm:$0xff]  ;;  %v2318_v11 = vld [vmem:[%s3161_s1 + $0x238] sm:$0xff]  ;;  %v1618_v15 = vor.u32 %v2181_v9, %v1617_v8  ;;  %v2193_v40 = vld [vmem:[%s3162_s0 + $0x94] sm:$0xf] }
  0x17   :  { %2383 = vmatpush.bf16.msra.mxu3 %v2249_v5  ;;  %1076 = vmatpush.bf16.msra.mxu0 %v2249_v5  ;;  %v2180_v5 = vld [vmem:[%s3162_s0 + $0x28] sm:$0xf0]  ;;  %v2299_v36 = vld [vmem:[%s3161_s1 + $0x1a0] sm:$0xff]  ;;  %v1675_v41 = vld [vmem:[%s3162_s0 + $0xb4] sm:$0xf0] }
  0x18   :  { %v1610_v13 = vor.u32 %v2180_v5, %v1609_v4  ;;  %v2307_v37 = vld [vmem:[%s3161_s1 + $0x1e0] sm:$0xff]  ;;  %v1681_v42 = vld [vmem:[%s3162_s0 + $0x98] sm:$0xf]  ;;  %v2198_v43 = vld [vmem:[%s3162_s0 + $0xb8] sm:$0xf0] }
  0x19   :  { %v2291_v38 = vld [vmem:[%s3161_s1 + $0x160] sm:$0xff]  ;;  %v1725_v62 = vld [vmem:[%s3162_s0 + $0xe8] sm:$0xf]  ;;  %v2297_v4 = vld [vmem:[%s3161_s1 + $0x190] sm:$0xff] }
  0x1a   :  { %2384 = vmatpush.bf16.msra.mxu1 %v2248_v6  ;;  %2385 = vmatpush.bf16.msra.mxu2 %v2248_v6  ;;  %v2315_v39 = vld [vmem:[%s3161_s1 + $0x220] sm:$0xff]  ;;  %v2305_v5 = vld [vmem:[%s3161_s1 + $0x1d0] sm:$0xff]  ;;  %v1747_v9 = vld [vmem:[%s3162_s0 + $0x144] sm:$0xf0] }
  0x1b   :  { %2386 = vmatpush.bf16.msra.mxu3 %v2248_v6  ;;  %1077 = vmatpush.bf16.msra.mxu0 %v2248_v6  ;;  %v2176_v6 = vld [vmem:[%s3162_s0 + $0xc] sm:$0xf]  ;;  %v2211_v8 = vld [vmem:[%s3162_s0 + $0x124] sm:$0xf] }
  0x1e   :  { %2387 = vmatpush.bf16.msra.mxu1 %v2247_v7  ;;  %2388 = vmatpush.bf16.msra.mxu2 %v2247_v7 }
  0x1f   :  { %2389 = vmatpush.bf16.msra.mxu3 %v2247_v7  ;;  %1078 = vmatpush.bf16.msra.mxu0 %v2247_v7  ;;  %v1611_v7 = vld [vmem:[%s3162_s0 + $0x2c] sm:$0xf0] }
  0x20   :  { %v1614_v14 = vor.u32 %v2176_v6, %v1611_v7  ;;  %v2289_v6 = vld [vmem:[%s3161_s1 + $0x150] sm:$0xff] }
  0x21   :  { %1089 = vmatmul.bf16.vlgmr.msra.gmra.mxu1 %v1674_v18  ;;  %1099 = vmatmul.bf16.vlgmr.msra.gmra.mxu2 %v1746_v19  ;;  %v2309_v18 = vld [vmem:[%s3161_s1 + $0x1f0] sm:$0xff] }
  0x22   :  { %1169 = vmatpush.bf16.msrb.mxu2 %v2270_v16  ;;  %1120 = vmatpush.bf16.msrb.mxu1 %v2262_v17  ;;  %v2301_v16 = vld [vmem:[%s3161_s1 + $0x1b0] sm:$0xff] }
  0x23   :  { %1109 = vmatmul.bf16.vlgmr.msra.gmra.mxu3 %v1818_v20  ;;  %1079 = vmatmul.bf16.vlgmr.msra.gmra.mxu0 %v1602_v21  ;;  %v2293_v17 = vld [vmem:[%s3161_s1 + $0x170] sm:$0xff]  ;;  %v2300_v20 = vld [vmem:[%s3161_s1 + $0x1a8] sm:$0xff] }
  0x24   :  { %1218 = vmatpush.bf16.msrb.mxu3 %v2278_v22  ;;  %1267 = vmatpush.bf16.msrb.mxu0 %v2286_v23  ;;  %v2317_v19 = vld [vmem:[%s3161_s1 + $0x230] sm:$0xff]  ;;  %v2292_v21 = vld [vmem:[%s3161_s1 + $0x168] sm:$0xff] }
  0x25   :  { %v2308_v22 = vld [vmem:[%s3161_s1 + $0x1e8] sm:$0xff]  ;;  %v2313_v7 = vld [vmem:[%s3161_s1 + $0x210] sm:$0xff] }
  0x26   :  { %1170 = vmatpush.bf16.msrb.mxu2 %v2269_v24  ;;  %1121 = vmatpush.bf16.msrb.mxu1 %v2261_v25  ;;  %v2316_v23 = vld [vmem:[%s3161_s1 + $0x228] sm:$0xff]  ;;  %v1639_v25 = vld [vmem:[%s3162_s0 + $0x6c] sm:$0xf0] }
  0x27   :  { %v2184_v24 = vld [vmem:[%s3162_s0 + $0x4c] sm:$0xf] }
  0x28   :  { %1219 = vmatpush.bf16.msrb.mxu3 %v2277_v26  ;;  %1268 = vmatpush.bf16.msrb.mxu0 %v2285_v27  ;;  %v1645_v26 = vld [vmem:[%s3162_s0 + $0x50] sm:$0xf]  ;;  %v2189_v27 = vld [vmem:[%s3162_s0 + $0x70] sm:$0xf0] }
  0x2a   :  { %1171 = vmatpush.bf16.msrb.mxu2 %v2268_v28  ;;  %1122 = vmatpush.bf16.msrb.mxu1 %v2260_v29  ;;  %v2185_v28 = vld [vmem:[%s3162_s0 + $0x54] sm:$0xf]  ;;  %v1647_v29 = vld [vmem:[%s3162_s0 + $0x74] sm:$0xf0] }
  0x2c   :  { %1220 = vmatpush.bf16.msrb.mxu3 %v2276_v30  ;;  %1269 = vmatpush.bf16.msrb.mxu0 %v2284_v31  ;;  %v1653_v30 = vld [vmem:[%s3162_s0 + $0x58] sm:$0xf]  ;;  %v2190_v31 = vld [vmem:[%s3162_s0 + $0x78] sm:$0xf0] }
  0x2e   :  { %1172 = vmatpush.bf16.msrb.mxu2 %v2267_v32  ;;  %1123 = vmatpush.bf16.msrb.mxu1 %v2259_v33  ;;  %v1642_v32 = vor.u32 %v2184_v24, %v1639_v25  ;;  %v1646_v33 = vor.u32 %v2189_v27, %v1645_v26  ;;  %v2220_v24 = vld [vmem:[%s3162_s0 + $0x16c] sm:$0xf]  ;;  %v1783_v25 = vld [vmem:[%s3162_s0 + $0x18c] sm:$0xf0]  ;;  %v2225_v27 = vld [vmem:[%s3162_s0 + $0x190] sm:$0xf0] }
  0x2f   :  { %v1789_v26 = vld [vmem:[%s3162_s0 + $0x170] sm:$0xf] }
  0x30   :  { %1221 = vmatpush.bf16.msrb.mxu3 %v2275_v34  ;;  %1270 = vmatpush.bf16.msrb.mxu0 %v2283_v35  ;;  %v1650_v34 = vor.u32 %v2185_v28, %v1647_v29  ;;  %v1654_v35 = vor.u32 %v2190_v31, %v1653_v30  ;;  %v2221_v28 = vld [vmem:[%s3162_s0 + $0x174] sm:$0xf]  ;;  %v1791_v29 = vld [vmem:[%s3162_s0 + $0x194] sm:$0xf0]  ;;  %v2226_v31 = vld [vmem:[%s3162_s0 + $0x198] sm:$0xf0] }
  0x31   :  { %1094 = vmatmul.bf16.gmra.mxu1 %v1710_v46  ;;  %1104 = vmatmul.bf16.gmra.mxu2 %v1782_v47  ;;  %v1689_v46 = vld [vmem:[%s3162_s0 + $0xa0] sm:$0xf]  ;;  %v2199_v47 = vld [vmem:[%s3162_s0 + $0xc0] sm:$0xf0]  ;;  %v1797_v30 = vld [vmem:[%s3162_s0 + $0x178] sm:$0xf] }
  0x32   :  { %1173 = vmatpush.bf16.msrb.mxu2 %v2266_v44  ;;  %1124 = vmatpush.bf16.msrb.mxu1 %v2258_v45  ;;  %v2194_v44 = vld [vmem:[%s3162_s0 + $0x9c] sm:$0xf]  ;;  %v1683_v45 = vld [vmem:[%s3162_s0 + $0xbc] sm:$0xf0] }
  0x33   :  { %1114 = vmatmul.bf16.gmra.mxu3 %v1854_v48  ;;  %1084 = vmatmul.bf16.gmra.mxu0 %v1638_v49  ;;  %v1678_v48 = vor.u32 %v2193_v40, %v1675_v41  ;;  %v1682_v49 = vor.u32 %v2198_v43, %v1681_v42  ;;  %v2229_v40 = vld [vmem:[%s3162_s0 + $0x1b4] sm:$0xf]  ;;  %v1819_v41 = vld [vmem:[%s3162_s0 + $0x1d4] sm:$0xf0]  ;;  %v2234_v43 = vld [vmem:[%s3162_s0 + $0x1d8] sm:$0xf0] }
  0x34   :  { %1222 = vmatpush.bf16.msrb.mxu3 %v2274_v50  ;;  %1271 = vmatpush.bf16.msrb.mxu0 %v2282_v51  ;;  %v1686_v50 = vor.u32 %v2194_v44, %v1683_v45  ;;  %v1690_v51 = vor.u32 %v2199_v47, %v1689_v46  ;;  %v1825_v42 = vld [vmem:[%s3162_s0 + $0x1b8] sm:$0xf]  ;;  %v2230_v44 = vld [vmem:[%s3162_s0 + $0x1bc] sm:$0xf]  ;;  %v1827_v45 = vld [vmem:[%s3162_s0 + $0x1dc] sm:$0xf0] }
  0x35   :  { %v1833_v46 = vld [vmem:[%s3162_s0 + $0x1c0] sm:$0xf]  ;;  %v2235_v47 = vld [vmem:[%s3162_s0 + $0x1e0] sm:$0xf0] }
  0x36   :  { %1174 = vmatpush.bf16.msrb.mxu2 %v2265_v52  ;;  %1125 = vmatpush.bf16.msrb.mxu1 %v2257_v53  ;;  %v2298_v52 = vld [vmem:[%s3161_s1 + $0x198] sm:$0xff] }
  0x37   :  { %v2306_v53 = vld [vmem:[%s3161_s1 + $0x1d8] sm:$0xff] }
  0x38   :  { %1223 = vmatpush.bf16.msrb.mxu3 %v2273_v54  ;;  %1272 = vmatpush.bf16.msrb.mxu0 %v2281_v55  ;;  %v2290_v54 = vld [vmem:[%s3161_s1 + $0x158] sm:$0xff] }
  0x39   :  { %v2314_v55 = vld [vmem:[%s3161_s1 + $0x218] sm:$0xff] }
  0x3a   :  { %1175 = vmatpush.bf16.msrb.mxu2 %v2264_v56  ;;  %1126 = vmatpush.bf16.msrb.mxu1 %v2256_v57  ;;  %v2202_v56 = vld [vmem:[%s3162_s0 + $0xdc] sm:$0xf]  ;;  %v1711_v57 = vld [vmem:[%s3162_s0 + $0xfc] sm:$0xf0] }
  0x3c   :  { %1224 = vmatpush.bf16.msrb.mxu3 %v2272_v58  ;;  %1273 = vmatpush.bf16.msrb.mxu0 %v2280_v59  ;;  %v1717_v58 = vld [vmem:[%s3162_s0 + $0xe0] sm:$0xf]  ;;  %v2207_v59 = vld [vmem:[%s3162_s0 + $0x100] sm:$0xf0] }
  0x3d   :  { %v1718_v1 = vor.u32 %v2207_v59, %v1717_v58  ;;  %v2238_v58 = vld [vmem:[%s3162_s0 + $0x1fc] sm:$0xf]  ;;  %v1855_v59 = vld [vmem:[%s3162_s0 + $0x21c] sm:$0xf0] }
  0x3e   :  { %1176 = vmatpush.bf16.msrb.mxu2 %v2263_v60  ;;  %1127 = vmatpush.bf16.msrb.mxu1 %v2255_v61  ;;  %v2203_v60 = vld [vmem:[%s3162_s0 + $0xe4] sm:$0xf]  ;;  %v1719_v61 = vld [vmem:[%s3162_s0 + $0x104] sm:$0xf0] }
  0x40   :  { %1225 = vmatpush.bf16.msrb.mxu3 %v2271_v63  ;;  %1274 = vmatpush.bf16.msrb.mxu0 %v2279_v0  ;;  %v2208_v63 = vld [vmem:[%s3162_s0 + $0x108] sm:$0xf0]  ;;  %v1714_v0 = vor.u32 %v2202_v56, %v1711_v57 }
  0x41   :  { %1128 = vmatmul.bf16.vlgmr.msrb.gmra.mxu1 %v1606_v12  ;;  %1177 = vmatmul.bf16.vlgmr.msrb.gmra.mxu2 %v1610_v13  ;;  %v2212_v12 = vld [vmem:[%s3162_s0 + $0x12c] sm:$0xf]  ;;  %v1755_v13 = vld [vmem:[%s3162_s0 + $0x14c] sm:$0xf0] }
  0x42   :  { %1365 = vmatpush.bf16.msra.mxu2 %v2302_v2  ;;  %1316 = vmatpush.bf16.msra.mxu1 %v2294_v3  ;;  %v1722_v2 = vor.u32 %v2203_v60, %v1719_v61  ;;  %v1726_v3 = vor.u32 %v2208_v63, %v1725_v62  ;;  %v1861_v60 = vld [vmem:[%s3162_s0 + $0x200] sm:$0xf]  ;;  %v2243_v61 = vld [vmem:[%s3162_s0 + $0x220] sm:$0xf0]  ;;  %v1863_v63 = vld [vmem:[%s3162_s0 + $0x224] sm:$0xf0] }
  0x43   :  { %1226 = vmatmul.bf16.vlgmr.msrb.gmra.mxu3 %v1614_v14  ;;  %1275 = vmatmul.bf16.vlgmr.msrb.gmra.mxu0 %v1618_v15  ;;  %v1761_v14 = vld [vmem:[%s3162_s0 + $0x130] sm:$0xf]  ;;  %v2217_v15 = vld [vmem:[%s3162_s0 + $0x150] sm:$0xf0]  ;;  %v2239_v62 = vld [vmem:[%s3162_s0 + $0x204] sm:$0xf] }
  0x44   :  { %1414 = vmatpush.bf16.msra.mxu3 %v2310_v10  ;;  %1463 = vmatpush.bf16.msra.mxu0 %v2318_v11  ;;  %v1753_v10 = vld [vmem:[%s3162_s0 + $0x128] sm:$0xf]  ;;  %v2216_v11 = vld [vmem:[%s3162_s0 + $0x148] sm:$0xf0] }
  0x46   :  { %1366 = vmatpush.bf16.msra.mxu2 %v2301_v16  ;;  %1317 = vmatpush.bf16.msra.mxu1 %v2293_v17  ;;  %v1750_v16 = vor.u32 %v2211_v8, %v1747_v9  ;;  %v1754_v17 = vor.u32 %v2216_v11, %v1753_v10 }
  0x48   :  { %1415 = vmatpush.bf16.msra.mxu3 %v2309_v18  ;;  %1464 = vmatpush.bf16.msra.mxu0 %v2317_v19  ;;  %v1758_v18 = vor.u32 %v2212_v12, %v1755_v13  ;;  %v1762_v19 = vor.u32 %v2217_v15, %v1761_v14  ;;  %v2177_v14 = vld [vmem:[%s3162_s0 + $0x14] sm:$0xf]  ;;  %v1619_v15 = vld [vmem:[%s3162_s0 + $0x34] sm:$0xf0] }
  0x4a   :  { %1367 = vmatpush.bf16.msra.mxu2 %v2300_v20  ;;  %1318 = vmatpush.bf16.msra.mxu1 %v2292_v21  ;;  %v2296_v20 = vld [vmem:[%s3161_s1 + $0x188] sm:$0xff] }
  0x4b   :  { %v2304_v21 = vld [vmem:[%s3161_s1 + $0x1c8] sm:$0xff] }
  0x4c   :  { %1416 = vmatpush.bf16.msra.mxu3 %v2308_v22  ;;  %1465 = vmatpush.bf16.msra.mxu0 %v2316_v23  ;;  %v2288_v22 = vld [vmem:[%s3161_s1 + $0x148] sm:$0xff] }
  0x4d   :  { %v2312_v23 = vld [vmem:[%s3161_s1 + $0x208] sm:$0xff] }
  0x4e   :  { %1368 = vmatpush.bf16.msra.mxu2 %v2299_v36  ;;  %1319 = vmatpush.bf16.msra.mxu1 %v2291_v38  ;;  %v2295_v36 = vld [vmem:[%s3161_s1 + $0x180] sm:$0xff] }
  0x4f   :  { %v2287_v38 = vld [vmem:[%s3161_s1 + $0x140] sm:$0xff] }
  0x50   :  { %1417 = vmatpush.bf16.msra.mxu3 %v2307_v37  ;;  %1466 = vmatpush.bf16.msra.mxu0 %v2315_v39  ;;  %v2303_v37 = vld [vmem:[%s3161_s1 + $0x1c0] sm:$0xff] }
  0x51   :  { %1133 = vmatmul.bf16.gmra.mxu1 %v1642_v32  ;;  %1182 = vmatmul.bf16.gmra.mxu2 %v1646_v33  ;;  %v1786_v32 = vor.u32 %v2220_v24, %v1783_v25  ;;  %v1790_v33 = vor.u32 %v2225_v27, %v1789_v26  ;;  %v2311_v39 = vld [vmem:[%s3161_s1 + $0x200] sm:$0xff]  ;;  %v1622_v24 = vor.u32 %v2177_v14, %v1619_v15 }
  0x52   :  { %1369 = vmatpush.bf16.msra.mxu2 %v2298_v52  ;;  %1320 = vmatpush.bf16.msra.mxu1 %v2290_v54  ;;  %v1834_v52 = vor.u32 %v2235_v47, %v1833_v46  ;;  %v2192_v46 = vld [vmem:[%s3162_s0 + $0x88] sm:$0xf0]  ;;  %v2195_v14 = vld [vmem:[%s3162_s0 + $0xa4] sm:$0xf] }
  0x53   :  { %1231 = vmatmul.bf16.gmra.mxu3 %v1650_v34  ;;  %1280 = vmatmul.bf16.gmra.mxu0 %v1654_v35  ;;  %v1794_v34 = vor.u32 %v2221_v28, %v1791_v29  ;;  %v1798_v35 = vor.u32 %v2226_v31, %v1797_v30 }
  0x54   :  { %1418 = vmatpush.bf16.msra.mxu3 %v2306_v53  ;;  %1467 = vmatpush.bf16.msra.mxu0 %v2314_v55 }
  0x56   :  { %1370 = vmatpush.bf16.msra.mxu2 %v2297_v4  ;;  %1321 = vmatpush.bf16.msra.mxu1 %v2289_v6  ;;  %v1858_v4 = vor.u32 %v2238_v58, %v1855_v59 }
  0x58   :  { %1419 = vmatpush.bf16.msra.mxu3 %v2305_v5  ;;  %1468 = vmatpush.bf16.msra.mxu0 %v2313_v7  ;;  %v1862_v5 = vor.u32 %v2243_v61, %v1861_v60  ;;  %v1866_v7 = vor.u32 %v2239_v62, %v1863_v63 }
  0x5a   :  { %1371 = vmatpush.bf16.msra.mxu2 %v2296_v20  ;;  %1322 = vmatpush.bf16.msra.mxu1 %v2288_v22  ;;  %v1633_v20 = vld [vmem:[%s3162_s0 + $0x20] sm:$0xf] }
  0x5c   :  { %1420 = vmatpush.bf16.msra.mxu3 %v2304_v21  ;;  %1469 = vmatpush.bf16.msra.mxu0 %v2312_v23  ;;  %v2183_v21 = vld [vmem:[%s3162_s0 + $0x40] sm:$0xf0] }
  0x5d   :  { %v1634_v28 = vor.u32 %v2183_v21, %v1633_v20  ;;  %v2201_v20 = vld [vmem:[%s3162_s0 + $0xd0] sm:$0xf0] }
  0x5e   :  { %1372 = vmatpush.bf16.msra.mxu2 %v2295_v36  ;;  %1323 = vmatpush.bf16.msra.mxu1 %v2287_v38  ;;  %v2186_v38 = vld [vmem:[%s3162_s0 + $0x5c] sm:$0xf] }
  0x60   :  { %1421 = vmatpush.bf16.msra.mxu3 %v2303_v37  ;;  %1470 = vmatpush.bf16.msra.mxu0 %v2311_v39  ;;  %v1655_v39 = vld [vmem:[%s3162_s0 + $0x7c] sm:$0xf0] }
  0x61   :  { %1138 = vmatmul.bf16.gmra.mxu1 %v1678_v48  ;;  %1187 = vmatmul.bf16.gmra.mxu2 %v1682_v49  ;;  %v1822_v48 = vor.u32 %v2229_v40, %v1819_v41  ;;  %v1826_v49 = vor.u32 %v2234_v43, %v1825_v42  ;;  %v1661_v41 = vld [vmem:[%s3162_s0 + $0x60] sm:$0xf]  ;;  %v2191_v42 = vld [vmem:[%s3162_s0 + $0x80] sm:$0xf0] }
  0x62   :  { %v2187_v43 = vld [vmem:[%s3162_s0 + $0x64] sm:$0xf] }
  0x63   :  { %1236 = vmatmul.bf16.gmra.mxu3 %v1686_v50  ;;  %1285 = vmatmul.bf16.gmra.mxu0 %v1690_v51  ;;  %v1830_v51 = vor.u32 %v2230_v44, %v1827_v45  ;;  %v1663_v44 = vld [vmem:[%s3162_s0 + $0x84] sm:$0xf0] }
  0x64   :  { %v1669_v45 = vld [vmem:[%s3162_s0 + $0x68] sm:$0xf] }
  0x65   :  { %v1670_v58 = vor.u32 %v2192_v46, %v1669_v45  ;;  %v1733_v45 = vld [vmem:[%s3162_s0 + $0xf0] sm:$0xf]  ;;  %v2209_v46 = vld [vmem:[%s3162_s0 + $0x110] sm:$0xf0] }
  0x71   :  { %1143 = vmatmul.bf16.gmra.mxu1 %v1714_v0  ;;  %1192 = vmatmul.bf16.gmra.mxu2 %v1718_v1  ;;  %v1869_v0 = vld [vmem:[%s3162_s0 + $0x208] sm:$0xf]  ;;  %v2244_v1 = vld [vmem:[%s3162_s0 + $0x228] sm:$0xf0] }
  0x72   :  { %v1870_v8 = vor.u32 %v2244_v1, %v1869_v0 }
  0x73   :  { %1241 = vmatmul.bf16.gmra.mxu3 %v1722_v2  ;;  %1290 = vmatmul.bf16.gmra.mxu0 %v1726_v3 }
  0x81   :  { %1148 = vmatmul.bf16.gmra.mxu1 %v1750_v16  ;;  %1197 = vmatmul.bf16.gmra.mxu2 %v1754_v17  ;;  %v1625_v16 = vld [vmem:[%s3162_s0 + $0x18] sm:$0xf]  ;;  %v2182_v17 = vld [vmem:[%s3162_s0 + $0x38] sm:$0xf0] }
  0x82   :  { %v1626_v25 = vor.u32 %v2182_v17, %v1625_v16  ;;  %v1697_v16 = vld [vmem:[%s3162_s0 + $0xa8] sm:$0xf]  ;;  %v2200_v17 = vld [vmem:[%s3162_s0 + $0xc8] sm:$0xf0] }
  0x83   :  { %1246 = vmatmul.bf16.gmra.mxu3 %v1758_v18  ;;  %1295 = vmatmul.bf16.gmra.mxu0 %v1762_v19  ;;  %v2178_v18 = vld [vmem:[%s3162_s0 + $0x1c] sm:$0xf]  ;;  %v1627_v19 = vld [vmem:[%s3162_s0 + $0x3c] sm:$0xf0] }
  0x84   :  { %v1630_v27 = vor.u32 %v2178_v18, %v1627_v19  ;;  %v1699_v18 = vld [vmem:[%s3162_s0 + $0xcc] sm:$0xf0] }
  0x85   :  { %v1705_v19 = vld [vmem:[%s3162_s0 + $0xb0] sm:$0xf] }
  0x91   :  { %1153 = vmatmul.bf16.gmra.mxu1 %v1786_v32  ;;  %1202 = vmatmul.bf16.gmra.mxu2 %v1790_v33 }
  0x93   :  { %1251 = vmatmul.bf16.gmra.mxu3 %v1794_v34  ;;  %1300 = vmatmul.bf16.gmra.mxu0 %v1798_v35 }
  0x9e   :  { %v2837_v50 = vpop.f32.mrf.mxu1 }
  0xa0   :  { %v1080_v53 = vpop.f32.mrf.mxu0 }
  0xa1   :  { %1158 = vmatmul.bf16.gmra.mxu1 %v1822_v48  ;;  %1207 = vmatmul.bf16.gmra.mxu2 %v1826_v49 }
  0xa3   :  { %1256 = vmatmul.bf16.gmra.mxu3 %v1830_v51  ;;  %1305 = vmatmul.bf16.gmra.mxu0 %v1834_v52  ;;  %v1658_v51 = vor.u32 %v2186_v38, %v1655_v39  ;;  %v1662_v52 = vor.u32 %v2191_v42, %v1661_v41 }
  0xa4   :  { %v2839_v54 = vpop.f32.mrf.mxu2 }
  0xa6   :  { %v2841_v55 = vpop.f32.mrf.mxu3  ;;  %v2843_v56 = vpop.f32.mrf.mxu1 }
  0xa8   :  { %v1082_v57 = vpop.f32.mrf.mxu0 }
  0xac   :  { %v2869_v2 = vpop.f32.mrf.mxu2 }
  0xae   :  { %v2871_v3 = vpop.f32.mrf.mxu3  ;;  %v2873_v6 = vpop.f32.mrf.mxu1 }
  0xb0   :  { %v1085_v9 = vpop.f32.mrf.mxu0 }
  0xb1   :  { %1163 = vmatmul.bf16.gmra.mxu1 %v1858_v4  ;;  %1212 = vmatmul.bf16.gmra.mxu2 %v1862_v5 }
  0xb3   :  { %1261 = vmatmul.bf16.gmra.mxu3 %v1866_v7  ;;  %1310 = vmatmul.bf16.gmra.mxu0 %v1870_v8 }
  0xb4   :  { %v2875_v10 = vpop.f32.mrf.mxu2 }
  0xb6   :  { %v2877_v11 = vpop.f32.mrf.mxu3  ;;  %v2879_v12 = vpop.f32.mrf.mxu1 }
  0xb8   :  { %v1087_v13 = vpop.f32.mrf.mxu0 }
  0xbc   :  { %v2905_v22 = vpop.f32.mrf.mxu2 }
  0xbe   :  { %v2907_v23 = vpop.f32.mrf.mxu3  ;;  %v1129_v26 = vpop.f32.mrf.mxu1 }
  0xbf   :  { %v1130_v29 = vadd.f32 %v1129_v26, %v1080_v53 }
  0xc0   :  { %v1276_v30 = vpop.f32.mrf.mxu0 }
  0xc1   :  { %1324 = vmatmul.bf16.vlgmr.msra.gmra.mxu1 %v1622_v24  ;;  %1373 = vmatmul.bf16.vlgmr.msra.gmra.mxu2 %v1626_v25 }
  0xc3   :  { %1422 = vmatmul.bf16.vlgmr.msra.gmra.mxu3 %v1630_v27  ;;  %1471 = vmatmul.bf16.vlgmr.msra.gmra.mxu0 %v1634_v28  ;;  %v1698_v27 = vor.u32 %v2200_v17, %v1697_v16 }
  0xc4   :  { %v1178_v31 = vpop.f32.mrf.mxu2 }
  0xc5   :  { %v1179_v32 = vadd.f32 %v1178_v31, %v1130_v29 }
  0xc6   :  { %v1227_v33 = vpop.f32.mrf.mxu3  ;;  %v1131_v34 = vpop.f32.mrf.mxu1 }
  0xc7   :  { %v1228_v35 = vadd.f32 %v1227_v33, %v1179_v32  ;;  %v1132_v36 = vadd.f32 %v1131_v34, %v1082_v57  ;;  %v1666_v57 = vor.u32 %v2187_v43, %v1663_v44  ;;  %v2204_v43 = vld [vmem:[%s3162_s0 + $0xec] sm:$0xf] }
  0xc8   :  { %v1278_v37 = vpop.f32.mrf.mxu0 }
  0xc9   :  { %v2915_v40 = vadd.f32 %v1276_v30, %v1228_v35  ;;  %v1706_v30 = vor.u32 %v2201_v20, %v1705_v19  ;;  %v1769_v19 = vld [vmem:[%s3162_s0 + $0x138] sm:$0xf]  ;;  %v2218_v20 = vld [vmem:[%s3162_s0 + $0x158] sm:$0xf0] }
  0xcc   :  { %v1180_v47 = vpop.f32.mrf.mxu2 }
  0xcd   :  { %v1181_v48 = vadd.f32 %v1180_v47, %v1132_v36  ;;  %v1735_v47 = vld [vmem:[%s3162_s0 + $0x114] sm:$0xf0] }
  0xce   :  { %v1229_v49 = vpop.f32.mrf.mxu3  ;;  %v1134_v53 = vpop.f32.mrf.mxu1 }
  0xcf   :  { %v1230_v59 = vadd.f32 %v1229_v49, %v1181_v48  ;;  %v1135_v60 = vadd.f32 %v1134_v53, %v1085_v9  ;;  %v1691_v9 = vld [vmem:[%s3162_s0 + $0xc4] sm:$0xf0]  ;;  %v1741_v48 = vld [vmem:[%s3162_s0 + $0xf8] sm:$0xf]  ;;  %v2210_v49 = vld [vmem:[%s3162_s0 + $0x118] sm:$0xf0] }
  0xd0   :  { %v1281_v61 = vpop.f32.mrf.mxu0  ;;  %v1694_v26 = vor.u32 %v2195_v14, %v1691_v9 }
  0xd1   :  { %1329 = vmatmul.bf16.gmra.mxu1 %v1658_v51  ;;  %1378 = vmatmul.bf16.gmra.mxu2 %v1662_v52  ;;  %v2935_v62 = vadd.f32 %v1278_v37, %v1230_v59 }
  0xd3   :  { %1427 = vmatmul.bf16.gmra.mxu3 %v1666_v57  ;;  %1476 = vmatmul.bf16.gmra.mxu0 %v1670_v58  ;;  %v1734_v58 = vor.u32 %v2209_v46, %v1733_v45  ;;  %v2222_v46 = vld [vmem:[%s3162_s0 + $0x17c] sm:$0xf] }
  0xd4   :  { %v1183_v63 = vpop.f32.mrf.mxu2 }
  0xd5   :  { %v1184_v0 = vadd.f32 %v1183_v63, %v1135_v60 }
  0xd6   :  { %v1232_v1 = vpop.f32.mrf.mxu3  ;;  %v1136_v4 = vpop.f32.mrf.mxu1 }
  0xd7   :  { %v1233_v5 = vadd.f32 %v1232_v1, %v1184_v0  ;;  %v1137_v7 = vadd.f32 %v1136_v4, %v1087_v13  ;;  %v2196_v13 = vld [vmem:[%s3162_s0 + $0xac] sm:$0xf] }
  0xd8   :  { %v1283_v8 = vpop.f32.mrf.mxu0  ;;  %v1702_v29 = vor.u32 %v2196_v13, %v1699_v18  ;;  %v2213_v13 = vld [vmem:[%s3162_s0 + $0x134] sm:$0xf] }
  0xd9   :  { %v2943_v15 = vadd.f32 %v1281_v61, %v1233_v5  ;;  %v1742_v61 = vor.u32 %v2210_v49, %v1741_v48  ;;  %v2227_v48 = vld [vmem:[%s3162_s0 + $0x1a0] sm:$0xf0] }
  0xda   :  { %v2223_v49 = vld [vmem:[%s3162_s0 + $0x184] sm:$0xf] }
  0xdc   :  { %v1185_v21 = vpop.f32.mrf.mxu2 }
  0xdd   :  { %v1186_v24 = vadd.f32 %v1185_v21, %v1137_v7  ;;  %v1771_v21 = vld [vmem:[%s3162_s0 + $0x15c] sm:$0xf0] }
  0xde   :  { %v1234_v25 = vpop.f32.mrf.mxu3  ;;  %v1139_v28 = vpop.f32.mrf.mxu1 }
  0xdf   :  { %v1235_v31 = vadd.f32 %v1234_v25, %v1186_v24  ;;  %v1140_v32 = vadd.f32 %v1139_v28, %v2837_v50  ;;  %v1727_v50 = vld [vmem:[%s3162_s0 + $0x10c] sm:$0xf0]  ;;  %v1777_v24 = vld [vmem:[%s3162_s0 + $0x140] sm:$0xf]  ;;  %v2219_v25 = vld [vmem:[%s3162_s0 + $0x160] sm:$0xf0] }
  0xe0   :  { %v1286_v33 = vpop.f32.mrf.mxu0  ;;  %v1730_v57 = vor.u32 %v2204_v43, %v1727_v50 }
  0xe1   :  { %1334 = vmatmul.bf16.gmra.mxu1 %v1694_v26  ;;  %1383 = vmatmul.bf16.gmra.mxu2 %v1698_v27  ;;  %v2964_v34 = vadd.f32 %v1283_v8, %v1235_v31 }
  0xe3   :  { %1432 = vmatmul.bf16.gmra.mxu3 %v1702_v29  ;;  %1481 = vmatmul.bf16.gmra.mxu0 %v1706_v30  ;;  %v1770_v30 = vor.u32 %v2218_v20, %v1769_v19  ;;  %v2231_v20 = vld [vmem:[%s3162_s0 + $0x1c4] sm:$0xf] }
  0xe4   :  { %v1188_v35 = vpop.f32.mrf.mxu2 }
  0xe5   :  { %v1189_v36 = vadd.f32 %v1188_v35, %v1140_v32 }
  0xe6   :  { %v1237_v37 = vpop.f32.mrf.mxu3  ;;  %v1141_v38 = vpop.f32.mrf.mxu1 }
  0xe7   :  { %v1238_v39 = vadd.f32 %v1237_v37, %v1189_v36  ;;  %v1142_v41 = vadd.f32 %v1141_v38, %v2843_v56  ;;  %v2205_v56 = vld [vmem:[%s3162_s0 + $0xf4] sm:$0xf] }
  0xe8   :  { %v1288_v42 = vpop.f32.mrf.mxu0  ;;  %v1738_v60 = vor.u32 %v2205_v56, %v1735_v47  ;;  %v1799_v56 = vld [vmem:[%s3162_s0 + $0x19c] sm:$0xf0] }
  0xe9   :  { %v2973_v44 = vadd.f32 %v1286_v33, %v1238_v39  ;;  %v1778_v33 = vor.u32 %v2219_v25, %v1777_v24  ;;  %v2236_v24 = vld [vmem:[%s3162_s0 + $0x1e8] sm:$0xf0] }
  0xea   :  { %v2232_v25 = vld [vmem:[%s3162_s0 + $0x1cc] sm:$0xf] }
  0xec   :  { %v1190_v51 = vpop.f32.mrf.mxu2 }
  0xed   :  { %v1191_v52 = vadd.f32 %v1190_v51, %v1142_v41 }
  0xee   :  { %v1239_v53 = vpop.f32.mrf.mxu3  ;;  %v1144_v59 = vpop.f32.mrf.mxu1 }
  0xef   :  { %v1240_v63 = vadd.f32 %v1239_v53, %v1191_v52  ;;  %v1145_v0 = vadd.f32 %v1144_v59, %v2873_v6  ;;  %v1763_v6 = vld [vmem:[%s3162_s0 + $0x154] sm:$0xf0]  ;;  %v1807_v52 = vld [vmem:[%s3162_s0 + $0x1a4] sm:$0xf0] }
  0xf0   :  { %v1291_v1 = vpop.f32.mrf.mxu0  ;;  %v1766_v29 = vor.u32 %v2213_v13, %v1763_v6  ;;  %v1813_v53 = vld [vmem:[%s3162_s0 + $0x188] sm:$0xf] }
  0xf1   :  { %1339 = vmatmul.bf16.gmra.mxu1 %v1730_v57  ;;  %1388 = vmatmul.bf16.gmra.mxu2 %v1734_v58  ;;  %v2994_v4 = vadd.f32 %v1288_v42, %v1240_v63  ;;  %v2228_v57 = vld [vmem:[%s3162_s0 + $0x1a8] sm:$0xf0] }
  0xf3   :  { %1437 = vmatmul.bf16.gmra.mxu3 %v1738_v60  ;;  %1486 = vmatmul.bf16.gmra.mxu0 %v1742_v61  ;;  %v1802_v61 = vor.u32 %v2222_v46, %v1799_v56 }
  0xf4   :  { %v1193_v5 = vpop.f32.mrf.mxu2 }
  0xf5   :  { %v1194_v7 = vadd.f32 %v1193_v5, %v1145_v0 }
  0xf6   :  { %v1242_v8 = vpop.f32.mrf.mxu3  ;;  %v1146_v14 = vpop.f32.mrf.mxu1 }
  0xf7   :  { %v1243_v9 = vadd.f32 %v1242_v8, %v1194_v7  ;;  %v1147_v16 = vadd.f32 %v1146_v14, %v2879_v12  ;;  %v2214_v12 = vld [vmem:[%s3162_s0 + $0x13c] sm:$0xf] }
  0xf8   :  { %v1293_v17 = vpop.f32.mrf.mxu0  ;;  %v1774_v32 = vor.u32 %v2214_v12, %v1771_v21  ;;  %v1835_v12 = vld [vmem:[%s3162_s0 + $0x1e4] sm:$0xf0] }
  0xf9   :  { %v3003_v18 = vadd.f32 %v1291_v1, %v1243_v9  ;;  %v1810_v1 = vor.u32 %v2223_v49, %v1807_v52  ;;  %v2240_v49 = vld [vmem:[%s3162_s0 + $0x20c] sm:$0xf] }
  0xfc   :  { %v1195_v26 = vpop.f32.mrf.mxu2 }
  0xfd   :  { %v1196_v27 = vadd.f32 %v1195_v26, %v1147_v16 }
  0xfe   :  { %v1244_v28 = vpop.f32.mrf.mxu3  ;;  %v1149_v31 = vpop.f32.mrf.mxu1 }
  0xff   :  { %v1245_v35 = vadd.f32 %v1244_v28, %v1196_v27  ;;  %v1150_v38 = vadd.f32 %v1149_v31, %v2839_v54  ;;  %v1805_v54 = vld [vmem:[%s3162_s0 + $0x180] sm:$0xf]  ;;  %v1843_v27 = vld [vmem:[%s3162_s0 + $0x1ec] sm:$0xf0] }
 0x100   :  { %v1296_v36 = vpop.f32.mrf.mxu0  ;;  %v1806_v63 = vor.u32 %v2227_v48, %v1805_v54  ;;  %v1849_v28 = vld [vmem:[%s3162_s0 + $0x1d0] sm:$0xf] }
 0x101   :  { %1344 = vmatmul.bf16.gmra.mxu1 %v1766_v29  ;;  %1393 = vmatmul.bf16.gmra.mxu2 %v1770_v30  ;;  %v3023_v37 = vadd.f32 %v1293_v17, %v1245_v35  ;;  %v2237_v29 = vld [vmem:[%s3162_s0 + $0x1f0] sm:$0xf0] }
 0x103   :  { %1442 = vmatmul.bf16.gmra.mxu3 %v1774_v32  ;;  %1491 = vmatmul.bf16.gmra.mxu0 %v1778_v33  ;;  %v1838_v33 = vor.u32 %v2231_v20, %v1835_v12 }
 0x104   :  { %v1198_v39 = vpop.f32.mrf.mxu2 }
 0x105   :  { %v1199_v41 = vadd.f32 %v1198_v39, %v1150_v38  ;;  %v1846_v38 = vor.u32 %v2232_v25, %v1843_v27 }
 0x106   :  { %v1247_v42 = vpop.f32.mrf.mxu3  ;;  %v1151_v43 = vpop.f32.mrf.mxu1 }
 0x107   :  { %v1248_v50 = vadd.f32 %v1247_v42, %v1199_v41  ;;  %v1152_v51 = vadd.f32 %v1151_v43, %v2869_v2  ;;  %v1814_v2 = vor.u32 %v2228_v57, %v1813_v53  ;;  %v2245_v53 = vld [vmem:[%s3162_s0 + $0x230] sm:$0xf0] }
 0x108   :  { %v1298_v45 = vpop.f32.mrf.mxu0  ;;  %v2241_v57 = vld [vmem:[%s3162_s0 + $0x214] sm:$0xf] }
 0x109   :  { %v3032_v47 = vadd.f32 %v1296_v36, %v1248_v50 }
 0x10c   :  { %v1200_v58 = vpop.f32.mrf.mxu2 }
 0x10d   :  { %v1201_v59 = vadd.f32 %v1200_v58, %v1152_v51  ;;  %v1871_v51 = vld [vmem:[%s3162_s0 + $0x22c] sm:$0xf0] }
 0x10e   :  { %v1249_v60 = vpop.f32.mrf.mxu3  ;;  %v1154_v0 = vpop.f32.mrf.mxu1 }
 0x10f   :  { %v1250_v5 = vadd.f32 %v1249_v60, %v1201_v59  ;;  %v1155_v14 = vadd.f32 %v1154_v0, %v2875_v10  ;;  %v1841_v10 = vld [vmem:[%s3162_s0 + $0x1c8] sm:$0xf]  ;;  %v1879_v59 = vld [vmem:[%s3162_s0 + $0x234] sm:$0xf0] }
 0x110   :  { %v1301_v7 = vpop.f32.mrf.mxu0  ;;  %v1842_v35 = vor.u32 %v2236_v24, %v1841_v10  ;;  %v1885_v60 = vld [vmem:[%s3162_s0 + $0x218] sm:$0xf] }
 0x111   :  { %1349 = vmatmul.bf16.gmra.mxu1 %v1802_v61  ;;  %1398 = vmatmul.bf16.gmra.mxu2 %v1806_v63  ;;  %v3053_v8 = vadd.f32 %v1298_v45, %v1250_v5  ;;  %v2246_v61 = vld [vmem:[%s3162_s0 + $0x238] sm:$0xf0] }
 0x113   :  { %1447 = vmatmul.bf16.gmra.mxu3 %v1810_v1  ;;  %1496 = vmatmul.bf16.gmra.mxu0 %v1814_v2  ;;  %v1874_v2 = vor.u32 %v2240_v49, %v1871_v51 }
 0x114   :  { %v1203_v9 = vpop.f32.mrf.mxu2 }
 0x115   :  { %v1204_v16 = vadd.f32 %v1203_v9, %v1155_v14  ;;  %v1882_v14 = vor.u32 %v2241_v57, %v1879_v59 }
 0x116   :  { %v1252_v17 = vpop.f32.mrf.mxu3  ;;  %v1156_v13 = vpop.f32.mrf.mxu1 }
 0x117   :  { %v1253_v6 = vadd.f32 %v1252_v17, %v1204_v16  ;;  %v1157_v26 = vadd.f32 %v1156_v13, %v2905_v22  ;;  %v1850_v22 = vor.u32 %v2237_v29, %v1849_v28 }
 0x118   :  { %v1303_v19 = vpop.f32.mrf.mxu0 }
 0x119   :  { %v3062_v21 = vadd.f32 %v1301_v7, %v1253_v6 }
 0x11c   :  { %v1205_v30 = vpop.f32.mrf.mxu2 }
 0x11d   :  { %v1206_v31 = vadd.f32 %v1205_v30, %v1157_v26 }
 0x11e   :  { %v1254_v32 = vpop.f32.mrf.mxu3  ;;  %v1159_v36 = vpop.f32.mrf.mxu1 }
 0x11f   :  { %v1255_v39 = vadd.f32 %v1254_v32, %v1206_v31  ;;  %v1160_v43 = vadd.f32 %v1159_v36, %v2841_v55  ;;  %v1877_v55 = vld [vmem:[%s3162_s0 + $0x210] sm:$0xf] }
 0x120   :  { %v1306_v41 = vpop.f32.mrf.mxu0  ;;  %v1878_v5 = vor.u32 %v2245_v53, %v1877_v55 }
 0x121   :  { %1354 = vmatmul.bf16.gmra.mxu1 %v1838_v33  ;;  %1403 = vmatmul.bf16.gmra.mxu2 %v1842_v35  ;;  %v3083_v42 = vadd.f32 %v1303_v19, %v1255_v39 }
 0x123   :  { %1452 = vmatmul.bf16.gmra.mxu3 %v1846_v38  ;;  %1501 = vmatmul.bf16.gmra.mxu0 %v1850_v22 }
 0x124   :  { %v1208_v50 = vpop.f32.mrf.mxu2 }
 0x125   :  { %v1209_v45 = vadd.f32 %v1208_v50, %v1160_v43 }
 0x126   :  { %v1257_v46 = vpop.f32.mrf.mxu3  ;;  %v1161_v56 = vpop.f32.mrf.mxu1 }
 0x127   :  { %v1258_v54 = vadd.f32 %v1257_v46, %v1209_v45  ;;  %v1162_v58 = vadd.f32 %v1161_v56, %v2871_v3  ;;  %v1886_v3 = vor.u32 %v2246_v61, %v1885_v60 }
 0x128   :  { %v1308_v48 = vpop.f32.mrf.mxu0 }
 0x129   :  { %v3092_v52 = vadd.f32 %v1306_v41, %v1258_v54 }
 0x12c   :  { %v1210_v63 = vpop.f32.mrf.mxu2 }
 0x12d   :  { %v1211_v0 = vadd.f32 %v1210_v63, %v1162_v58 }
 0x12e   :  { %v1259_v1 = vpop.f32.mrf.mxu3  ;;  %v1164_v7 = vpop.f32.mrf.mxu1 }
 0x12f   :  { %v1260_v9 = vadd.f32 %v1259_v1, %v1211_v0  ;;  %v1165_v13 = vadd.f32 %v1164_v7, %v2877_v11 }
 0x130   :  { %v1311_v16 = vpop.f32.mrf.mxu0 }
 0x131   :  { %1359 = vmatmul.bf16.gmra.mxu1 %v1874_v2  ;;  %1408 = vmatmul.bf16.gmra.mxu2 %v1878_v5  ;;  %v3113_v17 = vadd.f32 %v1308_v48, %v1260_v9 }
 0x133   :  { %1457 = vmatmul.bf16.gmra.mxu3 %v1882_v14  ;;  %1506 = vmatmul.bf16.gmra.mxu0 %v1886_v3 }
 0x134   :  { %v1213_v6 = vpop.f32.mrf.mxu2 }
 0x135   :  { %v1214_v19 = vadd.f32 %v1213_v6, %v1165_v13 }
 0x136   :  { %v1262_v20 = vpop.f32.mrf.mxu3  ;;  %v1166_v12 = vpop.f32.mrf.mxu1 }
 0x137   :  { %v1263_v10 = vadd.f32 %v1262_v20, %v1214_v19  ;;  %v1167_v26 = vadd.f32 %v1166_v12, %v2907_v23 }
 0x138   :  { %v1313_v24 = vpop.f32.mrf.mxu0 }
 0x139   :  { %v3116_v25 = vadd.f32 %v1311_v16, %v1263_v10 }
 0x13c   :  { %v1215_v27 = vpop.f32.mrf.mxu2 }
 0x13d   :  { %v1216_v28 = vadd.f32 %v1215_v27, %v1167_v26 }
 0x13e   :  { %v1264_v29 = vpop.f32.mrf.mxu3  ;;  %v1325_v30 = vpop.f32.mrf.mxu1 }
 0x13f   :  { %v1265_v31 = vadd.f32 %v1264_v29, %v1216_v28  ;;  %v1326_v38 = vadd.f32 %v1325_v30, %v2915_v40 }
 0x140   :  { %v1472_v32 = vpop.f32.mrf.mxu0 }
 0x141   :  { %v3119_v33 = vadd.f32 %v1313_v24, %v1265_v31 }
 0x144   :  { %v1374_v35 = vpop.f32.mrf.mxu2 }
 0x145   :  { %v1375_v39 = vadd.f32 %v1374_v35, %v1326_v38 }
 0x146   :  { %v1423_v11 = vpop.f32.mrf.mxu3  ;;  %v1327_v36 = vpop.f32.mrf.mxu1 }
 0x147   :  { %v1328_v41 = vadd.f32 %v1327_v36, %v2935_v62  ;;  %v1424_v50 = vadd.f32 %v1423_v11, %v1375_v39 }
 0x148   :  { %v1474_v22 = vpop.f32.mrf.mxu0 }
 0x149   :  { %v1473_v48 = vadd.f32 %v1472_v32, %v1424_v50 }
 0x14c   :  { %v1376_v43 = vpop.f32.mrf.mxu2 }
 0x14d   :  { %v1377_v23 = vadd.f32 %v1376_v43, %v1328_v41 }
 0x14e   :  { %v1425_v45 = vpop.f32.mrf.mxu3  ;;  %v1330_v46 = vpop.f32.mrf.mxu1 }
 0x14f   :  { %v1426_v56 = vadd.f32 %v1425_v45, %v1377_v23  ;;  %v1331_v57 = vadd.f32 %v1330_v46, %v2943_v15 }
 0x150   :  { %v1477_v54 = vpop.f32.mrf.mxu0 }
 0x151   :  { %v1475_v49 = vadd.f32 %v1474_v22, %v1426_v56 }
 0x153   :  { %v2322_v51 = vpack.c.bf16 %v1475_v49, %v1473_v48 }
 0x154   :  { %v1379_v55 = vpop.f32.mrf.mxu2 }
 0x155   :  { %2323 = vst [vmem:[%s3163_s2] sm:$0xff] %v2322_v51   ;;  %v1380_v58 = vadd.f32 %v1379_v55, %v1331_v57 }
 0x156   :  { %v1428_v40 = vpop.f32.mrf.mxu3  ;;  %v1332_v53 = vpop.f32.mrf.mxu1 }
 0x157   :  { %v1333_v59 = vadd.f32 %v1332_v53, %v2964_v34  ;;  %v1429_v61 = vadd.f32 %v1428_v40, %v1380_v58 }
 0x158   :  { %v1479_v62 = vpop.f32.mrf.mxu0 }
 0x159   :  { %v1478_v7 = vadd.f32 %v1477_v54, %v1429_v61 }
 0x15c   :  { %v1381_v60 = vpop.f32.mrf.mxu2 }
 0x15d   :  { %v1382_v63 = vadd.f32 %v1381_v60, %v1333_v59 }
 0x15e   :  { %v1430_v0 = vpop.f32.mrf.mxu3  ;;  %v1335_v1 = vpop.f32.mrf.mxu1 }
 0x15f   :  { %v1431_v2 = vadd.f32 %v1430_v0, %v1382_v63  ;;  %v1336_v13 = vadd.f32 %v1335_v1, %v2973_v44 }
 0x160   :  { %v1482_v5 = vpop.f32.mrf.mxu0 }
 0x161   :  { %v1480_v14 = vadd.f32 %v1479_v62, %v1431_v2 }
 0x163   :  { %v2327_v3 = vpack.c.bf16 %v1480_v14, %v1478_v7 }
 0x164   :  { %v1384_v9 = vpop.f32.mrf.mxu2 }
 0x165   :  { %2359 = vst [vmem:[%s3163_s2 + $0x8] sm:$0xff] %v2327_v3   ;;  %v1385_v6 = vadd.f32 %v1384_v9, %v1336_v13 }
 0x166   :  { %v1433_v15 = vpop.f32.mrf.mxu3  ;;  %v1337_v16 = vpop.f32.mrf.mxu1 }
 0x167   :  { %v1338_v19 = vadd.f32 %v1337_v16, %v2994_v4  ;;  %v1434_v12 = vadd.f32 %v1433_v15, %v1385_v6 }
 0x168   :  { %v1484_v34 = vpop.f32.mrf.mxu0 }
 0x169   :  { %v1483_v29 = vadd.f32 %v1482_v5, %v1434_v12 }
 0x16c   :  { %v1386_v20 = vpop.f32.mrf.mxu2 }
 0x16d   :  { %v1387_v10 = vadd.f32 %v1386_v20, %v1338_v19 }
 0x16e   :  { %v1435_v24 = vpop.f32.mrf.mxu3  ;;  %v1340_v26 = vpop.f32.mrf.mxu1 }
 0x16f   :  { %v1436_v27 = vadd.f32 %v1435_v24, %v1387_v10  ;;  %v1341_v11 = vadd.f32 %v1340_v26, %v3003_v18 }
 0x170   :  { %v1487_v28 = vpop.f32.mrf.mxu0 }
 0x171   :  { %v1485_v30 = vadd.f32 %v1484_v34, %v1436_v27 }
 0x173   :  { %v2332_v31 = vpack.c.bf16 %v1485_v30, %v1483_v29 }
 0x174   :  { %v1389_v32 = vpop.f32.mrf.mxu2 }
 0x175   :  { %2360 = vst [vmem:[%s3163_s2 + $0x10] sm:$0xff] %v2332_v31   ;;  %v1390_v36 = vadd.f32 %v1389_v32, %v1341_v11 }
 0x176   :  { %v1438_v44 = vpop.f32.mrf.mxu3  ;;  %v1342_v35 = vpop.f32.mrf.mxu1 }
 0x177   :  { %v1343_v38 = vadd.f32 %v1342_v35, %v3023_v37  ;;  %v1439_v39 = vadd.f32 %v1438_v44, %v1390_v36 }
 0x178   :  { %v1489_v4 = vpop.f32.mrf.mxu0 }
 0x179   :  { %v1488_v46 = vadd.f32 %v1487_v28, %v1439_v39 }
 0x17c   :  { %v1391_v22 = vpop.f32.mrf.mxu2 }
 0x17d   :  { %v1392_v41 = vadd.f32 %v1391_v22, %v1343_v38 }
 0x17e   :  { %v1440_v43 = vpop.f32.mrf.mxu3  ;;  %v1345_v50 = vpop.f32.mrf.mxu1 }
 0x17f   :  { %v1441_v23 = vadd.f32 %v1440_v43, %v1392_v41  ;;  %v1346_v51 = vadd.f32 %v1345_v50, %v3032_v47 }
 0x180   :  { %v1492_v45 = vpop.f32.mrf.mxu0 }
 0x181   :  { %v1490_v56 = vadd.f32 %v1489_v4, %v1441_v23 }
 0x183   :  { %v2337_v54 = vpack.c.bf16 %v1490_v56, %v1488_v46 }
 0x184   :  { %v1394_v48 = vpop.f32.mrf.mxu2 }
 0x185   :  { %2361 = vst [vmem:[%s3163_s2 + $0x18] sm:$0xff] %v2337_v54   ;;  %v1395_v55 = vadd.f32 %v1394_v48, %v1346_v51 }
 0x186   :  { %v1443_v18 = vpop.f32.mrf.mxu3  ;;  %v1347_v49 = vpop.f32.mrf.mxu1 }
 0x187   :  { %v1348_v40 = vadd.f32 %v1347_v49, %v3053_v8  ;;  %v1444_v57 = vadd.f32 %v1443_v18, %v1395_v55 }
 0x188   :  { %v1494_v37 = vpop.f32.mrf.mxu0 }
 0x189   :  { %v1493_v63 = vadd.f32 %v1492_v45, %v1444_v57 }
 0x18c   :  { %v1396_v53 = vpop.f32.mrf.mxu2 }
 0x18d   :  { %v1397_v62 = vadd.f32 %v1396_v53, %v1348_v40 }
 0x18e   :  { %v1445_v58 = vpop.f32.mrf.mxu3  ;;  %v1350_v59 = vpop.f32.mrf.mxu1 }
 0x18f   :  { %v1446_v60 = vadd.f32 %v1445_v58, %v1397_v62  ;;  %v1351_v7 = vadd.f32 %v1350_v59, %v3062_v21 }
 0x190   :  { %v1497_v61 = vpop.f32.mrf.mxu0 }
 0x191   :  { %v1495_v0 = vadd.f32 %v1494_v37, %v1446_v60 }
 0x193   :  { %v2342_v1 = vpack.c.bf16 %v1495_v0, %v1493_v63 }
 0x194   :  { %v1399_v2 = vpop.f32.mrf.mxu2 }
 0x195   :  { %2362 = vst [vmem:[%s3163_s2 + $0x20] sm:$0xff] %v2342_v1   ;;  %v1400_v14 = vadd.f32 %v1399_v2, %v1351_v7 }
 0x196   :  { %v1448_v47 = vpop.f32.mrf.mxu3  ;;  %v1352_v5 = vpop.f32.mrf.mxu1 }
 0x197   :  { %v1353_v3 = vadd.f32 %v1352_v5, %v3083_v42  ;;  %v1449_v15 = vadd.f32 %v1448_v47, %v1400_v14 }
 0x198   :  { %v1499_v8 = vpop.f32.mrf.mxu0 }
 0x199   :  { %v1498_v19 = vadd.f32 %v1497_v61, %v1449_v15 }
 0x19c   :  { %v1401_v9 = vpop.f32.mrf.mxu2 }
 0x19d   :  { %v1402_v16 = vadd.f32 %v1401_v9, %v1353_v3 }
 0x19e   :  { %v1450_v13 = vpop.f32.mrf.mxu3  ;;  %v1355_v34 = vpop.f32.mrf.mxu1 }
 0x19f   :  { %v1451_v6 = vadd.f32 %v1450_v13, %v1402_v16  ;;  %v1356_v27 = vadd.f32 %v1355_v34, %v3092_v52 }
 0x1a0   :  { %v1502_v12 = vpop.f32.mrf.mxu0 }
 0x1a1   :  { %v1500_v20 = vadd.f32 %v1499_v8, %v1451_v6 }
 0x1a3   :  { %v2347_v10 = vpack.c.bf16 %v1500_v20, %v1498_v19 }
 0x1a4   :  { %v1404_v24 = vpop.f32.mrf.mxu2 }
 0x1a5   :  { %2363 = vst [vmem:[%s3163_s2 + $0x28] sm:$0xff] %v2347_v10   ;;  %v1405_v42 = vadd.f32 %v1404_v24, %v1356_v27 }
 0x1a6   :  { %v1453_v21 = vpop.f32.mrf.mxu3  ;;  %v1357_v26 = vpop.f32.mrf.mxu1 }
 0x1a7   :  { %v1358_v28 = vadd.f32 %v1357_v26, %v3113_v17  ;;  %v1454_v31 = vadd.f32 %v1453_v21, %v1405_v42 }
 0x1a8   :  { %v1504_v29 = vpop.f32.mrf.mxu0 }
 0x1a9   :  { %v1503_v4 = vadd.f32 %v1502_v12, %v1454_v31 }
 0x1ac   :  { %v1406_v30 = vpop.f32.mrf.mxu2 }
 0x1ad   :  { %v1407_v32 = vadd.f32 %v1406_v30, %v1358_v28 }
 0x1ae   :  { %v1455_v44 = vpop.f32.mrf.mxu3  ;;  %v1360_v35 = vpop.f32.mrf.mxu1 }
 0x1af   :  { %v1456_v11 = vadd.f32 %v1455_v44, %v1407_v32  ;;  %v1361_v41 = vadd.f32 %v1360_v35, %v3116_v25 }
 0x1b0   :  { %v1507_v52 = vpop.f32.mrf.mxu0 }
 0x1b1   :  { %v1505_v36 = vadd.f32 %v1504_v29, %v1456_v11 }
 0x1b3   :  { %v2352_v38 = vpack.c.bf16 %v1505_v36, %v1503_v4 }
 0x1b4   :  { %v1409_v22 = vpop.f32.mrf.mxu2 }
 0x1b5   :  { %2364 = vst [vmem:[%s3163_s2 + $0x30] sm:$0xff] %v2352_v38   ;;  %v1410_v43 = vadd.f32 %v1409_v22, %v1361_v41 }
 0x1b6   :  { %v1458_v39 = vpop.f32.mrf.mxu3  ;;  %v1362_v17 = vpop.f32.mrf.mxu1 }
 0x1b7   :  { %v1363_v50 = vadd.f32 %v1362_v17, %v3119_v33  ;;  %v1459_v45 = vadd.f32 %v1458_v39, %v1410_v43 }
 0x1b8   :  { %v1509_v48 = vpop.f32.mrf.mxu0 }
 0x1b9   :  { %v1508_v18 = vadd.f32 %v1507_v52, %v1459_v45 }
 0x1bc   :  { %v1411_v23 = vpop.f32.mrf.mxu2 }
 0x1bd   :  { %v1412_v46 = vadd.f32 %v1411_v23, %v1363_v50 }
 0x1be   :  { %v1460_v56 = vpop.f32.mrf.mxu3 }
 0x1bf   :  { %v1461_v54 = vadd.f32 %v1460_v56, %v1412_v46 }
 0x1c1   :  { %v1510_v49 = vadd.f32 %v1509_v48, %v1461_v54 }
 0x1c3   :  { %v2357_v51 = vpack.c.bf16 %v1510_v49, %v1508_v18 }
 0x1c5   :  { %2365 = vst [vmem:[%s3163_s2 + $0x38] sm:$0xff] %v2357_v51  }

// kernel: densenet_forward.37
= control target key start
LH: loop header
LB: loop body
LE: loop exit
PB: predicated region body
PF: predicated region fallthrough
CT: control target
= control target key end

     0   :  { %s289_s0 = inlined_call_operand.vmem [shape: bf16[4,32,128], index: 0, kind: input, shape index: {}]   ;;  %s290_s1 = inlined_call_operand.vmem [shape: f32[1,128], index: 1, kind: input, shape index: {}]   ;;  %s291_s2 = inlined_call_operand.vmem [shape: f32[1,128], index: 2, kind: input, shape index: {}]   ;;  %s292_s3 = inlined_call_operand.vmem [shape: bf16[32,128], index: 3, kind: output, shape index: {}]  }
   0x1   :  { %v146_v0 = vld [vmem:[%s289_s0] sm:$0xff]   ;;  %v188_v5 = vld [vmem:[%s289_s0 + $0x10] sm:$0xff]   ;;  %v187_v26 = vld [vmem:[%s289_s0 + $0x8] sm:$0xff]  }
   0x2   :  { %v147_v1 = vunpack.c.l.bf16 %v146_v0  ;;  %v148_v2 = vunpack.c.h.bf16 %v146_v0  ;;  %v223_v3 = vld [vmem:[%s290_s1] ss:$0 sm:$0xff]  ;;  %v155_v6 = vunpack.c.l.bf16 %v188_v5  ;;  %v156_v7 = vunpack.c.h.bf16 %v188_v5  ;;  %v192_v9 = vld [vmem:[%s289_s0 + $0x30] sm:$0xff]   ;;  %v189_v35 = vld [vmem:[%s289_s0 + $0x18] sm:$0xff]  }
   0x3   :  { %v228_v4 = vld [vmem:[%s291_s2] ss:$0 sm:$0xff]  ;;  %v171_v16 = vunpack.c.l.bf16 %v192_v9  ;;  %v172_v17 = vunpack.c.h.bf16 %v192_v9  ;;  %v151_v38 = vunpack.c.l.bf16 %v187_v26  ;;  %v152_v39 = vunpack.c.h.bf16 %v187_v26  ;;  %v191_v40 = vld [vmem:[%s289_s0 + $0x28] sm:$0xff]   ;;  %v193_v61 = vld [vmem:[%s289_s0 + $0x38] sm:$0xff]  }
   0x4   :  { %v190_v8 = vld [vmem:[%s289_s0 + $0x20] sm:$0xff]   ;;  %v27_v10 = vmul.f32 %v223_v3, %v147_v1  ;;  %v28_v11 = vmul.f32 %v223_v3, %v148_v2  ;;  %v51_v14 = vmul.f32 %v223_v3, %v155_v6  ;;  %v52_v15 = vmul.f32 %v223_v3, %v156_v7 }
   0x5   :  { %v163_v12 = vunpack.c.l.bf16 %v190_v8  ;;  %v164_v13 = vunpack.c.h.bf16 %v190_v8  ;;  %v101_v24 = vmul.f32 %v223_v3, %v171_v16  ;;  %v102_v25 = vmul.f32 %v223_v3, %v172_v17 }
   0x6   :  { %v34_v18 = vadd.f32 %v228_v4, %v27_v10  ;;  %v35_v19 = vadd.f32 %v228_v4, %v28_v11  ;;  %v55_v22 = vadd.f32 %v228_v4, %v51_v14  ;;  %v56_v23 = vadd.f32 %v228_v4, %v52_v15 }
   0x7   :  { %v76_v20 = vmul.f32 %v223_v3, %v163_v12  ;;  %v77_v21 = vmul.f32 %v223_v3, %v164_v13  ;;  %v105_v33 = vadd.f32 %v228_v4, %v101_v24  ;;  %v106_v34 = vadd.f32 %v228_v4, %v102_v25 }
   0x8   :  { %v38_v27 = vmax.f32 %v34_v18, 0.0  ;;  %v39_v28 = vmax.f32 %v35_v19, 0.0  ;;  %v59_v31 = vmax.f32 %v55_v22, 0.0  ;;  %v60_v32 = vmax.f32 %v56_v23, 0.0 }
   0x9   :  { %v80_v29 = vadd.f32 %v228_v4, %v76_v20  ;;  %v81_v30 = vadd.f32 %v228_v4, %v77_v21  ;;  %v109_v43 = vmax.f32 %v105_v33, 0.0  ;;  %v110_v44 = vmax.f32 %v106_v34, 0.0 }
   0xa   :  { %v63_v41 = vadd.f32 %v59_v31, %v38_v27  ;;  %v64_v42 = vadd.f32 %v60_v32, %v39_v28  ;;  %v29_v45 = vmul.f32 %v223_v3, %v151_v38  ;;  %v30_v46 = vmul.f32 %v223_v3, %v152_v39 }
   0xb   :  { %v84_v36 = vmax.f32 %v80_v29, 0.0  ;;  %v85_v37 = vmax.f32 %v81_v30, 0.0  ;;  %v159_v47 = vunpack.c.l.bf16 %v189_v35  ;;  %v160_v48 = vunpack.c.h.bf16 %v189_v35 }
   0xc   :  { %v167_v51 = vunpack.c.l.bf16 %v191_v40  ;;  %v168_v52 = vunpack.c.h.bf16 %v191_v40  ;;  %v36_v53 = vadd.f32 %v228_v4, %v29_v45  ;;  %v37_v54 = vadd.f32 %v228_v4, %v30_v46 }
   0xd   :  { %v88_v49 = vadd.f32 %v84_v36, %v63_v41  ;;  %v89_v50 = vadd.f32 %v85_v37, %v64_v42  ;;  %v53_v55 = vmul.f32 %v223_v3, %v159_v47  ;;  %v54_v56 = vmul.f32 %v223_v3, %v160_v48 }
   0xe   :  { %v78_v59 = vmul.f32 %v223_v3, %v167_v51  ;;  %v79_v60 = vmul.f32 %v223_v3, %v168_v52  ;;  %v40_v62 = vmax.f32 %v36_v53, 0.0  ;;  %v41_v63 = vmax.f32 %v37_v54, 0.0 }
   0xf   :  { %v113_v57 = vadd.f32 %v109_v43, %v88_v49  ;;  %v114_v58 = vadd.f32 %v110_v44, %v89_v50  ;;  %v57_v0 = vadd.f32 %v228_v4, %v53_v55  ;;  %v58_v1 = vadd.f32 %v228_v4, %v54_v56 }
  0x10   :  { %v82_v6 = vadd.f32 %v228_v4, %v78_v59  ;;  %v83_v7 = vadd.f32 %v228_v4, %v79_v60  ;;  %v175_v10 = vunpack.c.l.bf16 %v193_v61  ;;  %v176_v11 = vunpack.c.h.bf16 %v193_v61 }
  0x11   :  { %v117_v2 = vmul.f32 0.25, %v113_v57  ;;  %v118_v5 = vmul.f32 0.25, %v114_v58  ;;  %v61_v8 = vmax.f32 %v57_v0, 0.0  ;;  %v62_v9 = vmax.f32 %v58_v1, 0.0 }
  0x12   :  { %v86_v13 = vmax.f32 %v82_v6, 0.0  ;;  %v87_v14 = vmax.f32 %v83_v7, 0.0  ;;  %v103_v17 = vmul.f32 %v223_v3, %v175_v10  ;;  %v104_v18 = vmul.f32 %v223_v3, %v176_v11 }
  0x13   :  { %v180_v12 = vpack.c.bf16 %v118_v5, %v117_v2  ;;  %v65_v15 = vadd.f32 %v61_v8, %v40_v62  ;;  %v66_v16 = vadd.f32 %v62_v9, %v41_v63 }
  0x14   :  { %v107_v21 = vadd.f32 %v228_v4, %v103_v17  ;;  %v108_v22 = vadd.f32 %v228_v4, %v104_v18 }
  0x15   :  { %181 = vst [vmem:[%s292_s3] sm:$0xff] %v180_v12   ;;  %v90_v19 = vadd.f32 %v86_v13, %v65_v15  ;;  %v91_v20 = vadd.f32 %v87_v14, %v66_v16 }
  0x16   :  { %v111_v23 = vmax.f32 %v107_v21, 0.0  ;;  %v112_v24 = vmax.f32 %v108_v22, 0.0 }
  0x18   :  { %v115_v25 = vadd.f32 %v111_v23, %v90_v19  ;;  %v116_v26 = vadd.f32 %v112_v24, %v91_v20 }
  0x1a   :  { %v119_v27 = vmul.f32 0.25, %v115_v25  ;;  %v120_v28 = vmul.f32 0.25, %v116_v26 }
  0x1c   :  { %v185_v29 = vpack.c.bf16 %v120_v28, %v119_v27 }
  0x1e   :  { %194 = vst [vmem:[%s292_s3 + $0x8] sm:$0xff] %v185_v29  }

// kernel: densenet_forward.43
= control target key start
LH: loop header
LB: loop body
LE: loop exit
PB: predicated region body
PF: predicated region fallthrough
CT: control target
= control target key end

     0   :  { %s95_s0 = inlined_call_operand.vmem [shape: bf16[4,8,128], index: 0, kind: input, shape index: {}]   ;;  %s96_s1 = inlined_call_operand.vmem [shape: f32[1,128], index: 1, kind: input, shape index: {}]   ;;  %s97_s2 = inlined_call_operand.vmem [shape: f32[1,128], index: 2, kind: input, shape index: {}]   ;;  %s98_s3 = inlined_call_operand.vmem [shape: bf16[8,128], index: 3, kind: output, shape index: {}]  }
   0x1   :  { %v16_v0 = vld [vmem:[%s95_s0] sm:$0xff]   ;;  %v56_v5 = vld [vmem:[%s95_s0 + $0x8] sm:$0xff]  }
   0x2   :  { %v17_v1 = vunpack.c.l.bf16 %v16_v0  ;;  %v58_v2 = vld [vmem:[%s96_s1] ss:$0 sm:$0xff]  ;;  %v29_v4 = vunpack.c.h.bf16 %v16_v0  ;;  %v36_v6 = vunpack.c.l.bf16 %v56_v5  ;;  %v43_v7 = vunpack.c.h.bf16 %v56_v5 }
   0x3   :  { %v59_v3 = vld [vmem:[%s97_s2] ss:$0 sm:$0xff] }
   0x4   :  { %v21_v8 = vmul.f32 %v58_v2, %v17_v1  ;;  %v30_v9 = vmul.f32 %v58_v2, %v29_v4  ;;  %v37_v10 = vmul.f32 %v58_v2, %v36_v6  ;;  %v44_v11 = vmul.f32 %v58_v2, %v43_v7 }
   0x6   :  { %v25_v12 = vadd.f32 %v59_v3, %v21_v8  ;;  %v31_v13 = vadd.f32 %v59_v3, %v30_v9  ;;  %v38_v14 = vadd.f32 %v59_v3, %v37_v10  ;;  %v45_v15 = vadd.f32 %v59_v3, %v44_v11 }
   0x8   :  { %v26_v16 = vmax.f32 %v25_v12, 0.0  ;;  %v32_v17 = vmax.f32 %v31_v13, 0.0  ;;  %v39_v18 = vmax.f32 %v38_v14, 0.0  ;;  %v46_v20 = vmax.f32 %v45_v15, 0.0 }
   0xa   :  { %v33_v19 = vadd.f32 %v32_v17, %v26_v16 }
   0xc   :  { %v40_v21 = vadd.f32 %v39_v18, %v33_v19 }
   0xe   :  { %v47_v22 = vadd.f32 %v46_v20, %v40_v21 }
  0x10   :  { %v48_v23 = vmul.f32 0.25, %v47_v22 }
  0x12   :  { %v49_v24 = vpack.c.bf16 %v48_v23, %v48_v23 }
  0x14   :  { %50 = vst [vmem:[%s98_s3] sm:$0xf] %v49_v24 }

// kernel: densenet_forward.49
= control target key start
LH: loop header
LB: loop body
LE: loop exit
PB: predicated region body
PF: predicated region fallthrough
CT: control target
= control target key end

     0   :  { %s1296_s21 = smov 0   ;;  %s1727_s0 = inlined_call_operand.vmem [shape: bf16[2,4,128], index: 0, kind: input, shape index: {}]   ;;  %s1728_s1 = inlined_call_operand.vmem [shape: f32[1,128], index: 1, kind: input, shape index: {}]   ;;  %s1729_s2 = inlined_call_operand.vmem [shape: f32[1,128], index: 2, kind: input, shape index: {}]   ;;  %s1730_s3 = inlined_call_operand.vmem [shape: bf16[128,1024], index: 3, kind: input, shape index: {}]   ;;  %s1731_s4 = inlined_call_operand.vmem [shape: f32[1,1024], index: 4, kind: input, shape index: {}]   ;;  %s1732_s5 = inlined_call_operand.vmem [shape: f32[2,4,128], index: 5, kind: output, shape index: {0}]   ;;  %s1733_s6 = inlined_call_operand.vmem [shape: f32[2,1,1024], index: 6, kind: output, shape index: {1}]  }
   0x1 LB: > { %s909_s22 = sadd.s32 4294967295, %s1258_s21   ;;  %p913_p0 = scmp.ge.s32.totalorder %s1258_s21, 1  ;;  %s1258_s21 = sphi %s1296_s21, %s17_s21  }
   0x2   : > { %p214_p1 = scmp.lt.s32.totalorder %s1258_s21, 3 }
   0x4   : > { %p215_p2 = pnand %p913_p0, %p214_p1 }
   0x5   : > { %p246_p3 = scmp.lt.s32.totalorder (!%p215_p2), %s909_s22, 1 }
   0x6   : > { %218 = sbr.rel (%p215_p2) target bundleno = 221 (0xdd), region = 40 }
   0xb   : > { %v1143_v0 = vld [vmem:[%s1730_s3 + $0x1c0] sm:$0xf]  ;;  %v1231_v2 = vld [vmem:[%s1730_s3 + $0x1c4] sm:$0xf]  ;;  %v1151_v5 = vld [vmem:[%s1730_s3 + $0x1c8] sm:$0xf] }
   0xc   : > { %v1235_v1 = vld [vmem:[%s1730_s3 + $0x1dc] sm:$0xf0]  ;;  %v1145_v4 = vld [vmem:[%s1730_s3 + $0x1e0] sm:$0xf0]  ;;  %v1236_v6 = vld [vmem:[%s1730_s3 + $0x1e4] sm:$0xf0] }
   0xd   : > { %v1144_v3 = vor.u32 %v1235_v1, %v1143_v0  ;;  %v1148_v7 = vor.u32 %v1231_v2, %v1145_v4  ;;  %v1152_v8 = vor.u32 %v1236_v6, %v1151_v5  ;;  %v1232_v9 = vld [vmem:[%s1730_s3 + $0x1cc] sm:$0xf]  ;;  %v1111_v11 = vld [vmem:[%s1730_s3 + $0x180] sm:$0xf]  ;;  %v1223_v14 = vld [vmem:[%s1730_s3 + $0x184] sm:$0xf] }
   0xe   : > { %v1153_v10 = vld [vmem:[%s1730_s3 + $0x1e8] sm:$0xf0]  ;;  %v1227_v13 = vld [vmem:[%s1730_s3 + $0x19c] sm:$0xf0]  ;;  %v1113_v15 = vld [vmem:[%s1730_s3 + $0x1a0] sm:$0xf0] }
   0xf   : > { %691 = vmatpush.bf16.msra.mxu0 %v1144_v3  ;;  %v1156_v12 = vor.u32 %v1232_v9, %v1153_v10  ;;  %704 = vmatpush.bf16.msra.mxu1 %v1148_v7  ;;  %v1112_v16 = vor.u32 %v1227_v13, %v1111_v11  ;;  %v1116_v17 = vor.u32 %v1223_v14, %v1113_v15  ;;  %v1119_v18 = vld [vmem:[%s1730_s3 + $0x188] sm:$0xf]  ;;  %v1224_v20 = vld [vmem:[%s1730_s3 + $0x18c] sm:$0xf]  ;;  %v1079_v23 = vld [vmem:[%s1730_s3 + $0x140] sm:$0xf] }
  0x10   : > { %717 = vmatpush.bf16.msra.mxu2 %v1152_v8  ;;  %v1228_v19 = vld [vmem:[%s1730_s3 + $0x1a4] sm:$0xf0]  ;;  %v1121_v22 = vld [vmem:[%s1730_s3 + $0x1a8] sm:$0xf0]  ;;  %v1219_v24 = vld [vmem:[%s1730_s3 + $0x15c] sm:$0xf0] }
  0x11   : > { %730 = vmatpush.bf16.msra.mxu3 %v1156_v12  ;;  %v1120_v21 = vor.u32 %v1228_v19, %v1119_v18  ;;  %v1124_v25 = vor.u32 %v1224_v20, %v1121_v22  ;;  %v1215_v26 = vld [vmem:[%s1730_s3 + $0x144] sm:$0xf]  ;;  %v1087_v28 = vld [vmem:[%s1730_s3 + $0x148] sm:$0xf]  ;;  %v1080_v29 = vor.u32 %v1219_v24, %v1079_v23  ;;  %v1216_v31 = vld [vmem:[%s1730_s3 + $0x14c] sm:$0xf] }
  0x12   : > { %v1081_v27 = vld [vmem:[%s1730_s3 + $0x160] sm:$0xf0]  ;;  %v1220_v30 = vld [vmem:[%s1730_s3 + $0x164] sm:$0xf0]  ;;  %v1089_v32 = vld [vmem:[%s1730_s3 + $0x168] sm:$0xf0] }
  0x13   : > { %692 = vmatpush.bf16.msra.mxu0 %v1112_v16  ;;  %705 = vmatpush.bf16.msra.mxu1 %v1116_v17  ;;  %v1084_v33 = vor.u32 %v1215_v26, %v1081_v27  ;;  %v1088_v34 = vor.u32 %v1220_v30, %v1087_v28  ;;  %v1047_v35 = vld [vmem:[%s1730_s3 + $0x100] sm:$0xf]  ;;  %v1207_v37 = vld [vmem:[%s1730_s3 + $0x104] sm:$0xf]  ;;  %v1092_v38 = vor.u32 %v1216_v31, %v1089_v32  ;;  %v1055_v40 = vld [vmem:[%s1730_s3 + $0x108] sm:$0xf] }
  0x14   : > { %718 = vmatpush.bf16.msra.mxu2 %v1120_v21  ;;  %v1211_v36 = vld [vmem:[%s1730_s3 + $0x11c] sm:$0xf0]  ;;  %v1049_v39 = vld [vmem:[%s1730_s3 + $0x120] sm:$0xf0]  ;;  %v1212_v41 = vld [vmem:[%s1730_s3 + $0x124] sm:$0xf0] }
  0x15   : > { %731 = vmatpush.bf16.msra.mxu3 %v1124_v25  ;;  %v1208_v42 = vld [vmem:[%s1730_s3 + $0x10c] sm:$0xf]  ;;  %v1048_v44 = vor.u32 %v1211_v36, %v1047_v35  ;;  %v1052_v45 = vor.u32 %v1207_v37, %v1049_v39  ;;  %v1056_v46 = vor.u32 %v1212_v41, %v1055_v40  ;;  %v1015_v47 = vld [vmem:[%s1730_s3 + $0xc0] sm:$0xf]  ;;  %v1199_v49 = vld [vmem:[%s1730_s3 + $0xc4] sm:$0xf] }
  0x16   : > { %v1057_v43 = vld [vmem:[%s1730_s3 + $0x128] sm:$0xf0]  ;;  %v1203_v48 = vld [vmem:[%s1730_s3 + $0xdc] sm:$0xf0]  ;;  %v1017_v51 = vld [vmem:[%s1730_s3 + $0xe0] sm:$0xf0] }
  0x17   : > { %693 = vmatpush.bf16.msra.mxu0 %v1080_v29  ;;  %706 = vmatpush.bf16.msra.mxu1 %v1084_v33  ;;  %v1060_v50 = vor.u32 %v1208_v42, %v1057_v43  ;;  %v1023_v52 = vld [vmem:[%s1730_s3 + $0xc8] sm:$0xf]  ;;  %v1200_v54 = vld [vmem:[%s1730_s3 + $0xcc] sm:$0xf]  ;;  %v1016_v56 = vor.u32 %v1203_v48, %v1015_v47  ;;  %v1020_v57 = vor.u32 %v1199_v49, %v1017_v51  ;;  %v983_v59 = vld [vmem:[%s1730_s3 + $0x80] sm:$0xf] }
  0x18   : > { %719 = vmatpush.bf16.msra.mxu2 %v1088_v34  ;;  %v1204_v53 = vld [vmem:[%s1730_s3 + $0xe4] sm:$0xf0]  ;;  %v1025_v55 = vld [vmem:[%s1730_s3 + $0xe8] sm:$0xf0]  ;;  %v1195_v60 = vld [vmem:[%s1730_s3 + $0x9c] sm:$0xf0] }
  0x19   : > { %732 = vmatpush.bf16.msra.mxu3 %v1092_v38  ;;  %v1024_v58 = vor.u32 %v1204_v53, %v1023_v52  ;;  %v1191_v61 = vld [vmem:[%s1730_s3 + $0x84] sm:$0xf]  ;;  %v1028_v62 = vor.u32 %v1200_v54, %v1025_v55  ;;  %v991_v0 = vld [vmem:[%s1730_s3 + $0x88] sm:$0xf]  ;;  %v1192_v2 = vld [vmem:[%s1730_s3 + $0x8c] sm:$0xf]  ;;  %v984_v4 = vor.u32 %v1195_v60, %v983_v59 }
  0x1a   : > { %v985_v63 = vld [vmem:[%s1730_s3 + $0xa0] sm:$0xf0]  ;;  %v1196_v1 = vld [vmem:[%s1730_s3 + $0xa4] sm:$0xf0]  ;;  %v993_v3 = vld [vmem:[%s1730_s3 + $0xa8] sm:$0xf0] }
  0x1b   : > { %694 = vmatpush.bf16.msra.mxu0 %v1048_v44  ;;  %707 = vmatpush.bf16.msra.mxu1 %v1052_v45  ;;  %v951_v5 = vld [vmem:[%s1730_s3 + $0x40] sm:$0xf]  ;;  %v988_v6 = vor.u32 %v1191_v61, %v985_v63  ;;  %v992_v7 = vor.u32 %v1196_v1, %v991_v0  ;;  %v1183_v9 = vld [vmem:[%s1730_s3 + $0x44] sm:$0xf]  ;;  %v996_v11 = vor.u32 %v1192_v2, %v993_v3  ;;  %v959_v12 = vld [vmem:[%s1730_s3 + $0x48] sm:$0xf] }
  0x1c   : > { %720 = vmatpush.bf16.msra.mxu2 %v1056_v46  ;;  %v1187_v8 = vld [vmem:[%s1730_s3 + $0x5c] sm:$0xf0]  ;;  %v953_v10 = vld [vmem:[%s1730_s3 + $0x60] sm:$0xf0]  ;;  %v1188_v13 = vld [vmem:[%s1730_s3 + $0x64] sm:$0xf0] }
  0x1d   : > { %733 = vmatpush.bf16.msra.mxu3 %v1060_v50  ;;  %v1184_v14 = vld [vmem:[%s1730_s3 + $0x4c] sm:$0xf]  ;;  %v919_v16 = vld [vmem:[%s1730_s3] sm:$0xf]  ;;  %v952_v18 = vor.u32 %v1187_v8, %v951_v5  ;;  %v1175_v19 = vld [vmem:[%s1730_s3 + $0x4] sm:$0xf]  ;;  %v956_v22 = vor.u32 %v1183_v9, %v953_v10  ;;  %v960_v23 = vor.u32 %v1188_v13, %v959_v12 }
  0x1e   : > { %v961_v15 = vld [vmem:[%s1730_s3 + $0x68] sm:$0xf0]  ;;  %v1179_v17 = vld [vmem:[%s1730_s3 + $0x1c] sm:$0xf0]  ;;  %v921_v20 = vld [vmem:[%s1730_s3 + $0x20] sm:$0xf0] }
  0x1f   : > { %695 = vmatpush.bf16.msra.mxu0 %v1016_v56  ;;  %708 = vmatpush.bf16.msra.mxu1 %v1020_v57  ;;  %v927_v21 = vld [vmem:[%s1730_s3 + $0x8] sm:$0xf]  ;;  %v1176_v25 = vld [vmem:[%s1730_s3 + $0xc] sm:$0xf]  ;;  %v964_v27 = vor.u32 %v1184_v14, %v961_v15  ;;  %v1159_v28 = vld [vmem:[%s1730_s3 + $0x1d0] sm:$0xf]  ;;  %v920_v33 = vor.u32 %v1179_v17, %v919_v16  ;;  %v924_v35 = vor.u32 %v1175_v19, %v921_v20 }
  0x20   : > { %721 = vmatpush.bf16.msra.mxu2 %v1024_v58  ;;  %v1180_v24 = vld [vmem:[%s1730_s3 + $0x24] sm:$0xf0]  ;;  %v929_v26 = vld [vmem:[%s1730_s3 + $0x28] sm:$0xf0]  ;;  %v1237_v29 = vld [vmem:[%s1730_s3 + $0x1ec] sm:$0xf0] }
  0x21   : > { %734 = vmatpush.bf16.msra.mxu3 %v1028_v62  ;;  %v1233_v30 = vld [vmem:[%s1730_s3 + $0x1d4] sm:$0xf]  ;;  %v1167_v32 = vld [vmem:[%s1730_s3 + $0x1d8] sm:$0xf]  ;;  %v928_v36 = vor.u32 %v1180_v24, %v927_v21  ;;  %v1234_v37 = vld [vmem:[%s1730_s3 + $0x1dc] sm:$0xf]  ;;  %v932_v39 = vor.u32 %v1176_v25, %v929_v26  ;;  %v1160_v40 = vor.u32 %v1237_v29, %v1159_v28 }
  0x22   : > { %v1161_v31 = vld [vmem:[%s1730_s3 + $0x1f0] sm:$0xf0]  ;;  %v1238_v34 = vld [vmem:[%s1730_s3 + $0x1f4] sm:$0xf0]  ;;  %v1169_v38 = vld [vmem:[%s1730_s3 + $0x1f8] sm:$0xf0] }
  0x23   : > { %696 = vmatpush.bf16.msra.mxu0 %v984_v4  ;;  %709 = vmatpush.bf16.msra.mxu1 %v988_v6  ;;  %s1735_s22 = smov (!%p246_p3, %s909_s22), 1  ;;  %v1127_v41 = vld [vmem:[%s1730_s3 + $0x190] sm:$0xf]  ;;  %v1260_v43 = vmov 4.0   ;;  %v1164_v44 = vor.u32 %v1233_v30, %v1161_v31  ;;  %v1168_v45 = vor.u32 %v1238_v34, %v1167_v32  ;;  %v1225_v46 = vld [vmem:[%s1730_s3 + $0x194] sm:$0xf]  ;;  %v1172_v48 = vor.u32 %v1234_v37, %v1169_v38 }
  0x24   : > { %722 = vmatpush.bf16.msra.mxu2 %v992_v7  ;;  %v1229_v42 = vld [vmem:[%s1730_s3 + $0x1ac] sm:$0xf0]  ;;  %1250 = vrcp.f32 %v1260_v43  ;;  %v1129_v47 = vld [vmem:[%s1730_s3 + $0x1b0] sm:$0xf0]  ;;  %s914_s19 = sshll.u32 %s1735_s22, 1  ;;  %s915_s23 = sshll.u32 %s1735_s22, 2 }
  0x25   : > { %735 = vmatpush.bf16.msra.mxu3 %v996_v11  ;;  %v1135_v49 = vld [vmem:[%s1730_s3 + $0x198] sm:$0xf]  ;;  %s249_s28 = scalar_lea.vmem %s1727_s0, %s914_s19  ;;  %v1248_v51 = vld [vmem:[%s1728_s1] ss:$0 sm:$0xff]  ;;  %v1226_v52 = vld [vmem:[%s1730_s3 + $0x19c] sm:$0xf]  ;;  %v1128_v55 = vor.u32 %v1229_v42, %v1127_v41  ;;  %v1132_v59 = vor.u32 %v1225_v46, %v1129_v47  ;;  %s253_s12 = scalar_lea.vmem %s1732_s5, %s915_s23 }
  0x26   : > { %v1230_v50 = vld [vmem:[%s1730_s3 + $0x1b4] sm:$0xf0]  ;;  %v1137_v53 = vld [vmem:[%s1730_s3 + $0x1b8] sm:$0xf0]  ;;  %v258_v54 = vld [vmem:[%s249_s28] sm:$0x3] }
  0x27   : > { %697 = vmatpush.bf16.msra.mxu0 %v952_v18  ;;  %710 = vmatpush.bf16.msra.mxu1 %v956_v22  ;;  %v259_v56 = vunpack.c.l.bf16 %v258_v54  ;;  %v1249_v57 = vld [vmem:[%s1729_s2] ss:$0 sm:$0xff]  ;;  %v1095_v58 = vld [vmem:[%s1730_s3 + $0x150] sm:$0xf]  ;;  %v1136_v60 = vor.u32 %v1230_v50, %v1135_v49  ;;  %v1217_v62 = vld [vmem:[%s1730_s3 + $0x154] sm:$0xf]  ;;  %v1140_v1 = vor.u32 %v1226_v52, %v1137_v53 }
  0x28   : > { %723 = vmatpush.bf16.msra.mxu2 %v960_v23  ;;  %v1221_v61 = vld [vmem:[%s1730_s3 + $0x16c] sm:$0xf0]  ;;  %v1097_v63 = vld [vmem:[%s1730_s3 + $0x170] sm:$0xf0]  ;;  %v1103_v3 = vld [vmem:[%s1730_s3 + $0x158] sm:$0xf] }
  0x29   : > { %736 = vmatpush.bf16.msra.mxu3 %v964_v27  ;;  %v264_v2 = vmul.f32 %v1248_v51, %v259_v56  ;;  %v1222_v4 = vld [vmem:[%s1730_s3 + $0x174] sm:$0xf0]  ;;  %v1218_v6 = vld [vmem:[%s1730_s3 + $0x15c] sm:$0xf]  ;;  %vm272_vm0 = vcmask 1043456   ;;  %v1096_v9 = vor.u32 %v1221_v61, %v1095_v58  ;;  %v1100_v11 = vor.u32 %v1217_v62, %v1097_v63  ;;  %s916_s29 = sshll.u32 %s1735_s22, 3 }
  0x2a   : > { %v1572_v0 = vpop.eup %1250  ;;  %v1105_v7 = vld [vmem:[%s1730_s3 + $0x178] sm:$0xf0]  ;;  %v1063_v10 = vld [vmem:[%s1730_s3 + $0x110] sm:$0xf]  ;;  %v1104_v12 = vor.u32 %v1222_v4, %v1103_v3  ;;  %v1209_v14 = vld [vmem:[%s1730_s3 + $0x114] sm:$0xf]  ;;  %s257_s8 = scalar_lea.vmem %s1733_s6, %s916_s29 }
  0x2b   : > { %698 = vmatpush.bf16.msra.mxu0 %v920_v33  ;;  %711 = vmatpush.bf16.msra.mxu1 %v924_v35  ;;  %v281_v5 = vmul.f32 4.0, %v1572_v0  ;;  %v269_v8 = vadd.f32 %v1249_v57, %v264_v2  ;;  %v1213_v13 = vld [vmem:[%s1730_s3 + $0x12c] sm:$0xf0]  ;;  %v1065_v15 = vld [vmem:[%s1730_s3 + $0x130] sm:$0xf0]  ;;  %v1108_v18 = vor.u32 %v1218_v6, %v1105_v7  ;;  %vm285_vm1 = vweird.f32 %v1572_v0 }
  0x2c   : > { %724 = vmatpush.bf16.msra.mxu2 %v928_v36  ;;  %v1071_v19 = vld [vmem:[%s1730_s3 + $0x118] sm:$0xf]  ;;  %v1210_v21 = vld [vmem:[%s1730_s3 + $0x11c] sm:$0xf]  ;;  %v1064_v24 = vor.u32 %v1213_v13, %v1063_v10  ;;  %v1031_v25 = vld [vmem:[%s1730_s3 + $0xd0] sm:$0xf]  ;;  %v1068_v27 = vor.u32 %v1209_v14, %v1065_v15 }
  0x2d   : > { %737 = vmatpush.bf16.msra.mxu3 %v932_v39  ;;  %v270_v16 = vmax.f32 %v269_v8, 0.0  ;;  %v282_v17 = vsub.f32 1.0, %v281_v5  ;;  %v1214_v20 = vld [vmem:[%s1730_s3 + $0x134] sm:$0xf0]  ;;  %v1073_v22 = vld [vmem:[%s1730_s3 + $0x138] sm:$0xf0] }
  0x2e   : > { %v1072_v28 = vor.u32 %v1214_v20, %v1071_v19  ;;  %v1205_v29 = vld [vmem:[%s1730_s3 + $0xec] sm:$0xf0]  ;;  %v1201_v30 = vld [vmem:[%s1730_s3 + $0xd4] sm:$0xf]  ;;  %v1076_v32 = vor.u32 %v1210_v21, %v1073_v22  ;;  %v1039_v34 = vld [vmem:[%s1730_s3 + $0xd8] sm:$0xf] }
  0x2f   : > { %743 = vmatpush.bf16.msrb.mxu0 %v1160_v40  ;;  %756 = vmatpush.bf16.msrb.mxu1 %v1164_v44  ;;  %271 = vst [vmem:[%s253_s12] sm:$0xf] %v270_v16  ;;  %v273_v23 = vsel %vm272_vm0, %v270_v16, 0.0  ;;  %v283_v31 = vmul.f32 %v1572_v0, %v282_v17  ;;  %v1033_v33 = vld [vmem:[%s1730_s3 + $0xf0] sm:$0xf0]  ;;  %v1206_v35 = vld [vmem:[%s1730_s3 + $0xf4] sm:$0xf0]  ;;  %v1032_v39 = vor.u32 %v1205_v29, %v1031_v25 }
  0x30   : > { %769 = vmatpush.bf16.msrb.mxu2 %v1168_v45  ;;  %v274_v26 = vrot.slane %v273_v23, 4  ;;  %v1202_v37 = vld [vmem:[%s1730_s3 + $0xdc] sm:$0xf]  ;;  %v999_v40 = vld [vmem:[%s1730_s3 + $0x90] sm:$0xf]  ;;  %v1036_v42 = vor.u32 %v1201_v30, %v1033_v33  ;;  %v1040_v43 = vor.u32 %v1206_v35, %v1039_v34  ;;  %vm810_vm2 = vcmask 1040384  }
  0x31   : > { %782 = vmatpush.bf16.msrb.mxu3 %v1172_v48  ;;  %v1041_v38 = vld [vmem:[%s1730_s3 + $0xf8] sm:$0xf0]  ;;  %v1197_v44 = vld [vmem:[%s1730_s3 + $0xac] sm:$0xf0]  ;;  %v1193_v45 = vld [vmem:[%s1730_s3 + $0x94] sm:$0xf]  ;;  %v284_v46 = vadd.f32 %v1572_v0, %v283_v31 }
  0x32   : > { %v275_v36 = vadd.f32 %v274_v26, %v273_v23  ;;  %v1044_v47 = vor.u32 %v1202_v37, %v1041_v38  ;;  %v1001_v48 = vld [vmem:[%s1730_s3 + $0xb0] sm:$0xf0]  ;;  %v1007_v49 = vld [vmem:[%s1730_s3 + $0x98] sm:$0xf]  ;;  %v1194_v52 = vld [vmem:[%s1730_s3 + $0x9c] sm:$0xf]  ;;  %v1000_v54 = vor.u32 %v1197_v44, %v999_v40 }
  0x33   : > { %744 = vmatpush.bf16.msrb.mxu0 %v1128_v55  ;;  %757 = vmatpush.bf16.msrb.mxu1 %v1132_v59  ;;  %v1198_v50 = vld [vmem:[%s1730_s3 + $0xb4] sm:$0xf0]  ;;  %v1009_v53 = vld [vmem:[%s1730_s3 + $0xb8] sm:$0xf0]  ;;  %v1004_v56 = vor.u32 %v1193_v45, %v1001_v48  ;;  %v967_v58 = vld [vmem:[%s1730_s3 + $0x50] sm:$0xf] }
  0x34   : > { %770 = vmatpush.bf16.msrb.mxu2 %v1136_v60  ;;  %v276_v41 = vrot.slane %v275_v36, 2  ;;  %v1008_v57 = vor.u32 %v1198_v50, %v1007_v49  ;;  %v1189_v59 = vld [vmem:[%s1730_s3 + $0x6c] sm:$0xf0]  ;;  %v286_v60 = vsel %vm285_vm1, %v1572_v0, %v284_v46  ;;  %v1012_v61 = vor.u32 %v1194_v52, %v1009_v53  ;;  %v1185_v63 = vld [vmem:[%s1730_s3 + $0x54] sm:$0xf] }
  0x35   : > { %783 = vmatpush.bf16.msrb.mxu3 %v1140_v1  ;;  %v969_v1 = vld [vmem:[%s1730_s3 + $0x70] sm:$0xf0]  ;;  %v968_v2 = vor.u32 %v1189_v59, %v967_v58  ;;  %v975_v3 = vld [vmem:[%s1730_s3 + $0x58] sm:$0xf]  ;;  %v1186_v4 = vld [vmem:[%s1730_s3 + $0x5c] sm:$0xf] }
  0x36   : > { %v277_v51 = vadd.f32 %v276_v41, %v275_v36  ;;  %v1190_v0 = vld [vmem:[%s1730_s3 + $0x74] sm:$0xf0]  ;;  %v977_v6 = vld [vmem:[%s1730_s3 + $0x78] sm:$0xf0]  ;;  %v935_v7 = vld [vmem:[%s1730_s3 + $0x10] sm:$0xf]  ;;  %v972_v10 = vor.u32 %v1185_v63, %v969_v1 }
  0x37   : > { %745 = vmatpush.bf16.msrb.mxu0 %v1096_v9  ;;  %758 = vmatpush.bf16.msrb.mxu1 %v1100_v11  ;;  %v1181_v8 = vld [vmem:[%s1730_s3 + $0x2c] sm:$0xf0]  ;;  %v976_v11 = vor.u32 %v1190_v0, %v975_v3  ;;  %v980_v13 = vor.u32 %v1186_v4, %v977_v6  ;;  %v937_v15 = vld [vmem:[%s1730_s3 + $0x30] sm:$0xf0]  ;;  %v943_v16 = vld [vmem:[%s1730_s3 + $0x18] sm:$0xf] }
  0x38   : > { %771 = vmatpush.bf16.msrb.mxu2 %v1104_v12  ;;  %v278_v55 = vrot.slane %v277_v51, 1  ;;  %v1177_v12 = vld [vmem:[%s1730_s3 + $0x14] sm:$0xf]  ;;  %v936_v14 = vor.u32 %v1181_v8, %v935_v7  ;;  %v1182_v17 = vld [vmem:[%s1730_s3 + $0x34] sm:$0xf0]  ;;  %vm812_vm3 = vcmask 1042434  }
  0x39   : > { %784 = vmatpush.bf16.msrb.mxu3 %v1108_v18  ;;  %v1178_v18 = vld [vmem:[%s1730_s3 + $0x1c] sm:$0xf]  ;;  %v940_v20 = vor.u32 %v1177_v12, %v937_v15  ;;  %v944_v21 = vor.u32 %v1182_v17, %v943_v16  ;;  %vm816_vm4 = vcmask 1044484   ;;  %vm814_vm5 = vcmask 1041408  }
  0x3a   : > { %v279_v62 = vadd.f32 %v278_v55, %v277_v51  ;;  %v945_v19 = vld [vmem:[%s1730_s3 + $0x38] sm:$0xf0]  ;;  %vm818_vm6 = vcmask 1046534   ;;  %vm820_vm7 = vcmask 1045508  }
  0x3b   : > { %746 = vmatpush.bf16.msrb.mxu0 %v1064_v24  ;;  %759 = vmatpush.bf16.msrb.mxu1 %v1068_v27  ;;  %v948_v22 = vor.u32 %v1178_v18, %v945_v19  ;;  %v353_v27 = vld [vmem:[%s1731_s4] sm:$0xff] }
  0x3c   : > { %772 = vmatpush.bf16.msrb.mxu2 %v1072_v28  ;;  %v287_v5 = vmul.f32 %v286_v60, %v279_v62  ;;  %v676_v30 = vperm.slane %v353_v27, 1  ;;  %v677_v31 = vperm.slane %v353_v27, 2  ;;  %v679_v35 = vperm.slane %v353_v27, 4 }
  0x3d   : > { %785 = vmatpush.bf16.msrb.mxu3 %v1076_v32  ;;  %v678_v32 = vperm.slane %v353_v27, 3  ;;  %v680_v36 = vperm.slane %v353_v27, 5  ;;  %v675_v37 = vperm.slane %v353_v27, 0  ;;  %v681_v45 = vperm.slane %v353_v27, 6 }
  0x3e   : > { %v288_v9 = vpack.c.bf16 %v287_v5, %v287_v5  ;;  %v682_v46 = vperm.slane %v353_v27, 7 }
  0x3f   : > { %747 = vmatpush.bf16.msrb.mxu0 %v1032_v39  ;;  %760 = vmatpush.bf16.msrb.mxu1 %v1036_v42 }
  0x40   : > { %773 = vmatpush.bf16.msrb.mxu2 %v1040_v43  ;;  %738 = vmatmul.bf16.vlgmr.msra.gmra.mxu3 %v288_v9 }
  0x41   : > { %786 = vmatpush.bf16.msrb.mxu3 %v1044_v47  ;;  %725 = vmatmul.bf16.vlgmr.msra.gmra.mxu2 %v288_v9 }
  0x42   : > { %699 = vmatmul.bf16.vlgmr.msra.gmra.mxu0 %v288_v9  ;;  %712 = vmatmul.bf16.vlgmr.msra.gmra.mxu1 %v288_v9 }
  0x43   : > { %748 = vmatpush.bf16.msrb.mxu0 %v1000_v54  ;;  %761 = vmatpush.bf16.msrb.mxu1 %v1004_v56 }
  0x44   : > { %774 = vmatpush.bf16.msrb.mxu2 %v1008_v57 }
  0x45   : > { %787 = vmatpush.bf16.msrb.mxu3 %v1012_v61 }
  0x47   : > { %749 = vmatpush.bf16.msrb.mxu0 %v968_v2  ;;  %762 = vmatpush.bf16.msrb.mxu1 %v972_v10 }
  0x48   : > { %775 = vmatpush.bf16.msrb.mxu2 %v976_v11 }
  0x49   : > { %788 = vmatpush.bf16.msrb.mxu3 %v980_v13 }
  0x4b   : > { %750 = vmatpush.bf16.msrb.mxu0 %v936_v14  ;;  %763 = vmatpush.bf16.msrb.mxu1 %v940_v20 }
  0x4c   : > { %776 = vmatpush.bf16.msrb.mxu2 %v944_v21 }
  0x4d   : > { %789 = vmatpush.bf16.msrb.mxu3 %v948_v22 }
  0x50   : > { %790 = vmatmul.bf16.vlgmr.msrb.gmra.mxu3 %v288_v9 }
  0x51   : > { %777 = vmatmul.bf16.vlgmr.msrb.gmra.mxu2 %v288_v9 }
  0x52   : > { %751 = vmatmul.bf16.vlgmr.msrb.gmra.mxu0 %v288_v9  ;;  %764 = vmatmul.bf16.vlgmr.msrb.gmra.mxu1 %v288_v9 }
  0xbf   : > { %v700_v23 = vpop.f32.mrf.mxu0  ;;  %v713_v24 = vpop.f32.mrf.mxu1 }
  0xc0   : > { %v714_v38 = vadd.f32 %v713_v24, %v676_v30  ;;  %v701_v47 = vadd.f32 %v700_v23, %v675_v37 }
  0xc2   : > { %v803_v48 = vrot.slane %v714_v38, 7 }
  0xc3   : > { %v739_v26 = vpop.f32.mrf.mxu3 }
  0xc4   : > { %v726_v25 = vpop.f32.mrf.mxu2  ;;  %v740_v40 = vadd.f32 %v739_v26, %v678_v32  ;;  %v811_v57 = vsel %vm810_vm2, %v701_v47, %v803_v48 }
  0xc5   : > { %v727_v39 = vadd.f32 %v726_v25, %v677_v31 }
  0xc6   : > { %v805_v50 = vrot.slane %v740_v40, 5 }
  0xc7   : > { %v702_v28 = vpop.f32.mrf.mxu0  ;;  %v715_v29 = vpop.f32.mrf.mxu1  ;;  %v804_v49 = vrot.slane %v727_v39, 6 }
  0xc9   : > { %v813_v58 = vsel %vm812_vm3, %v804_v49, %v805_v50 }
  0xca   : > { %v815_v2 = vsel %vm814_vm5, %v811_v57, %v813_v58 }
  0xcb   : > { %v741_v34 = vpop.f32.mrf.mxu3 }
  0xcc   : > { %v728_v33 = vpop.f32.mrf.mxu2 }
  0xcf   : > { %v752_v41 = vpop.f32.mrf.mxu0  ;;  %v765_v42 = vpop.f32.mrf.mxu1 }
  0xd0   : > { %v753_v43 = vadd.f32 %v752_v41, %v679_v35  ;;  %v766_v44 = vadd.f32 %v765_v42, %v680_v36 }
  0xd2   : > { %v806_v51 = vrot.slane %v753_v43, 4  ;;  %v807_v52 = vrot.slane %v766_v44, 3 }
  0xd3   : > { %v791_v54 = vpop.f32.mrf.mxu3 }
  0xd4   : > { %v778_v53 = vpop.f32.mrf.mxu2  ;;  %v792_v56 = vadd.f32 %v791_v54, %v682_v46  ;;  %v817_v59 = vsel %vm816_vm4, %v806_v51, %v807_v52 }
  0xd5   : > { %v779_v55 = vadd.f32 %v778_v53, %v681_v45 }
  0xd6   : > { %v809_v61 = vrot.slane %v792_v56, 1 }
  0xd7   : > { %v808_v60 = vrot.slane %v779_v55, 2  ;;  %v754_v62 = vpop.f32.mrf.mxu0  ;;  %v767_v63 = vpop.f32.mrf.mxu1 }
  0xd9   : > { %v819_v1 = vsel %vm818_vm6, %v808_v60, %v809_v61 }
  0xda   : > { %v821_v3 = vsel %vm820_vm7, %v817_v59, %v819_v1 }
  0xdb   : > { %v822_v0 = vsel %vm272_vm0, %v815_v2, %v821_v3  ;;  %v793_v5 = vpop.f32.mrf.mxu3 }
  0xdc   : > { %824 = vst [vmem:[%s257_s8] sm:$0xff] %v822_v0  ;;  %v780_v4 = vpop.f32.mrf.mxu2 }
  0xdd PF: > { %s17_s21 = sadd.s32 1, %s1258_s21  }
  0xde   : > { %p14_p4 = scmp.ge.s32.totalorder %s17_s21, 4  }
  0xe0   :  { %16 = sbr.rel (!%p14_p4) target bundleno = 1 (0x1), region = 82 }

</bundles_post_ra>
